<compile_context>
chip_gen: v7x
topology: tpu7x:2x2x1
jax: 0.10.0
libtpu: 0.0.40
codegen_flags: <defaults>
</compile_context>

<pallas_src>
import functools

import jax
import jax.numpy as jnp
from jax.experimental import pallas as pl
from jax.experimental.pallas import tpu as pltpu

STYLE_DIM = 128
HIDDEN = 256
IN_CHANNELS = 3
OUT_CHANNELS = 3
NEG_SLOPE = 0.2
LANE = 128
SUBLANE = 8


def _leaky_relu(x):
    return jnp.where(x > 0, x, NEG_SLOPE * x)


def _round_up(x, m):
    return ((x + m - 1) // m) * m


# ---------------------------------------------------------------------------
# Kernel 1: StyleMLP + fc_z_a fusion (one tiny launch per forward).
# Outputs: style (1, STYLE_DIM) and b1_za = fc1.bias + fc_z_a(style) (1, HIDDEN)
# ---------------------------------------------------------------------------
def style_za_kernel(z_ref,
                    w1, b1, w2, b2, w3, b3, w4, b4, w5, b5, wout, bout,
                    wza, sky_b1,
                    style_ref, b1za_ref):
    z = z_ref[...]
    # F.normalize(z, p=2, dim=-1)  (torch default eps = 1e-12)
    norm = jnp.sqrt(jnp.sum(z * z, axis=-1, keepdims=True))
    z = z / jnp.maximum(norm, 1e-12)

    h = _leaky_relu(jnp.dot(z, w1[...], preferred_element_type=jnp.float32) + b1[...])
    h = _leaky_relu(jnp.dot(h, w2[...], preferred_element_type=jnp.float32) + b2[...])
    h = _leaky_relu(jnp.dot(h, w3[...], preferred_element_type=jnp.float32) + b3[...])
    h = _leaky_relu(jnp.dot(h, w4[...], preferred_element_type=jnp.float32) + b4[...])
    h = _leaky_relu(jnp.dot(h, w5[...], preferred_element_type=jnp.float32) + b5[...])
    style = _leaky_relu(
        jnp.dot(h, wout[...], preferred_element_type=jnp.float32) + bout[...])
    style_ref[...] = style

    # Hoisted fc_z_a: pre-fold z_a into fc1's bias so the per-ray kernel
    # never touches the style code or wza again.
    z_a = jnp.dot(style, wza[...], preferred_element_type=jnp.float32)
    b1za_ref[...] = sky_b1[...] + z_a


def style_za_pallas(z, sp, kp):
    """z: (1, STYLE_DIM) -> (style (1, STYLE_DIM), b1 + z_a (1, HIDDEN))."""
    args = (z,
            sp["w1"], sp["b1"], sp["w2"], sp["b2"], sp["w3"], sp["b3"],
            sp["w4"], sp["b4"], sp["w5"], sp["b5"], sp["wout"], sp["bout"],
            kp["wza"], kp["b1"])
    return pl.pallas_call(
        style_za_kernel,
        out_shape=(jax.ShapeDtypeStruct((z.shape[0], STYLE_DIM), jnp.float32),
                   jax.ShapeDtypeStruct((z.shape[0], HIDDEN), jnp.float32)),
    )(*args)


# ---------------------------------------------------------------------------
# Kernel 2: SKYMLP + sky-mask compositing (the ray-count hot path)
# ---------------------------------------------------------------------------
def sky_mlp_kernel(xm_ref, b1za_ref,
                   w1, w2, b2, w3, b3, w4, b4, w5, b5, wc, bc,
                   o_ref):
    xm = xm_ref[...]                                   # (tm, 4) = [ray_d | mask]
    # w1 carries a zero 4th row, so xm @ w1 == ray_d @ fc1.weight (mask lane
    # contributes nothing).  b1za = fc1.bias + fc_z_a(style), precomputed.
    y = _leaky_relu(jnp.dot(xm, w1[...], preferred_element_type=jnp.float32)
                    + b1za_ref[...])
    y = _leaky_relu(jnp.dot(y.astype(w2.dtype), w2[...],
                            preferred_element_type=jnp.float32) + b2[...])
    y = _leaky_relu(jnp.dot(y.astype(w3.dtype), w3[...],
                            preferred_element_type=jnp.float32) + b3[...])
    y = _leaky_relu(jnp.dot(y.astype(w4.dtype), w4[...],
                            preferred_element_type=jnp.float32) + b4[...])
    y = _leaky_relu(jnp.dot(y.astype(w5.dtype), w5[...],
                            preferred_element_type=jnp.float32) + b5[...])
    c = jnp.dot(y.astype(wc.dtype), wc[...],
                preferred_element_type=jnp.float32) + bc[...]   # (tm, 3)

    mask = xm[:, IN_CHANNELS:]                          # (tm, 1) sky mask
    o_ref[...] = c * (1.0 - mask)                       # black background == 0


def sky_mlp_pallas(xm, b1_za, kp, *, tm=1024, use_bf16=False):
    """xm: (N, 4) concat of ray_d and sky_mask; b1_za: (1, HIDDEN)."""
    N = xm.shape[0]

    w_dtype = jnp.bfloat16 if use_bf16 else jnp.float32
    # fc1 weight extended with a zero row for the mask lane of xm.
    w1_ext = jnp.concatenate(
        [kp["w1"], jnp.zeros((1, HIDDEN), jnp.float32)], axis=0)      # (4, 256)
    weights = (w1_ext,
               kp["w2"].astype(w_dtype), kp["b2"],
               kp["w3"].astype(w_dtype), kp["b3"],
               kp["w4"].astype(w_dtype), kp["b4"],
               kp["w5"].astype(w_dtype), kp["b5"],
               kp["wc"].astype(w_dtype), kp["bc"])

    # Large tile amortizes per-grid-step overhead; cap so grid >= 2 whenever
    # N allows it (keeps both v7x TensorCores busy via "parallel" semantics).
    tm_eff = max(SUBLANE, min(tm, _round_up(pl.cdiv(N, 2), LANE)))
    n_pad = _round_up(N, tm_eff)
    if n_pad != N:
        xm = jnp.pad(xm, ((0, n_pad - N), (0, 0)))
    grid = (n_pad // tm_eff,)

    in_specs = [
        pl.BlockSpec((tm_eff, IN_CHANNELS + 1), lambda i: (i, 0)),   # rays+mask
        pl.BlockSpec(b1_za.shape, lambda i: (0, 0)),                 # b1 + z_a
    ]
    in_specs += [pl.BlockSpec(w.shape, lambda i: (0, 0)) for w in weights]

    out = pl.pallas_call(
        sky_mlp_kernel,
        out_shape=jax.ShapeDtypeStruct((n_pad, OUT_CHANNELS), jnp.float32),
        grid_spec=pltpu.PrefetchScalarGridSpec(
            num_scalar_prefetch=0,
            grid=grid,
            in_specs=in_specs,
            out_specs=pl.BlockSpec((tm_eff, OUT_CHANNELS), lambda i: (i, 0)),
        ),
        compiler_params=pltpu.CompilerParams(
            dimension_semantics=("parallel",)),
    )(xm, b1_za, *weights)
    return out[:N]


# ---------------------------------------------------------------------------
# SkyModel.forward wrapper
# ---------------------------------------------------------------------------
@functools.partial(jax.jit, static_argnames=("use_bf16",))
def sky_model_forward(ray_d, sky_style_code, sky_mask, style_params, sky_params,
                      use_bf16=False):
    style, b1_za = style_za_pallas(sky_style_code, style_params, sky_params)
    xm = jnp.concatenate([ray_d, sky_mask], axis=-1)      # (N, 4)
    rgb_sky = sky_mlp_pallas(xm, b1_za, sky_params, use_bf16=use_bf16)
    return rgb_sky, style


# ---------------------------------------------------------------------------
# Deterministic parameter construction (synthetic; no checkpoint loading)
# ---------------------------------------------------------------------------
def _linear(key, fan_in, fan_out, bias=True):
    kw, kb = jax.random.split(key)
    s = 1.0 / jnp.sqrt(fan_in)
    w = jax.random.normal(kw, (fan_in, fan_out), jnp.float32) * s
    b = (jax.random.normal(kb, (1, fan_out), jnp.float32) * s) if bias else None
    return w, b


def init_params(key):
    ks = jax.random.split(key, 16)
    # StyleMLP: 5 hidden layers + fc_out (all with bias)
    sw1, sb1 = _linear(ks[0], STYLE_DIM, HIDDEN)
    sw2, sb2 = _linear(ks[1], HIDDEN, HIDDEN)
    sw3, sb3 = _linear(ks[2], HIDDEN, HIDDEN)
    sw4, sb4 = _linear(ks[3], HIDDEN, HIDDEN)
    sw5, sb5 = _linear(ks[4], HIDDEN, HIDDEN)
    swo, sbo = _linear(ks[5], HIDDEN, STYLE_DIM)
    style_params = dict(w1=sw1, b1=sb1, w2=sw2, b2=sb2, w3=sw3, b3=sb3,
                        w4=sw4, b4=sb4, w5=sw5, b5=sb5, wout=swo, bout=sbo)
    # SKYMLP: fc_z_a (no bias), fc1..fc5, fc_out_c
    wza, _ = _linear(ks[6], STYLE_DIM, HIDDEN, bias=False)
    w1, b1 = _linear(ks[7], IN_CHANNELS, HIDDEN)
    w2, b2 = _linear(ks[8], HIDDEN, HIDDEN)
    w3, b3 = _linear(ks[9], HIDDEN, HIDDEN)
    w4, b4 = _linear(ks[10], HIDDEN, HIDDEN)
    w5, b5 = _linear(ks[11], HIDDEN, HIDDEN)
    wc, bc = _linear(ks[12], HIDDEN, OUT_CHANNELS)
    sky_params = dict(wza=wza, w1=w1, b1=b1, w2=w2, b2=b2, w3=w3, b3=b3,
                      w4=w4, b4=b4, w5=w5, b5=b5, wc=wc, bc=bc)
    return style_params, sky_params


# ---------------------------------------------------------------------------
# Pure-JAX reference (mirrors the PyTorch forward) for a correctness check
# ---------------------------------------------------------------------------
def reference_forward(ray_d, z, mask, sp, kp):
    zn = z / jnp.maximum(jnp.linalg.norm(z, axis=-1, keepdims=True), 1e-12)
    h = zn
    for i in range(1, 6):
        h = _leaky_relu(h @ sp[f"w{i}"] + sp[f"b{i}"])
    style = _leaky_relu(h @ sp["wout"] + sp["bout"])

    z_a = style @ kp["wza"]
    y = _leaky_relu(ray_d @ kp["w1"] + kp["b1"] + z_a)
    for i in range(2, 6):
        y = _leaky_relu(y @ kp[f"w{i}"] + kp[f"b{i}"])
    c = y @ kp["wc"] + kp["bc"]
    black = jnp.zeros((OUT_CHANNELS,), jnp.float32)
    rgb = c * (1.0 - mask) + black * mask
    return rgb, style


if __name__ == "__main__":
    key = jax.random.PRNGKey(0)
    kp_key, k1, k2, k3 = jax.random.split(key, 4)

    # Deliberately NOT a multiple of 128 to exercise the pad/slice tail path.
    N = 500
    ray_d = jax.random.normal(k1, (N, IN_CHANNELS), jnp.float32)
    ray_d = ray_d / jnp.linalg.norm(ray_d, axis=-1, keepdims=True)
    sky_style_code = jax.random.normal(k2, (1, STYLE_DIM), jnp.float32)
    sky_mask = (jax.random.uniform(k3, (N, 1)) > 0.5).astype(jnp.float32)

    style_params, sky_params = init_params(kp_key)

    rgb_ref, style_ref = reference_forward(ray_d, sky_style_code, sky_mask,
                                           style_params, sky_params)

    # f32 path (default on v5e; exact vs reference)
    rgb_sky, style_out = sky_model_forward(ray_d, sky_style_code, sky_mask,
                                           style_params, sky_params,
                                           use_bf16=False)
    jax.block_until_ready((rgb_sky, style_out))
    assert rgb_sky.shape == (N, OUT_CHANNELS)
    assert style_out.shape == (1, STYLE_DIM)
    assert jnp.allclose(rgb_sky, rgb_ref, atol=1e-4, rtol=1e-4)
    assert jnp.allclose(style_out, style_ref, atol=1e-4, rtol=1e-4)

    # bf16 hidden-weight path (v6e/v7x 256x256 MXU), f32 accumulation; relaxed
    # tolerance vs the f32 reference.
    rgb_bf16, _ = sky_model_forward(ray_d, sky_style_code, sky_mask,
                                    style_params, sky_params, use_bf16=True)
    jax.block_until_ready(rgb_bf16)
    assert jnp.allclose(rgb_bf16, rgb_ref, atol=1e-1, rtol=1e-1)

    print("KERNEL_OK")
</pallas_src>

<mosaic_0001>
module attributes {stable_mosaic.version = 11 : i64} {
  func.func @style_za_kernel(%arg0: memref<1x128xf32, #tpu.memory_space<vmem>>, %arg1: memref<128x256xf32, #tpu.memory_space<vmem>>, %arg2: memref<1x256xf32, #tpu.memory_space<vmem>>, %arg3: memref<256x256xf32, #tpu.memory_space<vmem>>, %arg4: memref<1x256xf32, #tpu.memory_space<vmem>>, %arg5: memref<256x256xf32, #tpu.memory_space<vmem>>, %arg6: memref<1x256xf32, #tpu.memory_space<vmem>>, %arg7: memref<256x256xf32, #tpu.memory_space<vmem>>, %arg8: memref<1x256xf32, #tpu.memory_space<vmem>>, %arg9: memref<256x256xf32, #tpu.memory_space<vmem>>, %arg10: memref<1x256xf32, #tpu.memory_space<vmem>>, %arg11: memref<256x128xf32, #tpu.memory_space<vmem>>, %arg12: memref<1x128xf32, #tpu.memory_space<vmem>>, %arg13: memref<128x256xf32, #tpu.memory_space<vmem>>, %arg14: memref<1x256xf32, #tpu.memory_space<vmem>>, %arg15: memref<1x128xf32, #tpu.memory_space<vmem>>, %arg16: memref<1x256xf32, #tpu.memory_space<vmem>>) attributes {dimension_semantics = [], scalar_prefetch = 0 : i64, scratch_operands = 0 : i64, tpu.core_type = #tpu.core_type<tc>} {
    %c0 = arith.constant 0 : index
    %c0_0 = arith.constant 0 : index
    %0 = vector.load %arg0[%c0, %c0_0] : memref<1x128xf32, #tpu.memory_space<vmem>>, vector<1x128xf32>
    %1 = arith.mulf %0, %0 : vector<1x128xf32>
    %cst = arith.constant dense<0.000000e+00> : vector<1xf32>
    %2 = vector.multi_reduction <add>, %1, %cst [1] : vector<1x128xf32> to vector<1xf32>
    %3 = vector.shape_cast %2 : vector<1xf32> to vector<1x1xf32>
    %4 = math.sqrt %3 : vector<1x1xf32>
    %cst_1 = arith.constant 9.99999996E-13 : f32
    %5 = vector.broadcast %cst_1 : f32 to vector<1x1xf32>
    %6 = arith.maximumf %4, %5 : vector<1x1xf32>
    %7 = vector.broadcast %6 : vector<1x1xf32> to vector<1x128xf32>
    %8 = arith.divf %0, %7 : vector<1x128xf32>
    %c0_2 = arith.constant 0 : index
    %c0_3 = arith.constant 0 : index
    %9 = vector.load %arg1[%c0_2, %c0_3] : memref<128x256xf32, #tpu.memory_space<vmem>>, vector<128x256xf32>
    %cst_4 = arith.constant dense<0.000000e+00> : vector<1x256xf32>
    %10 = tpu.matmul %8, %9, %cst_4 {dimension_numbers = #tpu.dot_dimension_numbers<[1], [0], [0], [1], [0, 0, 1, 1], [], []>} : vector<1x128xf32>, vector<128x256xf32>, vector<1x256xf32> -> vector<1x256xf32>
    %c0_5 = arith.constant 0 : index
    %c0_6 = arith.constant 0 : index
    %11 = vector.load %arg2[%c0_5, %c0_6] : memref<1x256xf32, #tpu.memory_space<vmem>>, vector<1x256xf32>
    %12 = arith.addf %10, %11 : vector<1x256xf32>
    %cst_7 = arith.constant 0.000000e+00 : f32
    %13 = vector.broadcast %cst_7 : f32 to vector<1x256xf32>
    %14 = arith.cmpf ogt, %12, %13 : vector<1x256xf32>
    %cst_8 = arith.constant 2.000000e-01 : f32
    %15 = vector.broadcast %cst_8 : f32 to vector<1x256xf32>
    %16 = arith.mulf %15, %12 : vector<1x256xf32>
    %17 = arith.select %14, %12, %16 : vector<1x256xi1>, vector<1x256xf32>
    %c0_9 = arith.constant 0 : index
    %c0_10 = arith.constant 0 : index
    %18 = vector.load %arg3[%c0_9, %c0_10] : memref<256x256xf32, #tpu.memory_space<vmem>>, vector<256x256xf32>
    %cst_11 = arith.constant dense<0.000000e+00> : vector<1x256xf32>
    %19 = tpu.matmul %17, %18, %cst_11 {dimension_numbers = #tpu.dot_dimension_numbers<[1], [0], [0], [1], [0, 0, 1, 1], [], []>} : vector<1x256xf32>, vector<256x256xf32>, vector<1x256xf32> -> vector<1x256xf32>
    %c0_12 = arith.constant 0 : index
    %c0_13 = arith.constant 0 : index
    %20 = vector.load %arg4[%c0_12, %c0_13] : memref<1x256xf32, #tpu.memory_space<vmem>>, vector<1x256xf32>
    %21 = arith.addf %19, %20 : vector<1x256xf32>
    %cst_14 = arith.constant 0.000000e+00 : f32
    %22 = vector.broadcast %cst_14 : f32 to vector<1x256xf32>
    %23 = arith.cmpf ogt, %21, %22 : vector<1x256xf32>
    %cst_15 = arith.constant 2.000000e-01 : f32
    %24 = vector.broadcast %cst_15 : f32 to vector<1x256xf32>
    %25 = arith.mulf %24, %21 : vector<1x256xf32>
    %26 = arith.select %23, %21, %25 : vector<1x256xi1>, vector<1x256xf32>
    %c0_16 = arith.constant 0 : index
    %c0_17 = arith.constant 0 : index
    %27 = vector.load %arg5[%c0_16, %c0_17] : memref<256x256xf32, #tpu.memory_space<vmem>>, vector<256x256xf32>
    %cst_18 = arith.constant dense<0.000000e+00> : vector<1x256xf32>
    %28 = tpu.matmul %26, %27, %cst_18 {dimension_numbers = #tpu.dot_dimension_numbers<[1], [0], [0], [1], [0, 0, 1, 1], [], []>} : vector<1x256xf32>, vector<256x256xf32>, vector<1x256xf32> -> vector<1x256xf32>
    %c0_19 = arith.constant 0 : index
    %c0_20 = arith.constant 0 : index
    %29 = vector.load %arg6[%c0_19, %c0_20] : memref<1x256xf32, #tpu.memory_space<vmem>>, vector<1x256xf32>
    %30 = arith.addf %28, %29 : vector<1x256xf32>
    %cst_21 = arith.constant 0.000000e+00 : f32
    %31 = vector.broadcast %cst_21 : f32 to vector<1x256xf32>
    %32 = arith.cmpf ogt, %30, %31 : vector<1x256xf32>
    %cst_22 = arith.constant 2.000000e-01 : f32
    %33 = vector.broadcast %cst_22 : f32 to vector<1x256xf32>
    %34 = arith.mulf %33, %30 : vector<1x256xf32>
    %35 = arith.select %32, %30, %34 : vector<1x256xi1>, vector<1x256xf32>
    %c0_23 = arith.constant 0 : index
    %c0_24 = arith.constant 0 : index
    %36 = vector.load %arg7[%c0_23, %c0_24] : memref<256x256xf32, #tpu.memory_space<vmem>>, vector<256x256xf32>
    %cst_25 = arith.constant dense<0.000000e+00> : vector<1x256xf32>
    %37 = tpu.matmul %35, %36, %cst_25 {dimension_numbers = #tpu.dot_dimension_numbers<[1], [0], [0], [1], [0, 0, 1, 1], [], []>} : vector<1x256xf32>, vector<256x256xf32>, vector<1x256xf32> -> vector<1x256xf32>
    %c0_26 = arith.constant 0 : index
    %c0_27 = arith.constant 0 : index
    %38 = vector.load %arg8[%c0_26, %c0_27] : memref<1x256xf32, #tpu.memory_space<vmem>>, vector<1x256xf32>
    %39 = arith.addf %37, %38 : vector<1x256xf32>
    %cst_28 = arith.constant 0.000000e+00 : f32
    %40 = vector.broadcast %cst_28 : f32 to vector<1x256xf32>
    %41 = arith.cmpf ogt, %39, %40 : vector<1x256xf32>
    %cst_29 = arith.constant 2.000000e-01 : f32
    %42 = vector.broadcast %cst_29 : f32 to vector<1x256xf32>
    %43 = arith.mulf %42, %39 : vector<1x256xf32>
    %44 = arith.select %41, %39, %43 : vector<1x256xi1>, vector<1x256xf32>
    %c0_30 = arith.constant 0 : index
    %c0_31 = arith.constant 0 : index
    %45 = vector.load %arg9[%c0_30, %c0_31] : memref<256x256xf32, #tpu.memory_space<vmem>>, vector<256x256xf32>
    %cst_32 = arith.constant dense<0.000000e+00> : vector<1x256xf32>
    %46 = tpu.matmul %44, %45, %cst_32 {dimension_numbers = #tpu.dot_dimension_numbers<[1], [0], [0], [1], [0, 0, 1, 1], [], []>} : vector<1x256xf32>, vector<256x256xf32>, vector<1x256xf32> -> vector<1x256xf32>
    %c0_33 = arith.constant 0 : index
    %c0_34 = arith.constant 0 : index
    %47 = vector.load %arg10[%c0_33, %c0_34] : memref<1x256xf32, #tpu.memory_space<vmem>>, vector<1x256xf32>
    %48 = arith.addf %46, %47 : vector<1x256xf32>
    %cst_35 = arith.constant 0.000000e+00 : f32
    %49 = vector.broadcast %cst_35 : f32 to vector<1x256xf32>
    %50 = arith.cmpf ogt, %48, %49 : vector<1x256xf32>
    %cst_36 = arith.constant 2.000000e-01 : f32
    %51 = vector.broadcast %cst_36 : f32 to vector<1x256xf32>
    %52 = arith.mulf %51, %48 : vector<1x256xf32>
    %53 = arith.select %50, %48, %52 : vector<1x256xi1>, vector<1x256xf32>
    %c0_37 = arith.constant 0 : index
    %c0_38 = arith.constant 0 : index
    %54 = vector.load %arg11[%c0_37, %c0_38] : memref<256x128xf32, #tpu.memory_space<vmem>>, vector<256x128xf32>
    %cst_39 = arith.constant dense<0.000000e+00> : vector<1x128xf32>
    %55 = tpu.matmul %53, %54, %cst_39 {dimension_numbers = #tpu.dot_dimension_numbers<[1], [0], [0], [1], [0, 0, 1, 1], [], []>} : vector<1x256xf32>, vector<256x128xf32>, vector<1x128xf32> -> vector<1x128xf32>
    %c0_40 = arith.constant 0 : index
    %c0_41 = arith.constant 0 : index
    %56 = vector.load %arg12[%c0_40, %c0_41] : memref<1x128xf32, #tpu.memory_space<vmem>>, vector<1x128xf32>
    %57 = arith.addf %55, %56 : vector<1x128xf32>
    %cst_42 = arith.constant 0.000000e+00 : f32
    %58 = vector.broadcast %cst_42 : f32 to vector<1x128xf32>
    %59 = arith.cmpf ogt, %57, %58 : vector<1x128xf32>
    %cst_43 = arith.constant 2.000000e-01 : f32
    %60 = vector.broadcast %cst_43 : f32 to vector<1x128xf32>
    %61 = arith.mulf %60, %57 : vector<1x128xf32>
    %62 = arith.select %59, %57, %61 : vector<1x128xi1>, vector<1x128xf32>
    %c0_44 = arith.constant 0 : index
    %c0_45 = arith.constant 0 : index
    %63 = vector.load %arg15[%c0_44, %c0_45] : memref<1x128xf32, #tpu.memory_space<vmem>>, vector<1x128xf32>
    tpu.vector_store %arg15[%c0_44, %c0_45], %62 {strides = array<i32>} : memref<1x128xf32, #tpu.memory_space<vmem>>, vector<1x128xf32>,
    %c0_46 = arith.constant 0 : index
    %c0_47 = arith.constant 0 : index
    %64 = vector.load %arg13[%c0_46, %c0_47] : memref<128x256xf32, #tpu.memory_space<vmem>>, vector<128x256xf32>
    %cst_48 = arith.constant dense<0.000000e+00> : vector<1x256xf32>
    %65 = tpu.matmul %62, %64, %cst_48 {dimension_numbers = #tpu.dot_dimension_numbers<[1], [0], [0], [1], [0, 0, 1, 1], [], []>} : vector<1x128xf32>, vector<128x256xf32>, vector<1x256xf32> -> vector<1x256xf32>
    %c0_49 = arith.constant 0 : index
    %c0_50 = arith.constant 0 : index
    %66 = vector.load %arg14[%c0_49, %c0_50] : memref<1x256xf32, #tpu.memory_space<vmem>>, vector<1x256xf32>
    %67 = arith.addf %66, %65 : vector<1x256xf32>
    %c0_51 = arith.constant 0 : index
    %c0_52 = arith.constant 0 : index
    %68 = vector.load %arg16[%c0_51, %c0_52] : memref<1x256xf32, #tpu.memory_space<vmem>>, vector<1x256xf32>
    tpu.vector_store %arg16[%c0_51, %c0_52], %67 {strides = array<i32>} : memref<1x256xf32, #tpu.memory_space<vmem>>, vector<1x256xf32>,
    return
  }
}

module attributes {stable_mosaic.version = 11 : i64} {
  func.func @sky_mlp_kernel(%arg0: i32, %arg1: memref<256x4xf32, #tpu.memory_space<vmem>>, %arg2: memref<1x256xf32, #tpu.memory_space<vmem>>, %arg3: memref<4x256xf32, #tpu.memory_space<vmem>>, %arg4: memref<256x256xf32, #tpu.memory_space<vmem>>, %arg5: memref<1x256xf32, #tpu.memory_space<vmem>>, %arg6: memref<256x256xf32, #tpu.memory_space<vmem>>, %arg7: memref<1x256xf32, #tpu.memory_space<vmem>>, %arg8: memref<256x256xf32, #tpu.memory_space<vmem>>, %arg9: memref<1x256xf32, #tpu.memory_space<vmem>>, %arg10: memref<256x256xf32, #tpu.memory_space<vmem>>, %arg11: memref<1x256xf32, #tpu.memory_space<vmem>>, %arg12: memref<256x3xf32, #tpu.memory_space<vmem>>, %arg13: memref<1x3xf32, #tpu.memory_space<vmem>>, %arg14: memref<256x3xf32, #tpu.memory_space<vmem>>) attributes {dimension_semantics = [#tpu.dimension_semantics<parallel>], iteration_bounds = array<i64: 2>, scalar_prefetch = 0 : i64, scratch_operands = 0 : i64, tpu.core_type = #tpu.core_type<tc>, window_params = [{transform_indices = @transform_0, window_bounds = array<i64: 256, 4>}, {pipeline_mode = #tpu.pipeline_mode<synchronous>, transform_indices = @transform_1, window_bounds = array<i64: 1, 256>}, {pipeline_mode = #tpu.pipeline_mode<synchronous>, transform_indices = @transform_2, window_bounds = array<i64: 4, 256>}, {pipeline_mode = #tpu.pipeline_mode<synchronous>, transform_indices = @transform_3, window_bounds = array<i64: 256, 256>}, {pipeline_mode = #tpu.pipeline_mode<synchronous>, transform_indices = @transform_4, window_bounds = array<i64: 1, 256>}, {pipeline_mode = #tpu.pipeline_mode<synchronous>, transform_indices = @transform_5, window_bounds = array<i64: 256, 256>}, {pipeline_mode = #tpu.pipeline_mode<synchronous>, transform_indices = @transform_6, window_bounds = array<i64: 1, 256>}, {pipeline_mode = #tpu.pipeline_mode<synchronous>, transform_indices = @transform_7, window_bounds = array<i64: 256, 256>}, {pipeline_mode = #tpu.pipeline_mode<synchronous>, transform_indices = @transform_8, window_bounds = array<i64: 1, 256>}, {pipeline_mode = #tpu.pipeline_mode<synchronous>, transform_indices = @transform_9, window_bounds = array<i64: 256, 256>}, {pipeline_mode = #tpu.pipeline_mode<synchronous>, transform_indices = @transform_10, window_bounds = array<i64: 1, 256>}, {pipeline_mode = #tpu.pipeline_mode<synchronous>, transform_indices = @transform_11, window_bounds = array<i64: 256, 3>}, {pipeline_mode = #tpu.pipeline_mode<synchronous>, transform_indices = @transform_12, window_bounds = array<i64: 1, 3>}, {transform_indices = @transform_13, window_bounds = array<i64: 256, 3>}]} {
    %c0 = arith.constant 0 : index
    %c0_0 = arith.constant 0 : index
    %0 = vector.load %arg1[%c0, %c0_0] : memref<256x4xf32, #tpu.memory_space<vmem>>, vector<256x4xf32>
    %c0_1 = arith.constant 0 : index
    %c0_2 = arith.constant 0 : index
    %1 = vector.load %arg3[%c0_1, %c0_2] : memref<4x256xf32, #tpu.memory_space<vmem>>, vector<4x256xf32>
    %cst = arith.constant dense<0.000000e+00> : vector<256x256xf32>
    %2 = tpu.matmul %0, %1, %cst {dimension_numbers = #tpu.dot_dimension_numbers<[1], [0], [0], [1], [0, 0, 1, 1], [], []>} : vector<256x4xf32>, vector<4x256xf32>, vector<256x256xf32> -> vector<256x256xf32>
    %c0_3 = arith.constant 0 : index
    %c0_4 = arith.constant 0 : index
    %3 = vector.load %arg2[%c0_3, %c0_4] : memref<1x256xf32, #tpu.memory_space<vmem>>, vector<1x256xf32>
    %4 = vector.broadcast %3 : vector<1x256xf32> to vector<256x256xf32>
    %5 = arith.addf %2, %4 : vector<256x256xf32>
    %cst_5 = arith.constant 0.000000e+00 : f32
    %6 = vector.broadcast %cst_5 : f32 to vector<256x256xf32>
    %7 = arith.cmpf ogt, %5, %6 : vector<256x256xf32>
    %cst_6 = arith.constant 2.000000e-01 : f32
    %8 = vector.broadcast %cst_6 : f32 to vector<256x256xf32>
    %9 = arith.mulf %8, %5 : vector<256x256xf32>
    %10 = arith.select %7, %5, %9 : vector<256x256xi1>, vector<256x256xf32>
    %c0_7 = arith.constant 0 : index
    %c0_8 = arith.constant 0 : index
    %11 = vector.load %arg4[%c0_7, %c0_8] : memref<256x256xf32, #tpu.memory_space<vmem>>, vector<256x256xf32>
    %cst_9 = arith.constant dense<0.000000e+00> : vector<256x256xf32>
    %12 = tpu.matmul %10, %11, %cst_9 {dimension_numbers = #tpu.dot_dimension_numbers<[1], [0], [0], [1], [0, 0, 1, 1], [], []>} : vector<256x256xf32>, vector<256x256xf32>, vector<256x256xf32> -> vector<256x256xf32>
    %c0_10 = arith.constant 0 : index
    %c0_11 = arith.constant 0 : index
    %13 = vector.load %arg5[%c0_10, %c0_11] : memref<1x256xf32, #tpu.memory_space<vmem>>, vector<1x256xf32>
    %14 = vector.broadcast %13 : vector<1x256xf32> to vector<256x256xf32>
    %15 = arith.addf %12, %14 : vector<256x256xf32>
    %cst_12 = arith.constant 0.000000e+00 : f32
    %16 = vector.broadcast %cst_12 : f32 to vector<256x256xf32>
    %17 = arith.cmpf ogt, %15, %16 : vector<256x256xf32>
    %cst_13 = arith.constant 2.000000e-01 : f32
    %18 = vector.broadcast %cst_13 : f32 to vector<256x256xf32>
    %19 = arith.mulf %18, %15 : vector<256x256xf32>
    %20 = arith.select %17, %15, %19 : vector<256x256xi1>, vector<256x256xf32>
    %c0_14 = arith.constant 0 : index
    %c0_15 = arith.constant 0 : index
    %21 = vector.load %arg6[%c0_14, %c0_15] : memref<256x256xf32, #tpu.memory_space<vmem>>, vector<256x256xf32>
    %cst_16 = arith.constant dense<0.000000e+00> : vector<256x256xf32>
    %22 = tpu.matmul %20, %21, %cst_16 {dimension_numbers = #tpu.dot_dimension_numbers<[1], [0], [0], [1], [0, 0, 1, 1], [], []>} : vector<256x256xf32>, vector<256x256xf32>, vector<256x256xf32> -> vector<256x256xf32>
    %c0_17 = arith.constant 0 : index
    %c0_18 = arith.constant 0 : index
    %23 = vector.load %arg7[%c0_17, %c0_18] : memref<1x256xf32, #tpu.memory_space<vmem>>, vector<1x256xf32>
    %24 = vector.broadcast %23 : vector<1x256xf32> to vector<256x256xf32>
    %25 = arith.addf %22, %24 : vector<256x256xf32>
    %cst_19 = arith.constant 0.000000e+00 : f32
    %26 = vector.broadcast %cst_19 : f32 to vector<256x256xf32>
    %27 = arith.cmpf ogt, %25, %26 : vector<256x256xf32>
    %cst_20 = arith.constant 2.000000e-01 : f32
    %28 = vector.broadcast %cst_20 : f32 to vector<256x256xf32>
    %29 = arith.mulf %28, %25 : vector<256x256xf32>
    %30 = arith.select %27, %25, %29 : vector<256x256xi1>, vector<256x256xf32>
    %c0_21 = arith.constant 0 : index
    %c0_22 = arith.constant 0 : index
    %31 = vector.load %arg8[%c0_21, %c0_22] : memref<256x256xf32, #tpu.memory_space<vmem>>, vector<256x256xf32>
    %cst_23 = arith.constant dense<0.000000e+00> : vector<256x256xf32>
    %32 = tpu.matmul %30, %31, %cst_23 {dimension_numbers = #tpu.dot_dimension_numbers<[1], [0], [0], [1], [0, 0, 1, 1], [], []>} : vector<256x256xf32>, vector<256x256xf32>, vector<256x256xf32> -> vector<256x256xf32>
    %c0_24 = arith.constant 0 : index
    %c0_25 = arith.constant 0 : index
    %33 = vector.load %arg9[%c0_24, %c0_25] : memref<1x256xf32, #tpu.memory_space<vmem>>, vector<1x256xf32>
    %34 = vector.broadcast %33 : vector<1x256xf32> to vector<256x256xf32>
    %35 = arith.addf %32, %34 : vector<256x256xf32>
    %cst_26 = arith.constant 0.000000e+00 : f32
    %36 = vector.broadcast %cst_26 : f32 to vector<256x256xf32>
    %37 = arith.cmpf ogt, %35, %36 : vector<256x256xf32>
    %cst_27 = arith.constant 2.000000e-01 : f32
    %38 = vector.broadcast %cst_27 : f32 to vector<256x256xf32>
    %39 = arith.mulf %38, %35 : vector<256x256xf32>
    %40 = arith.select %37, %35, %39 : vector<256x256xi1>, vector<256x256xf32>
    %c0_28 = arith.constant 0 : index
    %c0_29 = arith.constant 0 : index
    %41 = vector.load %arg10[%c0_28, %c0_29] : memref<256x256xf32, #tpu.memory_space<vmem>>, vector<256x256xf32>
    %cst_30 = arith.constant dense<0.000000e+00> : vector<256x256xf32>
    %42 = tpu.matmul %40, %41, %cst_30 {dimension_numbers = #tpu.dot_dimension_numbers<[1], [0], [0], [1], [0, 0, 1, 1], [], []>} : vector<256x256xf32>, vector<256x256xf32>, vector<256x256xf32> -> vector<256x256xf32>
    %c0_31 = arith.constant 0 : index
    %c0_32 = arith.constant 0 : index
    %43 = vector.load %arg11[%c0_31, %c0_32] : memref<1x256xf32, #tpu.memory_space<vmem>>, vector<1x256xf32>
    %44 = vector.broadcast %43 : vector<1x256xf32> to vector<256x256xf32>
    %45 = arith.addf %42, %44 : vector<256x256xf32>
    %cst_33 = arith.constant 0.000000e+00 : f32
    %46 = vector.broadcast %cst_33 : f32 to vector<256x256xf32>
    %47 = arith.cmpf ogt, %45, %46 : vector<256x256xf32>
    %cst_34 = arith.constant 2.000000e-01 : f32
    %48 = vector.broadcast %cst_34 : f32 to vector<256x256xf32>
    %49 = arith.mulf %48, %45 : vector<256x256xf32>
    %50 = arith.select %47, %45, %49 : vector<256x256xi1>, vector<256x256xf32>
    %c0_35 = arith.constant 0 : index
    %c0_36 = arith.constant 0 : index
    %51 = vector.load %arg12[%c0_35, %c0_36] : memref<256x3xf32, #tpu.memory_space<vmem>>, vector<256x3xf32>
    %cst_37 = arith.constant dense<0.000000e+00> : vector<256x3xf32>
    %52 = tpu.matmul %50, %51, %cst_37 {dimension_numbers = #tpu.dot_dimension_numbers<[1], [0], [0], [1], [0, 0, 1, 1], [], []>} : vector<256x256xf32>, vector<256x3xf32>, vector<256x3xf32> -> vector<256x3xf32>
    %c0_38 = arith.constant 0 : index
    %c0_39 = arith.constant 0 : index
    %53 = vector.load %arg13[%c0_38, %c0_39] : memref<1x3xf32, #tpu.memory_space<vmem>>, vector<1x3xf32>
    %54 = vector.broadcast %53 : vector<1x3xf32> to vector<256x3xf32>
    %55 = arith.addf %52, %54 : vector<256x3xf32>
    %56 = vector.extract_strided_slice %0 {offsets = [0, 3], sizes = [256, 1], strides = [1, 1]} : vector<256x4xf32> to vector<256x1xf32>
    %cst_40 = arith.constant 1.000000e+00 : f32
    %57 = vector.broadcast %cst_40 : f32 to vector<256x1xf32>
    %58 = arith.subf %57, %56 : vector<256x1xf32>
    %59 = vector.broadcast %58 : vector<256x1xf32> to vector<256x3xf32>
    %60 = arith.mulf %55, %59 : vector<256x3xf32>
    %c0_41 = arith.constant 0 : index
    %c0_42 = arith.constant 0 : index
    %61 = vector.load %arg14[%c0_41, %c0_42] : memref<256x3xf32, #tpu.memory_space<vmem>>, vector<256x3xf32>
    tpu.vector_store %arg14[%c0_41, %c0_42], %60 {strides = array<i32>} : memref<256x3xf32, #tpu.memory_space<vmem>>, vector<256x3xf32>,
    return
  }
  func.func @transform_0(%arg0: i32) -> (i32, i32) {
    %c0_i32 = arith.constant 0 : i32
    %c0_i32_0 = arith.constant 0 : i32
    return %arg0, %c0_i32 : i32, i32
  }
  func.func @transform_1(%arg0: i32) -> (i32, i32) {
    %c0_i32 = arith.constant 0 : i32
    %c0_i32_0 = arith.constant 0 : i32
    %c0_i32_1 = arith.constant 0 : i32
    return %c0_i32, %c0_i32_0 : i32, i32
  }
  func.func @transform_2(%arg0: i32) -> (i32, i32) {
    %c0_i32 = arith.constant 0 : i32
    %c0_i32_0 = arith.constant 0 : i32
    %c0_i32_1 = arith.constant 0 : i32
    return %c0_i32, %c0_i32_0 : i32, i32
  }
  func.func @transform_3(%arg0: i32) -> (i32, i32) {
    %c0_i32 = arith.constant 0 : i32
    %c0_i32_0 = arith.constant 0 : i32
    %c0_i32_1 = arith.constant 0 : i32
    return %c0_i32, %c0_i32_0 : i32, i32
  }
  func.func @transform_4(%arg0: i32) -> (i32, i32) {
    %c0_i32 = arith.constant 0 : i32
    %c0_i32_0 = arith.constant 0 : i32
    %c0_i32_1 = arith.constant 0 : i32
    return %c0_i32, %c0_i32_0 : i32, i32
  }
  func.func @transform_5(%arg0: i32) -> (i32, i32) {
    %c0_i32 = arith.constant 0 : i32
    %c0_i32_0 = arith.constant 0 : i32
    %c0_i32_1 = arith.constant 0 : i32
    return %c0_i32, %c0_i32_0 : i32, i32
  }
  func.func @transform_6(%arg0: i32) -> (i32, i32) {
    %c0_i32 = arith.constant 0 : i32
    %c0_i32_0 = arith.constant 0 : i32
    %c0_i32_1 = arith.constant 0 : i32
    return %c0_i32, %c0_i32_0 : i32, i32
  }
  func.func @transform_7(%arg0: i32) -> (i32, i32) {
    %c0_i32 = arith.constant 0 : i32
    %c0_i32_0 = arith.constant 0 : i32
    %c0_i32_1 = arith.constant 0 : i32
    return %c0_i32, %c0_i32_0 : i32, i32
  }
  func.func @transform_8(%arg0: i32) -> (i32, i32) {
    %c0_i32 = arith.constant 0 : i32
    %c0_i32_0 = arith.constant 0 : i32
    %c0_i32_1 = arith.constant 0 : i32
    return %c0_i32, %c0_i32_0 : i32, i32
  }
  func.func @transform_9(%arg0: i32) -> (i32, i32) {
    %c0_i32 = arith.constant 0 : i32
    %c0_i32_0 = arith.constant 0 : i32
    %c0_i32_1 = arith.constant 0 : i32
    return %c0_i32, %c0_i32_0 : i32, i32
  }
  func.func @transform_10(%arg0: i32) -> (i32, i32) {
    %c0_i32 = arith.constant 0 : i32
    %c0_i32_0 = arith.constant 0 : i32
    %c0_i32_1 = arith.constant 0 : i32
    return %c0_i32, %c0_i32_0 : i32, i32
  }
  func.func @transform_11(%arg0: i32) -> (i32, i32) {
    %c0_i32 = arith.constant 0 : i32
    %c0_i32_0 = arith.constant 0 : i32
    %c0_i32_1 = arith.constant 0 : i32
    return %c0_i32, %c0_i32_0 : i32, i32
  }
  func.func @transform_12(%arg0: i32) -> (i32, i32) {
    %c0_i32 = arith.constant 0 : i32
    %c0_i32_0 = arith.constant 0 : i32
    %c0_i32_1 = arith.constant 0 : i32
    return %c0_i32, %c0_i32_0 : i32, i32
  }
  func.func @transform_13(%arg0: i32) -> (i32, i32) {
    %c0_i32 = arith.constant 0 : i32
    %c0_i32_0 = arith.constant 0 : i32
    return %arg0, %c0_i32 : i32, i32
  }
}

</mosaic_0001>

<bundles_post_ra>
// kernel: sky_model_forward.2
= control target key start
LH: loop header
LB: loop body
LE: loop exit
PB: predicated region body
PF: predicated region fallthrough
CT: control target
= control target key end

     0   :  { %s2020_s0 = inlined_call_operand.vmem [shape: f32[1,128], index: 0, kind: input, shape index: {}]   ;;  %s2021_s1 = inlined_call_operand.hbm [shape: f32[128,256], index: 1, kind: input, shape index: {}]   ;;  %s2022_s2 = inlined_call_operand.vmem [shape: f32[1,256], index: 2, kind: input, shape index: {}]   ;;  %s2023_s3 = inlined_call_operand.hbm [shape: f32[256,256], index: 3, kind: input, shape index: {}]   ;;  %s2024_s4 = inlined_call_operand.vmem [shape: f32[1,256], index: 4, kind: input, shape index: {}]   ;;  %s2025_s5 = inlined_call_operand.hbm [shape: f32[256,256], index: 5, kind: input, shape index: {}]   ;;  %s2026_s6 = inlined_call_operand.vmem [shape: f32[1,256], index: 6, kind: input, shape index: {}]   ;;  %s2027_s7 = inlined_call_operand.hbm [shape: f32[256,256], index: 7, kind: input, shape index: {}]   ;;  %s2028_s8 = inlined_call_operand.vmem [shape: f32[1,256], index: 8, kind: input, shape index: {}]   ;;  %s2029_s9 = inlined_call_operand.hbm [shape: f32[256,256], index: 9, kind: input, shape index: {}]   ;;  %s2030_s10 = inlined_call_operand.vmem [shape: f32[1,256], index: 10, kind: input, shape index: {}]   ;;  %s2031_s11 = inlined_call_operand.hbm [shape: f32[256,128], index: 11, kind: input, shape index: {}]   ;;  %s2032_s12 = inlined_call_operand.vmem [shape: f32[1,128], index: 12, kind: input, shape index: {}]   ;;  %s2033_s13 = inlined_call_operand.hbm [shape: f32[128,256], index: 13, kind: input, shape index: {}]   ;;  %s2034_s14 = inlined_call_operand.vmem [shape: f32[1,256], index: 14, kind: input, shape index: {}]   ;;  %s2035_s15 = inlined_call_operand.hbm [shape: f32[1,128], index: 15, kind: output, shape index: {0}]   ;;  %s2036_s16 = inlined_call_operand.vmem [shape: f32[1,256], index: 16, kind: output, shape index: {1}]  }
   0x1   :  { %2039 = sst [smem:[#allocation20_spill]] %s2020_s0 }
   0x2   :  { %22 = vsyncpa [#allocation3], 0 }
   0x3   :  { %23 = vsyncpa [#allocation6], 0 }
   0x4   :  { %24 = vsyncpa [#allocation9], 0 }
   0x5   :  { %25 = vsyncpa [#allocation12], 0 }
   0x6   :  { %26 = vsyncpa [#allocation4], 0  ;;  %s1745_s21 = smov [#allocation5]   ;;  %s1746_s23 = smov [#allocation8]  }
   0x7   :  { %s48_s22 = sshll.u32 %s1745_s21, 4  ;;  %s76_s24 = sshll.u32 %s1746_s23, 4  ;;  %s49_s22 = int_to_ptr.vmem [resolvable:$true] %s48_s22  ;;  %s1844_s24 = int_to_ptr.vmem [resolvable:$true] %s76_s24 }
   0x8   :  { %s1559_s27 = scalar_lea.hbm %s2023_s3, 8192 }
   0x9   :  { %p1560_p0 = scmp.ne.s32.totalorder %s2023_s3, %s1559_s27  ;;  %p1563_p1 = scmp.lt.u32.totalorder %s1559_s27, %s2023_s3 }
   0xb   :  { %p1565_p2 = pnand %p1563_p1, %p1560_p0 }
   0xd   :  { %1568 = shalt.err (!%p1565_p2)
}
   0xe   :  { %s1569_s17 = scalar_lea.vmem %s49_s22, 8192  ;;  %p1574_p4 = scmp.lt.s32.totalorder %s49_s22, %s49_s22 }
   0xf   :  { %p1570_p3 = scmp.ne.s32.totalorder %s49_s22, %s1569_s17  ;;  %p1575_p5 = scmp.lt.s32.totalorder %s1569_s17, %s1569_s17 }
  0x11   :  { %p1576_p6 = por %p1575_p5, %p1574_p4 }
  0x13   :  { %p1577_p7 = pnand %p1576_p6, %p1570_p3 }
  0x15   :  { %1580 = shalt.err (!%p1577_p7)
}
  0x16   :  { %s2037_s18 = smov 256   ;;  %s1748_s19 = smov 16  }
  0x17   :  { %54 = dma.hbm_to_vmem [thread:$0]  %s2023_s3, 8192, %s49_s22, [#allocation6], %s2037_s18, %s2037_s18, %s1748_s19  }
  0x18   :  { %s1581_s26 = scalar_lea.hbm %s2027_s7, 8192 }
  0x19   :  { %p1582_p8 = scmp.ne.s32.totalorder %s2027_s7, %s1581_s26  ;;  %p1585_p9 = scmp.lt.u32.totalorder %s1581_s26, %s2027_s7 }
  0x1b   :  { %p1587_p10 = pnand %p1585_p9, %p1582_p8 }
  0x1d   :  { %1590 = shalt.err (!%p1587_p10)
}
  0x1e   :  { %s1591_s0 = scalar_lea.vmem %s1844_s24, 8192  ;;  %p1596_p12 = scmp.lt.s32.totalorder %s1844_s24, %s1844_s24 }
  0x1f   :  { %p1592_p11 = scmp.ne.s32.totalorder %s1844_s24, %s1591_s0  ;;  %p1597_p13 = scmp.lt.s32.totalorder %s1591_s0, %s1591_s0 }
  0x21   :  { %p1598_p0 = por %p1597_p13, %p1596_p12 }
  0x23   :  { %p1599_p1 = pnand %p1598_p0, %p1592_p11 }
  0x25   :  { %1602 = shalt.err (!%p1599_p1)
}
  0x26   :  { %82 = dma.hbm_to_vmem [thread:$0]  %s2027_s7, 8192, %s1844_s24, [#allocation9], %s2037_s18, %s2037_s18, %s1748_s19  }
  0x27   :  { %s1749_s17 = smov [#allocation11]   ;;  %s1603_s25 = scalar_lea.hbm %s2031_s11, 4096 }
  0x28   :  { %s104_s20 = sshll.u32 %s1749_s17, 4  ;;  %p1604_p2 = scmp.ne.s32.totalorder %s2031_s11, %s1603_s25  ;;  %s105_s20 = int_to_ptr.vmem [resolvable:$true] %s104_s20 }
  0x29   :  { %p1607_p3 = scmp.lt.u32.totalorder %s1603_s25, %s2031_s11 }
  0x2b   :  { %p1609_p4 = pnand %p1607_p3, %p1604_p2 }
  0x2d   :  { %1612 = shalt.err (!%p1609_p4)
}
  0x2e   :  { %s1613_s30 = scalar_lea.vmem %s105_s20, 4096  ;;  %p1618_p6 = scmp.lt.s32.totalorder %s105_s20, %s105_s20 }
  0x2f   :  { %p1614_p5 = scmp.ne.s32.totalorder %s105_s20, %s1613_s30  ;;  %p1619_p7 = scmp.lt.s32.totalorder %s1613_s30, %s1613_s30 }
  0x31   :  { %p1620_p8 = por %p1619_p7, %p1618_p6 }
  0x33   :  { %p1621_p9 = pnand %p1620_p8, %p1614_p5 }
  0x35   :  { %1624 = shalt.err (!%p1621_p9)
}
  0x36   :  { %s1750_s7 = smov 128   ;;  %s1751_s24 = smov 8  }
  0x37   :  { %110 = dma.hbm_to_vmem [thread:$0]  %s2031_s11, 4096, %s105_s20, [#allocation12], %s1750_s7, %s1750_s7, %s1751_s24  }
  0x38   :  { %s1752_s22 = smov [#allocation2]   ;;  %s1753_s21 = smov [#allocation7]  }
  0x39   :  { %s34_s17 = sshll.u32 %s1752_s22, 4  ;;  %s62_s23 = sshll.u32 %s1753_s21, 4  ;;  %s35_s17 = int_to_ptr.vmem [resolvable:$true] %s34_s17  ;;  %s63_s23 = int_to_ptr.vmem [resolvable:$true] %s62_s23 }
  0x3a   :  { %s1625_s27 = scalar_lea.hbm %s2021_s1, 4096 }
  0x3b   :  { %p1626_p10 = scmp.ne.s32.totalorder %s2021_s1, %s1625_s27  ;;  %p1629_p11 = scmp.lt.u32.totalorder %s1625_s27, %s2021_s1 }
  0x3d   :  { %p1631_p12 = pnand %p1629_p11, %p1626_p10 }
  0x3f   :  { %1634 = shalt.err (!%p1631_p12)
}
  0x40   :  { %s1635_s11 = scalar_lea.vmem %s35_s17, 4096  ;;  %p1640_p0 = scmp.lt.s32.totalorder %s35_s17, %s35_s17 }
  0x41   :  { %p1636_p13 = scmp.ne.s32.totalorder %s35_s17, %s1635_s11  ;;  %p1641_p1 = scmp.lt.s32.totalorder %s1635_s11, %s1635_s11 }
  0x43   :  { %p1642_p2 = por %p1641_p1, %p1640_p0 }
  0x45   :  { %p1643_p3 = pnand %p1642_p2, %p1636_p13 }
  0x47   :  { %1646 = shalt.err (!%p1643_p3)
}
  0x48   :  { %s2040_s20 = smov 256   ;;  %s1647_s3 = scalar_lea.hbm %s2025_s5, 8192 }
  0x49   :  { %40 = dma.hbm_to_vmem [thread:$0]  %s2021_s1, 4096, %s35_s17, [#allocation3], %s2040_s20, %s2040_s20, %s1748_s19  }
  0x4a   :  { %p1648_p4 = scmp.ne.s32.totalorder %s2025_s5, %s1647_s3  ;;  %p1651_p5 = scmp.lt.u32.totalorder %s1647_s3, %s2025_s5 }
  0x4c   :  { %p1653_p6 = pnand %p1651_p5, %p1648_p4 }
  0x4e   :  { %1656 = shalt.err (!%p1653_p6)
}
  0x4f   :  { %s1657_s27 = scalar_lea.vmem %s63_s23, 8192  ;;  %p1662_p8 = scmp.lt.s32.totalorder %s63_s23, %s63_s23 }
  0x50   :  { %p1658_p7 = scmp.ne.s32.totalorder %s63_s23, %s1657_s27  ;;  %p1663_p9 = scmp.lt.s32.totalorder %s1657_s27, %s1657_s27 }
  0x52   :  { %p1664_p10 = por %p1663_p9, %p1662_p8 }
  0x54   :  { %p1665_p11 = pnand %p1664_p10, %p1658_p7 }
  0x56   :  { %1668 = shalt.err (!%p1665_p11)
}
  0x57   :  { %68 = dma.hbm_to_vmem [thread:$0]  %s2025_s5, 8192, %s63_s23, [#allocation6], %s2040_s20, %s2040_s20, %s1748_s19  }
  0x58   :  { %s1754_s28 = smov [#allocation10]   ;;  %s1755_s30 = smov [#allocation13]  }
  0x59   :  { %s90_s29 = sshll.u32 %s1754_s28, 4  ;;  %s118_s11 = sshll.u32 %s1755_s30, 4  ;;  %s91_s29 = int_to_ptr.vmem [resolvable:$true] %s90_s29  ;;  %s119_s11 = int_to_ptr.vmem [resolvable:$true] %s118_s11 }
  0x5a   :  { %s1669_s0 = scalar_lea.hbm %s2029_s9, 8192 }
  0x5b   :  { %p1670_p12 = scmp.ne.s32.totalorder %s2029_s9, %s1669_s0  ;;  %p1673_p13 = scmp.lt.u32.totalorder %s1669_s0, %s2029_s9 }
  0x5d   :  { %p1675_p0 = pnand %p1673_p13, %p1670_p12 }
  0x5f   :  { %1678 = shalt.err (!%p1675_p0)
}
  0x60   :  { %s1679_s5 = scalar_lea.vmem %s91_s29, 8192  ;;  %p1684_p2 = scmp.lt.s32.totalorder %s91_s29, %s91_s29 }
  0x61   :  { %p1680_p1 = scmp.ne.s32.totalorder %s91_s29, %s1679_s5  ;;  %p1685_p3 = scmp.lt.s32.totalorder %s1679_s5, %s1679_s5 }
  0x63   :  { %p1686_p4 = por %p1685_p3, %p1684_p2 }
  0x65   :  { %p1687_p5 = pnand %p1686_p4, %p1680_p1 }
  0x67   :  { %1690 = shalt.err (!%p1687_p5)
}
  0x68   :  { %96 = dma.hbm_to_vmem [thread:$0]  %s2029_s9, 8192, %s91_s29, [#allocation9], %s2040_s20, %s2040_s20, %s1748_s19  }
  0x69   :  { %s1691_s1 = scalar_lea.hbm %s2033_s13, 4096 }
  0x6a   :  { %p1692_p6 = scmp.ne.s32.totalorder %s2033_s13, %s1691_s1  ;;  %p1695_p7 = scmp.lt.u32.totalorder %s1691_s1, %s2033_s13 }
  0x6c   :  { %p1697_p8 = pnand %p1695_p7, %p1692_p6 }
  0x6e   :  { %1700 = shalt.err (!%p1697_p8)
}
  0x6f   :  { %s1701_s24 = scalar_lea.vmem %s119_s11, 4096  ;;  %p1706_p10 = scmp.lt.s32.totalorder %s119_s11, %s119_s11 }
  0x70   :  { %p1702_p9 = scmp.ne.s32.totalorder %s119_s11, %s1701_s24  ;;  %p1707_p11 = scmp.lt.s32.totalorder %s1701_s24, %s1701_s24 }
  0x72   :  { %p1708_p12 = por %p1707_p11, %p1706_p10 }
  0x74   :  { %p1709_p13 = pnand %p1708_p12, %p1702_p9 }
  0x76   :  { %1712 = shalt.err (!%p1709_p13)
}
  0x77   :  { %124 = dma.hbm_to_vmem [thread:$0]  %s2033_s13, 4096, %s119_s11, [#allocation12], %s2040_s20, %s2040_s20, %s1748_s19  }
  0x78   :  { %1735 = dma.done.wait [#allocation3], 4096  }
  0x79   :  { %1736 = vsyncadd [#allocation3], 4294963200 }
  0x7a   :  { %1737 = dma.done.wait [#allocation6], 16384  }
  0x7b   :  { %1738 = vsyncadd [#allocation6], 4294950912 }
  0x7c   :  { %1739 = dma.done.wait [#allocation9], 16384  }
  0x7d   :  { %1740 = vsyncadd [#allocation9], 4294950912 }
  0x7e   :  { %1741 = dma.done.wait [#allocation12], 8192  }
  0x7f   :  { %1742 = vsyncadd [#allocation12], 4294959104  ;;  %s2041_s3 = sld [smem:[#allocation20_spill]]  ;;  %vm150_vm0 = vcmask 1040384   ;;  %v165_v1 = vld [vmem:[#allocation2 + $0x8] sm:$0xff]  ;;  %v167_v2 = vld [vmem:[#allocation2 + $0x18] sm:$0xff] }
  0x80   :  { %v1189_v4 = vpack.c.bf16 %v167_v2, %v165_v1  ;;  %v164_v6 = vld [vmem:[#allocation2] sm:$0xff]  ;;  %v166_v7 = vld [vmem:[#allocation2 + $0x10] sm:$0xff]  ;;  %v169_v9 = vld [vmem:[#allocation2 + $0x28] sm:$0xff]  ;;  %v1756_v46 = vmov 0.0   ;;  %s1757_s23 = smov [#allocation14]  }
  0x81   :  { %v1191_v8 = vpack.c.bf16 %v166_v7, %v164_v6  ;;  %v171_v10 = vld [vmem:[#allocation2 + $0x38] sm:$0xff]  ;;  %v168_v12 = vld [vmem:[#allocation2 + $0x20] sm:$0xff]  ;;  %v170_v13 = vld [vmem:[#allocation2 + $0x30] sm:$0xff]  ;;  %272 = vmatprep.mubr.f32.mxu0 %v1756_v46  ;;  %s1138_s25 = sshll.u32 %s1757_s23, 4  ;;  %s1139_s25 = int_to_ptr.vmem [resolvable:$true] %s1138_s25 }
  0x82   :  { %1190 = vmatprep.subr.bf16.mxu0 %v1189_v4  ;;  %v1193_v11 = vpack.c.bf16 %v171_v10, %v169_v9  ;;  %v1195_v14 = vpack.c.bf16 %v170_v13, %v168_v12  ;;  %v173_v15 = vld [vmem:[#allocation2 + $0x48] sm:$0xff]  ;;  %v175_v16 = vld [vmem:[#allocation2 + $0x58] sm:$0xff]  ;;  %v172_v18 = vld [vmem:[#allocation2 + $0x40] sm:$0xff]  ;;  %s1713_s26 = scalar_lea.vmem %s1139_s25, 16  ;;  %s1717_s27 = scalar_lea.vmem %s1139_s25, 32 }
  0x83   :  { %1192 = vmatpush1.bf16.msra.mxu0 %v1191_v8  ;;  %v1197_v17 = vpack.c.bf16 %v175_v16, %v173_v15  ;;  %v174_v19 = vld [vmem:[#allocation2 + $0x50] sm:$0xff]  ;;  %v177_v21 = vld [vmem:[#allocation2 + $0x68] sm:$0xff]  ;;  %v179_v22 = vld [vmem:[#allocation2 + $0x78] sm:$0xff]  ;;  %p1714_p0 = scmp.ne.s32.totalorder %s1139_s25, %s1713_s26  ;;  %p1718_p1 = scmp.lt.s32.totalorder %s1139_s25, %s1139_s25 }
  0x84   :  { %1194 = vmatprep.subr.bf16.mxu0 %v1193_v11  ;;  %v1199_v20 = vpack.c.bf16 %v174_v19, %v172_v18  ;;  %v1201_v23 = vpack.c.bf16 %v179_v22, %v177_v21  ;;  %v176_v24 = vld [vmem:[#allocation2 + $0x60] sm:$0xff]  ;;  %v178_v25 = vld [vmem:[#allocation2 + $0x70] sm:$0xff]  ;;  %v181_v27 = vld [vmem:[#allocation2 + $0x88] sm:$0xff]  ;;  %p1719_p2 = scmp.lt.s32.totalorder %s1717_s27, %s1713_s26 }
  0x85   :  { %v1956_v0 = vld [vmem:[%s2041_s3] sm:$0x1]  ;;  %v1203_v26 = vpack.c.bf16 %v178_v25, %v176_v24  ;;  %v183_v28 = vld [vmem:[#allocation2 + $0x98] sm:$0xff]  ;;  %v182_v31 = vld [vmem:[#allocation2 + $0x90] sm:$0xff] }
  0x86   :  { %v149_v3 = vmul.f32 %v1956_v0, %v1956_v0  ;;  %v1205_v29 = vpack.c.bf16 %v183_v28, %v181_v27  ;;  %v180_v30 = vld [vmem:[#allocation2 + $0x80] sm:$0xff]  ;;  %v185_v33 = vld [vmem:[#allocation2 + $0xa8] sm:$0xff]  ;;  %v187_v34 = vld [vmem:[#allocation2 + $0xb8] sm:$0xff]  ;;  %p1720_p3 = por %p1719_p2, %p1718_p1 }
  0x87   :  { %1196 = vmatpush1.bf16.msra.mxu0 %v1195_v14  ;;  %v1207_v32 = vpack.c.bf16 %v182_v31, %v180_v30  ;;  %v1209_v35 = vpack.c.bf16 %v187_v34, %v185_v33  ;;  %v184_v36 = vld [vmem:[#allocation2 + $0xa0] sm:$0xff]  ;;  %v186_v37 = vld [vmem:[#allocation2 + $0xb0] sm:$0xff]  ;;  %v189_v39 = vld [vmem:[#allocation2 + $0xc8] sm:$0xff] }
  0x88   :  { %v151_v5 = vsel %vm150_vm0, %v149_v3, 0.0  ;;  %1198 = vmatprep.subr.bf16.mxu0 %v1197_v17  ;;  %v1211_v38 = vpack.c.bf16 %v186_v37, %v184_v36  ;;  %v191_v40 = vld [vmem:[#allocation2 + $0xd8] sm:$0xff]  ;;  %v188_v41 = vld [vmem:[#allocation2 + $0xc0] sm:$0xff]  ;;  %v190_v43 = vld [vmem:[#allocation2 + $0xd0] sm:$0xff]  ;;  %p1721_p4 = pnand %p1720_p3, %p1714_p0 }
  0x89   :  { %152 = vadd.xlane.f32.xlu0 %v151_v5  ;;  %v1213_v42 = vpack.c.bf16 %v191_v40, %v189_v39  ;;  %v193_v44 = vld [vmem:[#allocation2 + $0xe8] sm:$0xff]  ;;  %v195_v45 = vld [vmem:[#allocation2 + $0xf8] sm:$0xff]  ;;  %v1215_v47 = vpack.c.bf16 %v190_v43, %v188_v41  ;;  %v192_v49 = vld [vmem:[#allocation2 + $0xe0] sm:$0xff] }
  0x8a   :  { %v1217_v48 = vpack.c.bf16 %v195_v45, %v193_v44  ;;  %v194_v50 = vld [vmem:[#allocation2 + $0xf0] sm:$0xff]  ;;  %v286_v52 = vld [vmem:[#allocation5 + $0x8] sm:$0xff]  ;;  %v288_v53 = vld [vmem:[#allocation5 + $0x18] sm:$0xff] }
  0x8b   :  { %1200 = vmatpush1.bf16.msra.mxu0 %v1199_v20  ;;  %v1219_v51 = vpack.c.bf16 %v194_v50, %v192_v49  ;;  %v285_v54 = vld [vmem:[#allocation5] sm:$0xff]  ;;  %v1221_v55 = vpack.c.bf16 %v288_v53, %v286_v52  ;;  %v287_v56 = vld [vmem:[#allocation5 + $0x10] sm:$0xff]  ;;  %v290_v57 = vld [vmem:[#allocation5 + $0x28] sm:$0xff] }
  0x8c   :  { %1202 = vmatprep.subr.bf16.mxu0 %v1201_v23  ;;  %v292_v58 = vld [vmem:[#allocation5 + $0x38] sm:$0xff]  ;;  %v1223_v59 = vpack.c.bf16 %v287_v56, %v285_v54  ;;  %v289_v61 = vld [vmem:[#allocation5 + $0x20] sm:$0xff]  ;;  %v291_v62 = vld [vmem:[#allocation5 + $0x30] sm:$0xff] }
  0x8d   :  { %v1225_v60 = vpack.c.bf16 %v292_v58, %v290_v57  ;;  %v294_v63 = vld [vmem:[#allocation5 + $0x48] sm:$0xff]  ;;  %1222 = vmatprep.subr.bf16.mxu1 %v1221_v55  ;;  %v296_v1 = vld [vmem:[#allocation5 + $0x58] sm:$0xff]  ;;  %v1227_v2 = vpack.c.bf16 %v291_v62, %v289_v61  ;;  %v293_v4 = vld [vmem:[#allocation5 + $0x40] sm:$0xff] }
  0x8e   :  { %1224 = vmatpush1.bf16.msra.mxu1 %v1223_v59  ;;  %v1229_v3 = vpack.c.bf16 %v296_v1, %v294_v63  ;;  %v295_v5 = vld [vmem:[#allocation5 + $0x50] sm:$0xff]  ;;  %v298_v6 = vld [vmem:[#allocation5 + $0x68] sm:$0xff]  ;;  %v300_v7 = vld [vmem:[#allocation5 + $0x78] sm:$0xff] }
  0x8f   :  { %1204 = vmatpush1.bf16.msra.mxu0 %v1203_v26  ;;  %1226 = vmatprep.subr.bf16.mxu1 %v1225_v60  ;;  %v1231_v8 = vpack.c.bf16 %v295_v5, %v293_v4  ;;  %v1233_v9 = vpack.c.bf16 %v300_v7, %v298_v6  ;;  %v297_v10 = vld [vmem:[#allocation5 + $0x60] sm:$0xff]  ;;  %v299_v11 = vld [vmem:[#allocation5 + $0x70] sm:$0xff]  ;;  %v302_v12 = vld [vmem:[#allocation5 + $0x88] sm:$0xff] }
  0x90   :  { %1206 = vmatprep.subr.bf16.mxu0 %v1205_v29  ;;  %v304_v13 = vld [vmem:[#allocation5 + $0x98] sm:$0xff]  ;;  %v1235_v14 = vpack.c.bf16 %v299_v11, %v297_v10  ;;  %v301_v16 = vld [vmem:[#allocation5 + $0x80] sm:$0xff]  ;;  %v303_v17 = vld [vmem:[#allocation5 + $0x90] sm:$0xff] }
  0x91   :  { %v1237_v15 = vpack.c.bf16 %v304_v13, %v302_v12  ;;  %v306_v18 = vld [vmem:[#allocation5 + $0xa8] sm:$0xff]  ;;  %v308_v19 = vld [vmem:[#allocation5 + $0xb8] sm:$0xff]  ;;  %v1239_v20 = vpack.c.bf16 %v303_v17, %v301_v16  ;;  %v305_v22 = vld [vmem:[#allocation5 + $0xa0] sm:$0xff] }
  0x92   :  { %1228 = vmatpush1.bf16.msra.mxu1 %v1227_v2  ;;  %v1241_v21 = vpack.c.bf16 %v308_v19, %v306_v18  ;;  %v307_v23 = vld [vmem:[#allocation5 + $0xb0] sm:$0xff]  ;;  %v310_v24 = vld [vmem:[#allocation5 + $0xc8] sm:$0xff]  ;;  %v312_v25 = vld [vmem:[#allocation5 + $0xd8] sm:$0xff] }
  0x93   :  { %1208 = vmatpush1.bf16.msra.mxu0 %v1207_v32  ;;  %1230 = vmatprep.subr.bf16.mxu1 %v1229_v3  ;;  %v1243_v26 = vpack.c.bf16 %v307_v23, %v305_v22  ;;  %v1245_v27 = vpack.c.bf16 %v312_v25, %v310_v24  ;;  %v309_v28 = vld [vmem:[#allocation5 + $0xc0] sm:$0xff]  ;;  %v311_v29 = vld [vmem:[#allocation5 + $0xd0] sm:$0xff]  ;;  %v314_v30 = vld [vmem:[#allocation5 + $0xe8] sm:$0xff] }
  0x94   :  { %1210 = vmatprep.subr.bf16.mxu0 %v1209_v35  ;;  %v316_v31 = vld [vmem:[#allocation5 + $0xf8] sm:$0xff]  ;;  %v1247_v32 = vpack.c.bf16 %v311_v29, %v309_v28  ;;  %v313_v34 = vld [vmem:[#allocation5 + $0xe0] sm:$0xff]  ;;  %v315_v35 = vld [vmem:[#allocation5 + $0xf0] sm:$0xff] }
  0x95   :  { %v1249_v33 = vpack.c.bf16 %v316_v31, %v314_v30  ;;  %v318_v36 = vld [vmem:[#allocation5 + $0x108] sm:$0xff]  ;;  %v320_v37 = vld [vmem:[#allocation5 + $0x118] sm:$0xff]  ;;  %v317_v40 = vld [vmem:[#allocation5 + $0x100] sm:$0xff] }
  0x96   :  { %1232 = vmatpush1.bf16.msra.mxu1 %v1231_v8  ;;  %v1253_v39 = vpack.c.bf16 %v320_v37, %v318_v36  ;;  %v319_v41 = vld [vmem:[#allocation5 + $0x110] sm:$0xff]  ;;  %v324_v43 = vld [vmem:[#allocation5 + $0x138] sm:$0xff]  ;;  %v326_v49 = vld [vmem:[#allocation5 + $0x148] sm:$0xff] }
  0x97   :  { %1212 = vmatpush1.bf16.msra.mxu0 %v1211_v38  ;;  %1234 = vmatprep.subr.bf16.mxu1 %v1233_v9  ;;  %v1251_v38 = vpack.c.bf16 %v315_v35, %v313_v34  ;;  %v1255_v44 = vpack.c.bf16 %v319_v41, %v317_v40  ;;  %v328_v50 = vld [vmem:[#allocation5 + $0x158] sm:$0xff]  ;;  %v325_v53 = vld [vmem:[#allocation5 + $0x140] sm:$0xff]  ;;  %v327_v54 = vld [vmem:[#allocation5 + $0x150] sm:$0xff] }
  0x98   :  { %1214 = vmatprep.subr.bf16.mxu0 %v1213_v42  ;;  %v322_v42 = vld [vmem:[#allocation5 + $0x128] sm:$0xff]  ;;  %v1261_v52 = vpack.c.bf16 %v328_v50, %v326_v49  ;;  %v332_v56 = vld [vmem:[#allocation5 + $0x178] sm:$0xff]  ;;  %v1263_v57 = vpack.c.bf16 %v327_v54, %v325_v53  ;;  %v329_v59 = vld [vmem:[#allocation5 + $0x160] sm:$0xff] }
  0x99   :  { %v1257_v45 = vpack.c.bf16 %v324_v43, %v322_v42  ;;  %v330_v55 = vld [vmem:[#allocation5 + $0x168] sm:$0xff]  ;;  %v331_v60 = vld [vmem:[#allocation5 + $0x170] sm:$0xff]  ;;  %v336_v62 = vld [vmem:[#allocation5 + $0x198] sm:$0xff] }
  0x9a   :  { %1236 = vmatpush1.bf16.msra.mxu1 %v1235_v14  ;;  %v1265_v58 = vpack.c.bf16 %v332_v56, %v330_v55  ;;  %v334_v61 = vld [vmem:[#allocation5 + $0x188] sm:$0xff]  ;;  %v1267_v63 = vpack.c.bf16 %v331_v60, %v329_v59  ;;  %v333_v2 = vld [vmem:[#allocation5 + $0x180] sm:$0xff]  ;;  %v335_v3 = vld [vmem:[#allocation5 + $0x190] sm:$0xff] }
  0x9b   :  { %1216 = vmatpush1.bf16.msra.mxu0 %v1215_v47  ;;  %1238 = vmatprep.subr.bf16.mxu1 %v1237_v15  ;;  %v321_v47 = vld [vmem:[#allocation5 + $0x120] sm:$0xff]  ;;  %v1269_v1 = vpack.c.bf16 %v336_v62, %v334_v61  ;;  %v338_v4 = vld [vmem:[#allocation5 + $0x1a8] sm:$0xff]  ;;  %v340_v5 = vld [vmem:[#allocation5 + $0x1b8] sm:$0xff]  ;;  %v1271_v6 = vpack.c.bf16 %v335_v3, %v333_v2 }
  0x9c   :  { %1218 = vmatprep.subr.bf16.mxu0 %v1217_v48  ;;  %v323_v48 = vld [vmem:[#allocation5 + $0x130] sm:$0xff]  ;;  %v1273_v7 = vpack.c.bf16 %v340_v5, %v338_v4  ;;  %v337_v8 = vld [vmem:[#allocation5 + $0x1a0] sm:$0xff]  ;;  %v443_v36 = vld [vmem:[#allocation7 + $0x28] sm:$0xff] }
  0x9d   :  { %v339_v9 = vld [vmem:[#allocation5 + $0x1b0] sm:$0xff]  ;;  %v341_v23 = vld [vmem:[#allocation5 + $0x1c0] sm:$0xff]  ;;  %v445_v37 = vld [vmem:[#allocation7 + $0x38] sm:$0xff] }
  0x9e   :  { %1240 = vmatpush1.bf16.msra.mxu1 %v1239_v20  ;;  %v1275_v10 = vpack.c.bf16 %v339_v9, %v337_v8  ;;  %v342_v20 = vld [vmem:[#allocation5 + $0x1c8] sm:$0xff]  ;;  %v343_v24 = vld [vmem:[#allocation5 + $0x1d0] sm:$0xff]  ;;  %v345_v29 = vld [vmem:[#allocation5 + $0x1e0] sm:$0xff] }
  0x9f   :  { %1220 = vmatpush1.bf16.msra.mxu0 %v1219_v51  ;;  %1242 = vmatprep.subr.bf16.mxu1 %v1241_v21  ;;  %v1259_v51 = vpack.c.bf16 %v323_v48, %v321_v47  ;;  %v344_v21 = vld [vmem:[#allocation5 + $0x1d8] sm:$0xff]  ;;  %v1279_v25 = vpack.c.bf16 %v343_v24, %v341_v23  ;;  %v347_v30 = vld [vmem:[#allocation5 + $0x1f0] sm:$0xff]  ;;  %v442_v40 = vld [vmem:[#allocation7 + $0x20] sm:$0xff] }
  0xa0   :  { %v1277_v22 = vpack.c.bf16 %v344_v21, %v342_v20  ;;  %v1283_v31 = vpack.c.bf16 %v347_v30, %v345_v29  ;;  %v440_v35 = vld [vmem:[#allocation7 + $0x10] sm:$0xff]  ;;  %v447_v42 = vld [vmem:[#allocation7 + $0x48] sm:$0xff]  ;;  %v449_v43 = vld [vmem:[#allocation7 + $0x58] sm:$0xff] }
  0xa1   :  { %v444_v41 = vld [vmem:[#allocation7 + $0x30] sm:$0xff]  ;;  %v446_v47 = vld [vmem:[#allocation7 + $0x40] sm:$0xff]  ;;  %v451_v49 = vld [vmem:[#allocation7 + $0x68] sm:$0xff] }
  0xa2   :  { %1244 = vmatpush1.bf16.msra.mxu1 %v1243_v26  ;;  %v346_v26 = vld [vmem:[#allocation5 + $0x1e8] sm:$0xff]  ;;  %v448_v48 = vld [vmem:[#allocation7 + $0x50] sm:$0xff]  ;;  %v453_v50 = vld [vmem:[#allocation7 + $0x78] sm:$0xff] }
  0xa3   :  { %1246 = vmatprep.subr.bf16.mxu1 %v1245_v27  ;;  %v348_v27 = vld [vmem:[#allocation5 + $0x1f8] sm:$0xff]  ;;  %v450_v53 = vld [vmem:[#allocation7 + $0x60] sm:$0xff]  ;;  %v452_v54 = vld [vmem:[#allocation7 + $0x70] sm:$0xff] }
  0xa4   :  { %v1281_v28 = vpack.c.bf16 %v348_v27, %v346_v26  ;;  %v455_v55 = vld [vmem:[#allocation7 + $0x88] sm:$0xff]  ;;  %v457_v56 = vld [vmem:[#allocation7 + $0x98] sm:$0xff]  ;;  %v454_v59 = vld [vmem:[#allocation7 + $0x80] sm:$0xff] }
  0xa5   :  { %v456_v60 = vld [vmem:[#allocation7 + $0x90] sm:$0xff]  ;;  %v459_v61 = vld [vmem:[#allocation7 + $0xa8] sm:$0xff]  ;;  %v461_v62 = vld [vmem:[#allocation7 + $0xb8] sm:$0xff] }
  0xa6   :  { %1248 = vmatpush1.bf16.msra.mxu1 %v1247_v32  ;;  %v439_v32 = vld [vmem:[#allocation7 + $0x8] sm:$0xff]  ;;  %v458_v2 = vld [vmem:[#allocation7 + $0xa0] sm:$0xff]  ;;  %v460_v3 = vld [vmem:[#allocation7 + $0xb0] sm:$0xff] }
  0xa7   :  { %1250 = vmatprep.subr.bf16.mxu1 %v1249_v33  ;;  %v441_v33 = vld [vmem:[#allocation7 + $0x18] sm:$0xff]  ;;  %v463_v4 = vld [vmem:[#allocation7 + $0xc8] sm:$0xff]  ;;  %v462_v8 = vld [vmem:[#allocation7 + $0xc0] sm:$0xff] }
  0xa8   :  { %v1285_v34 = vpack.c.bf16 %v441_v33, %v439_v32  ;;  %v465_v5 = vld [vmem:[#allocation7 + $0xd8] sm:$0xff]  ;;  %v464_v9 = vld [vmem:[#allocation7 + $0xd0] sm:$0xff]  ;;  %v470_v20 = vld [vmem:[#allocation7 + $0x100] sm:$0xff] }
  0xa9   :  { %v472_v21 = vld [vmem:[#allocation7 + $0x110] sm:$0xff]  ;;  %v477_v23 = vld [vmem:[#allocation7 + $0x138] sm:$0xff]  ;;  %v474_v26 = vld [vmem:[#allocation7 + $0x120] sm:$0xff] }
  0xaa   :  { %1252 = vmatpush1.bf16.msra.mxu1 %v1251_v38  ;;  %1286 = vmatprep.subr.bf16.mxu0 %v1285_v34  ;;  %v1319_v24 = vpack.c.bf16 %v472_v21, %v470_v20  ;;  %v476_v27 = vld [vmem:[#allocation7 + $0x130] sm:$0xff]  ;;  %v481_v29 = vld [vmem:[#allocation7 + $0x158] sm:$0xff]  ;;  %v478_v32 = vld [vmem:[#allocation7 + $0x140] sm:$0xff] }
  0xab   :  { %1254 = vmatprep.subr.bf16.mxu1 %v1253_v39  ;;  %v1289_v39 = vpack.c.bf16 %v445_v37, %v443_v36  ;;  %v1323_v30 = vpack.c.bf16 %v476_v27, %v474_v26  ;;  %v480_v33 = vld [vmem:[#allocation7 + $0x150] sm:$0xff]  ;;  %v485_v34 = vld [vmem:[#allocation7 + $0x178] sm:$0xff]  ;;  %v482_v37 = vld [vmem:[#allocation7 + $0x160] sm:$0xff] }
  0xac   :  { %v593_v21 = vld [vmem:[#allocation8 + $0x10] sm:$0xff]  ;;  %v595_v26 = vld [vmem:[#allocation8 + $0x20] sm:$0xff] }
  0xad   :  { %v597_v27 = vld [vmem:[#allocation8 + $0x30] sm:$0xff] }
  0xae   :  { %1256 = vmatpush1.bf16.msra.mxu1 %v1255_v44  ;;  %v1291_v44 = vpack.c.bf16 %v444_v41, %v442_v40  ;;  %v489_v40 = vld [vmem:[#allocation7 + $0x198] sm:$0xff] }
  0xaf   :  { %1258 = vmatprep.subr.bf16.mxu1 %v1257_v45  ;;  %v1293_v45 = vpack.c.bf16 %v449_v43, %v447_v42  ;;  %v486_v43 = vld [vmem:[#allocation7 + $0x180] sm:$0xff] }
  0xb2   :  { %1260 = vmatpush1.bf16.msra.mxu1 %v1259_v51  ;;  %v1295_v51 = vpack.c.bf16 %v448_v48, %v446_v47  ;;  %v493_v47 = vld [vmem:[#allocation7 + $0x1b8] sm:$0xff] }
  0xb3   :  { %1262 = vmatprep.subr.bf16.mxu1 %v1261_v52  ;;  %v1297_v52 = vpack.c.bf16 %v453_v50, %v451_v49  ;;  %v490_v50 = vld [vmem:[#allocation7 + $0x1a0] sm:$0xff] }
  0xb6   :  { %1264 = vmatpush1.bf16.msra.mxu1 %v1263_v57  ;;  %v1299_v57 = vpack.c.bf16 %v452_v54, %v450_v53  ;;  %v198_v53 = vlaneseq }
  0xb7   :  { %1266 = vmatprep.subr.bf16.mxu1 %v1265_v58  ;;  %v1301_v58 = vpack.c.bf16 %v457_v56, %v455_v55  ;;  %v196_v56 = vld [vmem:[%s2022_s2] sm:$0x3] }
  0xb8   :  { %v1963_v54 = vshrl.u32 %v198_v53, 7 }
  0xba   :  { %1268 = vmatpush1.bf16.msra.mxu1 %v1267_v63  ;;  %v1303_v63 = vpack.c.bf16 %v456_v60, %v454_v59  ;;  %v1966_v55 = vsub.s32 0, %v1963_v54 }
  0xbb   :  { %1270 = vmatprep.subr.bf16.mxu1 %v1269_v1  ;;  %v1305_v1 = vpack.c.bf16 %v461_v62, %v459_v61 }
  0xbe   :  { %1272 = vmatpush1.bf16.msra.mxu1 %v1271_v6  ;;  %v1307_v6 = vpack.c.bf16 %v460_v3, %v458_v2 }
  0xbf   :  { %1274 = vmatprep.subr.bf16.mxu1 %v1273_v7  ;;  %v1309_v7 = vpack.c.bf16 %v465_v5, %v463_v4  ;;  %v495_v5 = vld [vmem:[#allocation7 + $0x1c8] sm:$0xff] }
  0xc2   :  { %1276 = vmatpush1.bf16.msra.mxu1 %v1275_v10  ;;  %v467_v10 = vld [vmem:[#allocation7 + $0xe8] sm:$0xff] }
  0xc3   :  { %1278 = vmatprep.subr.bf16.mxu1 %v1277_v22  ;;  %v475_v22 = vld [vmem:[#allocation7 + $0x128] sm:$0xff] }
  0xc6   :  { %1280 = vmatpush1.bf16.msra.mxu1 %v1279_v25  ;;  %v1321_v25 = vpack.c.bf16 %v477_v23, %v475_v22  ;;  %v596_v22 = vld [vmem:[#allocation8 + $0x28] sm:$0xff]  ;;  %v598_v23 = vld [vmem:[#allocation8 + $0x38] sm:$0xff] }
  0xc7   :  { %1282 = vmatprep.subr.bf16.mxu1 %v1281_v28  ;;  %v479_v28 = vld [vmem:[#allocation7 + $0x148] sm:$0xff] }
  0xca   :  { %1284 = vmatpush1.bf16.msra.mxu1 %v1283_v31  ;;  %v1325_v31 = vpack.c.bf16 %v481_v29, %v479_v28  ;;  %v600_v28 = vld [vmem:[#allocation8 + $0x48] sm:$0xff]  ;;  %v602_v29 = vld [vmem:[#allocation8 + $0x58] sm:$0xff] }
 0x116   :  { %v153_v11 = vpop.xlane.xlu0 %152 }
 0x117   :  { %1555 = vrsqrt.f32 %v153_v11  ;;  %vm156_vm1 = vcmp.eq.f32.partialorder %v153_v11, inf  ;;  %v159_v14 = vand.u32 2147483648, %v153_v11  ;;  %vm158_vm2 = vcmp.eq.f32.partialorder %v153_v11, 0.0 }
 0x121   :  { %v1556_v12 = vpop.eup %1555 }
 0x122   :  { %v155_v13 = vmul.f32 %v1556_v12, %v153_v11  ;;  %v1311_v12 = vpack.c.bf16 %v464_v9, %v462_v8  ;;  %v494_v8 = vld [vmem:[#allocation7 + $0x1c0] sm:$0xff]  ;;  %v496_v9 = vld [vmem:[#allocation7 + $0x1d0] sm:$0xff] }
 0x124   :  { %v157_v15 = vsel %vm156_vm1, %v153_v11, %v155_v13  ;;  %v469_v11 = vld [vmem:[#allocation7 + $0xf8] sm:$0xff] }
 0x125   :  { %v160_v16 = vsel %vm158_vm2, %v159_v14, %v157_v15  ;;  %v1313_v13 = vpack.c.bf16 %v469_v11, %v467_v10  ;;  %v466_v14 = vld [vmem:[#allocation7 + $0xe0] sm:$0xff]  ;;  %v468_v15 = vld [vmem:[#allocation7 + $0xf0] sm:$0xff]  ;;  %v1343_v10 = vpack.c.bf16 %v496_v9, %v494_v8  ;;  %v499_v11 = vld [vmem:[#allocation7 + $0x1e8] sm:$0xff] }
 0x126   :  { %v161_v17 = vmax.f32 %v160_v16, 1e-12  ;;  %v471_v16 = vld [vmem:[#allocation7 + $0x108] sm:$0xff]  ;;  %v623_v9 = vld [vmem:[#allocation8 + $0x100] sm:$0xff] }
 0x128   :  { %1557 = vrcp.f32 %v161_v17  ;;  %v473_v17 = vld [vmem:[#allocation7 + $0x118] sm:$0xff] }
 0x132   :  { %v1558_v18 = vpop.eup %1557 }
 0x133   :  { %v163_v19 = vmul.f32 %v1558_v18, %v1956_v0  ;;  %v438_v0 = vld [vmem:[#allocation7] sm:$0xff]  ;;  %v1315_v18 = vpack.c.bf16 %v468_v15, %v466_v14  ;;  %v500_v15 = vld [vmem:[#allocation7 + $0x1f0] sm:$0xff] }
 0x134   :  { %v1287_v38 = vpack.c.bf16 %v440_v35, %v438_v0  ;;  %v483_v0 = vld [vmem:[#allocation7 + $0x168] sm:$0xff]  ;;  %v1327_v35 = vpack.c.bf16 %v480_v33, %v478_v32  ;;  %v498_v14 = vld [vmem:[#allocation7 + $0x1e0] sm:$0xff]  ;;  %v601_v33 = vld [vmem:[#allocation8 + $0x50] sm:$0xff] }
 0x135   :  { %273 = vmatmul.mubr.f32.vlgmr.msra.gmra.mrb[0].mxu0 %v163_v19  ;;  %v1317_v19 = vpack.c.bf16 %v473_v17, %v471_v16  ;;  %v1329_v36 = vpack.c.bf16 %v485_v34, %v483_v0  ;;  %v1347_v16 = vpack.c.bf16 %v500_v15, %v498_v14  ;;  %v592_v17 = vld [vmem:[#allocation8 + $0x8] sm:$0xff]  ;;  %v599_v32 = vld [vmem:[#allocation8 + $0x40] sm:$0xff]  ;;  %v606_v34 = vld [vmem:[#allocation8 + $0x78] sm:$0xff] }
 0x136   :  { %1288 = vmatpush1.bf16.msra.mxu0 %v1287_v38  ;;  %v484_v38 = vld [vmem:[#allocation7 + $0x170] sm:$0xff]  ;;  %v604_v0 = vld [vmem:[#allocation8 + $0x68] sm:$0xff]  ;;  %v627_v15 = vld [vmem:[#allocation8 + $0x120] sm:$0xff] }
 0x137   :  { %1290 = vmatprep.subr.bf16.mxu0 %v1289_v39  ;;  %v487_v39 = vld [vmem:[#allocation7 + $0x188] sm:$0xff]  ;;  %v1331_v41 = vpack.c.bf16 %v484_v38, %v482_v37  ;;  %v603_v37 = vld [vmem:[#allocation8 + $0x60] sm:$0xff]  ;;  %v605_v38 = vld [vmem:[#allocation8 + $0x70] sm:$0xff] }
 0x138   :  { %v1333_v42 = vpack.c.bf16 %v489_v40, %v487_v39  ;;  %v608_v39 = vld [vmem:[#allocation8 + $0x88] sm:$0xff]  ;;  %v610_v40 = vld [vmem:[#allocation8 + $0x98] sm:$0xff] }
 0x13a   :  { %1292 = vmatpush1.bf16.msra.mxu0 %v1291_v44  ;;  %v488_v44 = vld [vmem:[#allocation7 + $0x190] sm:$0xff] }
 0x13b   :  { %1294 = vmatprep.subr.bf16.mxu0 %v1293_v45  ;;  %v491_v45 = vld [vmem:[#allocation7 + $0x1a8] sm:$0xff]  ;;  %v1335_v48 = vpack.c.bf16 %v488_v44, %v486_v43  ;;  %v607_v43 = vld [vmem:[#allocation8 + $0x80] sm:$0xff]  ;;  %v609_v44 = vld [vmem:[#allocation8 + $0x90] sm:$0xff] }
 0x13c   :  { %v1337_v49 = vpack.c.bf16 %v493_v47, %v491_v45  ;;  %v612_v45 = vld [vmem:[#allocation8 + $0xa8] sm:$0xff]  ;;  %v614_v47 = vld [vmem:[#allocation8 + $0xb8] sm:$0xff] }
 0x13e   :  { %1296 = vmatpush1.bf16.msra.mxu0 %v1295_v51  ;;  %v492_v51 = vld [vmem:[#allocation7 + $0x1b0] sm:$0xff] }
 0x13f   :  { %1298 = vmatprep.subr.bf16.mxu0 %v1297_v52  ;;  %v1339_v52 = vpack.c.bf16 %v492_v51, %v490_v50  ;;  %v611_v50 = vld [vmem:[#allocation8 + $0xa0] sm:$0xff]  ;;  %v613_v51 = vld [vmem:[#allocation8 + $0xb0] sm:$0xff] }
 0x142   :  { %1300 = vmatpush1.bf16.msra.mxu0 %v1299_v57  ;;  %v1972_v57 = vsub.s32 1, %v1963_v54 }
 0x143   :  { %1302 = vmatprep.subr.bf16.mxu0 %v1301_v58  ;;  %v201_v58 = vrot.slane %v196_v56, %v1966_v55 }
 0x144   :  { %v205_v59 = vrot.slane %v196_v56, %v1972_v57  ;;  %v618_v56 = vld [vmem:[#allocation8 + $0xd8] sm:$0xff] }
 0x146   :  { %1304 = vmatpush1.bf16.msra.mxu0 %v1303_v63 }
 0x147   :  { %1306 = vmatprep.subr.bf16.mxu0 %v1305_v1 }
 0x14a   :  { %1308 = vmatpush1.bf16.msra.mxu0 %v1307_v6  ;;  %v497_v6 = vld [vmem:[#allocation7 + $0x1d8] sm:$0xff] }
 0x14b   :  { %1310 = vmatprep.subr.bf16.mxu0 %v1309_v7  ;;  %v1341_v7 = vpack.c.bf16 %v497_v6, %v495_v5  ;;  %v624_v5 = vld [vmem:[#allocation8 + $0x108] sm:$0xff]  ;;  %v626_v6 = vld [vmem:[#allocation8 + $0x118] sm:$0xff] }
 0x14c   :  { %v1381_v8 = vpack.c.bf16 %v626_v6, %v624_v5  ;;  %v745_v6 = vld [vmem:[#allocation10 + $0x8] sm:$0xff] }
 0x14e   :  { %1312 = vmatpush1.bf16.msra.mxu0 %v1311_v12  ;;  %v501_v12 = vld [vmem:[#allocation7 + $0x1f8] sm:$0xff] }
 0x14f   :  { %1314 = vmatprep.subr.bf16.mxu0 %v1313_v13  ;;  %v1345_v13 = vpack.c.bf16 %v501_v12, %v499_v11  ;;  %v628_v11 = vld [vmem:[#allocation8 + $0x128] sm:$0xff]  ;;  %v630_v12 = vld [vmem:[#allocation8 + $0x138] sm:$0xff] }
 0x150   :  { %v1385_v14 = vpack.c.bf16 %v630_v12, %v628_v11  ;;  %v749_v11 = vld [vmem:[#allocation10 + $0x28] sm:$0xff]  ;;  %v751_v12 = vld [vmem:[#allocation10 + $0x38] sm:$0xff] }
 0x152   :  { %1316 = vmatpush1.bf16.msra.mxu0 %v1315_v18  ;;  %v594_v18 = vld [vmem:[#allocation8 + $0x18] sm:$0xff] }
 0x153   :  { %1318 = vmatprep.subr.bf16.mxu0 %v1317_v19  ;;  %v591_v19 = vld [vmem:[#allocation8] sm:$0xff]  ;;  %v1349_v20 = vpack.c.bf16 %v594_v18, %v592_v17  ;;  %v632_v17 = vld [vmem:[#allocation8 + $0x148] sm:$0xff]  ;;  %v634_v18 = vld [vmem:[#allocation8 + $0x158] sm:$0xff] }
 0x155   :  { %1350 = vmatprep.subr.bf16.mxu1 %v1349_v20  ;;  %v1389_v20 = vpack.c.bf16 %v634_v18, %v632_v17  ;;  %v753_v17 = vld [vmem:[#allocation10 + $0x48] sm:$0xff]  ;;  %v755_v18 = vld [vmem:[#allocation10 + $0x58] sm:$0xff] }
 0x156   :  { %1320 = vmatpush1.bf16.msra.mxu0 %v1319_v24  ;;  %v1351_v24 = vpack.c.bf16 %v593_v21, %v591_v19  ;;  %v631_v21 = vld [vmem:[#allocation8 + $0x140] sm:$0xff] }
 0x157   :  { %1322 = vmatprep.subr.bf16.mxu0 %v1321_v25  ;;  %v1353_v25 = vpack.c.bf16 %v598_v23, %v596_v22  ;;  %v633_v22 = vld [vmem:[#allocation8 + $0x150] sm:$0xff]  ;;  %v636_v23 = vld [vmem:[#allocation8 + $0x168] sm:$0xff] }
 0x15a   :  { %1324 = vmatpush1.bf16.msra.mxu0 %v1323_v30  ;;  %v1355_v30 = vpack.c.bf16 %v597_v27, %v595_v26  ;;  %v635_v27 = vld [vmem:[#allocation8 + $0x160] sm:$0xff] }
 0x15b   :  { %1326 = vmatprep.subr.bf16.mxu0 %v1325_v31  ;;  %v1357_v31 = vpack.c.bf16 %v602_v29, %v600_v28  ;;  %v637_v28 = vld [vmem:[#allocation8 + $0x170] sm:$0xff]  ;;  %v640_v29 = vld [vmem:[#allocation8 + $0x188] sm:$0xff] }
 0x15e   :  { %1328 = vmatpush1.bf16.msra.mxu0 %v1327_v35  ;;  %v1359_v35 = vpack.c.bf16 %v601_v33, %v599_v32  ;;  %v639_v33 = vld [vmem:[#allocation8 + $0x180] sm:$0xff] }
 0x15f   :  { %1330 = vmatprep.subr.bf16.mxu0 %v1329_v36  ;;  %v1361_v36 = vpack.c.bf16 %v606_v34, %v604_v0  ;;  %v641_v0 = vld [vmem:[#allocation8 + $0x190] sm:$0xff]  ;;  %v644_v34 = vld [vmem:[#allocation8 + $0x1a8] sm:$0xff] }
 0x162   :  { %1332 = vmatpush1.bf16.msra.mxu0 %v1331_v41  ;;  %v1363_v41 = vpack.c.bf16 %v605_v38, %v603_v37  ;;  %v643_v38 = vld [vmem:[#allocation8 + $0x1a0] sm:$0xff] }
 0x163   :  { %1334 = vmatprep.subr.bf16.mxu0 %v1333_v42  ;;  %v1365_v42 = vpack.c.bf16 %v610_v40, %v608_v39  ;;  %v645_v39 = vld [vmem:[#allocation8 + $0x1b0] sm:$0xff] }
 0x164   :  { %v1403_v40 = vpack.c.bf16 %v645_v39, %v643_v38  ;;  %v764_v38 = vld [vmem:[#allocation10 + $0xa0] sm:$0xff]  ;;  %v766_v39 = vld [vmem:[#allocation10 + $0xb0] sm:$0xff] }
 0x166   :  { %1336 = vmatpush1.bf16.msra.mxu0 %v1335_v48  ;;  %v1367_v48 = vpack.c.bf16 %v609_v44, %v607_v43 }
 0x167   :  { %1338 = vmatprep.subr.bf16.mxu0 %v1337_v49  ;;  %v1369_v49 = vpack.c.bf16 %v614_v47, %v612_v45 }
 0x16a   :  { %1340 = vmatpush1.bf16.msra.mxu0 %v1339_v52  ;;  %v616_v52 = vld [vmem:[#allocation8 + $0xc8] sm:$0xff] }
 0x16b   :  { %1342 = vmatprep.subr.bf16.mxu0 %v1341_v7 }
 0x16e   :  { %1344 = vmatpush1.bf16.msra.mxu0 %v1343_v10  ;;  %v625_v10 = vld [vmem:[#allocation8 + $0x110] sm:$0xff] }
 0x16f   :  { %1346 = vmatprep.subr.bf16.mxu0 %v1345_v13  ;;  %v1383_v13 = vpack.c.bf16 %v625_v10, %v623_v9  ;;  %v746_v10 = vld [vmem:[#allocation10 + $0x10] sm:$0xff] }
 0x172   :  { %1348 = vmatpush1.bf16.msra.mxu0 %v1347_v16  ;;  %v629_v16 = vld [vmem:[#allocation8 + $0x130] sm:$0xff] }
 0x173   :  { %v1387_v19 = vpack.c.bf16 %v629_v16, %v627_v15  ;;  %v748_v15 = vld [vmem:[#allocation10 + $0x20] sm:$0xff]  ;;  %v750_v16 = vld [vmem:[#allocation10 + $0x30] sm:$0xff] }
 0x208   :  { %v274_v60 = vpop.f32.mrb[0].mxu0 }
 0x209   :  { %v275_v61 = vadd.f32 %v274_v60, %v201_v58  ;;  %v276_v62 = vpop.f32.mrb[1].mxu0  ;;  %v1371_v58 = vpack.c.bf16 %v613_v51, %v611_v50  ;;  %v615_v60 = vld [vmem:[#allocation8 + $0xc0] sm:$0xff] }
 0x20a   :  { %v277_v63 = vadd.f32 %v276_v62, %v205_v59  ;;  %v1373_v59 = vpack.c.bf16 %v618_v56, %v616_v52  ;;  %v620_v62 = vld [vmem:[#allocation8 + $0xe8] sm:$0xff] }
 0x20b   :  { %v281_v1 = vmul.f32 0.2, %v275_v61  ;;  %vm279_vm4 = vcmp.gt.f32.partialorder %v275_v61, 0.0  ;;  %v648_v56 = vld [vmem:[#allocation8 + $0x1c8] sm:$0xff] }
 0x20c   :  { %vm280_vm3 = vcmp.gt.f32.partialorder %v277_v63, 0.0  ;;  %v282_v2 = vmul.f32 0.2, %v277_v63 }
 0x20d   :  { %v283_v4 = vsel %vm279_vm4, %v275_v61, %v281_v1  ;;  %v617_v61 = vld [vmem:[#allocation8 + $0xd0] sm:$0xff] }
 0x20e   :  { %v284_v3 = vsel %vm280_vm3, %v277_v63, %v282_v2  ;;  %v622_v63 = vld [vmem:[#allocation8 + $0xf8] sm:$0xff]  ;;  %v1375_v1 = vpack.c.bf16 %v617_v61, %v615_v60  ;;  %v647_v60 = vld [vmem:[#allocation8 + $0x1c0] sm:$0xff]  ;;  %v649_v61 = vld [vmem:[#allocation8 + $0x1d0] sm:$0xff] }
 0x20f   :  { %425 = vmatprep.mubr.f32.mxu1 %v284_v3  ;;  %v1377_v2 = vpack.c.bf16 %v622_v63, %v620_v62  ;;  %v619_v3 = vld [vmem:[#allocation8 + $0xe0] sm:$0xff]  ;;  %v1407_v62 = vpack.c.bf16 %v649_v61, %v647_v60  ;;  %v652_v63 = vld [vmem:[#allocation8 + $0x1e8] sm:$0xff] }
 0x210   :  { %426 = vmatmul.mubr.f32.vlgmr.msra.gmra.mrb[0].mxu1 %v283_v4  ;;  %v621_v4 = vld [vmem:[#allocation8 + $0xf0] sm:$0xff]  ;;  %v776_v61 = vld [vmem:[#allocation10 + $0x100] sm:$0xff] }
 0x211   :  { %1352 = vmatpush1.bf16.msra.mxu1 %v1351_v24  ;;  %v1379_v7 = vpack.c.bf16 %v621_v4, %v619_v3  ;;  %v638_v24 = vld [vmem:[#allocation8 + $0x178] sm:$0xff]  ;;  %v651_v3 = vld [vmem:[#allocation8 + $0x1e0] sm:$0xff]  ;;  %v653_v4 = vld [vmem:[#allocation8 + $0x1f0] sm:$0xff] }
 0x212   :  { %1354 = vmatprep.subr.bf16.mxu1 %v1353_v25  ;;  %v1391_v25 = vpack.c.bf16 %v633_v22, %v631_v21  ;;  %v1393_v26 = vpack.c.bf16 %v638_v24, %v636_v23  ;;  %v1411_v5 = vpack.c.bf16 %v653_v4, %v651_v3  ;;  %v752_v21 = vld [vmem:[#allocation10 + $0x40] sm:$0xff]  ;;  %v754_v22 = vld [vmem:[#allocation10 + $0x50] sm:$0xff]  ;;  %v757_v23 = vld [vmem:[#allocation10 + $0x68] sm:$0xff] }
 0x213   :  { %v759_v24 = vld [vmem:[#allocation10 + $0x78] sm:$0xff]  ;;  %v780_v4 = vld [vmem:[#allocation10 + $0x120] sm:$0xff] }
 0x215   :  { %1356 = vmatpush1.bf16.msra.mxu1 %v1355_v30  ;;  %v642_v30 = vld [vmem:[#allocation8 + $0x198] sm:$0xff] }
 0x216   :  { %1358 = vmatprep.subr.bf16.mxu1 %v1357_v31  ;;  %v1395_v31 = vpack.c.bf16 %v637_v28, %v635_v27  ;;  %v1397_v32 = vpack.c.bf16 %v642_v30, %v640_v29  ;;  %v756_v27 = vld [vmem:[#allocation10 + $0x60] sm:$0xff]  ;;  %v758_v28 = vld [vmem:[#allocation10 + $0x70] sm:$0xff]  ;;  %v761_v29 = vld [vmem:[#allocation10 + $0x88] sm:$0xff] }
 0x217   :  { %v763_v30 = vld [vmem:[#allocation10 + $0x98] sm:$0xff] }
 0x219   :  { %1360 = vmatpush1.bf16.msra.mxu1 %v1359_v35  ;;  %v646_v35 = vld [vmem:[#allocation8 + $0x1b8] sm:$0xff] }
 0x21a   :  { %1362 = vmatprep.subr.bf16.mxu1 %v1361_v36  ;;  %v1399_v36 = vpack.c.bf16 %v641_v0, %v639_v33  ;;  %v1401_v37 = vpack.c.bf16 %v646_v35, %v644_v34  ;;  %v760_v33 = vld [vmem:[#allocation10 + $0x80] sm:$0xff]  ;;  %v762_v0 = vld [vmem:[#allocation10 + $0x90] sm:$0xff]  ;;  %v765_v34 = vld [vmem:[#allocation10 + $0xa8] sm:$0xff] }
 0x21b   :  { %v767_v35 = vld [vmem:[#allocation10 + $0xb8] sm:$0xff] }
 0x21d   :  { %1364 = vmatpush1.bf16.msra.mxu1 %v1363_v41  ;;  %v349_v41 = vld [vmem:[%s2024_s4] sm:$0x3] }
 0x21e   :  { %1366 = vmatprep.subr.bf16.mxu1 %v1365_v42  ;;  %v354_v42 = vrot.slane %v349_v41, %v1966_v55  ;;  %v358_v43 = vrot.slane %v349_v41, %v1972_v57  ;;  %v771_v41 = vld [vmem:[#allocation10 + $0xd8] sm:$0xff] }
 0x221   :  { %1368 = vmatpush1.bf16.msra.mxu1 %v1367_v48 }
 0x222   :  { %1370 = vmatprep.subr.bf16.mxu1 %v1369_v49 }
 0x225   :  { %1372 = vmatpush1.bf16.msra.mxu1 %v1371_v58  ;;  %v650_v58 = vld [vmem:[#allocation8 + $0x1d8] sm:$0xff] }
 0x226   :  { %1374 = vmatprep.subr.bf16.mxu1 %v1373_v59  ;;  %v1405_v59 = vpack.c.bf16 %v650_v58, %v648_v56  ;;  %v777_v56 = vld [vmem:[#allocation10 + $0x108] sm:$0xff]  ;;  %v779_v58 = vld [vmem:[#allocation10 + $0x118] sm:$0xff] }
 0x227   :  { %v1445_v60 = vpack.c.bf16 %v779_v58, %v777_v56  ;;  %v913_v58 = vld [vmem:[#allocation11 + $0x80] sm:$0xff] }
 0x229   :  { %1376 = vmatpush1.bf16.msra.mxu1 %v1375_v1  ;;  %v654_v1 = vld [vmem:[#allocation8 + $0x1f8] sm:$0xff] }
 0x22a   :  { %1378 = vmatprep.subr.bf16.mxu1 %v1377_v2  ;;  %v1409_v2 = vpack.c.bf16 %v654_v1, %v652_v63  ;;  %v781_v63 = vld [vmem:[#allocation10 + $0x128] sm:$0xff]  ;;  %v783_v1 = vld [vmem:[#allocation10 + $0x138] sm:$0xff] }
 0x22b   :  { %v1449_v3 = vpack.c.bf16 %v783_v1, %v781_v63  ;;  %v915_v63 = vld [vmem:[#allocation11 + $0x90] sm:$0xff]  ;;  %v916_v1 = vld [vmem:[#allocation11 + $0x98] sm:$0xff] }
 0x22d   :  { %1380 = vmatpush1.bf16.msra.mxu1 %v1379_v7  ;;  %v747_v7 = vld [vmem:[#allocation10 + $0x18] sm:$0xff] }
 0x22e   :  { %1382 = vmatprep.subr.bf16.mxu1 %v1381_v8  ;;  %v744_v8 = vld [vmem:[#allocation10] sm:$0xff]  ;;  %v1413_v9 = vpack.c.bf16 %v747_v7, %v745_v6  ;;  %v785_v6 = vld [vmem:[#allocation10 + $0x148] sm:$0xff]  ;;  %v787_v7 = vld [vmem:[#allocation10 + $0x158] sm:$0xff] }
 0x230   :  { %1414 = vmatprep.subr.bf16.mxu0 %v1413_v9  ;;  %v1453_v9 = vpack.c.bf16 %v787_v7, %v785_v6  ;;  %v917_v6 = vld [vmem:[#allocation11 + $0xa0] sm:$0xff]  ;;  %v918_v7 = vld [vmem:[#allocation11 + $0xa8] sm:$0xff] }
 0x231   :  { %1384 = vmatpush1.bf16.msra.mxu1 %v1383_v13  ;;  %v1415_v13 = vpack.c.bf16 %v746_v10, %v744_v8  ;;  %v784_v10 = vld [vmem:[#allocation10 + $0x140] sm:$0xff] }
 0x232   :  { %1386 = vmatprep.subr.bf16.mxu1 %v1385_v14  ;;  %v1417_v14 = vpack.c.bf16 %v751_v12, %v749_v11  ;;  %v786_v11 = vld [vmem:[#allocation10 + $0x150] sm:$0xff]  ;;  %v789_v12 = vld [vmem:[#allocation10 + $0x168] sm:$0xff] }
 0x235   :  { %1388 = vmatpush1.bf16.msra.mxu1 %v1387_v19  ;;  %v1419_v19 = vpack.c.bf16 %v750_v16, %v748_v15  ;;  %v788_v16 = vld [vmem:[#allocation10 + $0x160] sm:$0xff] }
 0x236   :  { %1390 = vmatprep.subr.bf16.mxu1 %v1389_v20  ;;  %v1421_v20 = vpack.c.bf16 %v755_v18, %v753_v17  ;;  %v790_v17 = vld [vmem:[#allocation10 + $0x170] sm:$0xff]  ;;  %v793_v18 = vld [vmem:[#allocation10 + $0x188] sm:$0xff] }
 0x239   :  { %1392 = vmatpush1.bf16.msra.mxu1 %v1391_v25  ;;  %v1423_v25 = vpack.c.bf16 %v754_v22, %v752_v21  ;;  %v792_v22 = vld [vmem:[#allocation10 + $0x180] sm:$0xff] }
 0x23a   :  { %1394 = vmatprep.subr.bf16.mxu1 %v1393_v26  ;;  %v1425_v26 = vpack.c.bf16 %v759_v24, %v757_v23  ;;  %v794_v23 = vld [vmem:[#allocation10 + $0x190] sm:$0xff]  ;;  %v797_v24 = vld [vmem:[#allocation10 + $0x1a8] sm:$0xff] }
 0x23d   :  { %1396 = vmatpush1.bf16.msra.mxu1 %v1395_v31  ;;  %v1427_v31 = vpack.c.bf16 %v758_v28, %v756_v27  ;;  %v796_v28 = vld [vmem:[#allocation10 + $0x1a0] sm:$0xff] }
 0x23e   :  { %1398 = vmatprep.subr.bf16.mxu1 %v1397_v32  ;;  %v1429_v32 = vpack.c.bf16 %v763_v30, %v761_v29  ;;  %v798_v29 = vld [vmem:[#allocation10 + $0x1b0] sm:$0xff] }
 0x23f   :  { %v1467_v30 = vpack.c.bf16 %v798_v29, %v796_v28  ;;  %v907_v28 = vld [vmem:[#allocation11 + $0x50] sm:$0xff]  ;;  %v908_v29 = vld [vmem:[#allocation11 + $0x58] sm:$0xff] }
 0x241   :  { %1400 = vmatpush1.bf16.msra.mxu1 %v1399_v36  ;;  %v1431_v36 = vpack.c.bf16 %v762_v0, %v760_v33 }
 0x242   :  { %1402 = vmatprep.subr.bf16.mxu1 %v1401_v37  ;;  %v1433_v37 = vpack.c.bf16 %v767_v35, %v765_v34 }
 0x245   :  { %1404 = vmatpush1.bf16.msra.mxu1 %v1403_v40  ;;  %v769_v40 = vld [vmem:[#allocation10 + $0xc8] sm:$0xff] }
 0x246   :  { %1406 = vmatprep.subr.bf16.mxu1 %v1405_v59 }
 0x249   :  { %1408 = vmatpush1.bf16.msra.mxu1 %v1407_v62  ;;  %v778_v62 = vld [vmem:[#allocation10 + $0x110] sm:$0xff] }
 0x24a   :  { %1410 = vmatprep.subr.bf16.mxu1 %v1409_v2  ;;  %v1447_v2 = vpack.c.bf16 %v778_v62, %v776_v61  ;;  %v898_v62 = vld [vmem:[#allocation11 + $0x8] sm:$0xff] }
 0x24d   :  { %1412 = vmatpush1.bf16.msra.mxu1 %v1411_v5  ;;  %v782_v5 = vld [vmem:[#allocation10 + $0x130] sm:$0xff] }
 0x24e   :  { %v1451_v8 = vpack.c.bf16 %v782_v5, %v780_v4  ;;  %v899_v4 = vld [vmem:[#allocation11 + $0x10] sm:$0xff]  ;;  %v900_v5 = vld [vmem:[#allocation11 + $0x18] sm:$0xff] }
 0x2e3   :  { %v427_v44 = vpop.f32.mrb[0].mxu1 }
 0x2e4   :  { %v428_v45 = vadd.f32 %v427_v44, %v354_v42  ;;  %v429_v47 = vpop.f32.mrb[1].mxu1  ;;  %v1435_v42 = vpack.c.bf16 %v766_v39, %v764_v38  ;;  %v768_v44 = vld [vmem:[#allocation10 + $0xc0] sm:$0xff] }
 0x2e5   :  { %v430_v48 = vadd.f32 %v429_v47, %v358_v43  ;;  %v1437_v43 = vpack.c.bf16 %v771_v41, %v769_v40  ;;  %v773_v47 = vld [vmem:[#allocation10 + $0xe8] sm:$0xff] }
 0x2e6   :  { %v434_v49 = vmul.f32 0.2, %v428_v45  ;;  %vm432_vm5 = vcmp.gt.f32.partialorder %v428_v45, 0.0  ;;  %v801_v41 = vld [vmem:[#allocation10 + $0x1c8] sm:$0xff] }
 0x2e7   :  { %v435_v50 = vmul.f32 0.2, %v430_v48  ;;  %vm433_vm6 = vcmp.gt.f32.partialorder %v430_v48, 0.0 }
 0x2e8   :  { %v436_v52 = vsel %vm432_vm5, %v428_v45, %v434_v49  ;;  %v770_v45 = vld [vmem:[#allocation10 + $0xd0] sm:$0xff] }
 0x2e9   :  { %v437_v51 = vsel %vm433_vm6, %v430_v48, %v435_v50  ;;  %v775_v48 = vld [vmem:[#allocation10 + $0xf8] sm:$0xff]  ;;  %v1439_v49 = vpack.c.bf16 %v770_v45, %v768_v44  ;;  %v800_v44 = vld [vmem:[#allocation10 + $0x1c0] sm:$0xff]  ;;  %v802_v45 = vld [vmem:[#allocation10 + $0x1d0] sm:$0xff] }
 0x2ea   :  { %578 = vmatprep.mubr.f32.mxu0 %v437_v51  ;;  %v1441_v50 = vpack.c.bf16 %v775_v48, %v773_v47  ;;  %v772_v51 = vld [vmem:[#allocation10 + $0xe0] sm:$0xff]  ;;  %v1471_v47 = vpack.c.bf16 %v802_v45, %v800_v44  ;;  %v805_v48 = vld [vmem:[#allocation10 + $0x1e8] sm:$0xff] }
 0x2eb   :  { %579 = vmatmul.mubr.f32.vlgmr.msra.gmra.mrb[2].mxu0 %v436_v52  ;;  %v774_v52 = vld [vmem:[#allocation10 + $0xf0] sm:$0xff]  ;;  %v909_v44 = vld [vmem:[#allocation11 + $0x60] sm:$0xff]  ;;  %v910_v45 = vld [vmem:[#allocation11 + $0x68] sm:$0xff] }
 0x2ec   :  { %1416 = vmatpush1.bf16.msra.mxu0 %v1415_v13  ;;  %v1443_v59 = vpack.c.bf16 %v774_v52, %v772_v51  ;;  %v791_v13 = vld [vmem:[#allocation10 + $0x178] sm:$0xff]  ;;  %v804_v51 = vld [vmem:[#allocation10 + $0x1e0] sm:$0xff]  ;;  %v806_v52 = vld [vmem:[#allocation10 + $0x1f0] sm:$0xff] }
 0x2ed   :  { %1418 = vmatprep.subr.bf16.mxu0 %v1417_v14  ;;  %v1455_v14 = vpack.c.bf16 %v786_v11, %v784_v10  ;;  %v1457_v15 = vpack.c.bf16 %v791_v13, %v789_v12  ;;  %v1475_v56 = vpack.c.bf16 %v806_v52, %v804_v51  ;;  %v901_v10 = vld [vmem:[#allocation11 + $0x20] sm:$0xff]  ;;  %v902_v11 = vld [vmem:[#allocation11 + $0x28] sm:$0xff]  ;;  %v919_v12 = vld [vmem:[#allocation11 + $0xb0] sm:$0xff] }
 0x2ee   :  { %v920_v13 = vld [vmem:[#allocation11 + $0xb8] sm:$0xff]  ;;  %v911_v51 = vld [vmem:[#allocation11 + $0x70] sm:$0xff] }
 0x2ef   :  { %v912_v52 = vld [vmem:[#allocation11 + $0x78] sm:$0xff] }
 0x2f0   :  { %1420 = vmatpush1.bf16.msra.mxu0 %v1419_v19  ;;  %v795_v19 = vld [vmem:[#allocation10 + $0x198] sm:$0xff] }
 0x2f1   :  { %1422 = vmatprep.subr.bf16.mxu0 %v1421_v20  ;;  %v1459_v20 = vpack.c.bf16 %v790_v17, %v788_v16  ;;  %v1461_v21 = vpack.c.bf16 %v795_v19, %v793_v18  ;;  %v903_v16 = vld [vmem:[#allocation11 + $0x30] sm:$0xff]  ;;  %v904_v17 = vld [vmem:[#allocation11 + $0x38] sm:$0xff]  ;;  %v921_v18 = vld [vmem:[#allocation11 + $0xc0] sm:$0xff] }
 0x2f2   :  { %v922_v19 = vld [vmem:[#allocation11 + $0xc8] sm:$0xff] }
 0x2f4   :  { %1424 = vmatpush1.bf16.msra.mxu0 %v1423_v25  ;;  %v799_v25 = vld [vmem:[#allocation10 + $0x1b8] sm:$0xff] }
 0x2f5   :  { %1426 = vmatprep.subr.bf16.mxu0 %v1425_v26  ;;  %v1463_v26 = vpack.c.bf16 %v794_v23, %v792_v22  ;;  %v1465_v27 = vpack.c.bf16 %v799_v25, %v797_v24  ;;  %v905_v22 = vld [vmem:[#allocation11 + $0x40] sm:$0xff]  ;;  %v906_v23 = vld [vmem:[#allocation11 + $0x48] sm:$0xff]  ;;  %v923_v24 = vld [vmem:[#allocation11 + $0xd0] sm:$0xff] }
 0x2f6   :  { %v924_v25 = vld [vmem:[#allocation11 + $0xd8] sm:$0xff] }
 0x2f8   :  { %1428 = vmatpush1.bf16.msra.mxu0 %v1427_v31  ;;  %v502_v31 = vld [vmem:[%s2026_s6] sm:$0x3] }
 0x2f9   :  { %1430 = vmatprep.subr.bf16.mxu0 %v1429_v32  ;;  %v507_v32 = vrot.slane %v502_v31, %v1966_v55  ;;  %v511_v33 = vrot.slane %v502_v31, %v1972_v57  ;;  %v655_v31 = vld [vmem:[%s2028_s8] sm:$0x3] }
 0x2fc   :  { %1432 = vmatpush1.bf16.msra.mxu0 %v1431_v36 }
 0x2fd   :  { %1434 = vmatprep.subr.bf16.mxu0 %v1433_v37 }
 0x300   :  { %1436 = vmatpush1.bf16.msra.mxu0 %v1435_v42  ;;  %v803_v42 = vld [vmem:[#allocation10 + $0x1d8] sm:$0xff] }
 0x301   :  { %1438 = vmatprep.subr.bf16.mxu0 %v1437_v43  ;;  %v1469_v43 = vpack.c.bf16 %v803_v42, %v801_v41  ;;  %v925_v41 = vld [vmem:[#allocation11 + $0xe0] sm:$0xff]  ;;  %v926_v42 = vld [vmem:[#allocation11 + $0xe8] sm:$0xff] }
 0x304   :  { %1440 = vmatpush1.bf16.msra.mxu0 %v1439_v49  ;;  %v807_v49 = vld [vmem:[#allocation10 + $0x1f8] sm:$0xff] }
 0x305   :  { %1442 = vmatprep.subr.bf16.mxu0 %v1441_v50  ;;  %v1473_v50 = vpack.c.bf16 %v807_v49, %v805_v48  ;;  %v927_v48 = vld [vmem:[#allocation11 + $0xf0] sm:$0xff]  ;;  %v928_v49 = vld [vmem:[#allocation11 + $0xf8] sm:$0xff] }
 0x308   :  { %1444 = vmatpush1.bf16.msra.mxu0 %v1443_v59  ;;  %v914_v59 = vld [vmem:[#allocation11 + $0x88] sm:$0xff] }
 0x309   :  { %1446 = vmatprep.subr.bf16.mxu0 %v1445_v60  ;;  %v897_v60 = vld [vmem:[#allocation11] sm:$0xff]  ;;  %v1477_v61 = vpack.c.bf16 %v914_v59, %v913_v58  ;;  %v1005_v58 = vld [vmem:[#allocation13 + $0x8] sm:$0xff]  ;;  %v1007_v59 = vld [vmem:[#allocation13 + $0x18] sm:$0xff] }
 0x30b   :  { %1478 = vmatprep.subr.bf16.mxu1 %v1477_v61  ;;  %v1006_v61 = vld [vmem:[#allocation13 + $0x10] sm:$0xff] }
 0x30c   :  { %1448 = vmatpush1.bf16.msra.mxu0 %v1447_v2  ;;  %v1479_v2 = vpack.c.bf16 %v898_v62, %v897_v60  ;;  %v1004_v60 = vld [vmem:[#allocation13] sm:$0xff]  ;;  %v1009_v62 = vld [vmem:[#allocation13 + $0x28] sm:$0xff] }
 0x30d   :  { %1450 = vmatprep.subr.bf16.mxu0 %v1449_v3  ;;  %v1481_v3 = vpack.c.bf16 %v916_v1, %v915_v63  ;;  %v1011_v63 = vld [vmem:[#allocation13 + $0x38] sm:$0xff]  ;;  %v1511_v1 = vpack.c.bf16 %v1006_v61, %v1004_v60 }
 0x310   :  { %1452 = vmatpush1.bf16.msra.mxu0 %v1451_v8  ;;  %v1483_v8 = vpack.c.bf16 %v900_v5, %v899_v4  ;;  %v1010_v4 = vld [vmem:[#allocation13 + $0x30] sm:$0xff]  ;;  %v1013_v5 = vld [vmem:[#allocation13 + $0x48] sm:$0xff] }
 0x311   :  { %1454 = vmatprep.subr.bf16.mxu0 %v1453_v9  ;;  %v1485_v9 = vpack.c.bf16 %v918_v7, %v917_v6  ;;  %v1015_v6 = vld [vmem:[#allocation13 + $0x58] sm:$0xff] }
 0x314   :  { %1456 = vmatpush1.bf16.msra.mxu0 %v1455_v14  ;;  %v1487_v14 = vpack.c.bf16 %v902_v11, %v901_v10  ;;  %v1014_v10 = vld [vmem:[#allocation13 + $0x50] sm:$0xff]  ;;  %v1017_v11 = vld [vmem:[#allocation13 + $0x68] sm:$0xff] }
 0x315   :  { %1458 = vmatprep.subr.bf16.mxu0 %v1457_v15  ;;  %v1489_v15 = vpack.c.bf16 %v920_v13, %v919_v12  ;;  %v1019_v12 = vld [vmem:[#allocation13 + $0x78] sm:$0xff] }
 0x318   :  { %1460 = vmatpush1.bf16.msra.mxu0 %v1459_v20  ;;  %v1491_v20 = vpack.c.bf16 %v904_v17, %v903_v16  ;;  %v1018_v16 = vld [vmem:[#allocation13 + $0x70] sm:$0xff]  ;;  %v1021_v17 = vld [vmem:[#allocation13 + $0x88] sm:$0xff] }
 0x319   :  { %1462 = vmatprep.subr.bf16.mxu0 %v1461_v21  ;;  %v1493_v21 = vpack.c.bf16 %v922_v19, %v921_v18  ;;  %v1023_v18 = vld [vmem:[#allocation13 + $0x98] sm:$0xff] }
 0x31c   :  { %1464 = vmatpush1.bf16.msra.mxu0 %v1463_v26  ;;  %v1495_v26 = vpack.c.bf16 %v906_v23, %v905_v22  ;;  %v1022_v22 = vld [vmem:[#allocation13 + $0x90] sm:$0xff]  ;;  %v1025_v23 = vld [vmem:[#allocation13 + $0xa8] sm:$0xff] }
 0x31d   :  { %1466 = vmatprep.subr.bf16.mxu0 %v1465_v27  ;;  %v1497_v27 = vpack.c.bf16 %v924_v25, %v923_v24  ;;  %v1027_v24 = vld [vmem:[#allocation13 + $0xb8] sm:$0xff] }
 0x320   :  { %1468 = vmatpush1.bf16.msra.mxu0 %v1467_v30  ;;  %v1499_v30 = vpack.c.bf16 %v908_v29, %v907_v28  ;;  %v1026_v28 = vld [vmem:[#allocation13 + $0xb0] sm:$0xff] }
 0x321   :  { %1470 = vmatprep.subr.bf16.mxu0 %v1469_v43  ;;  %v1501_v43 = vpack.c.bf16 %v926_v42, %v925_v41  ;;  %v1031_v41 = vld [vmem:[#allocation13 + $0xd8] sm:$0xff] }
 0x324   :  { %1472 = vmatpush1.bf16.msra.mxu0 %v1471_v47  ;;  %v1503_v47 = vpack.c.bf16 %v910_v45, %v909_v44  ;;  %v1030_v44 = vld [vmem:[#allocation13 + $0xd0] sm:$0xff]  ;;  %v1035_v45 = vld [vmem:[#allocation13 + $0xf8] sm:$0xff] }
 0x325   :  { %1474 = vmatprep.subr.bf16.mxu0 %v1473_v50  ;;  %v1505_v50 = vpack.c.bf16 %v928_v49, %v927_v48  ;;  %v1032_v48 = vld [vmem:[#allocation13 + $0xe0] sm:$0xff]  ;;  %v1034_v49 = vld [vmem:[#allocation13 + $0xf0] sm:$0xff] }
 0x328   :  { %1476 = vmatpush1.bf16.msra.mxu0 %v1475_v56  ;;  %v1507_v56 = vpack.c.bf16 %v912_v52, %v911_v51  ;;  %v929_v52 = vld [vmem:[%s2032_s12] sm:$0x1] }
 0x3be   :  { %v580_v0 = vpop.f32.mrb[2].mxu0 }
 0x3bf   :  { %v581_v34 = vadd.f32 %v580_v0, %v507_v32  ;;  %v582_v35 = vpop.f32.mrb[3].mxu0  ;;  %v660_v32 = vrot.slane %v655_v31, %v1966_v55 }
 0x3c0   :  { %v583_v36 = vadd.f32 %v582_v35, %v511_v33  ;;  %v664_v33 = vrot.slane %v655_v31, %v1972_v57 }
 0x3c1   :  { %v587_v37 = vmul.f32 0.2, %v581_v34  ;;  %vm585_vm7 = vcmp.gt.f32.partialorder %v581_v34, 0.0 }
 0x3c2   :  { %v588_v38 = vmul.f32 0.2, %v583_v36  ;;  %vm586_vm8 = vcmp.gt.f32.partialorder %v583_v36, 0.0 }
 0x3c3   :  { %v589_v40 = vsel %vm585_vm7, %v581_v34, %v587_v37 }
 0x3c4   :  { %v590_v39 = vsel %vm586_vm8, %v583_v36, %v588_v38 }
 0x3c5   :  { %731 = vmatprep.mubr.f32.mxu1 %v590_v39 }
 0x3c6   :  { %732 = vmatmul.mubr.f32.vlgmr.msra.gmra.mrb[2].mxu1 %v589_v40 }
 0x3c7   :  { %1480 = vmatpush3.bf16.msra.mxu1 %v1479_v2  ;;  %v1513_v2 = vpack.c.bf16 %v1011_v63, %v1009_v62 }
 0x3c8   :  { %1482 = vmatprep.subr.bf16.mxu1 %v1481_v3  ;;  %v1008_v3 = vld [vmem:[#allocation13 + $0x20] sm:$0xff] }
 0x3c9   :  { %v1515_v7 = vpack.c.bf16 %v1010_v4, %v1008_v3 }
 0x3cb   :  { %1484 = vmatpush3.bf16.msra.mxu1 %v1483_v8  ;;  %v1517_v8 = vpack.c.bf16 %v1015_v6, %v1013_v5 }
 0x3cc   :  { %1486 = vmatprep.subr.bf16.mxu1 %v1485_v9  ;;  %v1012_v9 = vld [vmem:[#allocation13 + $0x40] sm:$0xff] }
 0x3cd   :  { %v1519_v13 = vpack.c.bf16 %v1014_v10, %v1012_v9 }
 0x3cf   :  { %1488 = vmatpush3.bf16.msra.mxu1 %v1487_v14  ;;  %v1521_v14 = vpack.c.bf16 %v1019_v12, %v1017_v11 }
 0x3d0   :  { %1490 = vmatprep.subr.bf16.mxu1 %v1489_v15  ;;  %v1016_v15 = vld [vmem:[#allocation13 + $0x60] sm:$0xff] }
 0x3d1   :  { %v1523_v19 = vpack.c.bf16 %v1018_v16, %v1016_v15 }
 0x3d3   :  { %1492 = vmatpush3.bf16.msra.mxu1 %v1491_v20  ;;  %v1525_v20 = vpack.c.bf16 %v1023_v18, %v1021_v17 }
 0x3d4   :  { %1494 = vmatprep.subr.bf16.mxu1 %v1493_v21  ;;  %v1020_v21 = vld [vmem:[#allocation13 + $0x80] sm:$0xff] }
 0x3d5   :  { %v1527_v25 = vpack.c.bf16 %v1022_v22, %v1020_v21 }
 0x3d7   :  { %1496 = vmatpush3.bf16.msra.mxu1 %v1495_v26  ;;  %v1529_v26 = vpack.c.bf16 %v1027_v24, %v1025_v23 }
 0x3d8   :  { %1498 = vmatprep.subr.bf16.mxu1 %v1497_v27  ;;  %v1024_v27 = vld [vmem:[#allocation13 + $0xa0] sm:$0xff] }
 0x3d9   :  { %v1531_v29 = vpack.c.bf16 %v1026_v28, %v1024_v27 }
 0x3db   :  { %1500 = vmatpush3.bf16.msra.mxu1 %v1499_v30  ;;  %v808_v30 = vld [vmem:[%s2030_s10] sm:$0x3] }
 0x3dc   :  { %1502 = vmatprep.subr.bf16.mxu1 %v1501_v43  ;;  %v813_v31 = vrot.slane %v808_v30, %v1966_v55  ;;  %v1028_v43 = vld [vmem:[#allocation13 + $0xc0] sm:$0xff] }
 0x3dd   :  { %v1535_v55 = vpack.c.bf16 %v1030_v44, %v1028_v43 }
 0x3df   :  { %1504 = vmatpush3.bf16.msra.mxu1 %v1503_v47 }
 0x3e0   :  { %1506 = vmatprep.subr.bf16.mxu1 %v1505_v50  ;;  %v1539_v50 = vpack.c.bf16 %v1034_v49, %v1032_v48 }
 0x3e3   :  { %1508 = vmatpush3.bf16.msra.mxu1 %v1507_v56 }
 0x499   :  { %v733_v0 = vpop.f32.mrb[2].mxu1 }
 0x49a   :  { %v734_v34 = vadd.f32 %v733_v0, %v660_v32  ;;  %v735_v35 = vpop.f32.mrb[3].mxu1  ;;  %v817_v32 = vrot.slane %v808_v30, %v1972_v57  ;;  %v1033_v57 = vld [vmem:[#allocation13 + $0xe8] sm:$0xff] }
 0x49b   :  { %v736_v36 = vadd.f32 %v735_v35, %v664_v33  ;;  %v1537_v47 = vpack.c.bf16 %v1035_v45, %v1033_v57 }
 0x49c   :  { %v740_v37 = vmul.f32 0.2, %v734_v34  ;;  %vm738_vm9 = vcmp.gt.f32.partialorder %v734_v34, 0.0 }
 0x49d   :  { %v741_v38 = vmul.f32 0.2, %v736_v36  ;;  %vm739_vm10 = vcmp.gt.f32.partialorder %v736_v36, 0.0 }
 0x49e   :  { %v742_v40 = vsel %vm738_vm9, %v734_v34, %v740_v37 }
 0x49f   :  { %v743_v39 = vsel %vm739_vm10, %v736_v36, %v741_v38 }
 0x4a0   :  { %884 = vmatprep.mubr.f32.mxu0 %v743_v39 }
 0x4a1   :  { %885 = vmatmul.mubr.f32.vlgmr.msra.gmra.mrb[4].mxu0 %v742_v40  ;;  %v1029_v40 = vld [vmem:[#allocation13 + $0xc8] sm:$0xff] }
 0x4a2   :  { %1100 = vmatprep.mubr.f32.mxu0 %v1756_v46  ;;  %v1509_v46 = vpack.c.bf16 %v1007_v59, %v1005_v58  ;;  %v1533_v42 = vpack.c.bf16 %v1031_v41, %v1029_v40 }
 0x4a4   :  { %1510 = vmatprep.subr.bf16.mxu0 %v1509_v46 }
 0x4a5   :  { %1512 = vmatpush1.bf16.msra.mxu0 %v1511_v1 }
 0x4a6   :  { %1514 = vmatprep.subr.bf16.mxu0 %v1513_v2 }
 0x4a9   :  { %1516 = vmatpush1.bf16.msra.mxu0 %v1515_v7 }
 0x4aa   :  { %1518 = vmatprep.subr.bf16.mxu0 %v1517_v8 }
 0x4ad   :  { %1520 = vmatpush1.bf16.msra.mxu0 %v1519_v13 }
 0x4ae   :  { %1522 = vmatprep.subr.bf16.mxu0 %v1521_v14 }
 0x4b1   :  { %1524 = vmatpush1.bf16.msra.mxu0 %v1523_v19 }
 0x4b2   :  { %1526 = vmatprep.subr.bf16.mxu0 %v1525_v20 }
 0x4b5   :  { %1528 = vmatpush1.bf16.msra.mxu0 %v1527_v25 }
 0x4b6   :  { %1530 = vmatprep.subr.bf16.mxu0 %v1529_v26 }
 0x4b9   :  { %1532 = vmatpush1.bf16.msra.mxu0 %v1531_v29 }
 0x4ba   :  { %1534 = vmatprep.subr.bf16.mxu0 %v1533_v42 }
 0x4bd   :  { %1536 = vmatpush1.bf16.msra.mxu0 %v1535_v55 }
 0x4be   :  { %1538 = vmatprep.subr.bf16.mxu0 %v1537_v47 }
 0x4c1   :  { %1540 = vmatpush1.bf16.msra.mxu0 %v1539_v50 }
 0x574   :  { %v886_v33 = vpop.f32.mrb[4].mxu0 }
 0x575   :  { %v887_v0 = vadd.f32 %v886_v33, %v813_v31  ;;  %v888_v34 = vpop.f32.mrb[5].mxu0 }
 0x576   :  { %v889_v35 = vadd.f32 %v888_v34, %v817_v32 }
 0x577   :  { %v893_v36 = vmul.f32 0.2, %v887_v0  ;;  %vm891_vm11 = vcmp.gt.f32.partialorder %v887_v0, 0.0 }
 0x578   :  { %v894_v37 = vmul.f32 0.2, %v889_v35  ;;  %vm892_vm12 = vcmp.gt.f32.partialorder %v889_v35, 0.0 }
 0x579   :  { %v895_v39 = vsel %vm891_vm11, %v887_v0, %v893_v36 }
 0x57a   :  { %v896_v38 = vsel %vm892_vm12, %v889_v35, %v894_v37 }
 0x57b   :  { %994 = vmatprep.mubr.f32.mxu1 %v896_v38 }
 0x57c   :  { %995 = vmatmul.mubr.f32.vlgmr.msra.gmra.mrb[4].mxu1 %v895_v39 }
 0x64f   :  { %v1186_v51 = vpop.f32.mrb[4].mxu1 }
 0x650   :  { %v1187_v56 = vpop.f32.mrb[5].mxu1 }
 0x651   :  { %v1188_v58 = vadd.f32 %v1187_v56, %v1186_v51 }
 0x653   :  { %v997_v59 = vadd.f32 %v1188_v58, %v929_v52 }
 0x655   :  { %v1001_v60 = vmul.f32 0.2, %v997_v59  ;;  %vm1000_vm13 = vcmp.gt.f32.partialorder %v997_v59, 0.0 }
 0x657   :  { %v1002_v46 = vsel %vm1000_vm13, %v997_v59, %v1001_v60 }
 0x658   :  { %1101 = vmatmul.mubr.f32.vlgmr.msra.gmra.mrb[6].mxu0 %v1002_v46  ;;  %1003 = vst [vmem:[#allocation14] sm:$0x1] %v1002_v46 }
 0x659   :  { %1724 = shalt.err (!%p1721_p4)
}
 0x65a   :  { %s1725_s17 = scalar_lea.hbm %s2035_s15, 16 }
 0x65b   :  { %p1726_p5 = scmp.ne.s32.totalorder %s2035_s15, %s1725_s17  ;;  %p1729_p6 = scmp.lt.u32.totalorder %s1725_s17, %s2035_s15 }
 0x65d   :  { %p1731_p7 = pnand %p1729_p6, %p1726_p5 }
 0x65f   :  { %1734 = shalt.err (!%p1731_p7)
}
 0x660   :  { %1141 = dma.vmem_to_hbm [thread:$0]  %s1139_s25, 16, %s2035_s15, [#allocation4]   ;;  %v1758_v61 = vmov 1966171168   ;;  %v1107_v6 = vld [vmem:[%s2034_s14] sm:$0x3] }
 0x661   :  { %v1112_v62 = vunpack.c.l.s4 %v1758_v61  ;;  %vm1129_vm14 = vcmp.lt.s32.totalorder %v198_v53, 256 }
 0x663   :  { %v1113_v63 = vunpack.c.0.s8 %v1112_v62 }
 0x665   :  { %v1116_v2 = vsub.s32 %v1113_v63, %v1963_v54 }
 0x72b   :  { %v1102_v1 = vpop.f32.mrb[6].mxu0 }
 0x72c   :  { %v1104_v3 = vpop.f32.mrb[7].mxu0 }
 0x72d   :  { %v1110_v4 = vcombine.low %v1102_v1, %v1104_v3 }
 0x72f   :  { %v1117_v5 = vrot.slane %v1110_v4, %v1116_v2 }
 0x731   :  { %v1124_v7 = vrot.slane %v1117_v5, %v1116_v2 }
 0x733   :  { %v1126_v8 = vadd.f32 %v1124_v7, %v1107_v6 }
 0x735   :  { %1131 = vst.msk [vmem:[%s2036_s16] sm:$0x3] %vm1129_vm14, %v1126_v8 }
 0x736   :  { %1743 = dma.done.wait [#allocation4], 16  }
 0x737   :  { %1744 = vsyncadd [#allocation4], 4294967280 }
 0x738   :  { %1149 = vsyncpa [#allocation3], 1 }
 0x739   :  { %1150 = vsyncpa [#allocation6], 1 }
 0x73a   :  { %1151 = vsyncpa [#allocation9], 1 }
 0x73b   :  { %1152 = vsyncpa [#allocation12], 1 }
 0x73c   :  { %1153 = vsyncpa [#allocation4], 1 }

// kernel: sky_model_forward.3
= control target key start
LH: loop header
LB: loop body
LE: loop exit
PB: predicated region body
PF: predicated region fallthrough
CT: control target
= control target key end

     0   :  { %s4228_s25 = smov 0   ;;  %s5761_s0 = inlined_call_operand.vmem [shape: f32[512,4], index: 0, kind: input, shape index: {}]   ;;  %s5762_s1 = inlined_call_operand.vmem [shape: f32[1,256], index: 1, kind: input, shape index: {}]   ;;  %s5763_s2 = inlined_call_operand.vmem [shape: f32[4,256], index: 2, kind: input, shape index: {}]   ;;  %s5764_s3 = inlined_call_operand.vmem [shape: f32[256,256], index: 3, kind: input, shape index: {}]   ;;  %s5765_s4 = inlined_call_operand.vmem [shape: f32[1,256], index: 4, kind: input, shape index: {}]   ;;  %s5766_s5 = inlined_call_operand.vmem [shape: f32[256,256], index: 5, kind: input, shape index: {}]   ;;  %s5767_s6 = inlined_call_operand.vmem [shape: f32[1,256], index: 6, kind: input, shape index: {}]   ;;  %s5768_s7 = inlined_call_operand.vmem [shape: f32[256,256], index: 7, kind: input, shape index: {}]   ;;  %s5769_s8 = inlined_call_operand.vmem [shape: f32[1,256], index: 8, kind: input, shape index: {}]   ;;  %s5770_s9 = inlined_call_operand.vmem [shape: f32[256,256], index: 9, kind: input, shape index: {}]   ;;  %s5771_s10 = inlined_call_operand.vmem [shape: f32[1,256], index: 10, kind: input, shape index: {}]   ;;  %s5772_s11 = inlined_call_operand.vmem [shape: f32[256,3], index: 11, kind: input, shape index: {}]   ;;  %s5773_s12 = inlined_call_operand.vmem [shape: f32[1,3], index: 12, kind: input, shape index: {}]   ;;  %s5774_s13 = inlined_call_operand.vmem [shape: f32[512,3], index: 13, kind: output, shape index: {}]  }
   0x1 LB: > { %s3719_s26 = sadd.s32 4294967295, %s4153_s25   ;;  %p3723_p0 = scmp.ge.s32.totalorder %s4153_s25, 1  ;;  %s4153_s25 = sphi %s4228_s25, %s23_s25  }
   0x2   : > { %p388_p1 = scmp.lt.s32.totalorder %s4153_s25, 3 }
   0x4   : > { %p389_p2 = pnand %p3723_p0, %p388_p1 }
   0x5   : > { %v476_v0 = vld [vmem:[%s5763_s2] sm:$0xff] (!%p389_p2)  ;;  %vm588_vm0 = vcmask (!%p389_p2), 1043456   ;;  %s3724_s29 = sshll.u32 (!%p389_p2), %s3719_s26, 5  ;;  %v4155_v2 = vmov (!%p389_p2), 0.0   ;;  %v1043_v3 = vld [vmem:[%s5764_s3 + $0x8] sm:$0xff] (!%p389_p2)  ;;  %v1045_v4 = vld [vmem:[%s5764_s3 + $0x18] sm:$0xff] (!%p389_p2) }
   0x6   : > { %392 = sbr.rel (%p389_p2) target bundleno = 1453 (0x5ad), region = 72  ;;  %v490_v1 = vcombine.high (!%p389_p2), %v476_v0, %v476_v0  ;;  %657 = vmatprep.mubr.f32.mxu0 (!%p389_p2), %v4155_v2  ;;  %p433_p3 = scmp.lt.s32.totalorder (!%p389_p2), %s3724_s29, 63  ;;  %v1042_v5 = vld [vmem:[%s5764_s3] sm:$0xff] (!%p389_p2)  ;;  %vm491_vm1 = vcmask (!%p389_p2), 31744   ;;  %v3765_v6 = vpack.c.bf16 (!%p389_p2), %v1045_v4, %v1043_v3  ;;  %v1044_v7 = vld [vmem:[%s5764_s3 + $0x10] sm:$0xff] (!%p389_p2)  ;;  %v1047_v8 = vld [vmem:[%s5764_s3 + $0x28] sm:$0xff] (!%p389_p2) }
   0x7   : > { %v1049_v9 = vld [vmem:[%s5764_s3 + $0x38] sm:$0xff] (!%p389_p2)  ;;  %v3767_v10 = vpack.c.bf16 (!%p389_p2), %v1044_v7, %v1042_v5  ;;  %v1046_v12 = vld [vmem:[%s5764_s3 + $0x20] sm:$0xff] (!%p389_p2)  ;;  %v1048_v13 = vld [vmem:[%s5764_s3 + $0x30] sm:$0xff] (!%p389_p2) }
   0x8   : > { %3728 = vmatprep.subr.msk.mxu0 (!%p389_p2), %vm588_vm0, %v490_v1  ;;  %v3769_v11 = vpack.c.bf16 (!%p389_p2), %v1049_v9, %v1047_v8  ;;  %3766 = vmatprep.subr.bf16.mxu1 (!%p389_p2), %v3765_v6  ;;  %v3771_v15 = vpack.c.bf16 (!%p389_p2), %v1048_v13, %v1046_v12  ;;  %v1051_v18 = vld [vmem:[%s5764_s3 + $0x48] sm:$0xff] (!%p389_p2)  ;;  %v1053_v20 = vld [vmem:[%s5764_s3 + $0x58] sm:$0xff] (!%p389_p2)  ;;  %v1050_v22 = vld [vmem:[%s5764_s3 + $0x40] sm:$0xff] (!%p389_p2) }
   0x9   : > { %3729 = vmatpush1.msk.msra.mxu0 (!%p389_p2), %vm588_vm0, %v476_v0  ;;  %3768 = vmatpush1.bf16.msra.mxu1 (!%p389_p2), %v3767_v10  ;;  %v3773_v21 = vpack.c.bf16 (!%p389_p2), %v1053_v20, %v1051_v18  ;;  %v1052_v23 = vld [vmem:[%s5764_s3 + $0x50] sm:$0xff] (!%p389_p2)  ;;  %v1055_v24 = vld [vmem:[%s5764_s3 + $0x68] sm:$0xff] (!%p389_p2)  ;;  %v1057_v26 = vld [vmem:[%s5764_s3 + $0x78] sm:$0xff] (!%p389_p2) }
   0xa   : > { %3770 = vmatprep.subr.bf16.mxu1 (!%p389_p2), %v3769_v11  ;;  %v3775_v25 = vpack.c.bf16 (!%p389_p2), %v1052_v23, %v1050_v22  ;;  %v1054_v27 = vld [vmem:[%s5764_s3 + $0x60] sm:$0xff] (!%p389_p2)  ;;  %v1056_v28 = vld [vmem:[%s5764_s3 + $0x70] sm:$0xff] (!%p389_p2)  ;;  %v3777_v29 = vpack.c.bf16 (!%p389_p2), %v1057_v26, %v1055_v24  ;;  %v1059_v30 = vld [vmem:[%s5764_s3 + $0x88] sm:$0xff] (!%p389_p2) }
   0xb   : > { %v1061_v31 = vld [vmem:[%s5764_s3 + $0x98] sm:$0xff] (!%p389_p2)  ;;  %v3779_v33 = vpack.c.bf16 (!%p389_p2), %v1056_v28, %v1054_v27  ;;  %v1058_v35 = vld [vmem:[%s5764_s3 + $0x80] sm:$0xff] (!%p389_p2)  ;;  %v1060_v36 = vld [vmem:[%s5764_s3 + $0x90] sm:$0xff] (!%p389_p2) }
   0xc   : > { %v3781_v34 = vpack.c.bf16 (!%p389_p2), %v1061_v31, %v1059_v30  ;;  %v1063_v37 = vld [vmem:[%s5764_s3 + $0xa8] sm:$0xff] (!%p389_p2)  ;;  %v1065_v38 = vld [vmem:[%s5764_s3 + $0xb8] sm:$0xff] (!%p389_p2)  ;;  %v3783_v40 = vpack.c.bf16 (!%p389_p2), %v1060_v36, %v1058_v35  ;;  %v1062_v42 = vld [vmem:[%s5764_s3 + $0xa0] sm:$0xff] (!%p389_p2) }
   0xd   : > { %s5776_s29 = smov (!%p433_p3, %s3724_s29), 63  ;;  %3772 = vmatpush1.bf16.msra.mxu1 %v3771_v15  ;;  %v3785_v41 = vpack.c.bf16 %v1065_v38, %v1063_v37  ;;  %v1064_v43 = vld [vmem:[%s5764_s3 + $0xb0] sm:$0xff]  ;;  %v1067_v44 = vld [vmem:[%s5764_s3 + $0xc8] sm:$0xff]  ;;  %v1069_v45 = vld [vmem:[%s5764_s3 + $0xd8] sm:$0xff] }
   0xe   : > { %s3725_s19 = sshll.u32 %s5776_s29, 3  ;;  %3774 = vmatprep.subr.bf16.mxu1 %v3773_v21  ;;  %v3787_v47 = vpack.c.bf16 %v1064_v43, %v1062_v42  ;;  %v3789_v48 = vpack.c.bf16 %v1069_v45, %v1067_v44  ;;  %v1066_v49 = vld [vmem:[%s5764_s3 + $0xc0] sm:$0xff]  ;;  %v1068_v50 = vld [vmem:[%s5764_s3 + $0xd0] sm:$0xff]  ;;  %v1071_v51 = vld [vmem:[%s5764_s3 + $0xe8] sm:$0xff] }
   0xf   : > { %s4266_s30 = scalar_lea.vmem %s5761_s0, %s3725_s19  ;;  %v1073_v52 = vld [vmem:[%s5764_s3 + $0xf8] sm:$0xff]  ;;  %v3791_v54 = vpack.c.bf16 %v1068_v50, %v1066_v49  ;;  %v1070_v56 = vld [vmem:[%s5764_s3 + $0xe0] sm:$0xff]  ;;  %v1072_v57 = vld [vmem:[%s5764_s3 + $0xf0] sm:$0xff]  ;;  %s5661_s20 = scalar_lea.vmem %s5774_s13, %s3725_s19 }
  0x10   : > { %v444_v14 = vld [vmem:[%s4266_s30] sm:$0xff]  ;;  %v445_v16 = vld [vmem:[%s4266_s30 + $0x8] sm:$0xff]  ;;  %v446_v17 = vld [vmem:[%s4266_s30 + $0x10] sm:$0xff]  ;;  %v3793_v55 = vpack.c.bf16 %v1073_v52, %v1071_v51  ;;  %v3795_v61 = vpack.c.bf16 %v1072_v57, %v1070_v56 }
  0x11   : > { %3730 = vmatmul.mubr.msk.f32.vlgmr.msra.gmra.mrb[0].mxu0 %vm491_vm1, %v444_v14  ;;  %v447_v19 = vld [vmem:[%s4266_s30 + $0x18] sm:$0xff]  ;;  %v448_v32 = vld [vmem:[%s4266_s30 + $0x20] sm:$0xff]  ;;  %3776 = vmatpush1.bf16.msra.mxu1 %v3775_v25  ;;  %v449_v39 = vld [vmem:[%s4266_s30 + $0x28] sm:$0xff] }
  0x12   : > { %663 = vmatprep.mubr.f32.mxu0 %v4155_v2  ;;  %3778 = vmatprep.subr.bf16.mxu1 %v3777_v29  ;;  %v450_v46 = vld [vmem:[%s4266_s30 + $0x30] sm:$0xff]  ;;  %v451_v53 = vld [vmem:[%s4266_s30 + $0x38] sm:$0xff]  ;;  %v1075_v58 = vld [vmem:[%s5764_s3 + $0x108] sm:$0xff] }
  0x13   : > { %v1077_v59 = vld [vmem:[%s5764_s3 + $0x118] sm:$0xff]  ;;  %v452_v60 = vld [vmem:[%s4266_s30 + $0x40] sm:$0xff]  ;;  %v1076_v0 = vld [vmem:[%s5764_s3 + $0x110] sm:$0xff] }
  0x14   : > { %v3797_v62 = vpack.c.bf16 %v1077_v59, %v1075_v58  ;;  %v1074_v63 = vld [vmem:[%s5764_s3 + $0x100] sm:$0xff]  ;;  %v1079_v1 = vld [vmem:[%s5764_s3 + $0x128] sm:$0xff]  ;;  %v1081_v3 = vld [vmem:[%s5764_s3 + $0x138] sm:$0xff] }
  0x15   : > { %3731 = vmatmul.mubr.msk.f32.gmra.mrb[2].mxu0 %vm491_vm1, %v445_v16  ;;  %3780 = vmatpush1.bf16.msra.mxu1 %v3779_v33  ;;  %v453_v4 = vld [vmem:[%s4266_s30 + $0x48] sm:$0xff]  ;;  %v3799_v5 = vpack.c.bf16 %v1076_v0, %v1074_v63  ;;  %v3801_v6 = vpack.c.bf16 %v1081_v3, %v1079_v1  ;;  %v1078_v7 = vld [vmem:[%s5764_s3 + $0x120] sm:$0xff]  ;;  %v1080_v8 = vld [vmem:[%s5764_s3 + $0x130] sm:$0xff] }
  0x16   : > { %669 = vmatprep.mubr.f32.mxu0 %v4155_v2  ;;  %3782 = vmatprep.subr.bf16.mxu1 %v3781_v34  ;;  %v1083_v9 = vld [vmem:[%s5764_s3 + $0x148] sm:$0xff]  ;;  %v1085_v10 = vld [vmem:[%s5764_s3 + $0x158] sm:$0xff]  ;;  %v454_v11 = vld [vmem:[%s4266_s30 + $0x50] sm:$0xff]  ;;  %v3803_v12 = vpack.c.bf16 %v1080_v8, %v1078_v7 }
  0x17   : > { %v3805_v13 = vpack.c.bf16 %v1085_v10, %v1083_v9  ;;  %v1082_v14 = vld [vmem:[%s5764_s3 + $0x140] sm:$0xff]  ;;  %v1084_v15 = vld [vmem:[%s5764_s3 + $0x150] sm:$0xff]  ;;  %v1087_v16 = vld [vmem:[%s5764_s3 + $0x168] sm:$0xff] }
  0x18   : > { %v455_v18 = vld [vmem:[%s4266_s30 + $0x58] sm:$0xff]  ;;  %v1086_v21 = vld [vmem:[%s5764_s3 + $0x160] sm:$0xff]  ;;  %v1088_v22 = vld [vmem:[%s5764_s3 + $0x170] sm:$0xff] }
  0x19   : > { %3732 = vmatmul.mubr.msk.f32.gmra.mrb[4].mxu0 %vm491_vm1, %v446_v17  ;;  %3784 = vmatpush1.bf16.msra.mxu1 %v3783_v40  ;;  %v1089_v17 = vld [vmem:[%s5764_s3 + $0x178] sm:$0xff]  ;;  %v1091_v23 = vld [vmem:[%s5764_s3 + $0x188] sm:$0xff]  ;;  %v456_v25 = vld [vmem:[%s4266_s30 + $0x60] sm:$0xff]  ;;  %v3811_v26 = vpack.c.bf16 %v1088_v22, %v1086_v21 }
  0x1a   : > { %675 = vmatprep.mubr.f32.mxu0 %v4155_v2  ;;  %3786 = vmatprep.subr.bf16.mxu1 %v3785_v41  ;;  %v3809_v20 = vpack.c.bf16 %v1089_v17, %v1087_v16  ;;  %v1093_v24 = vld [vmem:[%s5764_s3 + $0x198] sm:$0xff]  ;;  %v1090_v28 = vld [vmem:[%s5764_s3 + $0x180] sm:$0xff]  ;;  %v1092_v29 = vld [vmem:[%s5764_s3 + $0x190] sm:$0xff]  ;;  %v479_v16 = vlaneseq }
  0x1b   : > { %v3813_v27 = vpack.c.bf16 %v1093_v24, %v1091_v23  ;;  %v1095_v30 = vld [vmem:[%s5764_s3 + $0x1a8] sm:$0xff]  ;;  %v1097_v31 = vld [vmem:[%s5764_s3 + $0x1b8] sm:$0xff]  ;;  %v3815_v33 = vpack.c.bf16 %v1092_v29, %v1090_v28  ;;  %v1094_v35 = vld [vmem:[%s5764_s3 + $0x1a0] sm:$0xff] }
  0x1c   : > { %v3817_v34 = vpack.c.bf16 %v1097_v31, %v1095_v30  ;;  %v1096_v36 = vld [vmem:[%s5764_s3 + $0x1b0] sm:$0xff]  ;;  %v460_v40 = vld [vmem:[%s4266_s30 + $0x80] sm:$0xff]  ;;  %v461_v41 = vld [vmem:[%s4266_s30 + $0x88] sm:$0xff] }
  0x1d   : > { %3733 = vmatmul.mubr.msk.f32.gmra.mrb[6].mxu0 %vm491_vm1, %v447_v19  ;;  %3788 = vmatpush1.bf16.msra.mxu1 %v3787_v47  ;;  %v3807_v19 = vpack.c.bf16 %v1084_v15, %v1082_v14  ;;  %v458_v37 = vld [vmem:[%s4266_s30 + $0x70] sm:$0xff]  ;;  %v3819_v38 = vpack.c.bf16 %v1096_v36, %v1094_v35  ;;  %v463_v43 = vld [vmem:[%s4266_s30 + $0x98] sm:$0xff]  ;;  %v464_v44 = vld [vmem:[%s4266_s30 + $0xa0] sm:$0xff] }
  0x1e   : > { %681 = vmatprep.mubr.f32.mxu0 %v4155_v2  ;;  %3790 = vmatprep.subr.bf16.mxu1 %v3789_v48  ;;  %v462_v42 = vld [vmem:[%s4266_s30 + $0x90] sm:$0xff]  ;;  %v1099_v45 = vld [vmem:[%s5764_s3 + $0x1c8] sm:$0xff]  ;;  %v1098_v49 = vld [vmem:[%s5764_s3 + $0x1c0] sm:$0xff] }
  0x1f   : > { %v465_v47 = vld [vmem:[%s4266_s30 + $0xa8] sm:$0xff]  ;;  %v1100_v50 = vld [vmem:[%s5764_s3 + $0x1d0] sm:$0xff]  ;;  %v1102_v56 = vld [vmem:[%s5764_s3 + $0x1e0] sm:$0xff] }
  0x20   : > { %v3823_v51 = vpack.c.bf16 %v1100_v50, %v1098_v49  ;;  %v1103_v52 = vld [vmem:[%s5764_s3 + $0x1e8] sm:$0xff]  ;;  %v1104_v57 = vld [vmem:[%s5764_s3 + $0x1f0] sm:$0xff]  ;;  %v467_v59 = vld [vmem:[%s4266_s30 + $0xb8] sm:$0xff] }
  0x21   : > { %3734 = vmatmul.mubr.msk.f32.gmra.mrb[8].mxu0 %vm491_vm1, %v448_v32  ;;  %3792 = vmatpush1.bf16.msra.mxu1 %v3791_v54  ;;  %v457_v32 = vld [vmem:[%s4266_s30 + $0x68] sm:$0xff]  ;;  %v466_v54 = vld [vmem:[%s4266_s30 + $0xb0] sm:$0xff]  ;;  %v3827_v58 = vpack.c.bf16 %v1104_v57, %v1102_v56  ;;  %v471_v63 = vld [vmem:[%s4266_s30 + $0xd8] sm:$0xff] }
  0x22   : > { %687 = vmatprep.mubr.f32.mxu0 %v4155_v2  ;;  %3794 = vmatprep.subr.bf16.mxu1 %v3793_v55  ;;  %v472_v0 = vld [vmem:[%s4266_s30 + $0xe0] sm:$0xff]  ;;  %v473_v1 = vld [vmem:[%s4266_s30 + $0xe8] sm:$0xff]  ;;  %v474_v3 = vld [vmem:[%s4266_s30 + $0xf0] sm:$0xff] }
  0x23   : > { %v1567_v7 = vld [vmem:[%s5766_s5] sm:$0xff]  ;;  %v1572_v10 = vld [vmem:[%s5766_s5 + $0x28] sm:$0xff]  ;;  %v1573_v14 = vld [vmem:[%s5766_s5 + $0x30] sm:$0xff] }
  0x24   : > { %v1576_v17 = vld [vmem:[%s5766_s5 + $0x48] sm:$0xff]  ;;  %v1577_v22 = vld [vmem:[%s5766_s5 + $0x50] sm:$0xff]  ;;  %v1582_v28 = vld [vmem:[%s5766_s5 + $0x78] sm:$0xff] }
  0x25   : > { %3735 = vmatmul.mubr.msk.f32.gmra.mrb[10].mxu0 %vm491_vm1, %v449_v39  ;;  %3796 = vmatpush1.bf16.msra.mxu1 %v3795_v61  ;;  %v459_v39 = vld [vmem:[%s4266_s30 + $0x78] sm:$0xff]  ;;  %v469_v61 = vld [vmem:[%s4266_s30 + $0xc8] sm:$0xff]  ;;  %v1579_v29 = vld [vmem:[%s5766_s5 + $0x60] sm:$0xff] }
  0x26   : > { %693 = vmatprep.mubr.f32.mxu0 %v4155_v2  ;;  %3798 = vmatprep.subr.bf16.mxu1 %v3797_v62  ;;  %v470_v62 = vld [vmem:[%s4266_s30 + $0xd0] sm:$0xff]  ;;  %v1584_v36 = vld [vmem:[%s5766_s5 + $0x88] sm:$0xff]  ;;  %v1590_v49 = vld [vmem:[%s5766_s5 + $0xb8] sm:$0xff] }
  0x29   : > { %3736 = vmatmul.mubr.msk.f32.gmra.mrb[12].mxu0 %vm491_vm1, %v450_v46  ;;  %3800 = vmatpush1.bf16.msra.mxu1 %v3799_v5  ;;  %v1101_v46 = vld [vmem:[%s5764_s3 + $0x1d8] sm:$0xff]  ;;  %v1568_v5 = vld [vmem:[%s5766_s5 + $0x8] sm:$0xff] }
  0x2a   : > { %699 = vmatprep.mubr.f32.mxu0 %v4155_v2  ;;  %3802 = vmatprep.subr.bf16.mxu1 %v3801_v6  ;;  %v3821_v48 = vpack.c.bf16 %v1101_v46, %v1099_v45  ;;  %v1570_v6 = vld [vmem:[%s5766_s5 + $0x18] sm:$0xff] }
  0x2b   : > { %v3829_v8 = vpack.c.bf16 %v1570_v6, %v1568_v5  ;;  %v1598_v5 = vld [vmem:[%s5766_s5 + $0xf8] sm:$0xff] }
  0x2d   : > { %3737 = vmatmul.mubr.msk.f32.gmra.mrb[14].mxu0 %vm491_vm1, %v451_v53  ;;  %3804 = vmatpush1.bf16.msra.mxu1 %v3803_v12  ;;  %v1105_v53 = vld [vmem:[%s5764_s3 + $0x1f8] sm:$0xff]  ;;  %v1571_v12 = vld [vmem:[%s5766_s5 + $0x20] sm:$0xff] }
  0x2e   : > { %705 = vmatprep.mubr.f32.mxu0 %v4155_v2  ;;  %3806 = vmatprep.subr.bf16.mxu1 %v3805_v13  ;;  %v3825_v55 = vpack.c.bf16 %v1105_v53, %v1103_v52  ;;  %v3835_v15 = vpack.c.bf16 %v1573_v14, %v1571_v12  ;;  %v1587_v53 = vld [vmem:[%s5766_s5 + $0xa0] sm:$0xff]  ;;  %v1597_v14 = vld [vmem:[%s5766_s5 + $0xf0] sm:$0xff] }
  0x2f   : > { %3830 = vmatprep.subr.bf16.mxu0 %v3829_v8 }
  0x31   : > { %3738 = vmatmul.mubr.msk.f32.gmra.mrb[16].mxu0 %vm491_vm1, %v452_v60  ;;  %3808 = vmatpush1.bf16.msra.mxu1 %v3807_v19  ;;  %v468_v60 = vld [vmem:[%s4266_s30 + $0xc0] sm:$0xff] }
  0x32   : > { %711 = vmatprep.mubr.f32.mxu0 %v4155_v2  ;;  %3810 = vmatprep.subr.bf16.mxu1 %v3809_v20  ;;  %v1575_v19 = vld [vmem:[%s5766_s5 + $0x40] sm:$0xff]  ;;  %v480_v20 = vshrl.u32 %v479_v16, 7 }
  0x33   : > { %v3839_v23 = vpack.c.bf16 %v1577_v22, %v1575_v19 }
  0x34   : > { %v4573_v24 = vsub.s32 0, %v480_v20 }
  0x35   : > { %3739 = vmatmul.mubr.msk.f32.gmra.mrb[18].mxu0 %vm491_vm1, %v453_v4  ;;  %3812 = vmatpush1.bf16.msra.mxu1 %v3811_v26  ;;  %v475_v4 = vld [vmem:[%s4266_s30 + $0xf8] sm:$0xff]  ;;  %v4578_v26 = vsub.s32 1, %v480_v20 }
  0x36   : > { %717 = vmatprep.mubr.f32.mxu0 %v4155_v2  ;;  %3814 = vmatprep.subr.bf16.mxu1 %v3813_v27  ;;  %v1580_v27 = vld [vmem:[%s5766_s5 + $0x68] sm:$0xff] }
  0x37   : > { %v3841_v31 = vpack.c.bf16 %v1582_v28, %v1580_v27 }
  0x39   : > { %3740 = vmatmul.mubr.msk.f32.gmra.mrb[20].mxu0 %vm491_vm1, %v454_v11  ;;  %3816 = vmatpush1.bf16.msra.mxu1 %v3815_v33  ;;  %v1574_v11 = vld [vmem:[%s5766_s5 + $0x38] sm:$0xff] }
  0x3a   : > { %723 = vmatprep.mubr.f32.mxu0 %v4155_v2  ;;  %3818 = vmatprep.subr.bf16.mxu1 %v3817_v34  ;;  %v3833_v13 = vpack.c.bf16 %v1574_v11, %v1572_v10 }
  0x3d   : > { %3741 = vmatmul.mubr.msk.f32.gmra.mrb[22].mxu0 %vm491_vm1, %v455_v18  ;;  %3820 = vmatpush1.bf16.msra.mxu1 %v3819_v38  ;;  %v1578_v18 = vld [vmem:[%s5766_s5 + $0x58] sm:$0xff] }
  0x3e   : > { %729 = vmatprep.mubr.f32.mxu0 %v4155_v2  ;;  %3822 = vmatprep.subr.bf16.mxu1 %v3821_v48  ;;  %v3837_v21 = vpack.c.bf16 %v1578_v18, %v1576_v17  ;;  %v1588_v48 = vld [vmem:[%s5766_s5 + $0xa8] sm:$0xff]  ;;  %v1602_v18 = vld [vmem:[%s5766_s5 + $0x118] sm:$0xff] }
  0x3f   : > { %v3849_v52 = vpack.c.bf16 %v1590_v49, %v1588_v48 }
  0x41   : > { %3742 = vmatmul.mubr.msk.f32.gmra.mrb[24].mxu0 %vm491_vm1, %v456_v25  ;;  %3824 = vmatpush1.bf16.msra.mxu1 %v3823_v51  ;;  %v477_v25 = vld [vmem:[%s5762_s1] sm:$0x3] }
  0x42   : > { %735 = vmatprep.mubr.f32.mxu0 %v4155_v2  ;;  %3826 = vmatprep.subr.bf16.mxu1 %v3825_v55  ;;  %v4590_v30 = vrot.slane %v477_v25, %v4573_v24  ;;  %v4596_v33 = vrot.slane %v477_v25, %v4578_v26  ;;  %v1592_v55 = vld [vmem:[%s5766_s5 + $0xc8] sm:$0xff] }
  0x45   : > { %3743 = vmatmul.mubr.msk.f32.gmra.mrb[26].mxu0 %vm491_vm1, %v457_v32  ;;  %3828 = vmatpush1.bf16.msra.mxu1 %v3827_v58  ;;  %v1581_v32 = vld [vmem:[%s5766_s5 + $0x70] sm:$0xff] }
  0x46   : > { %741 = vmatprep.mubr.f32.mxu0 %v4155_v2  ;;  %v3843_v34 = vpack.c.bf16 %v1581_v32, %v1579_v29  ;;  %v1599_v29 = vld [vmem:[%s5766_s5 + $0x100] sm:$0xff]  ;;  %v1604_v32 = vld [vmem:[%s5766_s5 + $0x128] sm:$0xff] }
  0x49   : > { %3744 = vmatmul.mubr.msk.f32.gmra.mrb[28].mxu0 %vm491_vm1, %v458_v37  ;;  %v1586_v37 = vld [vmem:[%s5766_s5 + $0x98] sm:$0xff] }
  0x4a   : > { %747 = vmatprep.mubr.f32.mxu0 %v4155_v2 }
  0x4d   : > { %3745 = vmatmul.mubr.msk.f32.gmra.mrb[30].mxu0 %vm491_vm1, %v459_v39 }
  0x4e   : > { %753 = vmatprep.mubr.f32.mxu0 %v4155_v2 }
  0x51   : > { %3746 = vmatmul.mubr.msk.f32.gmra.mrb[32].mxu0 %vm491_vm1, %v460_v40  ;;  %v3845_v40 = vpack.c.bf16 %v1586_v37, %v1584_v36  ;;  %v1606_v36 = vld [vmem:[%s5766_s5 + $0x138] sm:$0xff] }
  0x52   : > { %759 = vmatprep.mubr.f32.mxu0 %v4155_v2 }
  0x55   : > { %3747 = vmatmul.mubr.msk.f32.gmra.mrb[34].mxu0 %vm491_vm1, %v461_v41 }
  0x56   : > { %765 = vmatprep.mubr.f32.mxu0 %v4155_v2 }
  0x59   : > { %3748 = vmatmul.mubr.msk.f32.gmra.mrb[36].mxu0 %vm491_vm1, %v462_v42 }
  0x5a   : > { %771 = vmatprep.mubr.f32.mxu0 %v4155_v2 }
  0x5d   : > { %3749 = vmatmul.mubr.msk.f32.gmra.mrb[38].mxu0 %vm491_vm1, %v463_v43  ;;  %v1583_v43 = vld [vmem:[%s5766_s5 + $0x80] sm:$0xff] }
  0x5e   : > { %777 = vmatprep.mubr.f32.mxu0 %v4155_v2 }
  0x61   : > { %3750 = vmatmul.mubr.msk.f32.gmra.mrb[40].mxu0 %vm491_vm1, %v464_v44  ;;  %v1585_v44 = vld [vmem:[%s5766_s5 + $0x90] sm:$0xff] }
  0x62   : > { %783 = vmatprep.mubr.f32.mxu0 %v4155_v2 }
  0x65   : > { %3751 = vmatmul.mubr.msk.f32.gmra.mrb[42].mxu0 %vm491_vm1, %v465_v47  ;;  %v3847_v47 = vpack.c.bf16 %v1585_v44, %v1583_v43  ;;  %v3865_v44 = vpack.c.bf16 %v1606_v36, %v1604_v32 }
  0x66   : > { %789 = vmatprep.mubr.f32.mxu0 %v4155_v2 }
  0x69   : > { %3752 = vmatmul.mubr.msk.f32.gmra.mrb[44].mxu0 %vm491_vm1, %v466_v54  ;;  %v1589_v54 = vld [vmem:[%s5766_s5 + $0xb0] sm:$0xff] }
  0x6a   : > { %795 = vmatprep.mubr.f32.mxu0 %v4155_v2  ;;  %v3851_v58 = vpack.c.bf16 %v1589_v54, %v1587_v53 }
  0x6d   : > { %3753 = vmatmul.mubr.msk.f32.gmra.mrb[46].mxu0 %vm491_vm1, %v467_v59  ;;  %v1594_v59 = vld [vmem:[%s5766_s5 + $0xd8] sm:$0xff] }
  0x6e   : > { %801 = vmatprep.mubr.f32.mxu0 %v4155_v2 }
  0x71   : > { %3754 = vmatmul.mubr.msk.f32.gmra.mrb[48].mxu0 %vm491_vm1, %v468_v60 }
  0x72   : > { %807 = vmatprep.mubr.f32.mxu0 %v4155_v2 }
  0x75   : > { %3755 = vmatmul.mubr.msk.f32.gmra.mrb[50].mxu0 %vm491_vm1, %v469_v61 }
  0x76   : > { %813 = vmatprep.mubr.f32.mxu0 %v4155_v2 }
  0x79   : > { %3756 = vmatmul.mubr.msk.f32.gmra.mrb[52].mxu0 %vm491_vm1, %v470_v62  ;;  %v3853_v62 = vpack.c.bf16 %v1594_v59, %v1592_v55  ;;  %v1607_v59 = vld [vmem:[%s5766_s5 + $0x140] sm:$0xff] }
  0x7a   : > { %819 = vmatprep.mubr.f32.mxu0 %v4155_v2 }
  0x7d   : > { %3757 = vmatmul.mubr.msk.f32.gmra.mrb[54].mxu0 %vm491_vm1, %v471_v63  ;;  %v1591_v63 = vld [vmem:[%s5766_s5 + $0xc0] sm:$0xff] }
  0x7e   : > { %825 = vmatprep.mubr.f32.mxu0 %v4155_v2 }
  0x81   : > { %3758 = vmatmul.mubr.msk.f32.gmra.mrb[56].mxu0 %vm491_vm1, %v472_v0  ;;  %v1593_v0 = vld [vmem:[%s5766_s5 + $0xd0] sm:$0xff] }
  0x82   : > { %831 = vmatprep.mubr.f32.mxu0 %v4155_v2 }
  0x85   : > { %3759 = vmatmul.mubr.msk.f32.gmra.mrb[58].mxu0 %vm491_vm1, %v473_v1 }
  0x86   : > { %837 = vmatprep.mubr.f32.mxu0 %v4155_v2 }
  0x89   : > { %3760 = vmatmul.mubr.msk.f32.gmra.mrb[60].mxu0 %vm491_vm1, %v474_v3 }
  0x8a   : > { %843 = vmatprep.mubr.f32.mxu0 %v4155_v2  ;;  %v1569_v2 = vld [vmem:[%s5766_s5 + $0x10] sm:$0xff] }
  0x8b   : > { %v3831_v9 = vpack.c.bf16 %v1569_v2, %v1567_v7 }
  0x8d   : > { %3761 = vmatmul.mubr.msk.f32.gmra.mrb[62].mxu0 %vm491_vm1, %v475_v4  ;;  %v1596_v4 = vld [vmem:[%s5766_s5 + $0xe8] sm:$0xff] }
  0x8e   : > { %3832 = vmatpush1.bf16.msra.mxu0 %v3831_v9  ;;  %v3855_v9 = vpack.c.bf16 %v1593_v0, %v1591_v63  ;;  %v3857_v12 = vpack.c.bf16 %v1598_v5, %v1596_v4  ;;  %v1614_v0 = vld [vmem:[%s5766_s5 + $0x178] sm:$0xff] }
  0x8f   : > { %3834 = vmatprep.subr.bf16.mxu0 %v3833_v13  ;;  %v1595_v13 = vld [vmem:[%s5766_s5 + $0xe0] sm:$0xff] }
  0x92   : > { %3836 = vmatpush1.bf16.msra.mxu0 %v3835_v15  ;;  %v1600_v15 = vld [vmem:[%s5766_s5 + $0x108] sm:$0xff] }
  0x93   : > { %3838 = vmatprep.subr.bf16.mxu0 %v3837_v21  ;;  %v3861_v28 = vpack.c.bf16 %v1602_v18, %v1600_v15 }
  0x96   : > { %3840 = vmatpush1.bf16.msra.mxu0 %v3839_v23  ;;  %v3859_v23 = vpack.c.bf16 %v1597_v14, %v1595_v13  ;;  %v1618_v14 = vld [vmem:[%s5766_s5 + $0x198] sm:$0xff] }
  0x97   : > { %3842 = vmatprep.subr.bf16.mxu0 %v3841_v31  ;;  %v1601_v31 = vld [vmem:[%s5766_s5 + $0x110] sm:$0xff] }
  0x9a   : > { %3844 = vmatpush1.bf16.msra.mxu0 %v3843_v34 }
  0x9b   : > { %3846 = vmatprep.subr.bf16.mxu0 %v3845_v40 }
  0x9e   : > { %3848 = vmatpush1.bf16.msra.mxu0 %v3847_v47  ;;  %v1608_v47 = vld [vmem:[%s5766_s5 + $0x148] sm:$0xff] }
  0x9f   : > { %3850 = vmatprep.subr.bf16.mxu0 %v3849_v52 }
  0xa2   : > { %3852 = vmatpush1.bf16.msra.mxu0 %v3851_v58 }
  0xa3   : > { %3854 = vmatprep.subr.bf16.mxu0 %v3853_v62 }
  0xa6   : > { %3856 = vmatpush1.bf16.msra.mxu0 %v3855_v9  ;;  %v1611_v9 = vld [vmem:[%s5766_s5 + $0x160] sm:$0xff] }
  0xa7   : > { %3858 = vmatprep.subr.bf16.mxu0 %v3857_v12 }
  0xaa   : > { %3860 = vmatpush1.bf16.msra.mxu0 %v3859_v23  ;;  %v1615_v23 = vld [vmem:[%s5766_s5 + $0x180] sm:$0xff] }
  0xab   : > { %3862 = vmatprep.subr.bf16.mxu0 %v3861_v28 }
  0xe4   : > { %v659_v35 = vpop.f32.mrb[0].mxu0 }
  0xe5   : > { %v660_v38 = vadd.f32 %v659_v35, %v4590_v30  ;;  %v661_v39 = vpop.f32.mrb[1].mxu0 }
  0xe6   : > { %v662_v41 = vadd.f32 %v661_v39, %v4596_v33 }
  0xe7   : > { %v914_v42 = vmul.f32 0.2, %v660_v38  ;;  %vm850_vm2 = vcmp.gt.f32.partialorder %v660_v38, 0.0 }
  0xe8   : > { %v665_v45 = vpop.f32.mrb[2].mxu0  ;;  %vm851_vm3 = vcmp.gt.f32.partialorder %v662_v41, 0.0  ;;  %v915_v46 = vmul.f32 0.2, %v662_v41 }
  0xe9   : > { %v666_v50 = vadd.f32 %v665_v45, %v4590_v30  ;;  %v667_v51 = vpop.f32.mrb[3].mxu0  ;;  %v978_v61 = vsel %vm850_vm2, %v660_v38, %v914_v42  ;;  %v1603_v45 = vld [vmem:[%s5766_s5 + $0x120] sm:$0xff] }
  0xea   : > { %v668_v56 = vadd.f32 %v667_v51, %v4596_v33  ;;  %v979_v57 = vsel %vm851_vm3, %v662_v41, %v915_v46  ;;  %v3863_v41 = vpack.c.bf16 %v1601_v31, %v1599_v29  ;;  %v1605_v46 = vld [vmem:[%s5766_s5 + $0x130] sm:$0xff]  ;;  %v1622_v31 = vld [vmem:[%s5766_s5 + $0x1b8] sm:$0xff] }
  0xeb   : > { %v916_v60 = vmul.f32 0.2, %v666_v50  ;;  %1182 = vmatprep.mubr.f32.mxu1 %v979_v57  ;;  %vm852_vm4 = vcmp.gt.f32.partialorder %v666_v50, 0.0  ;;  %v3867_v55 = vpack.c.bf16 %v1605_v46, %v1603_v45  ;;  %v1626_v46 = vld [vmem:[%s5766_s5 + $0x1d8] sm:$0xff] }
  0xec   : > { %v917_v1 = vmul.f32 0.2, %v668_v56  ;;  %v671_v3 = vpop.f32.mrb[4].mxu0  ;;  %1183 = vmatmul.mubr.f32.vlgmr.msra.gmra.mrb[0].mxu1 %v978_v61  ;;  %vm853_vm5 = vcmp.gt.f32.partialorder %v668_v56, 0.0  ;;  %3864 = vmatpush1.bf16.msra.mxu0 %v3863_v41  ;;  %v1612_v61 = vld [vmem:[%s5766_s5 + $0x168] sm:$0xff]  ;;  %v1619_v41 = vld [vmem:[%s5766_s5 + $0x1a0] sm:$0xff] }
  0xed   : > { %v672_v6 = vadd.f32 %v671_v3, %v4590_v30  ;;  %v673_v7 = vpop.f32.mrb[5].mxu0  ;;  %v980_v11 = vsel %vm852_vm4, %v666_v50, %v916_v60  ;;  %v1610_v50 = vld [vmem:[%s5766_s5 + $0x158] sm:$0xff]  ;;  %3866 = vmatprep.subr.bf16.mxu0 %v3865_v44  ;;  %v1609_v60 = vld [vmem:[%s5766_s5 + $0x150] sm:$0xff] }
  0xee   : > { %v674_v8 = vadd.f32 %v673_v7, %v4596_v33  ;;  %v981_v2 = vsel %vm853_vm5, %v668_v56, %v917_v1  ;;  %v3869_v58 = vpack.c.bf16 %v1610_v50, %v1608_v47 }
  0xef   : > { %v918_v10 = vmul.f32 0.2, %v672_v6  ;;  %1188 = vmatprep.mubr.f32.mxu1 %v981_v2  ;;  %vm854_vm7 = vcmp.gt.f32.partialorder %v672_v6, 0.0  ;;  %v3873_v2 = vpack.c.bf16 %v1614_v0, %v1612_v61 }
  0xf0   : > { %v919_v16 = vmul.f32 0.2, %v674_v8  ;;  %v677_v17 = vpop.f32.mrb[6].mxu0  ;;  %1189 = vmatmul.mubr.f32.gmra.mrb[2].mxu1 %v980_v11  ;;  %vm855_vm6 = vcmp.gt.f32.partialorder %v674_v8, 0.0  ;;  %3868 = vmatpush1.bf16.msra.mxu0 %v3867_v55  ;;  %v1616_v11 = vld [vmem:[%s5766_s5 + $0x188] sm:$0xff]  ;;  %v1623_v55 = vld [vmem:[%s5766_s5 + $0x1c0] sm:$0xff] }
  0xf1   : > { %v678_v19 = vadd.f32 %v677_v17, %v4590_v30  ;;  %v679_v20 = vpop.f32.mrb[7].mxu0  ;;  %v982_v27 = vsel %vm854_vm7, %v672_v6, %v918_v10  ;;  %v3871_v6 = vpack.c.bf16 %v1609_v60, %v1607_v59  ;;  %3870 = vmatprep.subr.bf16.mxu0 %v3869_v58  ;;  %v1613_v10 = vld [vmem:[%s5766_s5 + $0x170] sm:$0xff]  ;;  %v1630_v60 = vld [vmem:[%s5766_s5 + $0x1f8] sm:$0xff] }
  0xf2   : > { %v680_v21 = vadd.f32 %v679_v20, %v4596_v33  ;;  %v983_v22 = vsel %vm855_vm6, %v674_v8, %v919_v16 }
  0xf3   : > { %v920_v25 = vmul.f32 0.2, %v678_v19  ;;  %1194 = vmatprep.mubr.f32.mxu1 %v983_v22  ;;  %vm856_vm9 = vcmp.gt.f32.partialorder %v678_v19, 0.0  ;;  %v3877_v22 = vpack.c.bf16 %v1618_v14, %v1616_v11 }
  0xf4   : > { %v921_v34 = vmul.f32 0.2, %v680_v21  ;;  %v683_v35 = vpop.f32.mrb[8].mxu0  ;;  %1195 = vmatmul.mubr.f32.gmra.mrb[4].mxu1 %v982_v27  ;;  %vm857_vm8 = vcmp.gt.f32.partialorder %v680_v21, 0.0  ;;  %3872 = vmatpush1.bf16.msra.mxu0 %v3871_v6  ;;  %v1620_v27 = vld [vmem:[%s5766_s5 + $0x1a8] sm:$0xff] }
  0xf5   : > { %v684_v37 = vadd.f32 %v683_v35, %v4590_v30  ;;  %v685_v38 = vpop.f32.mrb[9].mxu0  ;;  %v984_v43 = vsel %vm856_vm9, %v678_v19, %v920_v25  ;;  %v3875_v19 = vpack.c.bf16 %v1613_v10, %v1611_v9  ;;  %3874 = vmatprep.subr.bf16.mxu0 %v3873_v2  ;;  %v1617_v25 = vld [vmem:[%s5766_s5 + $0x190] sm:$0xff] }
  0xf6   : > { %v686_v39 = vadd.f32 %v685_v38, %v4596_v33  ;;  %v985_v40 = vsel %vm857_vm8, %v680_v21, %v921_v34 }
  0xf7   : > { %v922_v42 = vmul.f32 0.2, %v684_v37  ;;  %1200 = vmatprep.mubr.f32.mxu1 %v985_v40  ;;  %vm858_vm11 = vcmp.gt.f32.partialorder %v684_v37, 0.0  ;;  %v3881_v40 = vpack.c.bf16 %v1622_v31, %v1620_v27 }
  0xf8   : > { %v923_v48 = vmul.f32 0.2, %v686_v39  ;;  %v689_v49 = vpop.f32.mrb[10].mxu0  ;;  %1201 = vmatmul.mubr.f32.gmra.mrb[6].mxu1 %v984_v43  ;;  %vm859_vm10 = vcmp.gt.f32.partialorder %v686_v39, 0.0  ;;  %3876 = vmatpush1.bf16.msra.mxu0 %v3875_v19  ;;  %v1624_v43 = vld [vmem:[%s5766_s5 + $0x1c8] sm:$0xff] }
  0xf9   : > { %v690_v51 = vadd.f32 %v689_v49, %v4590_v30  ;;  %v691_v52 = vpop.f32.mrb[11].mxu0  ;;  %v986_v57 = vsel %vm858_vm11, %v684_v37, %v922_v42  ;;  %v3879_v37 = vpack.c.bf16 %v1617_v25, %v1615_v23  ;;  %3878 = vmatprep.subr.bf16.mxu0 %v3877_v22  ;;  %v1621_v42 = vld [vmem:[%s5766_s5 + $0x1b0] sm:$0xff] }
  0xfa   : > { %v692_v53 = vadd.f32 %v691_v52, %v4596_v33  ;;  %v987_v54 = vsel %vm859_vm10, %v686_v39, %v923_v48 }
  0xfb   : > { %v924_v56 = vmul.f32 0.2, %v690_v51  ;;  %1206 = vmatprep.mubr.f32.mxu1 %v987_v54  ;;  %vm860_vm13 = vcmp.gt.f32.partialorder %v690_v51, 0.0  ;;  %v3885_v54 = vpack.c.bf16 %v1626_v46, %v1624_v43 }
  0xfc   : > { %v925_v62 = vmul.f32 0.2, %v692_v53  ;;  %v695_v63 = vpop.f32.mrb[12].mxu0  ;;  %1207 = vmatmul.mubr.f32.gmra.mrb[8].mxu1 %v986_v57  ;;  %vm861_vm12 = vcmp.gt.f32.partialorder %v692_v53, 0.0  ;;  %3880 = vmatpush1.bf16.msra.mxu0 %v3879_v37  ;;  %v1628_v57 = vld [vmem:[%s5766_s5 + $0x1e8] sm:$0xff] }
  0xfd   : > { %v696_v1 = vadd.f32 %v695_v63, %v4590_v30  ;;  %v697_v3 = vpop.f32.mrb[13].mxu0  ;;  %v988_v8 = vsel %vm860_vm13, %v690_v51, %v924_v56  ;;  %v3883_v51 = vpack.c.bf16 %v1621_v42, %v1619_v41  ;;  %3882 = vmatprep.subr.bf16.mxu0 %v3881_v40  ;;  %v1625_v56 = vld [vmem:[%s5766_s5 + $0x1d0] sm:$0xff] }
  0xfe   : > { %v698_v4 = vadd.f32 %v697_v3, %v4596_v33  ;;  %v989_v5 = vsel %vm861_vm12, %v692_v53, %v925_v62 }
  0xff   : > { %v926_v7 = vmul.f32 0.2, %v696_v1  ;;  %1212 = vmatprep.mubr.f32.mxu1 %v989_v5  ;;  %vm862_vm15 = vcmp.gt.f32.partialorder %v696_v1, 0.0  ;;  %v3889_v5 = vpack.c.bf16 %v1630_v60, %v1628_v57 }
 0x100   : > { %v927_v12 = vmul.f32 0.2, %v698_v4  ;;  %v701_v13 = vpop.f32.mrb[14].mxu0  ;;  %1213 = vmatmul.mubr.f32.gmra.mrb[10].mxu1 %v988_v8  ;;  %vm863_vm14 = vcmp.gt.f32.partialorder %v698_v4, 0.0  ;;  %3884 = vmatpush1.bf16.msra.mxu0 %v3883_v51 }
 0x101   : > { %v702_v15 = vadd.f32 %v701_v13, %v4590_v30  ;;  %v703_v16 = vpop.f32.mrb[15].mxu0  ;;  %v990_v21 = vsel %vm862_vm15, %v696_v1, %v926_v7  ;;  %v3887_v1 = vpack.c.bf16 %v1625_v56, %v1623_v55  ;;  %3886 = vmatprep.subr.bf16.mxu0 %v3885_v54 }
 0x102   : > { %v704_v17 = vadd.f32 %v703_v16, %v4596_v33  ;;  %v991_v18 = vsel %vm863_vm14, %v698_v4, %v927_v12 }
 0x103   : > { %v928_v20 = vmul.f32 0.2, %v702_v15  ;;  %1218 = vmatprep.mubr.f32.mxu1 %v991_v18  ;;  %vm864_vm1 = vcmp.gt.f32.partialorder %v702_v15, 0.0 }
 0x104   : > { %v929_v28 = vmul.f32 0.2, %v704_v17  ;;  %v707_v29 = vpop.f32.mrb[16].mxu0  ;;  %1219 = vmatmul.mubr.f32.gmra.mrb[12].mxu1 %v990_v21  ;;  %vm865_vm0 = vcmp.gt.f32.partialorder %v704_v17, 0.0  ;;  %3888 = vmatpush1.bf16.msra.mxu0 %v3887_v1 }
 0x105   : > { %v708_v32 = vadd.f32 %v707_v29, %v4590_v30  ;;  %v709_v34 = vpop.f32.mrb[17].mxu0  ;;  %v992_v39 = vsel %vm864_vm1, %v702_v15, %v928_v20  ;;  %3890 = vmatprep.subr.bf16.mxu0 %v3889_v5 }
 0x106   : > { %v710_v35 = vadd.f32 %v709_v34, %v4596_v33  ;;  %v993_v36 = vsel %vm865_vm0, %v704_v17, %v929_v28 }
 0x107   : > { %v930_v38 = vmul.f32 0.2, %v708_v32  ;;  %1224 = vmatprep.mubr.f32.mxu1 %v993_v36  ;;  %vm866_vm3 = vcmp.gt.f32.partialorder %v708_v32, 0.0 }
 0x108   : > { %v931_v44 = vmul.f32 0.2, %v710_v35  ;;  %v713_v45 = vpop.f32.mrb[18].mxu0  ;;  %1225 = vmatmul.mubr.f32.gmra.mrb[14].mxu1 %v992_v39  ;;  %vm867_vm2 = vcmp.gt.f32.partialorder %v710_v35, 0.0 }
 0x109   : > { %v714_v47 = vadd.f32 %v713_v45, %v4590_v30  ;;  %v715_v48 = vpop.f32.mrb[19].mxu0  ;;  %v994_v53 = vsel %vm866_vm3, %v708_v32, %v930_v38 }
 0x10a   : > { %v716_v49 = vadd.f32 %v715_v48, %v4596_v33  ;;  %v995_v50 = vsel %vm867_vm2, %v710_v35, %v931_v44 }
 0x10b   : > { %v932_v52 = vmul.f32 0.2, %v714_v47  ;;  %1230 = vmatprep.mubr.f32.mxu1 %v995_v50  ;;  %vm868_vm5 = vcmp.gt.f32.partialorder %v714_v47, 0.0 }
 0x10c   : > { %v933_v58 = vmul.f32 0.2, %v716_v49  ;;  %v719_v59 = vpop.f32.mrb[20].mxu0  ;;  %1231 = vmatmul.mubr.f32.gmra.mrb[16].mxu1 %v994_v53  ;;  %vm869_vm4 = vcmp.gt.f32.partialorder %v716_v49, 0.0 }
 0x10d   : > { %v720_v61 = vadd.f32 %v719_v59, %v4590_v30  ;;  %v721_v62 = vpop.f32.mrb[21].mxu0  ;;  %v996_v4 = vsel %vm868_vm5, %v714_v47, %v932_v52 }
 0x10e   : > { %v722_v63 = vadd.f32 %v721_v62, %v4596_v33  ;;  %v997_v0 = vsel %vm869_vm4, %v716_v49, %v933_v58 }
 0x10f   : > { %v934_v3 = vmul.f32 0.2, %v720_v61  ;;  %1236 = vmatprep.mubr.f32.mxu1 %v997_v0  ;;  %vm870_vm7 = vcmp.gt.f32.partialorder %v720_v61, 0.0 }
 0x110   : > { %v935_v6 = vmul.f32 0.2, %v722_v63  ;;  %v725_v7 = vpop.f32.mrb[22].mxu0  ;;  %1237 = vmatmul.mubr.f32.gmra.mrb[18].mxu1 %v996_v4  ;;  %vm871_vm6 = vcmp.gt.f32.partialorder %v722_v63, 0.0 }
 0x111   : > { %v726_v8 = vadd.f32 %v725_v7, %v4590_v30  ;;  %v727_v2 = vpop.f32.mrb[23].mxu0  ;;  %v998_v12 = vsel %vm870_vm7, %v720_v61, %v934_v3 }
 0x112   : > { %v728_v9 = vadd.f32 %v727_v2, %v4596_v33  ;;  %v999_v10 = vsel %vm871_vm6, %v722_v63, %v935_v6 }
 0x113   : > { %v936_v11 = vmul.f32 0.2, %v726_v8  ;;  %1242 = vmatprep.mubr.f32.mxu1 %v999_v10  ;;  %vm872_vm9 = vcmp.gt.f32.partialorder %v726_v8, 0.0 }
 0x114   : > { %v937_v13 = vmul.f32 0.2, %v728_v9  ;;  %v731_v14 = vpop.f32.mrb[24].mxu0  ;;  %1243 = vmatmul.mubr.f32.gmra.mrb[20].mxu1 %v998_v12  ;;  %vm873_vm8 = vcmp.gt.f32.partialorder %v728_v9, 0.0 }
 0x115   : > { %v732_v15 = vadd.f32 %v731_v14, %v4590_v30  ;;  %v733_v16 = vpop.f32.mrb[25].mxu0  ;;  %v1000_v20 = vsel %vm872_vm9, %v726_v8, %v936_v11 }
 0x116   : > { %v734_v17 = vadd.f32 %v733_v16, %v4596_v33  ;;  %v1001_v18 = vsel %vm873_vm8, %v728_v9, %v937_v13 }
 0x117   : > { %v938_v19 = vmul.f32 0.2, %v732_v15  ;;  %1248 = vmatprep.mubr.f32.mxu1 %v1001_v18  ;;  %vm874_vm11 = vcmp.gt.f32.partialorder %v732_v15, 0.0 }
 0x118   : > { %v939_v21 = vmul.f32 0.2, %v734_v17  ;;  %v737_v22 = vpop.f32.mrb[26].mxu0  ;;  %1249 = vmatmul.mubr.f32.gmra.mrb[22].mxu1 %v1000_v20  ;;  %vm875_vm10 = vcmp.gt.f32.partialorder %v734_v17, 0.0 }
 0x119   : > { %v738_v23 = vadd.f32 %v737_v22, %v4590_v30  ;;  %v739_v25 = vpop.f32.mrb[27].mxu0  ;;  %v1002_v31 = vsel %vm874_vm11, %v732_v15, %v938_v19 }
 0x11a   : > { %v740_v27 = vadd.f32 %v739_v25, %v4596_v33  ;;  %v1003_v28 = vsel %vm875_vm10, %v734_v17, %v939_v21 }
 0x11b   : > { %v940_v29 = vmul.f32 0.2, %v738_v23  ;;  %1254 = vmatprep.mubr.f32.mxu1 %v1003_v28  ;;  %vm876_vm13 = vcmp.gt.f32.partialorder %v738_v23, 0.0 }
 0x11c   : > { %v941_v32 = vmul.f32 0.2, %v740_v27  ;;  %v743_v34 = vpop.f32.mrb[28].mxu0  ;;  %1255 = vmatmul.mubr.f32.gmra.mrb[24].mxu1 %v1002_v31  ;;  %vm877_vm12 = vcmp.gt.f32.partialorder %v740_v27, 0.0 }
 0x11d   : > { %v744_v35 = vadd.f32 %v743_v34, %v4590_v30  ;;  %v745_v36 = vpop.f32.mrb[29].mxu0  ;;  %v1004_v40 = vsel %vm876_vm13, %v738_v23, %v940_v29 }
 0x11e   : > { %v746_v37 = vadd.f32 %v745_v36, %v4596_v33  ;;  %v1005_v38 = vsel %vm877_vm12, %v740_v27, %v941_v32 }
 0x11f   : > { %v942_v39 = vmul.f32 0.2, %v744_v35  ;;  %1260 = vmatprep.mubr.f32.mxu1 %v1005_v38  ;;  %vm878_vm15 = vcmp.gt.f32.partialorder %v744_v35, 0.0 }
 0x120   : > { %v943_v41 = vmul.f32 0.2, %v746_v37  ;;  %v749_v42 = vpop.f32.mrb[30].mxu0  ;;  %1261 = vmatmul.mubr.f32.gmra.mrb[26].mxu1 %v1004_v40  ;;  %vm879_vm14 = vcmp.gt.f32.partialorder %v746_v37, 0.0 }
 0x121   : > { %v750_v43 = vadd.f32 %v749_v42, %v4590_v30  ;;  %v751_v44 = vpop.f32.mrb[31].mxu0  ;;  %v1006_v48 = vsel %vm878_vm15, %v744_v35, %v942_v39 }
 0x122   : > { %v752_v45 = vadd.f32 %v751_v44, %v4596_v33  ;;  %v1007_v46 = vsel %vm879_vm14, %v746_v37, %v943_v41 }
 0x123   : > { %v944_v47 = vmul.f32 0.2, %v750_v43  ;;  %1266 = vmatprep.mubr.f32.mxu1 %v1007_v46  ;;  %vm880_vm1 = vcmp.gt.f32.partialorder %v750_v43, 0.0 }
 0x124   : > { %v945_v49 = vmul.f32 0.2, %v752_v45  ;;  %v755_v50 = vpop.f32.mrb[32].mxu0  ;;  %1267 = vmatmul.mubr.f32.gmra.mrb[28].mxu1 %v1006_v48  ;;  %vm881_vm0 = vcmp.gt.f32.partialorder %v752_v45, 0.0 }
 0x125   : > { %v756_v51 = vadd.f32 %v755_v50, %v4590_v30  ;;  %v757_v52 = vpop.f32.mrb[33].mxu0  ;;  %v1008_v56 = vsel %vm880_vm1, %v750_v43, %v944_v47  ;;  %v1629_v50 = vld [vmem:[%s5766_s5 + $0x1f0] sm:$0xff] }
 0x126   : > { %v758_v53 = vadd.f32 %v757_v52, %v4596_v33  ;;  %v1009_v54 = vsel %vm881_vm0, %v752_v45, %v945_v49  ;;  %v1627_v49 = vld [vmem:[%s5766_s5 + $0x1e0] sm:$0xff] }
 0x127   : > { %v946_v55 = vmul.f32 0.2, %v756_v51  ;;  %1272 = vmatprep.mubr.f32.mxu1 %v1009_v54  ;;  %vm882_vm3 = vcmp.gt.f32.partialorder %v756_v51, 0.0 }
 0x128   : > { %v947_v57 = vmul.f32 0.2, %v758_v53  ;;  %v761_v58 = vpop.f32.mrb[34].mxu0  ;;  %1273 = vmatmul.mubr.f32.gmra.mrb[30].mxu1 %v1008_v56  ;;  %vm883_vm2 = vcmp.gt.f32.partialorder %v758_v53, 0.0 }
 0x129   : > { %v762_v59 = vadd.f32 %v761_v58, %v4590_v30  ;;  %v763_v60 = vpop.f32.mrb[35].mxu0  ;;  %v1010_v0 = vsel %vm882_vm3, %v756_v51, %v946_v55 }
 0x12a   : > { %v764_v61 = vadd.f32 %v763_v60, %v4596_v33  ;;  %v1011_v62 = vsel %vm883_vm2, %v758_v53, %v947_v57  ;;  %v3891_v53 = vpack.c.bf16 %v1629_v50, %v1627_v49 }
 0x12b   : > { %v948_v63 = vmul.f32 0.2, %v762_v59  ;;  %1278 = vmatprep.mubr.f32.mxu1 %v1011_v62  ;;  %vm884_vm5 = vcmp.gt.f32.partialorder %v762_v59, 0.0 }
 0x12c   : > { %v949_v1 = vmul.f32 0.2, %v764_v61  ;;  %v767_v3 = vpop.f32.mrb[36].mxu0  ;;  %1279 = vmatmul.mubr.f32.gmra.mrb[32].mxu1 %v1010_v0  ;;  %vm885_vm4 = vcmp.gt.f32.partialorder %v764_v61, 0.0  ;;  %3892 = vmatpush1.bf16.msra.mxu0 %v3891_v53 }
 0x12d   : > { %v768_v4 = vadd.f32 %v767_v3, %v4590_v30  ;;  %v769_v5 = vpop.f32.mrb[37].mxu0  ;;  %v1012_v2 = vsel %vm884_vm5, %v762_v59, %v948_v63 }
 0x12e   : > { %v770_v6 = vadd.f32 %v769_v5, %v4596_v33  ;;  %v1013_v7 = vsel %vm885_vm4, %v764_v61, %v949_v1 }
 0x12f   : > { %v950_v8 = vmul.f32 0.2, %v768_v4  ;;  %1284 = vmatprep.mubr.f32.mxu1 %v1013_v7  ;;  %vm886_vm7 = vcmp.gt.f32.partialorder %v768_v4, 0.0 }
 0x130   : > { %v951_v9 = vmul.f32 0.2, %v770_v6  ;;  %v773_v10 = vpop.f32.mrb[38].mxu0  ;;  %1285 = vmatmul.mubr.f32.gmra.mrb[34].mxu1 %v1012_v2  ;;  %vm887_vm6 = vcmp.gt.f32.partialorder %v770_v6, 0.0 }
 0x131   : > { %v774_v11 = vadd.f32 %v773_v10, %v4590_v30  ;;  %v775_v12 = vpop.f32.mrb[39].mxu0  ;;  %v1014_v16 = vsel %vm886_vm7, %v768_v4, %v950_v8 }
 0x132   : > { %v776_v13 = vadd.f32 %v775_v12, %v4596_v33  ;;  %v1015_v14 = vsel %vm887_vm6, %v770_v6, %v951_v9 }
 0x133   : > { %v952_v15 = vmul.f32 0.2, %v774_v11  ;;  %1290 = vmatprep.mubr.f32.mxu1 %v1015_v14  ;;  %vm888_vm9 = vcmp.gt.f32.partialorder %v774_v11, 0.0 }
 0x134   : > { %v953_v17 = vmul.f32 0.2, %v776_v13  ;;  %v779_v18 = vpop.f32.mrb[40].mxu0  ;;  %1291 = vmatmul.mubr.f32.gmra.mrb[36].mxu1 %v1014_v16  ;;  %vm889_vm8 = vcmp.gt.f32.partialorder %v776_v13, 0.0 }
 0x135   : > { %v780_v19 = vadd.f32 %v779_v18, %v4590_v30  ;;  %v781_v20 = vpop.f32.mrb[41].mxu0  ;;  %v1016_v25 = vsel %vm888_vm9, %v774_v11, %v952_v15 }
 0x136   : > { %v782_v21 = vadd.f32 %v781_v20, %v4596_v33  ;;  %v1017_v22 = vsel %vm889_vm8, %v776_v13, %v953_v17 }
 0x137   : > { %v954_v23 = vmul.f32 0.2, %v780_v19  ;;  %1296 = vmatprep.mubr.f32.mxu1 %v1017_v22  ;;  %vm890_vm11 = vcmp.gt.f32.partialorder %v780_v19, 0.0 }
 0x138   : > { %v955_v27 = vmul.f32 0.2, %v782_v21  ;;  %v785_v28 = vpop.f32.mrb[42].mxu0  ;;  %1297 = vmatmul.mubr.f32.gmra.mrb[38].mxu1 %v1016_v25  ;;  %vm891_vm10 = vcmp.gt.f32.partialorder %v782_v21, 0.0 }
 0x139   : > { %v786_v29 = vadd.f32 %v785_v28, %v4590_v30  ;;  %v787_v31 = vpop.f32.mrb[43].mxu0  ;;  %v1018_v36 = vsel %vm890_vm11, %v780_v19, %v954_v23 }
 0x13a   : > { %v788_v32 = vadd.f32 %v787_v31, %v4596_v33  ;;  %v1019_v34 = vsel %vm891_vm10, %v782_v21, %v955_v27 }
 0x13b   : > { %v956_v35 = vmul.f32 0.2, %v786_v29  ;;  %1302 = vmatprep.mubr.f32.mxu1 %v1019_v34  ;;  %vm892_vm13 = vcmp.gt.f32.partialorder %v786_v29, 0.0 }
 0x13c   : > { %v957_v37 = vmul.f32 0.2, %v788_v32  ;;  %v791_v38 = vpop.f32.mrb[44].mxu0  ;;  %1303 = vmatmul.mubr.f32.gmra.mrb[40].mxu1 %v1018_v36  ;;  %vm893_vm12 = vcmp.gt.f32.partialorder %v788_v32, 0.0 }
 0x13d   : > { %v792_v39 = vadd.f32 %v791_v38, %v4590_v30  ;;  %v793_v40 = vpop.f32.mrb[45].mxu0  ;;  %v1020_v44 = vsel %vm892_vm13, %v786_v29, %v956_v35 }
 0x13e   : > { %v794_v41 = vadd.f32 %v793_v40, %v4596_v33  ;;  %v1021_v42 = vsel %vm893_vm12, %v788_v32, %v957_v37 }
 0x13f   : > { %v958_v43 = vmul.f32 0.2, %v792_v39  ;;  %1308 = vmatprep.mubr.f32.mxu1 %v1021_v42  ;;  %vm894_vm15 = vcmp.gt.f32.partialorder %v792_v39, 0.0 }
 0x140   : > { %v959_v45 = vmul.f32 0.2, %v794_v41  ;;  %v797_v46 = vpop.f32.mrb[46].mxu0  ;;  %1309 = vmatmul.mubr.f32.gmra.mrb[42].mxu1 %v1020_v44  ;;  %vm895_vm14 = vcmp.gt.f32.partialorder %v794_v41, 0.0 }
 0x141   : > { %v798_v47 = vadd.f32 %v797_v46, %v4590_v30  ;;  %v799_v48 = vpop.f32.mrb[47].mxu0  ;;  %v1022_v55 = vsel %vm894_vm15, %v792_v39, %v958_v43 }
 0x142   : > { %v800_v51 = vadd.f32 %v799_v48, %v4596_v33  ;;  %v1023_v52 = vsel %vm895_vm14, %v794_v41, %v959_v45 }
 0x143   : > { %v960_v54 = vmul.f32 0.2, %v798_v47  ;;  %1314 = vmatprep.mubr.f32.mxu1 %v1023_v52  ;;  %vm896_vm1 = vcmp.gt.f32.partialorder %v798_v47, 0.0 }
 0x144   : > { %v961_v56 = vmul.f32 0.2, %v800_v51  ;;  %v803_v57 = vpop.f32.mrb[48].mxu0  ;;  %1315 = vmatmul.mubr.f32.gmra.mrb[44].mxu1 %v1022_v55  ;;  %vm897_vm0 = vcmp.gt.f32.partialorder %v800_v51, 0.0 }
 0x145   : > { %v804_v58 = vadd.f32 %v803_v57, %v4590_v30  ;;  %v805_v59 = vpop.f32.mrb[49].mxu0  ;;  %v1024_v63 = vsel %vm896_vm1, %v798_v47, %v960_v54 }
 0x146   : > { %v806_v60 = vadd.f32 %v805_v59, %v4596_v33  ;;  %v1025_v61 = vsel %vm897_vm0, %v800_v51, %v961_v56 }
 0x147   : > { %v962_v62 = vmul.f32 0.2, %v804_v58  ;;  %1320 = vmatprep.mubr.f32.mxu1 %v1025_v61  ;;  %vm898_vm3 = vcmp.gt.f32.partialorder %v804_v58, 0.0 }
 0x148   : > { %v963_v0 = vmul.f32 0.2, %v806_v60  ;;  %v809_v1 = vpop.f32.mrb[50].mxu0  ;;  %1321 = vmatmul.mubr.f32.gmra.mrb[46].mxu1 %v1024_v63  ;;  %vm899_vm2 = vcmp.gt.f32.partialorder %v806_v60, 0.0  ;;  %v2093_v63 = vld [vmem:[%s5768_s7 + $0x8] sm:$0xff] }
 0x149   : > { %v810_v3 = vadd.f32 %v809_v1, %v4590_v30  ;;  %v811_v4 = vpop.f32.mrb[51].mxu0  ;;  %v1026_v8 = vsel %vm898_vm3, %v804_v58, %v962_v62  ;;  %v2094_v1 = vld [vmem:[%s5768_s7 + $0x10] sm:$0xff] }
 0x14a   : > { %v812_v5 = vadd.f32 %v811_v4, %v4596_v33  ;;  %v1027_v6 = vsel %vm899_vm2, %v806_v60, %v963_v0  ;;  %v2097_v4 = vld [vmem:[%s5768_s7 + $0x28] sm:$0xff] }
 0x14b   : > { %v964_v7 = vmul.f32 0.2, %v810_v3  ;;  %1326 = vmatprep.mubr.f32.mxu1 %v1027_v6  ;;  %vm900_vm5 = vcmp.gt.f32.partialorder %v810_v3, 0.0  ;;  %v2096_v6 = vld [vmem:[%s5768_s7 + $0x20] sm:$0xff] }
 0x14c   : > { %v965_v2 = vmul.f32 0.2, %v812_v5  ;;  %v815_v9 = vpop.f32.mrb[52].mxu0  ;;  %1327 = vmatmul.mubr.f32.gmra.mrb[48].mxu1 %v1026_v8  ;;  %vm901_vm4 = vcmp.gt.f32.partialorder %v812_v5, 0.0  ;;  %v2098_v8 = vld [vmem:[%s5768_s7 + $0x30] sm:$0xff] }
 0x14d   : > { %v816_v10 = vadd.f32 %v815_v9, %v4590_v30  ;;  %v817_v11 = vpop.f32.mrb[53].mxu0  ;;  %v1028_v15 = vsel %vm900_vm5, %v810_v3, %v964_v7  ;;  %v2101_v9 = vld [vmem:[%s5768_s7 + $0x48] sm:$0xff] }
 0x14e   : > { %v818_v12 = vadd.f32 %v817_v11, %v4596_v33  ;;  %v1029_v13 = vsel %vm901_vm4, %v812_v5, %v965_v2  ;;  %v2099_v5 = vld [vmem:[%s5768_s7 + $0x38] sm:$0xff]  ;;  %v3899_v2 = vpack.c.bf16 %v2098_v8, %v2096_v6  ;;  %v2100_v11 = vld [vmem:[%s5768_s7 + $0x40] sm:$0xff]  ;;  %v2122_v6 = vld [vmem:[%s5768_s7 + $0xf0] sm:$0xff] }
 0x14f   : > { %v966_v14 = vmul.f32 0.2, %v816_v10  ;;  %1332 = vmatprep.mubr.f32.mxu1 %v1029_v13  ;;  %vm902_vm7 = vcmp.gt.f32.partialorder %v816_v10, 0.0  ;;  %v3897_v7 = vpack.c.bf16 %v2099_v5, %v2097_v4  ;;  %v2102_v13 = vld [vmem:[%s5768_s7 + $0x50] sm:$0xff]  ;;  %v2120_v5 = vld [vmem:[%s5768_s7 + $0xe0] sm:$0xff] }
 0x150   : > { %v967_v16 = vmul.f32 0.2, %v818_v12  ;;  %v821_v17 = vpop.f32.mrb[54].mxu0  ;;  %1333 = vmatmul.mubr.f32.gmra.mrb[50].mxu1 %v1028_v15  ;;  %vm903_vm6 = vcmp.gt.f32.partialorder %v818_v12, 0.0  ;;  %v1106_v15 = vld [vmem:[%s5765_s4] sm:$0x3] }
 0x151   : > { %v822_v18 = vadd.f32 %v821_v17, %v4590_v30  ;;  %v823_v19 = vpop.f32.mrb[55].mxu0  ;;  %v1030_v23 = vsel %vm902_vm7, %v816_v10, %v966_v14  ;;  %v2103_v10 = vld [vmem:[%s5768_s7 + $0x58] sm:$0xff]  ;;  %v3903_v14 = vpack.c.bf16 %v2102_v13, %v2100_v11 }
 0x152   : > { %v824_v20 = vadd.f32 %v823_v19, %v4596_v33  ;;  %v1031_v21 = vsel %vm903_vm6, %v818_v12, %v967_v16  ;;  %v3901_v12 = vpack.c.bf16 %v2103_v10, %v2101_v9  ;;  %v2105_v16 = vld [vmem:[%s5768_s7 + $0x68] sm:$0xff]  ;;  %v2107_v17 = vld [vmem:[%s5768_s7 + $0x78] sm:$0xff]  ;;  %v4857_v19 = vrot.slane %v1106_v15, %v4573_v24 }
 0x153   : > { %v968_v22 = vmul.f32 0.2, %v822_v18  ;;  %1338 = vmatprep.mubr.f32.mxu1 %v1031_v21  ;;  %vm904_vm9 = vcmp.gt.f32.partialorder %v822_v18, 0.0  ;;  %v2106_v21 = vld [vmem:[%s5768_s7 + $0x70] sm:$0xff]  ;;  %v2127_v9 = vld [vmem:[%s5768_s7 + $0x118] sm:$0xff] }
 0x154   : > { %v969_v25 = vmul.f32 0.2, %v824_v20  ;;  %v827_v27 = vpop.f32.mrb[56].mxu0  ;;  %1339 = vmatmul.mubr.f32.gmra.mrb[52].mxu1 %v1030_v23  ;;  %vm905_vm8 = vcmp.gt.f32.partialorder %v824_v20, 0.0 }
 0x155   : > { %v828_v28 = vadd.f32 %v827_v27, %v4590_v30  ;;  %v829_v29 = vpop.f32.mrb[57].mxu0  ;;  %v1032_v35 = vsel %vm904_vm9, %v822_v18, %v968_v22  ;;  %v2104_v18 = vld [vmem:[%s5768_s7 + $0x60] sm:$0xff]  ;;  %v4863_v22 = vrot.slane %v1106_v15, %v4578_v26  ;;  %v2109_v27 = vld [vmem:[%s5768_s7 + $0x88] sm:$0xff] }
 0x156   : > { %v830_v31 = vadd.f32 %v829_v29, %v4596_v33  ;;  %v1033_v32 = vsel %vm905_vm8, %v824_v20, %v969_v25  ;;  %v3905_v20 = vpack.c.bf16 %v2107_v17, %v2105_v16  ;;  %v3907_v23 = vpack.c.bf16 %v2106_v21, %v2104_v18  ;;  %v2124_v18 = vld [vmem:[%s5768_s7 + $0x100] sm:$0xff]  ;;  %v2129_v21 = vld [vmem:[%s5768_s7 + $0x128] sm:$0xff] }
 0x157   : > { %v970_v34 = vmul.f32 0.2, %v828_v28  ;;  %1344 = vmatprep.mubr.f32.mxu1 %v1033_v32  ;;  %vm906_vm11 = vcmp.gt.f32.partialorder %v828_v28, 0.0 }
 0x158   : > { %v971_v36 = vmul.f32 0.2, %v830_v31  ;;  %v833_v37 = vpop.f32.mrb[58].mxu0  ;;  %1345 = vmatmul.mubr.f32.gmra.mrb[54].mxu1 %v1032_v35  ;;  %vm907_vm10 = vcmp.gt.f32.partialorder %v830_v31, 0.0 }
 0x159   : > { %v834_v38 = vadd.f32 %v833_v37, %v4590_v30  ;;  %v835_v39 = vpop.f32.mrb[59].mxu0  ;;  %v1034_v43 = vsel %vm906_vm11, %v828_v28, %v970_v34  ;;  %v2111_v28 = vld [vmem:[%s5768_s7 + $0x98] sm:$0xff]  ;;  %v2110_v37 = vld [vmem:[%s5768_s7 + $0x90] sm:$0xff] }
 0x15a   : > { %v836_v40 = vadd.f32 %v835_v39, %v4596_v33  ;;  %v1035_v41 = vsel %vm907_vm10, %v830_v31, %v971_v36  ;;  %v3909_v32 = vpack.c.bf16 %v2111_v28, %v2109_v27  ;;  %v2108_v36 = vld [vmem:[%s5768_s7 + $0x80] sm:$0xff]  ;;  %v2131_v27 = vld [vmem:[%s5768_s7 + $0x138] sm:$0xff] }
 0x15b   : > { %v972_v42 = vmul.f32 0.2, %v834_v38  ;;  %1350 = vmatprep.mubr.f32.mxu1 %v1035_v41  ;;  %vm908_vm13 = vcmp.gt.f32.partialorder %v834_v38, 0.0  ;;  %v2113_v41 = vld [vmem:[%s5768_s7 + $0xa8] sm:$0xff] }
 0x15c   : > { %v973_v44 = vmul.f32 0.2, %v836_v40  ;;  %v839_v45 = vpop.f32.mrb[60].mxu0  ;;  %1351 = vmatmul.mubr.f32.gmra.mrb[56].mxu1 %v1034_v43  ;;  %vm909_vm12 = vcmp.gt.f32.partialorder %v836_v40, 0.0 }
 0x15d   : > { %v840_v46 = vadd.f32 %v839_v45, %v4590_v30  ;;  %v841_v47 = vpop.f32.mrb[61].mxu0  ;;  %v1036_v51 = vsel %vm908_vm13, %v834_v38, %v972_v42  ;;  %v2115_v42 = vld [vmem:[%s5768_s7 + $0xb8] sm:$0xff] }
 0x15e   : > { %v842_v48 = vadd.f32 %v841_v47, %v4596_v33  ;;  %v1037_v49 = vsel %vm909_vm12, %v836_v40, %v973_v44  ;;  %v3911_v40 = vpack.c.bf16 %v2110_v37, %v2108_v36  ;;  %v3913_v45 = vpack.c.bf16 %v2115_v42, %v2113_v41  ;;  %v2114_v47 = vld [vmem:[%s5768_s7 + $0xb0] sm:$0xff] }
 0x15f   : > { %v974_v50 = vmul.f32 0.2, %v840_v46  ;;  %1356 = vmatprep.mubr.f32.mxu1 %v1037_v49  ;;  %vm910_vm15 = vcmp.gt.f32.partialorder %v840_v46, 0.0  ;;  %v3929_v37 = vpack.c.bf16 %v2131_v27, %v2129_v21 }
 0x160   : > { %v975_v52 = vmul.f32 0.2, %v842_v48  ;;  %v845_v53 = vpop.f32.mrb[62].mxu0  ;;  %1357 = vmatmul.mubr.f32.gmra.mrb[58].mxu1 %v1036_v51  ;;  %vm911_vm14 = vcmp.gt.f32.partialorder %v842_v48, 0.0 }
 0x161   : > { %v846_v54 = vadd.f32 %v845_v53, %v4590_v30  ;;  %v847_v55 = vpop.f32.mrb[63].mxu0  ;;  %v1038_v59 = vsel %vm910_vm15, %v840_v46, %v974_v50  ;;  %v2095_v30 = vld [vmem:[%s5768_s7 + $0x18] sm:$0xff]  ;;  %v2112_v46 = vld [vmem:[%s5768_s7 + $0xa0] sm:$0xff] }
 0x162   : > { %v848_v56 = vadd.f32 %v847_v55, %v4596_v33  ;;  %v1039_v57 = vsel %vm911_vm14, %v842_v48, %v975_v52  ;;  %v2092_v33 = vld [vmem:[%s5768_s7] sm:$0xff]  ;;  %v3893_v0 = vpack.c.bf16 %v2095_v30, %v2093_v63  ;;  %v2117_v48 = vld [vmem:[%s5768_s7 + $0xc8] sm:$0xff]  ;;  %v3915_v51 = vpack.c.bf16 %v2114_v47, %v2112_v46  ;;  %v2119_v52 = vld [vmem:[%s5768_s7 + $0xd8] sm:$0xff] }
 0x163   : > { %v976_v58 = vmul.f32 0.2, %v846_v54  ;;  %1362 = vmatprep.mubr.f32.mxu1 %v1039_v57  ;;  %vm912_vm1 = vcmp.gt.f32.partialorder %v846_v54, 0.0  ;;  %v3895_v3 = vpack.c.bf16 %v2094_v1, %v2092_v33  ;;  %v3917_v55 = vpack.c.bf16 %v2119_v52, %v2117_v48  ;;  %v2118_v57 = vld [vmem:[%s5768_s7 + $0xd0] sm:$0xff]  ;;  %v2132_v52 = vld [vmem:[%s5768_s7 + $0x140] sm:$0xff] }
 0x164   : > { %v977_v60 = vmul.f32 0.2, %v848_v56  ;;  %1363 = vmatmul.mubr.f32.gmra.mrb[60].mxu1 %v1038_v59  ;;  %vm913_vm0 = vcmp.gt.f32.partialorder %v848_v56, 0.0  ;;  %3894 = vmatprep.subr.bf16.mxu1 %v3893_v0 }
 0x165   : > { %v1040_v62 = vsel %vm912_vm1, %v846_v54, %v976_v58  ;;  %3896 = vmatpush1.bf16.msra.mxu1 %v3895_v3 }
 0x166   : > { %v1041_v61 = vsel %vm913_vm0, %v848_v56, %v977_v60  ;;  %3898 = vmatprep.subr.bf16.mxu1 %v3897_v7  ;;  %v2116_v56 = vld [vmem:[%s5768_s7 + $0xc0] sm:$0xff]  ;;  %v2121_v60 = vld [vmem:[%s5768_s7 + $0xe8] sm:$0xff] }
 0x167   : > { %1368 = vmatprep.mubr.f32.mxu1 %v1041_v61  ;;  %v2123_v61 = vld [vmem:[%s5768_s7 + $0xf8] sm:$0xff]  ;;  %v3919_v0 = vpack.c.bf16 %v2118_v57, %v2116_v56  ;;  %v2125_v7 = vld [vmem:[%s5768_s7 + $0x108] sm:$0xff] }
 0x168   : > { %1369 = vmatmul.mubr.f32.gmra.mrb[62].mxu1 %v1040_v62  ;;  %v3921_v4 = vpack.c.bf16 %v2123_v61, %v2121_v60  ;;  %v3925_v17 = vpack.c.bf16 %v2127_v9, %v2125_v7  ;;  %v2139_v57 = vld [vmem:[%s5768_s7 + $0x178] sm:$0xff] }
 0x169   : > { %3900 = vmatpush1.bf16.msra.mxu1 %v3899_v2 }
 0x16a   : > { %3902 = vmatprep.subr.bf16.mxu1 %v3901_v12 }
 0x16d   : > { %3904 = vmatpush1.bf16.msra.mxu1 %v3903_v14  ;;  %v3923_v14 = vpack.c.bf16 %v2122_v6, %v2120_v5  ;;  %v2143_v6 = vld [vmem:[%s5768_s7 + $0x198] sm:$0xff] }
 0x16e   : > { %3906 = vmatprep.subr.bf16.mxu1 %v3905_v20  ;;  %v2126_v20 = vld [vmem:[%s5768_s7 + $0x110] sm:$0xff] }
 0x171   : > { %3908 = vmatpush1.bf16.msra.mxu1 %v3907_v23 }
 0x172   : > { %3910 = vmatprep.subr.bf16.mxu1 %v3909_v32 }
 0x175   : > { %3912 = vmatpush1.bf16.msra.mxu1 %v3911_v40  ;;  %v2133_v40 = vld [vmem:[%s5768_s7 + $0x148] sm:$0xff] }
 0x176   : > { %3914 = vmatprep.subr.bf16.mxu1 %v3913_v45 }
 0x179   : > { %3916 = vmatpush1.bf16.msra.mxu1 %v3915_v51 }
 0x17a   : > { %3918 = vmatprep.subr.bf16.mxu1 %v3917_v55 }
 0x17d   : > { %3920 = vmatpush1.bf16.msra.mxu1 %v3919_v0  ;;  %v2136_v0 = vld [vmem:[%s5768_s7 + $0x160] sm:$0xff] }
 0x17e   : > { %3922 = vmatprep.subr.bf16.mxu1 %v3921_v4 }
 0x181   : > { %3924 = vmatpush1.bf16.msra.mxu1 %v3923_v14  ;;  %v2140_v14 = vld [vmem:[%s5768_s7 + $0x180] sm:$0xff] }
 0x182   : > { %3926 = vmatprep.subr.bf16.mxu1 %v3925_v17 }
 0x1bf   : > { %v1184_v25 = vpop.f32.mrb[0].mxu1 }
 0x1c0   : > { %v1185_v29 = vadd.f32 %v1184_v25, %v4857_v19  ;;  %v1186_v31 = vpop.f32.mrb[1].mxu1 }
 0x1c1   : > { %v1187_v34 = vadd.f32 %v1186_v31, %v4863_v22 }
 0x1c2   : > { %vm1375_vm2 = vcmp.gt.f32.partialorder %v1185_v29, 0.0  ;;  %v1439_v35 = vmul.f32 0.2, %v1185_v29 }
 0x1c3   : > { %v1440_v38 = vmul.f32 0.2, %v1187_v34  ;;  %v1190_v39 = vpop.f32.mrb[2].mxu1  ;;  %vm1376_vm3 = vcmp.gt.f32.partialorder %v1187_v34, 0.0 }
 0x1c4   : > { %v1191_v43 = vadd.f32 %v1190_v39, %v4857_v19  ;;  %v1192_v44 = vpop.f32.mrb[3].mxu1  ;;  %v1503_v53 = vsel %vm1375_vm2, %v1185_v29, %v1439_v35  ;;  %v2130_v39 = vld [vmem:[%s5768_s7 + $0x130] sm:$0xff] }
 0x1c5   : > { %v1193_v49 = vadd.f32 %v1192_v44, %v4863_v22  ;;  %v1504_v50 = vsel %vm1376_vm3, %v1187_v34, %v1440_v38  ;;  %v3927_v34 = vpack.c.bf16 %v2126_v20, %v2124_v18  ;;  %v2128_v38 = vld [vmem:[%s5768_s7 + $0x120] sm:$0xff]  ;;  %v2147_v20 = vld [vmem:[%s5768_s7 + $0x1b8] sm:$0xff] }
 0x1c6   : > { %v1441_v54 = vmul.f32 0.2, %v1191_v43  ;;  %1707 = vmatprep.mubr.f32.mxu0 %v1504_v50  ;;  %vm1377_vm4 = vcmp.gt.f32.partialorder %v1191_v43, 0.0  ;;  %v3931_v48 = vpack.c.bf16 %v2130_v39, %v2128_v38  ;;  %v2151_v39 = vld [vmem:[%s5768_s7 + $0x1d8] sm:$0xff] }
 0x1c7   : > { %v1442_v58 = vmul.f32 0.2, %v1193_v49  ;;  %v1196_v59 = vpop.f32.mrb[4].mxu1  ;;  %1708 = vmatmul.mubr.f32.vlgmr.msra.gmra.mrb[64].mxu0 %v1503_v53  ;;  %vm1378_vm5 = vcmp.gt.f32.partialorder %v1193_v49, 0.0  ;;  %3928 = vmatpush1.bf16.msra.mxu1 %v3927_v34  ;;  %v2134_v53 = vld [vmem:[%s5768_s7 + $0x150] sm:$0xff]  ;;  %v2144_v34 = vld [vmem:[%s5768_s7 + $0x1a0] sm:$0xff] }
 0x1c8   : > { %v1197_v62 = vadd.f32 %v1196_v59, %v4857_v19  ;;  %v1198_v63 = vpop.f32.mrb[5].mxu1  ;;  %v1505_v3 = vsel %vm1377_vm4, %v1191_v43, %v1441_v54  ;;  %v2135_v43 = vld [vmem:[%s5768_s7 + $0x158] sm:$0xff]  ;;  %3930 = vmatprep.subr.bf16.mxu1 %v3929_v37  ;;  %v2137_v54 = vld [vmem:[%s5768_s7 + $0x168] sm:$0xff] }
 0x1c9   : > { %v1199_v30 = vadd.f32 %v1198_v63, %v4863_v22  ;;  %v1506_v33 = vsel %vm1378_vm5, %v1193_v49, %v1442_v58  ;;  %v3933_v51 = vpack.c.bf16 %v2135_v43, %v2133_v40 }
 0x1ca   : > { %v1443_v1 = vmul.f32 0.2, %v1197_v62  ;;  %1713 = vmatprep.mubr.f32.mxu0 %v1506_v33  ;;  %vm1379_vm7 = vcmp.gt.f32.partialorder %v1197_v62, 0.0  ;;  %v3937_v33 = vpack.c.bf16 %v2139_v57, %v2137_v54 }
 0x1cb   : > { %v1444_v8 = vmul.f32 0.2, %v1199_v30  ;;  %v1202_v2 = vpop.f32.mrb[6].mxu1  ;;  %1714 = vmatmul.mubr.f32.gmra.mrb[66].mxu0 %v1505_v3  ;;  %vm1380_vm6 = vcmp.gt.f32.partialorder %v1199_v30, 0.0  ;;  %3932 = vmatpush1.bf16.msra.mxu1 %v3931_v48  ;;  %v2141_v3 = vld [vmem:[%s5768_s7 + $0x188] sm:$0xff]  ;;  %v2148_v48 = vld [vmem:[%s5768_s7 + $0x1c0] sm:$0xff] }
 0x1cc   : > { %v1203_v10 = vadd.f32 %v1202_v2, %v4857_v19  ;;  %v1204_v11 = vpop.f32.mrb[7].mxu1  ;;  %v1507_v16 = vsel %vm1379_vm7, %v1197_v62, %v1443_v1  ;;  %v3935_v62 = vpack.c.bf16 %v2134_v53, %v2132_v52  ;;  %3934 = vmatprep.subr.bf16.mxu1 %v3933_v51  ;;  %v2138_v1 = vld [vmem:[%s5768_s7 + $0x170] sm:$0xff]  ;;  %v2155_v53 = vld [vmem:[%s5768_s7 + $0x1f8] sm:$0xff] }
 0x1cd   : > { %v1205_v12 = vadd.f32 %v1204_v11, %v4863_v22  ;;  %v1508_v13 = vsel %vm1380_vm6, %v1199_v30, %v1444_v8 }
 0x1ce   : > { %v1445_v15 = vmul.f32 0.2, %v1203_v10  ;;  %1719 = vmatprep.mubr.f32.mxu0 %v1508_v13  ;;  %vm1381_vm9 = vcmp.gt.f32.partialorder %v1203_v10, 0.0  ;;  %v3941_v13 = vpack.c.bf16 %v2143_v6, %v2141_v3 }
 0x1cf   : > { %v1446_v23 = vmul.f32 0.2, %v1205_v12  ;;  %v1208_v25 = vpop.f32.mrb[8].mxu1  ;;  %1720 = vmatmul.mubr.f32.gmra.mrb[68].mxu0 %v1507_v16  ;;  %vm1382_vm8 = vcmp.gt.f32.partialorder %v1205_v12, 0.0  ;;  %3936 = vmatpush1.bf16.msra.mxu1 %v3935_v62  ;;  %v2145_v16 = vld [vmem:[%s5768_s7 + $0x1a8] sm:$0xff] }
 0x1d0   : > { %v1209_v28 = vadd.f32 %v1208_v25, %v4857_v19  ;;  %v1210_v29 = vpop.f32.mrb[9].mxu1  ;;  %v1509_v36 = vsel %vm1381_vm9, %v1203_v10, %v1445_v15  ;;  %v3939_v10 = vpack.c.bf16 %v2138_v1, %v2136_v0  ;;  %3938 = vmatprep.subr.bf16.mxu1 %v3937_v33  ;;  %v2142_v15 = vld [vmem:[%s5768_s7 + $0x190] sm:$0xff] }
 0x1d1   : > { %v1211_v31 = vadd.f32 %v1210_v29, %v4863_v22  ;;  %v1510_v32 = vsel %vm1382_vm8, %v1205_v12, %v1446_v23 }
 0x1d2   : > { %v1447_v35 = vmul.f32 0.2, %v1209_v28  ;;  %1725 = vmatprep.mubr.f32.mxu0 %v1510_v32  ;;  %vm1383_vm11 = vcmp.gt.f32.partialorder %v1209_v28, 0.0  ;;  %v3945_v32 = vpack.c.bf16 %v2147_v20, %v2145_v16 }
 0x1d3   : > { %v1448_v41 = vmul.f32 0.2, %v1211_v31  ;;  %v1214_v42 = vpop.f32.mrb[10].mxu1  ;;  %1726 = vmatmul.mubr.f32.gmra.mrb[70].mxu0 %v1509_v36  ;;  %vm1384_vm10 = vcmp.gt.f32.partialorder %v1211_v31, 0.0  ;;  %3940 = vmatpush1.bf16.msra.mxu1 %v3939_v10  ;;  %v2149_v36 = vld [vmem:[%s5768_s7 + $0x1c8] sm:$0xff] }
 0x1d4   : > { %v1215_v44 = vadd.f32 %v1214_v42, %v4857_v19  ;;  %v1216_v45 = vpop.f32.mrb[11].mxu1  ;;  %v1511_v50 = vsel %vm1383_vm11, %v1209_v28, %v1447_v35  ;;  %v3943_v28 = vpack.c.bf16 %v2142_v15, %v2140_v14  ;;  %3942 = vmatprep.subr.bf16.mxu1 %v3941_v13  ;;  %v2146_v35 = vld [vmem:[%s5768_s7 + $0x1b0] sm:$0xff] }
 0x1d5   : > { %v1217_v46 = vadd.f32 %v1216_v45, %v4863_v22  ;;  %v1512_v47 = vsel %vm1384_vm10, %v1211_v31, %v1448_v41 }
 0x1d6   : > { %v1449_v49 = vmul.f32 0.2, %v1215_v44  ;;  %1731 = vmatprep.mubr.f32.mxu0 %v1512_v47  ;;  %vm1385_vm13 = vcmp.gt.f32.partialorder %v1215_v44, 0.0  ;;  %v3949_v47 = vpack.c.bf16 %v2151_v39, %v2149_v36 }
 0x1d7   : > { %v1450_v55 = vmul.f32 0.2, %v1217_v46  ;;  %v1220_v56 = vpop.f32.mrb[12].mxu1  ;;  %1732 = vmatmul.mubr.f32.gmra.mrb[72].mxu0 %v1511_v50  ;;  %vm1386_vm12 = vcmp.gt.f32.partialorder %v1217_v46, 0.0  ;;  %3944 = vmatpush1.bf16.msra.mxu1 %v3943_v28  ;;  %v2153_v50 = vld [vmem:[%s5768_s7 + $0x1e8] sm:$0xff] }
 0x1d8   : > { %v1221_v58 = vadd.f32 %v1220_v56, %v4857_v19  ;;  %v1222_v59 = vpop.f32.mrb[13].mxu1  ;;  %v1513_v30 = vsel %vm1385_vm13, %v1215_v44, %v1449_v49  ;;  %v3947_v44 = vpack.c.bf16 %v2146_v35, %v2144_v34  ;;  %3946 = vmatprep.subr.bf16.mxu1 %v3945_v32  ;;  %v2150_v49 = vld [vmem:[%s5768_s7 + $0x1d0] sm:$0xff] }
 0x1d9   : > { %v1223_v60 = vadd.f32 %v1222_v59, %v4863_v22  ;;  %v1514_v61 = vsel %vm1386_vm12, %v1217_v46, %v1450_v55 }
 0x1da   : > { %v1451_v63 = vmul.f32 0.2, %v1221_v58  ;;  %1737 = vmatprep.mubr.f32.mxu0 %v1514_v61  ;;  %vm1387_vm15 = vcmp.gt.f32.partialorder %v1221_v58, 0.0  ;;  %v3953_v61 = vpack.c.bf16 %v2155_v53, %v2153_v50 }
 0x1db   : > { %v1452_v4 = vmul.f32 0.2, %v1223_v60  ;;  %v1226_v5 = vpop.f32.mrb[14].mxu1  ;;  %1738 = vmatmul.mubr.f32.gmra.mrb[74].mxu0 %v1513_v30  ;;  %vm1388_vm14 = vcmp.gt.f32.partialorder %v1223_v60, 0.0  ;;  %3948 = vmatpush1.bf16.msra.mxu1 %v3947_v44 }
 0x1dc   : > { %v1227_v7 = vadd.f32 %v1226_v5, %v4857_v19  ;;  %v1228_v8 = vpop.f32.mrb[15].mxu1  ;;  %v1515_v12 = vsel %vm1387_vm15, %v1221_v58, %v1451_v63  ;;  %v3951_v58 = vpack.c.bf16 %v2150_v49, %v2148_v48  ;;  %3950 = vmatprep.subr.bf16.mxu1 %v3949_v47 }
 0x1dd   : > { %v1229_v2 = vadd.f32 %v1228_v8, %v4863_v22  ;;  %v1516_v9 = vsel %vm1388_vm14, %v1223_v60, %v1452_v4 }
 0x1de   : > { %v1453_v11 = vmul.f32 0.2, %v1227_v7  ;;  %1743 = vmatprep.mubr.f32.mxu0 %v1516_v9  ;;  %vm1389_vm1 = vcmp.gt.f32.partialorder %v1227_v7, 0.0 }
 0x1df   : > { %v1454_v17 = vmul.f32 0.2, %v1229_v2  ;;  %v1232_v18 = vpop.f32.mrb[16].mxu1  ;;  %1744 = vmatmul.mubr.f32.gmra.mrb[76].mxu0 %v1515_v12  ;;  %vm1390_vm0 = vcmp.gt.f32.partialorder %v1229_v2, 0.0  ;;  %3952 = vmatpush1.bf16.msra.mxu1 %v3951_v58 }
 0x1e0   : > { %v1233_v21 = vadd.f32 %v1232_v18, %v4857_v19  ;;  %v1234_v23 = vpop.f32.mrb[17].mxu1  ;;  %v1517_v31 = vsel %vm1389_vm1, %v1227_v7, %v1453_v11  ;;  %3954 = vmatprep.subr.bf16.mxu1 %v3953_v61 }
 0x1e1   : > { %v1235_v25 = vadd.f32 %v1234_v23, %v4863_v22  ;;  %v1518_v27 = vsel %vm1390_vm0, %v1229_v2, %v1454_v17 }
 0x1e2   : > { %v1455_v29 = vmul.f32 0.2, %v1233_v21  ;;  %1749 = vmatprep.mubr.f32.mxu0 %v1518_v27  ;;  %vm1391_vm3 = vcmp.gt.f32.partialorder %v1233_v21, 0.0 }
 0x1e3   : > { %v1456_v37 = vmul.f32 0.2, %v1235_v25  ;;  %v1238_v38 = vpop.f32.mrb[18].mxu1  ;;  %1750 = vmatmul.mubr.f32.gmra.mrb[78].mxu0 %v1517_v31  ;;  %vm1392_vm2 = vcmp.gt.f32.partialorder %v1235_v25, 0.0 }
 0x1e4   : > { %v1239_v40 = vadd.f32 %v1238_v38, %v4857_v19  ;;  %v1240_v41 = vpop.f32.mrb[19].mxu1  ;;  %v1519_v46 = vsel %vm1391_vm3, %v1233_v21, %v1455_v29 }
 0x1e5   : > { %v1241_v42 = vadd.f32 %v1240_v41, %v4863_v22  ;;  %v1520_v43 = vsel %vm1392_vm2, %v1235_v25, %v1456_v37 }
 0x1e6   : > { %v1457_v45 = vmul.f32 0.2, %v1239_v40  ;;  %1755 = vmatprep.mubr.f32.mxu0 %v1520_v43  ;;  %vm1393_vm5 = vcmp.gt.f32.partialorder %v1239_v40, 0.0 }
 0x1e7   : > { %v1458_v51 = vmul.f32 0.2, %v1241_v42  ;;  %v1244_v52 = vpop.f32.mrb[20].mxu1  ;;  %1756 = vmatmul.mubr.f32.gmra.mrb[80].mxu0 %v1519_v46  ;;  %vm1394_vm4 = vcmp.gt.f32.partialorder %v1241_v42, 0.0 }
 0x1e8   : > { %v1245_v54 = vadd.f32 %v1244_v52, %v4857_v19  ;;  %v1246_v55 = vpop.f32.mrb[21].mxu1  ;;  %v1521_v60 = vsel %vm1393_vm5, %v1239_v40, %v1457_v45 }
 0x1e9   : > { %v1247_v56 = vadd.f32 %v1246_v55, %v4863_v22  ;;  %v1522_v57 = vsel %vm1394_vm4, %v1241_v42, %v1458_v51 }
 0x1ea   : > { %v1459_v59 = vmul.f32 0.2, %v1245_v54  ;;  %1761 = vmatprep.mubr.f32.mxu0 %v1522_v57  ;;  %vm1395_vm7 = vcmp.gt.f32.partialorder %v1245_v54, 0.0 }
 0x1eb   : > { %v1460_v62 = vmul.f32 0.2, %v1247_v56  ;;  %v1250_v63 = vpop.f32.mrb[22].mxu1  ;;  %1762 = vmatmul.mubr.f32.gmra.mrb[82].mxu0 %v1521_v60  ;;  %vm1396_vm6 = vcmp.gt.f32.partialorder %v1247_v56, 0.0 }
 0x1ec   : > { %v1251_v30 = vadd.f32 %v1250_v63, %v4857_v19  ;;  %v1252_v33 = vpop.f32.mrb[23].mxu1  ;;  %v1523_v4 = vsel %vm1395_vm7, %v1245_v54, %v1459_v59 }
 0x1ed   : > { %v1253_v0 = vadd.f32 %v1252_v33, %v4863_v22  ;;  %v1524_v1 = vsel %vm1396_vm6, %v1247_v56, %v1460_v62 }
 0x1ee   : > { %v1461_v3 = vmul.f32 0.2, %v1251_v30  ;;  %1767 = vmatprep.mubr.f32.mxu0 %v1524_v1  ;;  %vm1397_vm9 = vcmp.gt.f32.partialorder %v1251_v30, 0.0 }
 0x1ef   : > { %v1462_v5 = vmul.f32 0.2, %v1253_v0  ;;  %v1256_v6 = vpop.f32.mrb[24].mxu1  ;;  %1768 = vmatmul.mubr.f32.gmra.mrb[84].mxu0 %v1523_v4  ;;  %vm1398_vm8 = vcmp.gt.f32.partialorder %v1253_v0, 0.0 }
 0x1f0   : > { %v1257_v7 = vadd.f32 %v1256_v6, %v4857_v19  ;;  %v1258_v8 = vpop.f32.mrb[25].mxu1  ;;  %v1525_v11 = vsel %vm1397_vm9, %v1251_v30, %v1461_v3 }
 0x1f1   : > { %v1259_v2 = vadd.f32 %v1258_v8, %v4863_v22  ;;  %v1526_v9 = vsel %vm1398_vm8, %v1253_v0, %v1462_v5 }
 0x1f2   : > { %v1463_v10 = vmul.f32 0.2, %v1257_v7  ;;  %1773 = vmatprep.mubr.f32.mxu0 %v1526_v9  ;;  %vm1399_vm11 = vcmp.gt.f32.partialorder %v1257_v7, 0.0 }
 0x1f3   : > { %v1464_v12 = vmul.f32 0.2, %v1259_v2  ;;  %v1262_v13 = vpop.f32.mrb[26].mxu1  ;;  %1774 = vmatmul.mubr.f32.gmra.mrb[86].mxu0 %v1525_v11  ;;  %vm1400_vm10 = vcmp.gt.f32.partialorder %v1259_v2, 0.0 }
 0x1f4   : > { %v1263_v14 = vadd.f32 %v1262_v13, %v4857_v19  ;;  %v1264_v15 = vpop.f32.mrb[27].mxu1  ;;  %v1527_v20 = vsel %vm1399_vm11, %v1257_v7, %v1463_v10 }
 0x1f5   : > { %v1265_v16 = vadd.f32 %v1264_v15, %v4863_v22  ;;  %v1528_v17 = vsel %vm1400_vm10, %v1259_v2, %v1464_v12 }
 0x1f6   : > { %v1465_v18 = vmul.f32 0.2, %v1263_v14  ;;  %1779 = vmatprep.mubr.f32.mxu0 %v1528_v17  ;;  %vm1401_vm13 = vcmp.gt.f32.partialorder %v1263_v14, 0.0 }
 0x1f7   : > { %v1466_v21 = vmul.f32 0.2, %v1265_v16  ;;  %v1268_v23 = vpop.f32.mrb[28].mxu1  ;;  %1780 = vmatmul.mubr.f32.gmra.mrb[88].mxu0 %v1527_v20  ;;  %vm1402_vm12 = vcmp.gt.f32.partialorder %v1265_v16, 0.0 }
 0x1f8   : > { %v1269_v25 = vadd.f32 %v1268_v23, %v4857_v19  ;;  %v1270_v27 = vpop.f32.mrb[29].mxu1  ;;  %v1529_v32 = vsel %vm1401_vm13, %v1263_v14, %v1465_v18 }
 0x1f9   : > { %v1271_v28 = vadd.f32 %v1270_v27, %v4863_v22  ;;  %v1530_v29 = vsel %vm1402_vm12, %v1265_v16, %v1466_v21 }
 0x1fa   : > { %v1467_v31 = vmul.f32 0.2, %v1269_v25  ;;  %1785 = vmatprep.mubr.f32.mxu0 %v1530_v29  ;;  %vm1403_vm15 = vcmp.gt.f32.partialorder %v1269_v25, 0.0 }
 0x1fb   : > { %v1468_v34 = vmul.f32 0.2, %v1271_v28  ;;  %v1274_v35 = vpop.f32.mrb[30].mxu1  ;;  %1786 = vmatmul.mubr.f32.gmra.mrb[90].mxu0 %v1529_v32  ;;  %vm1404_vm14 = vcmp.gt.f32.partialorder %v1271_v28, 0.0 }
 0x1fc   : > { %v1275_v36 = vadd.f32 %v1274_v35, %v4857_v19  ;;  %v1276_v37 = vpop.f32.mrb[31].mxu1  ;;  %v1531_v41 = vsel %vm1403_vm15, %v1269_v25, %v1467_v31 }
 0x1fd   : > { %v1277_v38 = vadd.f32 %v1276_v37, %v4863_v22  ;;  %v1532_v39 = vsel %vm1404_vm14, %v1271_v28, %v1468_v34 }
 0x1fe   : > { %v1469_v40 = vmul.f32 0.2, %v1275_v36  ;;  %1791 = vmatprep.mubr.f32.mxu0 %v1532_v39  ;;  %vm1405_vm1 = vcmp.gt.f32.partialorder %v1275_v36, 0.0 }
 0x1ff   : > { %v1470_v42 = vmul.f32 0.2, %v1277_v38  ;;  %v1280_v43 = vpop.f32.mrb[32].mxu1  ;;  %1792 = vmatmul.mubr.f32.gmra.mrb[92].mxu0 %v1531_v41  ;;  %vm1406_vm0 = vcmp.gt.f32.partialorder %v1277_v38, 0.0 }
 0x200   : > { %v1281_v44 = vadd.f32 %v1280_v43, %v4857_v19  ;;  %v1282_v45 = vpop.f32.mrb[33].mxu1  ;;  %v1533_v49 = vsel %vm1405_vm1, %v1275_v36, %v1469_v40  ;;  %v2154_v43 = vld [vmem:[%s5768_s7 + $0x1f0] sm:$0xff] }
 0x201   : > { %v1283_v46 = vadd.f32 %v1282_v45, %v4863_v22  ;;  %v1534_v47 = vsel %vm1406_vm0, %v1277_v38, %v1470_v42  ;;  %v2152_v42 = vld [vmem:[%s5768_s7 + $0x1e0] sm:$0xff] }
 0x202   : > { %v1471_v48 = vmul.f32 0.2, %v1281_v44  ;;  %1797 = vmatprep.mubr.f32.mxu0 %v1534_v47  ;;  %vm1407_vm3 = vcmp.gt.f32.partialorder %v1281_v44, 0.0 }
 0x203   : > { %v1472_v50 = vmul.f32 0.2, %v1283_v46  ;;  %v1286_v51 = vpop.f32.mrb[34].mxu1  ;;  %1798 = vmatmul.mubr.f32.gmra.mrb[94].mxu0 %v1533_v49  ;;  %vm1408_vm2 = vcmp.gt.f32.partialorder %v1283_v46, 0.0 }
 0x204   : > { %v1287_v52 = vadd.f32 %v1286_v51, %v4857_v19  ;;  %v1288_v53 = vpop.f32.mrb[35].mxu1  ;;  %v1535_v57 = vsel %vm1407_vm3, %v1281_v44, %v1471_v48 }
 0x205   : > { %v1289_v54 = vadd.f32 %v1288_v53, %v4863_v22  ;;  %v1536_v55 = vsel %vm1408_vm2, %v1283_v46, %v1472_v50  ;;  %v3955_v46 = vpack.c.bf16 %v2154_v43, %v2152_v42 }
 0x206   : > { %v1473_v56 = vmul.f32 0.2, %v1287_v52  ;;  %1803 = vmatprep.mubr.f32.mxu0 %v1536_v55  ;;  %vm1409_vm5 = vcmp.gt.f32.partialorder %v1287_v52, 0.0 }
 0x207   : > { %v1474_v58 = vmul.f32 0.2, %v1289_v54  ;;  %v1292_v59 = vpop.f32.mrb[36].mxu1  ;;  %1804 = vmatmul.mubr.f32.gmra.mrb[96].mxu0 %v1535_v57  ;;  %vm1410_vm4 = vcmp.gt.f32.partialorder %v1289_v54, 0.0  ;;  %3956 = vmatpush1.bf16.msra.mxu1 %v3955_v46 }
 0x208   : > { %v1293_v60 = vadd.f32 %v1292_v59, %v4857_v19  ;;  %v1294_v61 = vpop.f32.mrb[37].mxu1  ;;  %v1537_v33 = vsel %vm1409_vm5, %v1287_v52, %v1473_v56 }
 0x209   : > { %v1295_v62 = vadd.f32 %v1294_v61, %v4863_v22  ;;  %v1538_v63 = vsel %vm1410_vm4, %v1289_v54, %v1474_v58 }
 0x20a   : > { %v1475_v30 = vmul.f32 0.2, %v1293_v60  ;;  %1809 = vmatprep.mubr.f32.mxu0 %v1538_v63  ;;  %vm1411_vm7 = vcmp.gt.f32.partialorder %v1293_v60, 0.0 }
 0x20b   : > { %v1476_v0 = vmul.f32 0.2, %v1295_v62  ;;  %v1298_v1 = vpop.f32.mrb[38].mxu1  ;;  %1810 = vmatmul.mubr.f32.gmra.mrb[98].mxu0 %v1537_v33  ;;  %vm1412_vm6 = vcmp.gt.f32.partialorder %v1295_v62, 0.0 }
 0x20c   : > { %v1299_v3 = vadd.f32 %v1298_v1, %v4857_v19  ;;  %v1300_v4 = vpop.f32.mrb[39].mxu1  ;;  %v1539_v8 = vsel %vm1411_vm7, %v1293_v60, %v1475_v30 }
 0x20d   : > { %v1301_v5 = vadd.f32 %v1300_v4, %v4863_v22  ;;  %v1540_v6 = vsel %vm1412_vm6, %v1295_v62, %v1476_v0 }
 0x20e   : > { %v1477_v7 = vmul.f32 0.2, %v1299_v3  ;;  %1815 = vmatprep.mubr.f32.mxu0 %v1540_v6  ;;  %vm1413_vm9 = vcmp.gt.f32.partialorder %v1299_v3, 0.0 }
 0x20f   : > { %v1478_v2 = vmul.f32 0.2, %v1301_v5  ;;  %v1304_v9 = vpop.f32.mrb[40].mxu1  ;;  %1816 = vmatmul.mubr.f32.gmra.mrb[100].mxu0 %v1539_v8  ;;  %vm1414_vm8 = vcmp.gt.f32.partialorder %v1301_v5, 0.0 }
 0x210   : > { %v1305_v10 = vadd.f32 %v1304_v9, %v4857_v19  ;;  %v1306_v11 = vpop.f32.mrb[41].mxu1  ;;  %v1541_v15 = vsel %vm1413_vm9, %v1299_v3, %v1477_v7 }
 0x211   : > { %v1307_v12 = vadd.f32 %v1306_v11, %v4863_v22  ;;  %v1542_v13 = vsel %vm1414_vm8, %v1301_v5, %v1478_v2 }
 0x212   : > { %v1479_v14 = vmul.f32 0.2, %v1305_v10  ;;  %1821 = vmatprep.mubr.f32.mxu0 %v1542_v13  ;;  %vm1415_vm11 = vcmp.gt.f32.partialorder %v1305_v10, 0.0 }
 0x213   : > { %v1480_v16 = vmul.f32 0.2, %v1307_v12  ;;  %v1310_v17 = vpop.f32.mrb[42].mxu1  ;;  %1822 = vmatmul.mubr.f32.gmra.mrb[102].mxu0 %v1541_v15  ;;  %vm1416_vm10 = vcmp.gt.f32.partialorder %v1307_v12, 0.0 }
 0x214   : > { %v1311_v18 = vadd.f32 %v1310_v17, %v4857_v19  ;;  %v1312_v20 = vpop.f32.mrb[43].mxu1  ;;  %v1543_v27 = vsel %vm1415_vm11, %v1305_v10, %v1479_v14 }
 0x215   : > { %v1313_v21 = vadd.f32 %v1312_v20, %v4863_v22  ;;  %v1544_v23 = vsel %vm1416_vm10, %v1307_v12, %v1480_v16 }
 0x216   : > { %v1481_v25 = vmul.f32 0.2, %v1311_v18  ;;  %1827 = vmatprep.mubr.f32.mxu0 %v1544_v23  ;;  %vm1417_vm13 = vcmp.gt.f32.partialorder %v1311_v18, 0.0 }
 0x217   : > { %v1482_v28 = vmul.f32 0.2, %v1313_v21  ;;  %v1316_v29 = vpop.f32.mrb[44].mxu1  ;;  %1828 = vmatmul.mubr.f32.gmra.mrb[104].mxu0 %v1543_v27  ;;  %vm1418_vm12 = vcmp.gt.f32.partialorder %v1313_v21, 0.0 }
 0x218   : > { %v1317_v31 = vadd.f32 %v1316_v29, %v4857_v19  ;;  %v1318_v32 = vpop.f32.mrb[45].mxu1  ;;  %v1545_v37 = vsel %vm1417_vm13, %v1311_v18, %v1481_v25 }
 0x219   : > { %v1319_v34 = vadd.f32 %v1318_v32, %v4863_v22  ;;  %v1546_v35 = vsel %vm1418_vm12, %v1313_v21, %v1482_v28 }
 0x21a   : > { %v1483_v36 = vmul.f32 0.2, %v1317_v31  ;;  %1833 = vmatprep.mubr.f32.mxu0 %v1546_v35  ;;  %vm1419_vm15 = vcmp.gt.f32.partialorder %v1317_v31, 0.0 }
 0x21b   : > { %v1484_v38 = vmul.f32 0.2, %v1319_v34  ;;  %v1322_v39 = vpop.f32.mrb[46].mxu1  ;;  %1834 = vmatmul.mubr.f32.gmra.mrb[106].mxu0 %v1545_v37  ;;  %vm1420_vm14 = vcmp.gt.f32.partialorder %v1319_v34, 0.0 }
 0x21c   : > { %v1323_v40 = vadd.f32 %v1322_v39, %v4857_v19  ;;  %v1324_v41 = vpop.f32.mrb[47].mxu1  ;;  %v1547_v48 = vsel %vm1419_vm15, %v1317_v31, %v1483_v36 }
 0x21d   : > { %v1325_v44 = vadd.f32 %v1324_v41, %v4863_v22  ;;  %v1548_v45 = vsel %vm1420_vm14, %v1319_v34, %v1484_v38 }
 0x21e   : > { %v1485_v47 = vmul.f32 0.2, %v1323_v40  ;;  %1839 = vmatprep.mubr.f32.mxu0 %v1548_v45  ;;  %vm1421_vm1 = vcmp.gt.f32.partialorder %v1323_v40, 0.0 }
 0x21f   : > { %v1486_v49 = vmul.f32 0.2, %v1325_v44  ;;  %v1328_v50 = vpop.f32.mrb[48].mxu1  ;;  %1840 = vmatmul.mubr.f32.gmra.mrb[108].mxu0 %v1547_v48  ;;  %vm1422_vm0 = vcmp.gt.f32.partialorder %v1325_v44, 0.0 }
 0x220   : > { %v1329_v51 = vadd.f32 %v1328_v50, %v4857_v19  ;;  %v1330_v52 = vpop.f32.mrb[49].mxu1  ;;  %v1549_v56 = vsel %vm1421_vm1, %v1323_v40, %v1485_v47 }
 0x221   : > { %v1331_v53 = vadd.f32 %v1330_v52, %v4863_v22  ;;  %v1550_v54 = vsel %vm1422_vm0, %v1325_v44, %v1486_v49 }
 0x222   : > { %v1487_v55 = vmul.f32 0.2, %v1329_v51  ;;  %1845 = vmatprep.mubr.f32.mxu0 %v1550_v54  ;;  %vm1423_vm3 = vcmp.gt.f32.partialorder %v1329_v51, 0.0 }
 0x223   : > { %v1488_v57 = vmul.f32 0.2, %v1331_v53  ;;  %v1334_v58 = vpop.f32.mrb[50].mxu1  ;;  %1846 = vmatmul.mubr.f32.gmra.mrb[110].mxu0 %v1549_v56  ;;  %vm1424_vm2 = vcmp.gt.f32.partialorder %v1331_v53, 0.0  ;;  %v2618_v56 = vld [vmem:[%s5770_s9 + $0x8] sm:$0xff] }
 0x224   : > { %v1335_v59 = vadd.f32 %v1334_v58, %v4857_v19  ;;  %v1336_v60 = vpop.f32.mrb[51].mxu1  ;;  %v1551_v30 = vsel %vm1423_vm3, %v1329_v51, %v1487_v55  ;;  %v2619_v58 = vld [vmem:[%s5770_s9 + $0x10] sm:$0xff] }
 0x225   : > { %v1337_v61 = vadd.f32 %v1336_v60, %v4863_v22  ;;  %v1552_v62 = vsel %vm1424_vm2, %v1331_v53, %v1488_v57  ;;  %v2622_v60 = vld [vmem:[%s5770_s9 + $0x28] sm:$0xff] }
 0x226   : > { %v1489_v63 = vmul.f32 0.2, %v1335_v59  ;;  %1851 = vmatprep.mubr.f32.mxu0 %v1552_v62  ;;  %vm1425_vm5 = vcmp.gt.f32.partialorder %v1335_v59, 0.0  ;;  %v2621_v62 = vld [vmem:[%s5770_s9 + $0x20] sm:$0xff] }
 0x227   : > { %v1490_v33 = vmul.f32 0.2, %v1337_v61  ;;  %v1340_v0 = vpop.f32.mrb[52].mxu1  ;;  %1852 = vmatmul.mubr.f32.gmra.mrb[112].mxu0 %v1551_v30  ;;  %vm1426_vm4 = vcmp.gt.f32.partialorder %v1337_v61, 0.0  ;;  %v2623_v30 = vld [vmem:[%s5770_s9 + $0x30] sm:$0xff] }
 0x228   : > { %v1341_v1 = vadd.f32 %v1340_v0, %v4857_v19  ;;  %v1342_v3 = vpop.f32.mrb[53].mxu1  ;;  %v1553_v7 = vsel %vm1425_vm5, %v1335_v59, %v1489_v63  ;;  %v2626_v0 = vld [vmem:[%s5770_s9 + $0x48] sm:$0xff] }
 0x229   : > { %v1343_v4 = vadd.f32 %v1342_v3, %v4863_v22  ;;  %v1554_v5 = vsel %vm1426_vm4, %v1337_v61, %v1490_v33  ;;  %v2624_v61 = vld [vmem:[%s5770_s9 + $0x38] sm:$0xff]  ;;  %v3963_v33 = vpack.c.bf16 %v2623_v30, %v2621_v62  ;;  %v2625_v3 = vld [vmem:[%s5770_s9 + $0x40] sm:$0xff]  ;;  %v2647_v62 = vld [vmem:[%s5770_s9 + $0xf0] sm:$0xff] }
 0x22a   : > { %v1491_v6 = vmul.f32 0.2, %v1341_v1  ;;  %1857 = vmatprep.mubr.f32.mxu0 %v1554_v5  ;;  %vm1427_vm7 = vcmp.gt.f32.partialorder %v1341_v1, 0.0  ;;  %v3961_v63 = vpack.c.bf16 %v2624_v61, %v2622_v60  ;;  %v2627_v5 = vld [vmem:[%s5770_s9 + $0x50] sm:$0xff]  ;;  %v2645_v61 = vld [vmem:[%s5770_s9 + $0xe0] sm:$0xff] }
 0x22b   : > { %v1492_v8 = vmul.f32 0.2, %v1343_v4  ;;  %v1346_v2 = vpop.f32.mrb[54].mxu1  ;;  %1858 = vmatmul.mubr.f32.gmra.mrb[114].mxu0 %v1553_v7  ;;  %vm1428_vm6 = vcmp.gt.f32.partialorder %v1343_v4, 0.0  ;;  %v1631_v7 = vld [vmem:[%s5767_s6] sm:$0x3] }
 0x22c   : > { %v1347_v9 = vadd.f32 %v1346_v2, %v4857_v19  ;;  %v1348_v10 = vpop.f32.mrb[55].mxu1  ;;  %v1555_v14 = vsel %vm1427_vm7, %v1341_v1, %v1491_v6  ;;  %v2628_v1 = vld [vmem:[%s5770_s9 + $0x58] sm:$0xff]  ;;  %v3967_v6 = vpack.c.bf16 %v2627_v5, %v2625_v3 }
 0x22d   : > { %v1349_v11 = vadd.f32 %v1348_v10, %v4863_v22  ;;  %v1556_v12 = vsel %vm1428_vm6, %v1343_v4, %v1492_v8  ;;  %v3965_v4 = vpack.c.bf16 %v2628_v1, %v2626_v0  ;;  %v2630_v8 = vld [vmem:[%s5770_s9 + $0x68] sm:$0xff]  ;;  %v2632_v2 = vld [vmem:[%s5770_s9 + $0x78] sm:$0xff]  ;;  %v5124_v10 = vrot.slane %v1631_v7, %v4573_v24 }
 0x22e   : > { %v1493_v13 = vmul.f32 0.2, %v1347_v9  ;;  %1863 = vmatprep.mubr.f32.mxu0 %v1556_v12  ;;  %vm1429_vm9 = vcmp.gt.f32.partialorder %v1347_v9, 0.0  ;;  %v2631_v12 = vld [vmem:[%s5770_s9 + $0x70] sm:$0xff]  ;;  %v2652_v0 = vld [vmem:[%s5770_s9 + $0x118] sm:$0xff] }
 0x22f   : > { %v1494_v15 = vmul.f32 0.2, %v1349_v11  ;;  %v1352_v16 = vpop.f32.mrb[56].mxu1  ;;  %1864 = vmatmul.mubr.f32.gmra.mrb[116].mxu0 %v1555_v14  ;;  %vm1430_vm8 = vcmp.gt.f32.partialorder %v1349_v11, 0.0 }
 0x230   : > { %v1353_v17 = vadd.f32 %v1352_v16, %v4857_v19  ;;  %v1354_v18 = vpop.f32.mrb[57].mxu1  ;;  %v1557_v25 = vsel %vm1429_vm9, %v1347_v9, %v1493_v13  ;;  %v2629_v9 = vld [vmem:[%s5770_s9 + $0x60] sm:$0xff]  ;;  %v5130_v13 = vrot.slane %v1631_v7, %v4578_v26  ;;  %v2634_v16 = vld [vmem:[%s5770_s9 + $0x88] sm:$0xff] }
 0x231   : > { %v1355_v20 = vadd.f32 %v1354_v18, %v4863_v22  ;;  %v1558_v21 = vsel %vm1430_vm8, %v1349_v11, %v1494_v15  ;;  %v3969_v11 = vpack.c.bf16 %v2632_v2, %v2630_v8  ;;  %v3971_v14 = vpack.c.bf16 %v2631_v12, %v2629_v9  ;;  %v2649_v9 = vld [vmem:[%s5770_s9 + $0x100] sm:$0xff]  ;;  %v2654_v12 = vld [vmem:[%s5770_s9 + $0x128] sm:$0xff] }
 0x232   : > { %v1495_v23 = vmul.f32 0.2, %v1353_v17  ;;  %1869 = vmatprep.mubr.f32.mxu0 %v1558_v21  ;;  %vm1431_vm11 = vcmp.gt.f32.partialorder %v1353_v17, 0.0 }
 0x233   : > { %v1496_v27 = vmul.f32 0.2, %v1355_v20  ;;  %v1358_v28 = vpop.f32.mrb[58].mxu1  ;;  %1870 = vmatmul.mubr.f32.gmra.mrb[118].mxu0 %v1557_v25  ;;  %vm1432_vm10 = vcmp.gt.f32.partialorder %v1355_v20, 0.0 }
 0x234   : > { %v1359_v29 = vadd.f32 %v1358_v28, %v4857_v19  ;;  %v1360_v31 = vpop.f32.mrb[59].mxu1  ;;  %v1559_v36 = vsel %vm1431_vm11, %v1353_v17, %v1495_v23  ;;  %v2636_v17 = vld [vmem:[%s5770_s9 + $0x98] sm:$0xff]  ;;  %v2635_v28 = vld [vmem:[%s5770_s9 + $0x90] sm:$0xff] }
 0x235   : > { %v1361_v32 = vadd.f32 %v1360_v31, %v4863_v22  ;;  %v1560_v34 = vsel %vm1432_vm10, %v1355_v20, %v1496_v27  ;;  %v3973_v21 = vpack.c.bf16 %v2636_v17, %v2634_v16  ;;  %v2633_v27 = vld [vmem:[%s5770_s9 + $0x80] sm:$0xff]  ;;  %v2656_v16 = vld [vmem:[%s5770_s9 + $0x138] sm:$0xff] }
 0x236   : > { %v1497_v35 = vmul.f32 0.2, %v1359_v29  ;;  %1875 = vmatprep.mubr.f32.mxu0 %v1560_v34  ;;  %vm1433_vm13 = vcmp.gt.f32.partialorder %v1359_v29, 0.0  ;;  %v2638_v34 = vld [vmem:[%s5770_s9 + $0xa8] sm:$0xff] }
 0x237   : > { %v1498_v37 = vmul.f32 0.2, %v1361_v32  ;;  %v1364_v38 = vpop.f32.mrb[60].mxu1  ;;  %1876 = vmatmul.mubr.f32.gmra.mrb[120].mxu0 %v1559_v36  ;;  %vm1434_vm12 = vcmp.gt.f32.partialorder %v1361_v32, 0.0 }
 0x238   : > { %v1365_v39 = vadd.f32 %v1364_v38, %v4857_v19  ;;  %v1366_v40 = vpop.f32.mrb[61].mxu1  ;;  %v1561_v44 = vsel %vm1433_vm13, %v1359_v29, %v1497_v35  ;;  %v2640_v35 = vld [vmem:[%s5770_s9 + $0xb8] sm:$0xff] }
 0x239   : > { %v1367_v41 = vadd.f32 %v1366_v40, %v4863_v22  ;;  %v1562_v42 = vsel %vm1434_vm12, %v1361_v32, %v1498_v37  ;;  %v3975_v32 = vpack.c.bf16 %v2635_v28, %v2633_v27  ;;  %v3977_v38 = vpack.c.bf16 %v2640_v35, %v2638_v34  ;;  %v2639_v40 = vld [vmem:[%s5770_s9 + $0xb0] sm:$0xff] }
 0x23a   : > { %v1499_v43 = vmul.f32 0.2, %v1365_v39  ;;  %1881 = vmatprep.mubr.f32.mxu0 %v1562_v42  ;;  %vm1435_vm15 = vcmp.gt.f32.partialorder %v1365_v39, 0.0  ;;  %v3993_v28 = vpack.c.bf16 %v2656_v16, %v2654_v12 }
 0x23b   : > { %v1500_v45 = vmul.f32 0.2, %v1367_v41  ;;  %v1370_v46 = vpop.f32.mrb[62].mxu1  ;;  %1882 = vmatmul.mubr.f32.gmra.mrb[122].mxu0 %v1561_v44  ;;  %vm1436_vm14 = vcmp.gt.f32.partialorder %v1367_v41, 0.0 }
 0x23c   : > { %v1371_v47 = vadd.f32 %v1370_v46, %v4857_v19  ;;  %v1372_v48 = vpop.f32.mrb[63].mxu1  ;;  %v1563_v52 = vsel %vm1435_vm15, %v1365_v39, %v1499_v43  ;;  %v2620_v19 = vld [vmem:[%s5770_s9 + $0x18] sm:$0xff]  ;;  %v2637_v39 = vld [vmem:[%s5770_s9 + $0xa0] sm:$0xff] }
 0x23d   : > { %v1373_v49 = vadd.f32 %v1372_v48, %v4863_v22  ;;  %v1564_v50 = vsel %vm1436_vm14, %v1367_v41, %v1500_v45  ;;  %v2617_v22 = vld [vmem:[%s5770_s9] sm:$0xff]  ;;  %v3957_v57 = vpack.c.bf16 %v2620_v19, %v2618_v56  ;;  %v2642_v41 = vld [vmem:[%s5770_s9 + $0xc8] sm:$0xff]  ;;  %v3979_v44 = vpack.c.bf16 %v2639_v40, %v2637_v39  ;;  %v2644_v45 = vld [vmem:[%s5770_s9 + $0xd8] sm:$0xff] }
 0x23e   : > { %v1501_v51 = vmul.f32 0.2, %v1371_v47  ;;  %1887 = vmatprep.mubr.f32.mxu0 %v1564_v50  ;;  %vm1437_vm1 = vcmp.gt.f32.partialorder %v1371_v47, 0.0  ;;  %v3959_v59 = vpack.c.bf16 %v2619_v58, %v2617_v22  ;;  %v3981_v48 = vpack.c.bf16 %v2644_v45, %v2642_v41  ;;  %v2643_v50 = vld [vmem:[%s5770_s9 + $0xd0] sm:$0xff]  ;;  %v2657_v45 = vld [vmem:[%s5770_s9 + $0x140] sm:$0xff] }
 0x23f   : > { %v1502_v53 = vmul.f32 0.2, %v1373_v49  ;;  %1888 = vmatmul.mubr.f32.gmra.mrb[124].mxu0 %v1563_v52  ;;  %vm1438_vm0 = vcmp.gt.f32.partialorder %v1373_v49, 0.0  ;;  %3958 = vmatprep.subr.bf16.mxu0 %v3957_v57 }
 0x240   : > { %v1565_v55 = vsel %vm1437_vm1, %v1371_v47, %v1501_v51  ;;  %3960 = vmatpush1.bf16.msra.mxu0 %v3959_v59 }
 0x241   : > { %v1566_v54 = vsel %vm1438_vm0, %v1373_v49, %v1502_v53  ;;  %3962 = vmatprep.subr.bf16.mxu0 %v3961_v63  ;;  %v2641_v49 = vld [vmem:[%s5770_s9 + $0xc0] sm:$0xff]  ;;  %v2646_v53 = vld [vmem:[%s5770_s9 + $0xe8] sm:$0xff] }
 0x242   : > { %1893 = vmatprep.mubr.f32.mxu0 %v1566_v54  ;;  %v2648_v54 = vld [vmem:[%s5770_s9 + $0xf8] sm:$0xff]  ;;  %v3983_v57 = vpack.c.bf16 %v2643_v50, %v2641_v49  ;;  %v2650_v63 = vld [vmem:[%s5770_s9 + $0x108] sm:$0xff] }
 0x243   : > { %1894 = vmatmul.mubr.f32.gmra.mrb[126].mxu0 %v1565_v55  ;;  %v3985_v60 = vpack.c.bf16 %v2648_v54, %v2646_v53  ;;  %v3989_v2 = vpack.c.bf16 %v2652_v0, %v2650_v63  ;;  %v2664_v50 = vld [vmem:[%s5770_s9 + $0x178] sm:$0xff] }
 0x244   : > { %3964 = vmatpush1.bf16.msra.mxu0 %v3963_v33 }
 0x245   : > { %3966 = vmatprep.subr.bf16.mxu0 %v3965_v4 }
 0x248   : > { %3968 = vmatpush1.bf16.msra.mxu0 %v3967_v6  ;;  %v3987_v6 = vpack.c.bf16 %v2647_v62, %v2645_v61  ;;  %v2668_v62 = vld [vmem:[%s5770_s9 + $0x198] sm:$0xff] }
 0x249   : > { %3970 = vmatprep.subr.bf16.mxu0 %v3969_v11  ;;  %v2651_v11 = vld [vmem:[%s5770_s9 + $0x110] sm:$0xff] }
 0x24c   : > { %3972 = vmatpush1.bf16.msra.mxu0 %v3971_v14 }
 0x24d   : > { %3974 = vmatprep.subr.bf16.mxu0 %v3973_v21 }
 0x250   : > { %3976 = vmatpush1.bf16.msra.mxu0 %v3975_v32  ;;  %v2658_v32 = vld [vmem:[%s5770_s9 + $0x148] sm:$0xff] }
 0x251   : > { %3978 = vmatprep.subr.bf16.mxu0 %v3977_v38 }
 0x254   : > { %3980 = vmatpush1.bf16.msra.mxu0 %v3979_v44 }
 0x255   : > { %3982 = vmatprep.subr.bf16.mxu0 %v3981_v48 }
 0x258   : > { %3984 = vmatpush1.bf16.msra.mxu0 %v3983_v57  ;;  %v2661_v57 = vld [vmem:[%s5770_s9 + $0x160] sm:$0xff] }
 0x259   : > { %3986 = vmatprep.subr.bf16.mxu0 %v3985_v60 }
 0x25c   : > { %3988 = vmatpush1.bf16.msra.mxu0 %v3987_v6  ;;  %v2665_v6 = vld [vmem:[%s5770_s9 + $0x180] sm:$0xff] }
 0x25d   : > { %3990 = vmatprep.subr.bf16.mxu0 %v3989_v2 }
 0x29a   : > { %v1709_v15 = vpop.f32.mrb[64].mxu0 }
 0x29b   : > { %v1710_v18 = vadd.f32 %v1709_v15, %v5124_v10  ;;  %v1711_v20 = vpop.f32.mrb[65].mxu0 }
 0x29c   : > { %v1712_v23 = vadd.f32 %v1711_v20, %v5130_v13 }
 0x29d   : > { %vm1900_vm2 = vcmp.gt.f32.partialorder %v1710_v18, 0.0  ;;  %v1964_v25 = vmul.f32 0.2, %v1710_v18 }
 0x29e   : > { %v1965_v29 = vmul.f32 0.2, %v1712_v23  ;;  %v1715_v31 = vpop.f32.mrb[66].mxu0  ;;  %vm1901_vm3 = vcmp.gt.f32.partialorder %v1712_v23, 0.0 }
 0x29f   : > { %v1716_v36 = vadd.f32 %v1715_v31, %v5124_v10  ;;  %v1717_v37 = vpop.f32.mrb[67].mxu0  ;;  %v2028_v46 = vsel %vm1900_vm2, %v1710_v18, %v1964_v25  ;;  %v2655_v31 = vld [vmem:[%s5770_s9 + $0x130] sm:$0xff] }
 0x2a0   : > { %v1718_v42 = vadd.f32 %v1717_v37, %v5130_v13  ;;  %v2029_v43 = vsel %vm1901_vm3, %v1712_v23, %v1965_v29  ;;  %v3991_v23 = vpack.c.bf16 %v2651_v11, %v2649_v9  ;;  %v2653_v29 = vld [vmem:[%s5770_s9 + $0x120] sm:$0xff]  ;;  %v2672_v11 = vld [vmem:[%s5770_s9 + $0x1b8] sm:$0xff] }
 0x2a1   : > { %v1966_v47 = vmul.f32 0.2, %v1716_v36  ;;  %2232 = vmatprep.mubr.f32.mxu1 %v2029_v43  ;;  %vm1902_vm4 = vcmp.gt.f32.partialorder %v1716_v36, 0.0  ;;  %v3995_v41 = vpack.c.bf16 %v2655_v31, %v2653_v29  ;;  %v2676_v31 = vld [vmem:[%s5770_s9 + $0x1d8] sm:$0xff] }
 0x2a2   : > { %v1967_v51 = vmul.f32 0.2, %v1718_v42  ;;  %v1721_v52 = vpop.f32.mrb[68].mxu0  ;;  %2233 = vmatmul.mubr.f32.vlgmr.msra.gmra.mrb[64].mxu1 %v2028_v46  ;;  %vm1903_vm5 = vcmp.gt.f32.partialorder %v1718_v42, 0.0  ;;  %3992 = vmatpush1.bf16.msra.mxu0 %v3991_v23  ;;  %v2659_v46 = vld [vmem:[%s5770_s9 + $0x150] sm:$0xff]  ;;  %v2669_v23 = vld [vmem:[%s5770_s9 + $0x1a0] sm:$0xff] }
 0x2a3   : > { %v1722_v55 = vadd.f32 %v1721_v52, %v5124_v10  ;;  %v1723_v56 = vpop.f32.mrb[69].mxu0  ;;  %v2030_v59 = vsel %vm1902_vm4, %v1716_v36, %v1966_v47  ;;  %v2660_v36 = vld [vmem:[%s5770_s9 + $0x158] sm:$0xff]  ;;  %3994 = vmatprep.subr.bf16.mxu0 %v3993_v28  ;;  %v2662_v47 = vld [vmem:[%s5770_s9 + $0x168] sm:$0xff] }
 0x2a4   : > { %v1724_v19 = vadd.f32 %v1723_v56, %v5130_v13  ;;  %v2031_v22 = vsel %vm1903_vm5, %v1718_v42, %v1967_v51  ;;  %v3997_v44 = vpack.c.bf16 %v2660_v36, %v2658_v32 }
 0x2a5   : > { %v1968_v58 = vmul.f32 0.2, %v1722_v55  ;;  %2238 = vmatprep.mubr.f32.mxu1 %v2031_v22  ;;  %vm1904_vm7 = vcmp.gt.f32.partialorder %v1722_v55, 0.0  ;;  %v4001_v22 = vpack.c.bf16 %v2664_v50, %v2662_v47 }
 0x2a6   : > { %v1969_v30 = vmul.f32 0.2, %v1724_v19  ;;  %v1727_v33 = vpop.f32.mrb[70].mxu0  ;;  %2239 = vmatmul.mubr.f32.gmra.mrb[66].mxu1 %v2030_v59  ;;  %vm1905_vm6 = vcmp.gt.f32.partialorder %v1724_v19, 0.0  ;;  %3996 = vmatpush1.bf16.msra.mxu0 %v3995_v41  ;;  %v2666_v59 = vld [vmem:[%s5770_s9 + $0x188] sm:$0xff]  ;;  %v2673_v41 = vld [vmem:[%s5770_s9 + $0x1c0] sm:$0xff] }
 0x2a7   : > { %v1728_v1 = vadd.f32 %v1727_v33, %v5124_v10  ;;  %v1729_v3 = vpop.f32.mrb[71].mxu0  ;;  %v2032_v8 = vsel %vm1904_vm7, %v1722_v55, %v1968_v58  ;;  %v3999_v55 = vpack.c.bf16 %v2659_v46, %v2657_v45  ;;  %3998 = vmatprep.subr.bf16.mxu0 %v3997_v44  ;;  %v2663_v58 = vld [vmem:[%s5770_s9 + $0x170] sm:$0xff]  ;;  %v2680_v46 = vld [vmem:[%s5770_s9 + $0x1f8] sm:$0xff] }
 0x2a8   : > { %v1730_v4 = vadd.f32 %v1729_v3, %v5130_v13  ;;  %v2033_v5 = vsel %vm1905_vm6, %v1724_v19, %v1969_v30 }
 0x2a9   : > { %v1970_v7 = vmul.f32 0.2, %v1728_v1  ;;  %2244 = vmatprep.mubr.f32.mxu1 %v2033_v5  ;;  %vm1906_vm9 = vcmp.gt.f32.partialorder %v1728_v1, 0.0  ;;  %v4005_v5 = vpack.c.bf16 %v2668_v62, %v2666_v59 }
 0x2aa   : > { %v1971_v14 = vmul.f32 0.2, %v1730_v4  ;;  %v1733_v15 = vpop.f32.mrb[72].mxu0  ;;  %2245 = vmatmul.mubr.f32.gmra.mrb[68].mxu1 %v2032_v8  ;;  %vm1907_vm8 = vcmp.gt.f32.partialorder %v1730_v4, 0.0  ;;  %4000 = vmatpush1.bf16.msra.mxu0 %v3999_v55  ;;  %v2670_v8 = vld [vmem:[%s5770_s9 + $0x1a8] sm:$0xff] }
 0x2ab   : > { %v1734_v17 = vadd.f32 %v1733_v15, %v5124_v10  ;;  %v1735_v18 = vpop.f32.mrb[73].mxu0  ;;  %v2034_v27 = vsel %vm1906_vm9, %v1728_v1, %v1970_v7  ;;  %v4003_v1 = vpack.c.bf16 %v2663_v58, %v2661_v57  ;;  %4002 = vmatprep.subr.bf16.mxu0 %v4001_v22  ;;  %v2667_v7 = vld [vmem:[%s5770_s9 + $0x190] sm:$0xff] }
 0x2ac   : > { %v1736_v20 = vadd.f32 %v1735_v18, %v5130_v13  ;;  %v2035_v21 = vsel %vm1907_vm8, %v1730_v4, %v1971_v14 }
 0x2ad   : > { %v1972_v25 = vmul.f32 0.2, %v1734_v17  ;;  %2250 = vmatprep.mubr.f32.mxu1 %v2035_v21  ;;  %vm1908_vm11 = vcmp.gt.f32.partialorder %v1734_v17, 0.0  ;;  %v4009_v21 = vpack.c.bf16 %v2672_v11, %v2670_v8 }
 0x2ae   : > { %v1973_v34 = vmul.f32 0.2, %v1736_v20  ;;  %v1739_v35 = vpop.f32.mrb[74].mxu0  ;;  %2251 = vmatmul.mubr.f32.gmra.mrb[70].mxu1 %v2034_v27  ;;  %vm1909_vm10 = vcmp.gt.f32.partialorder %v1736_v20, 0.0  ;;  %4004 = vmatpush1.bf16.msra.mxu0 %v4003_v1  ;;  %v2674_v27 = vld [vmem:[%s5770_s9 + $0x1c8] sm:$0xff] }
 0x2af   : > { %v1740_v37 = vadd.f32 %v1739_v35, %v5124_v10  ;;  %v1741_v38 = vpop.f32.mrb[75].mxu0  ;;  %v2036_v43 = vsel %vm1908_vm11, %v1734_v17, %v1972_v25  ;;  %v4007_v17 = vpack.c.bf16 %v2667_v7, %v2665_v6  ;;  %4006 = vmatprep.subr.bf16.mxu0 %v4005_v5  ;;  %v2671_v25 = vld [vmem:[%s5770_s9 + $0x1b0] sm:$0xff] }
 0x2b0   : > { %v1742_v39 = vadd.f32 %v1741_v38, %v5130_v13  ;;  %v2037_v40 = vsel %vm1909_vm10, %v1736_v20, %v1973_v34 }
 0x2b1   : > { %v1974_v42 = vmul.f32 0.2, %v1740_v37  ;;  %2256 = vmatprep.mubr.f32.mxu1 %v2037_v40  ;;  %vm1910_vm13 = vcmp.gt.f32.partialorder %v1740_v37, 0.0  ;;  %v4013_v40 = vpack.c.bf16 %v2676_v31, %v2674_v27 }
 0x2b2   : > { %v1975_v48 = vmul.f32 0.2, %v1742_v39  ;;  %v1745_v49 = vpop.f32.mrb[76].mxu0  ;;  %2257 = vmatmul.mubr.f32.gmra.mrb[72].mxu1 %v2036_v43  ;;  %vm1911_vm12 = vcmp.gt.f32.partialorder %v1742_v39, 0.0  ;;  %4008 = vmatpush1.bf16.msra.mxu0 %v4007_v17  ;;  %v2678_v43 = vld [vmem:[%s5770_s9 + $0x1e8] sm:$0xff] }
 0x2b3   : > { %v1746_v51 = vadd.f32 %v1745_v49, %v5124_v10  ;;  %v1747_v52 = vpop.f32.mrb[77].mxu0  ;;  %v2038_v19 = vsel %vm1910_vm13, %v1740_v37, %v1974_v42  ;;  %v4011_v37 = vpack.c.bf16 %v2671_v25, %v2669_v23  ;;  %4010 = vmatprep.subr.bf16.mxu0 %v4009_v21  ;;  %v2675_v42 = vld [vmem:[%s5770_s9 + $0x1d0] sm:$0xff] }
 0x2b4   : > { %v1748_v53 = vadd.f32 %v1747_v52, %v5130_v13  ;;  %v2039_v54 = vsel %vm1911_vm12, %v1742_v39, %v1975_v48 }
 0x2b5   : > { %v1976_v56 = vmul.f32 0.2, %v1746_v51  ;;  %2262 = vmatprep.mubr.f32.mxu1 %v2039_v54  ;;  %vm1912_vm15 = vcmp.gt.f32.partialorder %v1746_v51, 0.0  ;;  %v4017_v54 = vpack.c.bf16 %v2680_v46, %v2678_v43 }
 0x2b6   : > { %v1977_v60 = vmul.f32 0.2, %v1748_v53  ;;  %v1751_v61 = vpop.f32.mrb[78].mxu0  ;;  %2263 = vmatmul.mubr.f32.gmra.mrb[74].mxu1 %v2038_v19  ;;  %vm1913_vm14 = vcmp.gt.f32.partialorder %v1748_v53, 0.0  ;;  %4012 = vmatpush1.bf16.msra.mxu0 %v4011_v37 }
 0x2b7   : > { %v1752_v63 = vadd.f32 %v1751_v61, %v5124_v10  ;;  %v1753_v30 = vpop.f32.mrb[79].mxu0  ;;  %v2040_v4 = vsel %vm1912_vm15, %v1746_v51, %v1976_v56  ;;  %v4015_v51 = vpack.c.bf16 %v2675_v42, %v2673_v41  ;;  %4014 = vmatprep.subr.bf16.mxu0 %v4013_v40 }
 0x2b8   : > { %v1754_v33 = vadd.f32 %v1753_v30, %v5130_v13  ;;  %v2041_v0 = vsel %vm1913_vm14, %v1748_v53, %v1977_v60 }
 0x2b9   : > { %v1978_v3 = vmul.f32 0.2, %v1752_v63  ;;  %2268 = vmatprep.mubr.f32.mxu1 %v2041_v0  ;;  %vm1914_vm1 = vcmp.gt.f32.partialorder %v1752_v63, 0.0 }
 0x2ba   : > { %v1979_v2 = vmul.f32 0.2, %v1754_v33  ;;  %v1757_v9 = vpop.f32.mrb[80].mxu0  ;;  %2269 = vmatmul.mubr.f32.gmra.mrb[76].mxu1 %v2040_v4  ;;  %vm1915_vm0 = vcmp.gt.f32.partialorder %v1754_v33, 0.0  ;;  %4016 = vmatpush1.bf16.msra.mxu0 %v4015_v51 }
 0x2bb   : > { %v1758_v12 = vadd.f32 %v1757_v9, %v5124_v10  ;;  %v1759_v14 = vpop.f32.mrb[81].mxu0  ;;  %v2042_v20 = vsel %vm1914_vm1, %v1752_v63, %v1978_v3  ;;  %4018 = vmatprep.subr.bf16.mxu0 %v4017_v54 }
 0x2bc   : > { %v1760_v15 = vadd.f32 %v1759_v14, %v5130_v13  ;;  %v2043_v16 = vsel %vm1915_vm0, %v1754_v33, %v1979_v2 }
 0x2bd   : > { %v1980_v18 = vmul.f32 0.2, %v1758_v12  ;;  %2274 = vmatprep.mubr.f32.mxu1 %v2043_v16  ;;  %vm1916_vm3 = vcmp.gt.f32.partialorder %v1758_v12, 0.0 }
 0x2be   : > { %v1981_v28 = vmul.f32 0.2, %v1760_v15  ;;  %v1763_v29 = vpop.f32.mrb[82].mxu0  ;;  %2275 = vmatmul.mubr.f32.gmra.mrb[78].mxu1 %v2042_v20  ;;  %vm1917_vm2 = vcmp.gt.f32.partialorder %v1760_v15, 0.0 }
 0x2bf   : > { %v1764_v32 = vadd.f32 %v1763_v29, %v5124_v10  ;;  %v1765_v34 = vpop.f32.mrb[83].mxu0  ;;  %v2044_v39 = vsel %vm1916_vm3, %v1758_v12, %v1980_v18 }
 0x2c0   : > { %v1766_v35 = vadd.f32 %v1765_v34, %v5130_v13  ;;  %v2045_v36 = vsel %vm1917_vm2, %v1760_v15, %v1981_v28 }
 0x2c1   : > { %v1982_v38 = vmul.f32 0.2, %v1764_v32  ;;  %2280 = vmatprep.mubr.f32.mxu1 %v2045_v36  ;;  %vm1918_vm5 = vcmp.gt.f32.partialorder %v1764_v32, 0.0 }
 0x2c2   : > { %v1983_v44 = vmul.f32 0.2, %v1766_v35  ;;  %v1769_v45 = vpop.f32.mrb[84].mxu0  ;;  %2281 = vmatmul.mubr.f32.gmra.mrb[80].mxu1 %v2044_v39  ;;  %vm1919_vm4 = vcmp.gt.f32.partialorder %v1766_v35, 0.0 }
 0x2c3   : > { %v1770_v47 = vadd.f32 %v1769_v45, %v5124_v10  ;;  %v1771_v48 = vpop.f32.mrb[85].mxu0  ;;  %v2046_v53 = vsel %vm1918_vm5, %v1764_v32, %v1982_v38 }
 0x2c4   : > { %v1772_v49 = vadd.f32 %v1771_v48, %v5130_v13  ;;  %v2047_v50 = vsel %vm1919_vm4, %v1766_v35, %v1983_v44 }
 0x2c5   : > { %v1984_v52 = vmul.f32 0.2, %v1770_v47  ;;  %2286 = vmatprep.mubr.f32.mxu1 %v2047_v50  ;;  %vm1920_vm7 = vcmp.gt.f32.partialorder %v1770_v47, 0.0 }
 0x2c6   : > { %v1985_v55 = vmul.f32 0.2, %v1772_v49  ;;  %v1775_v56 = vpop.f32.mrb[86].mxu0  ;;  %2287 = vmatmul.mubr.f32.gmra.mrb[82].mxu1 %v2046_v53  ;;  %vm1921_vm6 = vcmp.gt.f32.partialorder %v1772_v49, 0.0 }
 0x2c7   : > { %v1776_v19 = vadd.f32 %v1775_v56, %v5124_v10  ;;  %v1777_v22 = vpop.f32.mrb[87].mxu0  ;;  %v2048_v60 = vsel %vm1920_vm7, %v1770_v47, %v1984_v52 }
 0x2c8   : > { %v1778_v57 = vadd.f32 %v1777_v22, %v5130_v13  ;;  %v2049_v58 = vsel %vm1921_vm6, %v1772_v49, %v1985_v55 }
 0x2c9   : > { %v1986_v59 = vmul.f32 0.2, %v1776_v19  ;;  %2292 = vmatprep.mubr.f32.mxu1 %v2049_v58  ;;  %vm1922_vm9 = vcmp.gt.f32.partialorder %v1776_v19, 0.0 }
 0x2ca   : > { %v1987_v61 = vmul.f32 0.2, %v1778_v57  ;;  %v1781_v62 = vpop.f32.mrb[88].mxu0  ;;  %2293 = vmatmul.mubr.f32.gmra.mrb[84].mxu1 %v2048_v60  ;;  %vm1923_vm8 = vcmp.gt.f32.partialorder %v1778_v57, 0.0 }
 0x2cb   : > { %v1782_v63 = vadd.f32 %v1781_v62, %v5124_v10  ;;  %v1783_v30 = vpop.f32.mrb[89].mxu0  ;;  %v2050_v3 = vsel %vm1922_vm9, %v1776_v19, %v1986_v59 }
 0x2cc   : > { %v1784_v33 = vadd.f32 %v1783_v30, %v5130_v13  ;;  %v2051_v0 = vsel %vm1923_vm8, %v1778_v57, %v1987_v61 }
 0x2cd   : > { %v1988_v1 = vmul.f32 0.2, %v1782_v63  ;;  %2298 = vmatprep.mubr.f32.mxu1 %v2051_v0  ;;  %vm1924_vm11 = vcmp.gt.f32.partialorder %v1782_v63, 0.0 }
 0x2ce   : > { %v1989_v4 = vmul.f32 0.2, %v1784_v33  ;;  %v1787_v5 = vpop.f32.mrb[90].mxu0  ;;  %2299 = vmatmul.mubr.f32.gmra.mrb[86].mxu1 %v2050_v3  ;;  %vm1925_vm10 = vcmp.gt.f32.partialorder %v1784_v33, 0.0 }
 0x2cf   : > { %v1788_v6 = vadd.f32 %v1787_v5, %v5124_v10  ;;  %v1789_v7 = vpop.f32.mrb[91].mxu0  ;;  %v2052_v11 = vsel %vm1924_vm11, %v1782_v63, %v1988_v1 }
 0x2d0   : > { %v1790_v8 = vadd.f32 %v1789_v7, %v5130_v13  ;;  %v2053_v2 = vsel %vm1925_vm10, %v1784_v33, %v1989_v4 }
 0x2d1   : > { %v1990_v9 = vmul.f32 0.2, %v1788_v6  ;;  %2304 = vmatprep.mubr.f32.mxu1 %v2053_v2  ;;  %vm1926_vm13 = vcmp.gt.f32.partialorder %v1788_v6, 0.0 }
 0x2d2   : > { %v1991_v12 = vmul.f32 0.2, %v1790_v8  ;;  %v1793_v14 = vpop.f32.mrb[92].mxu0  ;;  %2305 = vmatmul.mubr.f32.gmra.mrb[88].mxu1 %v2052_v11  ;;  %vm1927_vm12 = vcmp.gt.f32.partialorder %v1790_v8, 0.0 }
 0x2d3   : > { %v1794_v15 = vadd.f32 %v1793_v14, %v5124_v10  ;;  %v1795_v16 = vpop.f32.mrb[93].mxu0  ;;  %v2054_v21 = vsel %vm1926_vm13, %v1788_v6, %v1990_v9 }
 0x2d4   : > { %v1796_v17 = vadd.f32 %v1795_v16, %v5130_v13  ;;  %v2055_v18 = vsel %vm1927_vm12, %v1790_v8, %v1991_v12 }
 0x2d5   : > { %v1992_v20 = vmul.f32 0.2, %v1794_v15  ;;  %2310 = vmatprep.mubr.f32.mxu1 %v2055_v18  ;;  %vm1928_vm15 = vcmp.gt.f32.partialorder %v1794_v15, 0.0 }
 0x2d6   : > { %v1993_v23 = vmul.f32 0.2, %v1796_v17  ;;  %v1799_v25 = vpop.f32.mrb[94].mxu0  ;;  %2311 = vmatmul.mubr.f32.gmra.mrb[90].mxu1 %v2054_v21  ;;  %vm1929_vm14 = vcmp.gt.f32.partialorder %v1796_v17, 0.0 }
 0x2d7   : > { %v1800_v27 = vadd.f32 %v1799_v25, %v5124_v10  ;;  %v1801_v28 = vpop.f32.mrb[95].mxu0  ;;  %v2056_v34 = vsel %vm1928_vm15, %v1794_v15, %v1992_v20 }
 0x2d8   : > { %v1802_v29 = vadd.f32 %v1801_v28, %v5130_v13  ;;  %v2057_v31 = vsel %vm1929_vm14, %v1796_v17, %v1993_v23 }
 0x2d9   : > { %v1994_v32 = vmul.f32 0.2, %v1800_v27  ;;  %2316 = vmatprep.mubr.f32.mxu1 %v2057_v31  ;;  %vm1930_vm1 = vcmp.gt.f32.partialorder %v1800_v27, 0.0 }
 0x2da   : > { %v1995_v35 = vmul.f32 0.2, %v1802_v29  ;;  %v1805_v36 = vpop.f32.mrb[96].mxu0  ;;  %2317 = vmatmul.mubr.f32.gmra.mrb[92].mxu1 %v2056_v34  ;;  %vm1931_vm0 = vcmp.gt.f32.partialorder %v1802_v29, 0.0 }
 0x2db   : > { %v1806_v37 = vadd.f32 %v1805_v36, %v5124_v10  ;;  %v1807_v38 = vpop.f32.mrb[97].mxu0  ;;  %v2058_v42 = vsel %vm1930_vm1, %v1800_v27, %v1994_v32  ;;  %v2679_v36 = vld [vmem:[%s5770_s9 + $0x1f0] sm:$0xff] }
 0x2dc   : > { %v1808_v39 = vadd.f32 %v1807_v38, %v5130_v13  ;;  %v2059_v40 = vsel %vm1931_vm0, %v1802_v29, %v1995_v35  ;;  %v2677_v35 = vld [vmem:[%s5770_s9 + $0x1e0] sm:$0xff] }
 0x2dd   : > { %v1996_v41 = vmul.f32 0.2, %v1806_v37  ;;  %2322 = vmatprep.mubr.f32.mxu1 %v2059_v40  ;;  %vm1932_vm3 = vcmp.gt.f32.partialorder %v1806_v37, 0.0 }
 0x2de   : > { %v1997_v43 = vmul.f32 0.2, %v1808_v39  ;;  %v1811_v44 = vpop.f32.mrb[98].mxu0  ;;  %2323 = vmatmul.mubr.f32.gmra.mrb[94].mxu1 %v2058_v42  ;;  %vm1933_vm2 = vcmp.gt.f32.partialorder %v1808_v39, 0.0 }
 0x2df   : > { %v1812_v45 = vadd.f32 %v1811_v44, %v5124_v10  ;;  %v1813_v46 = vpop.f32.mrb[99].mxu0  ;;  %v2060_v50 = vsel %vm1932_vm3, %v1806_v37, %v1996_v41 }
 0x2e0   : > { %v1814_v47 = vadd.f32 %v1813_v46, %v5130_v13  ;;  %v2061_v48 = vsel %vm1933_vm2, %v1808_v39, %v1997_v43  ;;  %v4019_v39 = vpack.c.bf16 %v2679_v36, %v2677_v35 }
 0x2e1   : > { %v1998_v49 = vmul.f32 0.2, %v1812_v45  ;;  %2328 = vmatprep.mubr.f32.mxu1 %v2061_v48  ;;  %vm1934_vm5 = vcmp.gt.f32.partialorder %v1812_v45, 0.0 }
 0x2e2   : > { %v1999_v51 = vmul.f32 0.2, %v1814_v47  ;;  %v1817_v52 = vpop.f32.mrb[100].mxu0  ;;  %2329 = vmatmul.mubr.f32.gmra.mrb[96].mxu1 %v2060_v50  ;;  %vm1935_vm4 = vcmp.gt.f32.partialorder %v1814_v47, 0.0  ;;  %4020 = vmatpush1.bf16.msra.mxu0 %v4019_v39 }
 0x2e3   : > { %v1818_v53 = vadd.f32 %v1817_v52, %v5124_v10  ;;  %v1819_v54 = vpop.f32.mrb[101].mxu0  ;;  %v2062_v22 = vsel %vm1934_vm5, %v1812_v45, %v1998_v49 }
 0x2e4   : > { %v1820_v55 = vadd.f32 %v1819_v54, %v5130_v13  ;;  %v2063_v56 = vsel %vm1935_vm4, %v1814_v47, %v1999_v51 }
 0x2e5   : > { %v2000_v19 = vmul.f32 0.2, %v1818_v53  ;;  %2334 = vmatprep.mubr.f32.mxu1 %v2063_v56  ;;  %vm1936_vm7 = vcmp.gt.f32.partialorder %v1818_v53, 0.0 }
 0x2e6   : > { %v2001_v57 = vmul.f32 0.2, %v1820_v55  ;;  %v1823_v58 = vpop.f32.mrb[102].mxu0  ;;  %2335 = vmatmul.mubr.f32.gmra.mrb[98].mxu1 %v2062_v22  ;;  %vm1937_vm6 = vcmp.gt.f32.partialorder %v1820_v55, 0.0 }
 0x2e7   : > { %v1824_v59 = vadd.f32 %v1823_v58, %v5124_v10  ;;  %v1825_v60 = vpop.f32.mrb[103].mxu0  ;;  %v2064_v30 = vsel %vm1936_vm7, %v1818_v53, %v2000_v19 }
 0x2e8   : > { %v1826_v61 = vadd.f32 %v1825_v60, %v5130_v13  ;;  %v2065_v62 = vsel %vm1937_vm6, %v1820_v55, %v2001_v57 }
 0x2e9   : > { %v2002_v63 = vmul.f32 0.2, %v1824_v59  ;;  %2340 = vmatprep.mubr.f32.mxu1 %v2065_v62  ;;  %vm1938_vm9 = vcmp.gt.f32.partialorder %v1824_v59, 0.0 }
 0x2ea   : > { %v2003_v33 = vmul.f32 0.2, %v1826_v61  ;;  %v1829_v0 = vpop.f32.mrb[104].mxu0  ;;  %2341 = vmatmul.mubr.f32.gmra.mrb[100].mxu1 %v2064_v30  ;;  %vm1939_vm8 = vcmp.gt.f32.partialorder %v1826_v61, 0.0 }
 0x2eb   : > { %v1830_v1 = vadd.f32 %v1829_v0, %v5124_v10  ;;  %v1831_v3 = vpop.f32.mrb[105].mxu0  ;;  %v2066_v7 = vsel %vm1938_vm9, %v1824_v59, %v2002_v63 }
 0x2ec   : > { %v1832_v4 = vadd.f32 %v1831_v3, %v5130_v13  ;;  %v2067_v5 = vsel %vm1939_vm8, %v1826_v61, %v2003_v33 }
 0x2ed   : > { %v2004_v6 = vmul.f32 0.2, %v1830_v1  ;;  %2346 = vmatprep.mubr.f32.mxu1 %v2067_v5  ;;  %vm1940_vm11 = vcmp.gt.f32.partialorder %v1830_v1, 0.0 }
 0x2ee   : > { %v2005_v8 = vmul.f32 0.2, %v1832_v4  ;;  %v1835_v2 = vpop.f32.mrb[106].mxu0  ;;  %2347 = vmatmul.mubr.f32.gmra.mrb[102].mxu1 %v2066_v7  ;;  %vm1941_vm10 = vcmp.gt.f32.partialorder %v1832_v4, 0.0 }
 0x2ef   : > { %v1836_v9 = vadd.f32 %v1835_v2, %v5124_v10  ;;  %v1837_v11 = vpop.f32.mrb[107].mxu0  ;;  %v2068_v16 = vsel %vm1940_vm11, %v1830_v1, %v2004_v6 }
 0x2f0   : > { %v1838_v12 = vadd.f32 %v1837_v11, %v5130_v13  ;;  %v2069_v14 = vsel %vm1941_vm10, %v1832_v4, %v2005_v8 }
 0x2f1   : > { %v2006_v15 = vmul.f32 0.2, %v1836_v9  ;;  %2352 = vmatprep.mubr.f32.mxu1 %v2069_v14  ;;  %vm1942_vm13 = vcmp.gt.f32.partialorder %v1836_v9, 0.0 }
 0x2f2   : > { %v2007_v17 = vmul.f32 0.2, %v1838_v12  ;;  %v1841_v18 = vpop.f32.mrb[108].mxu0  ;;  %2353 = vmatmul.mubr.f32.gmra.mrb[104].mxu1 %v2068_v16  ;;  %vm1943_vm12 = vcmp.gt.f32.partialorder %v1838_v12, 0.0 }
 0x2f3   : > { %v1842_v20 = vadd.f32 %v1841_v18, %v5124_v10  ;;  %v1843_v21 = vpop.f32.mrb[109].mxu0  ;;  %v2070_v28 = vsel %vm1942_vm13, %v1836_v9, %v2006_v15 }
 0x2f4   : > { %v1844_v23 = vadd.f32 %v1843_v21, %v5130_v13  ;;  %v2071_v25 = vsel %vm1943_vm12, %v1838_v12, %v2007_v17 }
 0x2f5   : > { %v2008_v27 = vmul.f32 0.2, %v1842_v20  ;;  %2358 = vmatprep.mubr.f32.mxu1 %v2071_v25  ;;  %vm1944_vm15 = vcmp.gt.f32.partialorder %v1842_v20, 0.0 }
 0x2f6   : > { %v2009_v29 = vmul.f32 0.2, %v1844_v23  ;;  %v1847_v31 = vpop.f32.mrb[110].mxu0  ;;  %2359 = vmatmul.mubr.f32.gmra.mrb[106].mxu1 %v2070_v28  ;;  %vm1945_vm14 = vcmp.gt.f32.partialorder %v1844_v23, 0.0 }
 0x2f7   : > { %v1848_v32 = vadd.f32 %v1847_v31, %v5124_v10  ;;  %v1849_v34 = vpop.f32.mrb[111].mxu0  ;;  %v2072_v41 = vsel %vm1944_vm15, %v1842_v20, %v2008_v27 }
 0x2f8   : > { %v1850_v37 = vadd.f32 %v1849_v34, %v5130_v13  ;;  %v2073_v38 = vsel %vm1945_vm14, %v1844_v23, %v2009_v29 }
 0x2f9   : > { %v2010_v40 = vmul.f32 0.2, %v1848_v32  ;;  %2364 = vmatprep.mubr.f32.mxu1 %v2073_v38  ;;  %vm1946_vm1 = vcmp.gt.f32.partialorder %v1848_v32, 0.0 }
 0x2fa   : > { %v2011_v42 = vmul.f32 0.2, %v1850_v37  ;;  %v1853_v43 = vpop.f32.mrb[112].mxu0  ;;  %2365 = vmatmul.mubr.f32.gmra.mrb[108].mxu1 %v2072_v41  ;;  %vm1947_vm0 = vcmp.gt.f32.partialorder %v1850_v37, 0.0 }
 0x2fb   : > { %v1854_v44 = vadd.f32 %v1853_v43, %v5124_v10  ;;  %v1855_v45 = vpop.f32.mrb[113].mxu0  ;;  %v2074_v49 = vsel %vm1946_vm1, %v1848_v32, %v2010_v40 }
 0x2fc   : > { %v1856_v46 = vadd.f32 %v1855_v45, %v5130_v13  ;;  %v2075_v47 = vsel %vm1947_vm0, %v1850_v37, %v2011_v42 }
 0x2fd   : > { %v2012_v48 = vmul.f32 0.2, %v1854_v44  ;;  %2370 = vmatprep.mubr.f32.mxu1 %v2075_v47  ;;  %vm1948_vm3 = vcmp.gt.f32.partialorder %v1854_v44, 0.0 }
 0x2fe   : > { %v2013_v50 = vmul.f32 0.2, %v1856_v46  ;;  %v1859_v51 = vpop.f32.mrb[114].mxu0  ;;  %2371 = vmatmul.mubr.f32.gmra.mrb[110].mxu1 %v2074_v49  ;;  %vm1949_vm2 = vcmp.gt.f32.partialorder %v1856_v46, 0.0  ;;  %v2156_v49 = vld [vmem:[%s5769_s8] sm:$0x3] }
 0x2ff   : > { %v1860_v52 = vadd.f32 %v1859_v51, %v5124_v10  ;;  %v1861_v53 = vpop.f32.mrb[115].mxu0  ;;  %v2076_v19 = vsel %vm1948_vm3, %v1854_v44, %v2012_v48  ;;  %v3142_v51 = vld [vmem:[%s5772_s11] sm:$0xff] }
 0x300   : > { %v1862_v54 = vadd.f32 %v1861_v53, %v5130_v13  ;;  %v2077_v55 = vsel %vm1949_vm2, %v1856_v46, %v2013_v50 }
 0x301   : > { %v2014_v56 = vmul.f32 0.2, %v1860_v52  ;;  %2376 = vmatprep.mubr.f32.mxu1 %v2077_v55  ;;  %vm1950_vm5 = vcmp.gt.f32.partialorder %v1860_v52, 0.0  ;;  %v4156_v55 = vmov 0.0|0.0  }
 0x302   : > { %v2015_v22 = vmul.f32 0.2, %v1862_v54  ;;  %v1865_v57 = vpop.f32.mrb[116].mxu0  ;;  %2377 = vmatmul.mubr.f32.gmra.mrb[112].mxu1 %v2076_v19  ;;  %vm1951_vm4 = vcmp.gt.f32.partialorder %v1862_v54, 0.0  ;;  %4069 = vmatprep.subr.bf16.mxu1 %v4156_v55 }
 0x303   : > { %v1866_v58 = vadd.f32 %v1865_v57, %v5124_v10  ;;  %v1867_v59 = vpop.f32.mrb[117].mxu0  ;;  %v2078_v63 = vsel %vm1950_vm5, %v1860_v52, %v2014_v56  ;;  %v3143_v52 = vld [vmem:[%s5772_s11 + $0x8] sm:$0xff]  ;;  %4021 = vmatprep.subr.bf16.mxu0 %v4156_v55 }
 0x304   : > { %v1868_v60 = vadd.f32 %v1867_v59, %v5130_v13  ;;  %v2079_v61 = vsel %vm1951_vm4, %v1862_v54, %v2015_v22  ;;  %v4022_v56 = vpack.c.bf16 %v3143_v52, %v3142_v51  ;;  %v3144_v59 = vld [vmem:[%s5772_s11 + $0x10] sm:$0xff]  ;;  %v3154_v52 = vld [vmem:[%s5772_s11 + $0x60] sm:$0xff] }
 0x305   : > { %v2016_v62 = vmul.f32 0.2, %v1866_v58  ;;  %2382 = vmatprep.mubr.f32.mxu1 %v2079_v61  ;;  %vm1952_vm7 = vcmp.gt.f32.partialorder %v1866_v58, 0.0 }
 0x306   : > { %v2017_v30 = vmul.f32 0.2, %v1868_v60  ;;  %v1871_v33 = vpop.f32.mrb[118].mxu0  ;;  %2383 = vmatmul.mubr.f32.gmra.mrb[114].mxu1 %v2078_v63  ;;  %vm1953_vm6 = vcmp.gt.f32.partialorder %v1868_v60, 0.0 }
 0x307   : > { %v1872_v0 = vadd.f32 %v1871_v33, %v5124_v10  ;;  %v1873_v1 = vpop.f32.mrb[119].mxu0  ;;  %v2080_v6 = vsel %vm1952_vm7, %v1866_v58, %v2016_v62  ;;  %4085 = vmatpush1.bf16.msra.mxu1 %v4022_v56 }
 0x308   : > { %v1874_v3 = vadd.f32 %v1873_v1, %v5130_v13  ;;  %v2081_v4 = vsel %vm1953_vm6, %v1868_v60, %v2017_v30  ;;  %4070 = vmatprep.subr.bf16.mxu1 %v4156_v55  ;;  %v3145_v60 = vld [vmem:[%s5772_s11 + $0x18] sm:$0xff]  ;;  %v3147_v1 = vld [vmem:[%s5772_s11 + $0x28] sm:$0xff] }
 0x309   : > { %v2018_v5 = vmul.f32 0.2, %v1872_v0  ;;  %2388 = vmatprep.mubr.f32.mxu1 %v2081_v4  ;;  %vm1954_vm9 = vcmp.gt.f32.partialorder %v1872_v0, 0.0  ;;  %v4025_v63 = vpack.c.bf16 %v3145_v60, %v3144_v59 }
 0x30a   : > { %v2019_v7 = vmul.f32 0.2, %v1874_v3  ;;  %v1877_v8 = vpop.f32.mrb[120].mxu0  ;;  %2389 = vmatmul.mubr.f32.gmra.mrb[116].mxu1 %v2080_v6  ;;  %vm1955_vm8 = vcmp.gt.f32.partialorder %v1874_v3, 0.0 }
 0x30b   : > { %v1878_v2 = vadd.f32 %v1877_v8, %v5124_v10  ;;  %v1879_v9 = vpop.f32.mrb[121].mxu0  ;;  %v2082_v15 = vsel %vm1954_vm9, %v1872_v0, %v2018_v5  ;;  %v3146_v0 = vld [vmem:[%s5772_s11 + $0x20] sm:$0xff]  ;;  %4086 = vmatpush1.bf16.msra.mxu1 %v4025_v63 }
 0x30c   : > { %v1880_v11 = vadd.f32 %v1879_v9, %v5130_v13  ;;  %v2083_v12 = vsel %vm1955_vm8, %v1874_v3, %v2019_v7  ;;  %4071 = vmatprep.subr.bf16.mxu1 %v4156_v55 }
 0x30d   : > { %v2020_v14 = vmul.f32 0.2, %v1878_v2  ;;  %2394 = vmatprep.mubr.f32.mxu1 %v2083_v12  ;;  %vm1956_vm11 = vcmp.gt.f32.partialorder %v1878_v2, 0.0  ;;  %v3148_v12 = vld [vmem:[%s5772_s11 + $0x30] sm:$0xff] }
 0x30e   : > { %v2021_v16 = vmul.f32 0.2, %v1880_v11  ;;  %v1883_v17 = vpop.f32.mrb[122].mxu0  ;;  %2395 = vmatmul.mubr.f32.gmra.mrb[118].mxu1 %v2082_v15  ;;  %vm1957_vm10 = vcmp.gt.f32.partialorder %v1880_v11, 0.0 }
 0x30f   : > { %v1884_v18 = vadd.f32 %v1883_v17, %v5124_v10  ;;  %v1885_v20 = vpop.f32.mrb[123].mxu0  ;;  %v2084_v27 = vsel %vm1956_vm11, %v1878_v2, %v2020_v14  ;;  %v4028_v2 = vpack.c.bf16 %v3147_v1, %v3146_v0  ;;  %v3149_v14 = vld [vmem:[%s5772_s11 + $0x38] sm:$0xff] }
 0x310   : > { %v1886_v21 = vadd.f32 %v1885_v20, %v5130_v13  ;;  %v2085_v23 = vsel %vm1957_vm10, %v1880_v11, %v2021_v16 }
 0x311   : > { %v2022_v25 = vmul.f32 0.2, %v1884_v18  ;;  %2400 = vmatprep.mubr.f32.mxu1 %v2085_v23  ;;  %vm1958_vm13 = vcmp.gt.f32.partialorder %v1884_v18, 0.0  ;;  %4087 = vmatpush1.bf16.msra.mxu1 %v4028_v2  ;;  %v4031_v23 = vpack.c.bf16 %v3149_v14, %v3148_v12 }
 0x312   : > { %v2023_v28 = vmul.f32 0.2, %v1886_v21  ;;  %v1889_v29 = vpop.f32.mrb[124].mxu0  ;;  %2401 = vmatmul.mubr.f32.gmra.mrb[120].mxu1 %v2084_v27  ;;  %vm1959_vm12 = vcmp.gt.f32.partialorder %v1886_v21, 0.0  ;;  %4072 = vmatprep.subr.bf16.mxu1 %v4156_v55 }
 0x313   : > { %v1890_v31 = vadd.f32 %v1889_v29, %v5124_v10  ;;  %v1891_v32 = vpop.f32.mrb[125].mxu0  ;;  %v2086_v37 = vsel %vm1958_vm13, %v1884_v18, %v2022_v25  ;;  %v3151_v29 = vld [vmem:[%s5772_s11 + $0x48] sm:$0xff] }
 0x314   : > { %v1892_v34 = vadd.f32 %v1891_v32, %v5130_v13  ;;  %v2087_v35 = vsel %vm1959_vm12, %v1886_v21, %v2023_v28  ;;  %v3150_v28 = vld [vmem:[%s5772_s11 + $0x40] sm:$0xff] }
 0x315   : > { %v2024_v36 = vmul.f32 0.2, %v1890_v31  ;;  %2406 = vmatprep.mubr.f32.mxu1 %v2087_v35  ;;  %vm1960_vm15 = vcmp.gt.f32.partialorder %v1890_v31, 0.0  ;;  %4088 = vmatpush1.bf16.msra.mxu1 %v4031_v23 }
 0x316   : > { %v2025_v38 = vmul.f32 0.2, %v1892_v34  ;;  %v1895_v39 = vpop.f32.mrb[126].mxu0  ;;  %2407 = vmatmul.mubr.f32.gmra.mrb[122].mxu1 %v2086_v37  ;;  %vm1961_vm14 = vcmp.gt.f32.partialorder %v1892_v34, 0.0  ;;  %4073 = vmatprep.subr.bf16.mxu1 %v4156_v55 }
 0x317   : > { %v1896_v40 = vadd.f32 %v1895_v39, %v5124_v10  ;;  %v1897_v41 = vpop.f32.mrb[127].mxu0  ;;  %v2088_v45 = vsel %vm1960_vm15, %v1890_v31, %v2024_v36  ;;  %v5346_v10 = vrot.slane %v2156_v49, %v4573_v24 }
 0x318   : > { %v1898_v42 = vadd.f32 %v1897_v41, %v5130_v13  ;;  %v2089_v43 = vsel %vm1961_vm14, %v1892_v34, %v2025_v38  ;;  %v5349_v13 = vrot.slane %v2156_v49, %v4578_v26  ;;  %v4034_v38 = vpack.c.bf16 %v3151_v29, %v3150_v28  ;;  %v3152_v41 = vld [vmem:[%s5772_s11 + $0x50] sm:$0xff] }
 0x319   : > { %v2026_v44 = vmul.f32 0.2, %v1896_v40  ;;  %2412 = vmatprep.mubr.f32.mxu1 %v2089_v43  ;;  %vm1962_vm1 = vcmp.gt.f32.partialorder %v1896_v40, 0.0 }
 0x31a   : > { %v2027_v46 = vmul.f32 0.2, %v1898_v42  ;;  %2413 = vmatmul.mubr.f32.gmra.mrb[124].mxu1 %v2088_v45  ;;  %vm1963_vm0 = vcmp.gt.f32.partialorder %v1898_v42, 0.0 }
 0x31b   : > { %v2090_v48 = vsel %vm1962_vm1, %v1896_v40, %v2026_v44  ;;  %4089 = vmatpush1.bf16.msra.mxu1 %v4034_v38 }
 0x31c   : > { %v2091_v47 = vsel %vm1963_vm0, %v1898_v42, %v2027_v46  ;;  %v3153_v42 = vld [vmem:[%s5772_s11 + $0x58] sm:$0xff]  ;;  %4074 = vmatprep.subr.bf16.mxu1 %v4156_v55 }
 0x31d   : > { %2418 = vmatprep.mubr.f32.mxu1 %v2091_v47  ;;  %v4037_v49 = vpack.c.bf16 %v3153_v42, %v3152_v41 }
 0x31e   : > { %2419 = vmatmul.mubr.f32.gmra.mrb[126].mxu1 %v2090_v48 }
 0x31f   : > { %4090 = vmatpush1.bf16.msra.mxu1 %v4037_v49 }
 0x320   : > { %4075 = vmatprep.subr.bf16.mxu1 %v4156_v55 }
 0x375   : > { %v2234_v50 = vpop.f32.mrb[64].mxu1 }
 0x376   : > { %v2235_v53 = vadd.f32 %v2234_v50, %v5346_v10  ;;  %v2236_v54 = vpop.f32.mrb[65].mxu1 }
 0x377   : > { %v2237_v19 = vadd.f32 %v2236_v54, %v5349_v13 }
 0x378   : > { %vm2425_vm2 = vcmp.gt.f32.partialorder %v2235_v53, 0.0  ;;  %v2489_v22 = vmul.f32 0.2, %v2235_v53 }
 0x379   : > { %v2490_v57 = vmul.f32 0.2, %v2237_v19  ;;  %v2240_v58 = vpop.f32.mrb[66].mxu1  ;;  %vm2426_vm3 = vcmp.gt.f32.partialorder %v2237_v19, 0.0 }
 0x37a   : > { %v2241_v61 = vadd.f32 %v2240_v58, %v5346_v10  ;;  %v2242_v62 = vpop.f32.mrb[67].mxu1  ;;  %v2553_v3 = vsel %vm2425_vm2, %v2235_v53, %v2489_v22  ;;  %v3155_v53 = vld [vmem:[%s5772_s11 + $0x68] sm:$0xff] }
 0x37b   : > { %v2243_v30 = vadd.f32 %v2242_v62, %v5349_v13  ;;  %v2554_v33 = vsel %vm2426_vm3, %v2237_v19, %v2490_v57  ;;  %v4040_v59 = vpack.c.bf16 %v3155_v53, %v3154_v52  ;;  %v3156_v62 = vld [vmem:[%s5772_s11 + $0x70] sm:$0xff] }
 0x37c   : > { %v2491_v4 = vmul.f32 0.2, %v2241_v61  ;;  %2757 = vmatprep.mubr.f32.mxu0 %v2554_v33  ;;  %vm2427_vm5 = vcmp.gt.f32.partialorder %v2241_v61, 0.0 }
 0x37d   : > { %v2492_v5 = vmul.f32 0.2, %v2243_v30  ;;  %v2246_v6 = vpop.f32.mrb[68].mxu1  ;;  %2758 = vmatmul.mubr.f32.vlgmr.msra.gmra.mrb[128].mxu0 %v2553_v3  ;;  %vm2428_vm4 = vcmp.gt.f32.partialorder %v2243_v30, 0.0  ;;  %4091 = vmatpush1.bf16.msra.mxu1 %v4040_v59 }
 0x37e   : > { %v2247_v7 = vadd.f32 %v2246_v6, %v5346_v10  ;;  %v2248_v8 = vpop.f32.mrb[69].mxu1  ;;  %4023 = vmatpush1.bf16.msra.mxu0 %v4022_v56  ;;  %v2555_v16 = vsel %vm2427_vm5, %v2241_v61, %v2491_v4  ;;  %4076 = vmatprep.subr.bf16.mxu1 %v4156_v55 }
 0x37f   : > { %v2249_v9 = vadd.f32 %v2248_v8, %v5349_v13  ;;  %v2556_v11 = vsel %vm2428_vm4, %v2243_v30, %v2492_v5  ;;  %4024 = vmatprep.subr.bf16.mxu0 %v4156_v55  ;;  %v3158_v8 = vld [vmem:[%s5772_s11 + $0x80] sm:$0xff] }
 0x380   : > { %v2493_v15 = vmul.f32 0.2, %v2247_v7  ;;  %2763 = vmatprep.mubr.f32.mxu0 %v2556_v11  ;;  %vm2429_vm7 = vcmp.gt.f32.partialorder %v2247_v7, 0.0 }
 0x381   : > { %v2494_v17 = vmul.f32 0.2, %v2249_v9  ;;  %v2252_v18 = vpop.f32.mrb[70].mxu1  ;;  %2764 = vmatmul.mubr.f32.gmra.mrb[130].mxu0 %v2555_v16  ;;  %vm2430_vm6 = vcmp.gt.f32.partialorder %v2249_v9, 0.0 }
 0x382   : > { %v2253_v20 = vadd.f32 %v2252_v18, %v5346_v10  ;;  %v2254_v21 = vpop.f32.mrb[71].mxu1  ;;  %4026 = vmatpush1.bf16.msra.mxu0 %v4025_v63  ;;  %v2557_v32 = vsel %vm2429_vm7, %v2247_v7, %v2493_v15  ;;  %v3157_v63 = vld [vmem:[%s5772_s11 + $0x78] sm:$0xff] }
 0x383   : > { %v2255_v25 = vadd.f32 %v2254_v21, %v5349_v13  ;;  %v2558_v27 = vsel %vm2430_vm6, %v2249_v9, %v2494_v17  ;;  %4027 = vmatprep.subr.bf16.mxu0 %v4156_v55  ;;  %v4043_v5 = vpack.c.bf16 %v3157_v63, %v3156_v62  ;;  %v3160_v21 = vld [vmem:[%s5772_s11 + $0x90] sm:$0xff] }
 0x384   : > { %v2495_v31 = vmul.f32 0.2, %v2253_v20  ;;  %2769 = vmatprep.mubr.f32.mxu0 %v2558_v27  ;;  %vm2431_vm9 = vcmp.gt.f32.partialorder %v2253_v20, 0.0 }
 0x385   : > { %v2496_v34 = vmul.f32 0.2, %v2255_v25  ;;  %v2258_v35 = vpop.f32.mrb[72].mxu1  ;;  %2770 = vmatmul.mubr.f32.gmra.mrb[132].mxu0 %v2557_v32  ;;  %vm2432_vm8 = vcmp.gt.f32.partialorder %v2255_v25, 0.0  ;;  %4092 = vmatpush1.bf16.msra.mxu1 %v4043_v5 }
 0x386   : > { %v2259_v36 = vadd.f32 %v2258_v35, %v5346_v10  ;;  %v2260_v37 = vpop.f32.mrb[73].mxu1  ;;  %4029 = vmatpush1.bf16.msra.mxu0 %v4028_v2  ;;  %v2559_v44 = vsel %vm2431_vm9, %v2253_v20, %v2495_v31  ;;  %v3159_v2 = vld [vmem:[%s5772_s11 + $0x88] sm:$0xff]  ;;  %4077 = vmatprep.subr.bf16.mxu1 %v4156_v55 }
 0x387   : > { %v2261_v39 = vadd.f32 %v2260_v37, %v5349_v13  ;;  %v2560_v40 = vsel %vm2432_vm8, %v2255_v25, %v2496_v34  ;;  %4030 = vmatprep.subr.bf16.mxu0 %v4156_v55  ;;  %v4046_v17 = vpack.c.bf16 %v3159_v2, %v3158_v8  ;;  %v3162_v37 = vld [vmem:[%s5772_s11 + $0xa0] sm:$0xff] }
 0x388   : > { %v2497_v43 = vmul.f32 0.2, %v2259_v36  ;;  %2775 = vmatprep.mubr.f32.mxu0 %v2560_v40  ;;  %vm2433_vm11 = vcmp.gt.f32.partialorder %v2259_v36, 0.0 }
 0x389   : > { %v2498_v45 = vmul.f32 0.2, %v2261_v39  ;;  %v2264_v46 = vpop.f32.mrb[74].mxu1  ;;  %2776 = vmatmul.mubr.f32.gmra.mrb[134].mxu0 %v2559_v44  ;;  %vm2434_vm10 = vcmp.gt.f32.partialorder %v2261_v39, 0.0  ;;  %4093 = vmatpush1.bf16.msra.mxu1 %v4046_v17 }
 0x38a   : > { %v2265_v47 = vadd.f32 %v2264_v46, %v5346_v10  ;;  %v2266_v48 = vpop.f32.mrb[75].mxu1  ;;  %4032 = vmatpush1.bf16.msra.mxu0 %v4031_v23  ;;  %v2561_v56 = vsel %vm2433_vm11, %v2259_v36, %v2497_v43  ;;  %v3161_v23 = vld [vmem:[%s5772_s11 + $0x98] sm:$0xff]  ;;  %4078 = vmatprep.subr.bf16.mxu1 %v4156_v55 }
 0x38b   : > { %v2267_v50 = vadd.f32 %v2266_v48, %v5349_v13  ;;  %v2562_v51 = vsel %vm2434_vm10, %v2261_v39, %v2498_v45  ;;  %4033 = vmatprep.subr.bf16.mxu0 %v4156_v55  ;;  %v4049_v34 = vpack.c.bf16 %v3161_v23, %v3160_v21  ;;  %v3164_v48 = vld [vmem:[%s5772_s11 + $0xb0] sm:$0xff] }
 0x38c   : > { %v2499_v54 = vmul.f32 0.2, %v2265_v47  ;;  %2781 = vmatprep.mubr.f32.mxu0 %v2562_v51  ;;  %vm2435_vm13 = vcmp.gt.f32.partialorder %v2265_v47, 0.0 }
 0x38d   : > { %v2500_v19 = vmul.f32 0.2, %v2267_v50  ;;  %v2270_v22 = vpop.f32.mrb[76].mxu1  ;;  %2782 = vmatmul.mubr.f32.gmra.mrb[136].mxu0 %v2561_v56  ;;  %vm2436_vm12 = vcmp.gt.f32.partialorder %v2267_v50, 0.0  ;;  %4094 = vmatpush1.bf16.msra.mxu1 %v4049_v34 }
 0x38e   : > { %v2271_v57 = vadd.f32 %v2270_v22, %v5346_v10  ;;  %v2272_v58 = vpop.f32.mrb[77].mxu1  ;;  %4035 = vmatpush1.bf16.msra.mxu0 %v4034_v38  ;;  %v2563_v33 = vsel %vm2435_vm13, %v2265_v47, %v2499_v54  ;;  %v3163_v38 = vld [vmem:[%s5772_s11 + $0xa8] sm:$0xff]  ;;  %4079 = vmatprep.subr.bf16.mxu1 %v4156_v55 }
 0x38f   : > { %v2273_v60 = vadd.f32 %v2272_v58, %v5349_v13  ;;  %v2564_v61 = vsel %vm2436_vm12, %v2267_v50, %v2500_v19  ;;  %4036 = vmatprep.subr.bf16.mxu0 %v4156_v55  ;;  %v4052_v45 = vpack.c.bf16 %v3163_v38, %v3162_v37  ;;  %v3166_v58 = vld [vmem:[%s5772_s11 + $0xc0] sm:$0xff] }
 0x390   : > { %v2501_v30 = vmul.f32 0.2, %v2271_v57  ;;  %2787 = vmatprep.mubr.f32.mxu0 %v2564_v61  ;;  %vm2437_vm15 = vcmp.gt.f32.partialorder %v2271_v57, 0.0 }
 0x391   : > { %v2502_v0 = vmul.f32 0.2, %v2273_v60  ;;  %v2276_v1 = vpop.f32.mrb[78].mxu1  ;;  %2788 = vmatmul.mubr.f32.gmra.mrb[138].mxu0 %v2563_v33  ;;  %vm2438_vm14 = vcmp.gt.f32.partialorder %v2273_v60, 0.0  ;;  %4095 = vmatpush1.bf16.msra.mxu1 %v4052_v45 }
 0x392   : > { %v2277_v3 = vadd.f32 %v2276_v1, %v5346_v10  ;;  %v2278_v4 = vpop.f32.mrb[79].mxu1  ;;  %4038 = vmatpush1.bf16.msra.mxu0 %v4037_v49  ;;  %v2565_v11 = vsel %vm2437_vm15, %v2271_v57, %v2501_v30  ;;  %v3165_v49 = vld [vmem:[%s5772_s11 + $0xb8] sm:$0xff]  ;;  %4080 = vmatprep.subr.bf16.mxu1 %v4156_v55 }
 0x393   : > { %v2279_v6 = vadd.f32 %v2278_v4, %v5349_v13  ;;  %v2566_v7 = vsel %vm2438_vm14, %v2273_v60, %v2502_v0  ;;  %4039 = vmatprep.subr.bf16.mxu0 %v4156_v55  ;;  %v4055_v19 = vpack.c.bf16 %v3165_v49, %v3164_v48  ;;  %v3168_v4 = vld [vmem:[%s5772_s11 + $0xd0] sm:$0xff] }
 0x394   : > { %v2503_v9 = vmul.f32 0.2, %v2277_v3  ;;  %2793 = vmatprep.mubr.f32.mxu0 %v2566_v7  ;;  %vm2439_vm1 = vcmp.gt.f32.partialorder %v2277_v3, 0.0 }
 0x395   : > { %v2504_v12 = vmul.f32 0.2, %v2279_v6  ;;  %v2282_v14 = vpop.f32.mrb[80].mxu1  ;;  %2794 = vmatmul.mubr.f32.gmra.mrb[140].mxu0 %v2565_v11  ;;  %vm2440_vm0 = vcmp.gt.f32.partialorder %v2279_v6, 0.0  ;;  %4096 = vmatpush1.bf16.msra.mxu1 %v4055_v19 }
 0x396   : > { %v2283_v15 = vadd.f32 %v2282_v14, %v5346_v10  ;;  %v2284_v16 = vpop.f32.mrb[81].mxu1  ;;  %4041 = vmatpush1.bf16.msra.mxu0 %v4040_v59  ;;  %v2567_v27 = vsel %vm2439_vm1, %v2277_v3, %v2503_v9  ;;  %v3167_v59 = vld [vmem:[%s5772_s11 + $0xc8] sm:$0xff]  ;;  %4081 = vmatprep.subr.bf16.mxu1 %v4156_v55 }
 0x397   : > { %v2285_v18 = vadd.f32 %v2284_v16, %v5349_v13  ;;  %v2568_v20 = vsel %vm2440_vm0, %v2279_v6, %v2504_v12  ;;  %4042 = vmatprep.subr.bf16.mxu0 %v4156_v55  ;;  %v4058_v0 = vpack.c.bf16 %v3167_v59, %v3166_v58 }
 0x398   : > { %v2505_v25 = vmul.f32 0.2, %v2283_v15  ;;  %2799 = vmatprep.mubr.f32.mxu0 %v2568_v20  ;;  %vm2441_vm3 = vcmp.gt.f32.partialorder %v2283_v15, 0.0 }
 0x399   : > { %v2506_v28 = vmul.f32 0.2, %v2285_v18  ;;  %v2288_v29 = vpop.f32.mrb[82].mxu1  ;;  %2800 = vmatmul.mubr.f32.gmra.mrb[142].mxu0 %v2567_v27  ;;  %vm2442_vm2 = vcmp.gt.f32.partialorder %v2285_v18, 0.0  ;;  %4097 = vmatpush1.bf16.msra.mxu1 %v4058_v0 }
 0x39a   : > { %v2289_v31 = vadd.f32 %v2288_v29, %v5346_v10  ;;  %v2290_v32 = vpop.f32.mrb[83].mxu1  ;;  %4044 = vmatpush1.bf16.msra.mxu0 %v4043_v5  ;;  %v2569_v40 = vsel %vm2441_vm3, %v2283_v15, %v2505_v25  ;;  %v3169_v5 = vld [vmem:[%s5772_s11 + $0xd8] sm:$0xff]  ;;  %4082 = vmatprep.subr.bf16.mxu1 %v4156_v55 }
 0x39b   : > { %v2291_v35 = vadd.f32 %v2290_v32, %v5349_v13  ;;  %v2570_v36 = vsel %vm2442_vm2, %v2285_v18, %v2506_v28  ;;  %4045 = vmatprep.subr.bf16.mxu0 %v4156_v55  ;;  %v4061_v12 = vpack.c.bf16 %v3169_v5, %v3168_v4 }
 0x39c   : > { %v2507_v39 = vmul.f32 0.2, %v2289_v31  ;;  %2805 = vmatprep.mubr.f32.mxu0 %v2570_v36  ;;  %vm2443_vm5 = vcmp.gt.f32.partialorder %v2289_v31, 0.0 }
 0x39d   : > { %v2508_v41 = vmul.f32 0.2, %v2291_v35  ;;  %v2294_v42 = vpop.f32.mrb[84].mxu1  ;;  %2806 = vmatmul.mubr.f32.gmra.mrb[144].mxu0 %v2569_v40  ;;  %vm2444_vm4 = vcmp.gt.f32.partialorder %v2291_v35, 0.0  ;;  %4098 = vmatpush1.bf16.msra.mxu1 %v4061_v12 }
 0x39e   : > { %v2295_v43 = vadd.f32 %v2294_v42, %v5346_v10  ;;  %v2296_v44 = vpop.f32.mrb[85].mxu1  ;;  %4047 = vmatpush1.bf16.msra.mxu0 %v4046_v17  ;;  %v2571_v51 = vsel %vm2443_vm5, %v2289_v31, %v2507_v39  ;;  %4083 = vmatprep.subr.bf16.mxu1 %v4156_v55 }
 0x39f   : > { %v2297_v46 = vadd.f32 %v2296_v44, %v5349_v13  ;;  %v2572_v47 = vsel %vm2444_vm4, %v2291_v35, %v2508_v41  ;;  %4048 = vmatprep.subr.bf16.mxu0 %v4156_v55 }
 0x3a0   : > { %v2509_v50 = vmul.f32 0.2, %v2295_v43  ;;  %2811 = vmatprep.mubr.f32.mxu0 %v2572_v47  ;;  %vm2445_vm7 = vcmp.gt.f32.partialorder %v2295_v43, 0.0 }
 0x3a1   : > { %v2510_v52 = vmul.f32 0.2, %v2297_v46  ;;  %v2300_v53 = vpop.f32.mrb[86].mxu1  ;;  %2812 = vmatmul.mubr.f32.gmra.mrb[146].mxu0 %v2571_v51  ;;  %vm2446_vm6 = vcmp.gt.f32.partialorder %v2297_v46, 0.0 }
 0x3a2   : > { %v2301_v54 = vadd.f32 %v2300_v53, %v5346_v10  ;;  %v2302_v56 = vpop.f32.mrb[87].mxu1  ;;  %4050 = vmatpush1.bf16.msra.mxu0 %v4049_v34  ;;  %v2573_v61 = vsel %vm2445_vm7, %v2295_v43, %v2509_v50 }
 0x3a3   : > { %v2303_v22 = vadd.f32 %v2302_v56, %v5349_v13  ;;  %v2574_v57 = vsel %vm2446_vm6, %v2297_v46, %v2510_v52  ;;  %4051 = vmatprep.subr.bf16.mxu0 %v4156_v55 }
 0x3a4   : > { %v2511_v60 = vmul.f32 0.2, %v2301_v54  ;;  %2817 = vmatprep.mubr.f32.mxu0 %v2574_v57  ;;  %vm2447_vm9 = vcmp.gt.f32.partialorder %v2301_v54, 0.0 }
 0x3a5   : > { %v2512_v62 = vmul.f32 0.2, %v2303_v22  ;;  %v2306_v63 = vpop.f32.mrb[88].mxu1  ;;  %2818 = vmatmul.mubr.f32.gmra.mrb[148].mxu0 %v2573_v61  ;;  %vm2448_vm8 = vcmp.gt.f32.partialorder %v2303_v22, 0.0 }
 0x3a6   : > { %v2307_v30 = vadd.f32 %v2306_v63, %v5346_v10  ;;  %v2308_v33 = vpop.f32.mrb[89].mxu1  ;;  %4053 = vmatpush1.bf16.msra.mxu0 %v4052_v45  ;;  %v2575_v7 = vsel %vm2447_vm9, %v2301_v54, %v2511_v60 }
 0x3a7   : > { %v2309_v1 = vadd.f32 %v2308_v33, %v5349_v13  ;;  %v2576_v3 = vsel %vm2448_vm8, %v2303_v22, %v2512_v62  ;;  %4054 = vmatprep.subr.bf16.mxu0 %v4156_v55 }
 0x3a8   : > { %v2513_v6 = vmul.f32 0.2, %v2307_v30  ;;  %2823 = vmatprep.mubr.f32.mxu0 %v2576_v3  ;;  %vm2449_vm11 = vcmp.gt.f32.partialorder %v2307_v30, 0.0 }
 0x3a9   : > { %v2514_v8 = vmul.f32 0.2, %v2309_v1  ;;  %v2312_v2 = vpop.f32.mrb[90].mxu1  ;;  %2824 = vmatmul.mubr.f32.gmra.mrb[150].mxu0 %v2575_v7  ;;  %vm2450_vm10 = vcmp.gt.f32.partialorder %v2309_v1, 0.0 }
 0x3aa   : > { %v2313_v9 = vadd.f32 %v2312_v2, %v5346_v10  ;;  %v2314_v11 = vpop.f32.mrb[91].mxu1  ;;  %4056 = vmatpush1.bf16.msra.mxu0 %v4055_v19  ;;  %v2577_v17 = vsel %vm2449_vm11, %v2307_v30, %v2513_v6 }
 0x3ab   : > { %v2315_v14 = vadd.f32 %v2314_v11, %v5349_v13  ;;  %v2578_v15 = vsel %vm2450_vm10, %v2309_v1, %v2514_v8  ;;  %4057 = vmatprep.subr.bf16.mxu0 %v4156_v55 }
 0x3ac   : > { %v2515_v16 = vmul.f32 0.2, %v2313_v9  ;;  %2829 = vmatprep.mubr.f32.mxu0 %v2578_v15  ;;  %vm2451_vm13 = vcmp.gt.f32.partialorder %v2313_v9, 0.0 }
 0x3ad   : > { %v2516_v18 = vmul.f32 0.2, %v2315_v14  ;;  %v2318_v20 = vpop.f32.mrb[92].mxu1  ;;  %2830 = vmatmul.mubr.f32.gmra.mrb[152].mxu0 %v2577_v17  ;;  %vm2452_vm12 = vcmp.gt.f32.partialorder %v2315_v14, 0.0 }
 0x3ae   : > { %v2319_v21 = vadd.f32 %v2318_v20, %v5346_v10  ;;  %v2320_v23 = vpop.f32.mrb[93].mxu1  ;;  %4059 = vmatpush1.bf16.msra.mxu0 %v4058_v0  ;;  %v2579_v29 = vsel %vm2451_vm13, %v2313_v9, %v2515_v16 }
 0x3af   : > { %v2321_v25 = vadd.f32 %v2320_v23, %v5349_v13  ;;  %v2580_v27 = vsel %vm2452_vm12, %v2315_v14, %v2516_v18  ;;  %4060 = vmatprep.subr.bf16.mxu0 %v4156_v55 }
 0x3b0   : > { %v2517_v28 = vmul.f32 0.2, %v2319_v21  ;;  %2835 = vmatprep.mubr.f32.mxu0 %v2580_v27  ;;  %vm2453_vm15 = vcmp.gt.f32.partialorder %v2319_v21, 0.0 }
 0x3b1   : > { %v2518_v31 = vmul.f32 0.2, %v2321_v25  ;;  %v2324_v32 = vpop.f32.mrb[94].mxu1  ;;  %2836 = vmatmul.mubr.f32.gmra.mrb[154].mxu0 %v2579_v29  ;;  %vm2454_vm14 = vcmp.gt.f32.partialorder %v2321_v25, 0.0 }
 0x3b2   : > { %v2325_v34 = vadd.f32 %v2324_v32, %v5346_v10  ;;  %v2326_v35 = vpop.f32.mrb[95].mxu1  ;;  %4062 = vmatpush1.bf16.msra.mxu0 %v4061_v12  ;;  %v2581_v39 = vsel %vm2453_vm15, %v2319_v21, %v2517_v28  ;;  %v3170_v32 = vld [vmem:[%s5772_s11 + $0xe0] sm:$0xff] }
 0x3b3   : > { %v2327_v36 = vadd.f32 %v2326_v35, %v5349_v13  ;;  %v2582_v37 = vsel %vm2454_vm14, %v2321_v25, %v2518_v31  ;;  %4063 = vmatprep.subr.bf16.mxu0 %v4156_v55 }
 0x3b4   : > { %v2519_v38 = vmul.f32 0.2, %v2325_v34  ;;  %2841 = vmatprep.mubr.f32.mxu0 %v2582_v37  ;;  %vm2455_vm1 = vcmp.gt.f32.partialorder %v2325_v34, 0.0 }
 0x3b5   : > { %v2520_v40 = vmul.f32 0.2, %v2327_v36  ;;  %v2330_v41 = vpop.f32.mrb[96].mxu1  ;;  %2842 = vmatmul.mubr.f32.gmra.mrb[156].mxu0 %v2581_v39  ;;  %vm2456_vm0 = vcmp.gt.f32.partialorder %v2327_v36, 0.0 }
 0x3b6   : > { %v2331_v42 = vadd.f32 %v2330_v41, %v5346_v10  ;;  %v2332_v43 = vpop.f32.mrb[97].mxu1  ;;  %v2583_v47 = vsel %vm2455_vm1, %v2325_v34, %v2519_v38  ;;  %v3171_v34 = vld [vmem:[%s5772_s11 + $0xe8] sm:$0xff] }
 0x3b7   : > { %v2333_v44 = vadd.f32 %v2332_v43, %v5349_v13  ;;  %v2584_v45 = vsel %vm2456_vm0, %v2327_v36, %v2520_v40  ;;  %v4064_v37 = vpack.c.bf16 %v3171_v34, %v3170_v32 }
 0x3b8   : > { %v2521_v46 = vmul.f32 0.2, %v2331_v42  ;;  %2847 = vmatprep.mubr.f32.mxu0 %v2584_v45  ;;  %vm2457_vm3 = vcmp.gt.f32.partialorder %v2331_v42, 0.0  ;;  %v3173_v45 = vld [vmem:[%s5772_s11 + $0xf8] sm:$0xff] }
 0x3b9   : > { %v2522_v48 = vmul.f32 0.2, %v2333_v44  ;;  %v2336_v49 = vpop.f32.mrb[98].mxu1  ;;  %2848 = vmatmul.mubr.f32.gmra.mrb[158].mxu0 %v2583_v47  ;;  %vm2458_vm2 = vcmp.gt.f32.partialorder %v2333_v44, 0.0  ;;  %4099 = vmatpush1.bf16.msra.mxu1 %v4064_v37 }
 0x3ba   : > { %v2337_v50 = vadd.f32 %v2336_v49, %v5346_v10  ;;  %v2338_v51 = vpop.f32.mrb[99].mxu1  ;;  %v2585_v56 = vsel %vm2457_vm3, %v2331_v42, %v2521_v46  ;;  %4065 = vmatpush1.bf16.msra.mxu0 %v4064_v37  ;;  %4084 = vmatprep.subr.bf16.mxu1 %v4156_v55 }
 0x3bb   : > { %v2339_v52 = vadd.f32 %v2338_v51, %v5349_v13  ;;  %v2586_v53 = vsel %vm2458_vm2, %v2333_v44, %v2522_v48  ;;  %v3172_v44 = vld [vmem:[%s5772_s11 + $0xf0] sm:$0xff]  ;;  %4066 = vmatprep.subr.bf16.mxu0 %v4156_v55 }
 0x3bc   : > { %v2523_v54 = vmul.f32 0.2, %v2337_v50  ;;  %2853 = vmatprep.mubr.f32.mxu0 %v2586_v53  ;;  %vm2459_vm5 = vcmp.gt.f32.partialorder %v2337_v50, 0.0  ;;  %v4067_v48 = vpack.c.bf16 %v3173_v45, %v3172_v44 }
 0x3bd   : > { %v2524_v19 = vmul.f32 0.2, %v2339_v52  ;;  %v2342_v22 = vpop.f32.mrb[100].mxu1  ;;  %2854 = vmatmul.mubr.f32.gmra.mrb[160].mxu0 %v2585_v56  ;;  %vm2460_vm4 = vcmp.gt.f32.partialorder %v2339_v52, 0.0 }
 0x3be   : > { %v2343_v57 = vadd.f32 %v2342_v22, %v5346_v10  ;;  %v2344_v58 = vpop.f32.mrb[101].mxu1  ;;  %v2587_v62 = vsel %vm2459_vm5, %v2337_v50, %v2523_v54  ;;  %4100 = vmatpush1.bf16.msra.mxu1 %v4067_v48  ;;  %4068 = vmatpush1.bf16.msra.mxu0 %v4067_v48 }
 0x3bf   : > { %v2345_v59 = vadd.f32 %v2344_v58, %v5349_v13  ;;  %v2588_v60 = vsel %vm2460_vm4, %v2339_v52, %v2524_v19 }
 0x3c0   : > { %v2525_v61 = vmul.f32 0.2, %v2343_v57  ;;  %2859 = vmatprep.mubr.f32.mxu0 %v2588_v60  ;;  %vm2461_vm7 = vcmp.gt.f32.partialorder %v2343_v57, 0.0 }
 0x3c1   : > { %v2526_v63 = vmul.f32 0.2, %v2345_v59  ;;  %v2348_v30 = vpop.f32.mrb[102].mxu1  ;;  %2860 = vmatmul.mubr.f32.gmra.mrb[162].mxu0 %v2587_v62  ;;  %vm2462_vm6 = vcmp.gt.f32.partialorder %v2345_v59, 0.0 }
 0x3c2   : > { %v2349_v33 = vadd.f32 %v2348_v30, %v5346_v10  ;;  %v2350_v0 = vpop.f32.mrb[103].mxu1  ;;  %v2589_v5 = vsel %vm2461_vm7, %v2343_v57, %v2525_v61 }
 0x3c3   : > { %v2351_v1 = vadd.f32 %v2350_v0, %v5349_v13  ;;  %v2590_v3 = vsel %vm2462_vm6, %v2345_v59, %v2526_v63 }
 0x3c4   : > { %v2527_v4 = vmul.f32 0.2, %v2349_v33  ;;  %2865 = vmatprep.mubr.f32.mxu0 %v2590_v3  ;;  %vm2463_vm9 = vcmp.gt.f32.partialorder %v2349_v33, 0.0 }
 0x3c5   : > { %v2528_v6 = vmul.f32 0.2, %v2351_v1  ;;  %v2354_v7 = vpop.f32.mrb[104].mxu1  ;;  %2866 = vmatmul.mubr.f32.gmra.mrb[164].mxu0 %v2589_v5  ;;  %vm2464_vm8 = vcmp.gt.f32.partialorder %v2351_v1, 0.0 }
 0x3c6   : > { %v2355_v8 = vadd.f32 %v2354_v7, %v5346_v10  ;;  %v2356_v2 = vpop.f32.mrb[105].mxu1  ;;  %v2591_v14 = vsel %vm2463_vm9, %v2349_v33, %v2527_v4 }
 0x3c7   : > { %v2357_v9 = vadd.f32 %v2356_v2, %v5349_v13  ;;  %v2592_v11 = vsel %vm2464_vm8, %v2351_v1, %v2528_v6 }
 0x3c8   : > { %v2529_v12 = vmul.f32 0.2, %v2355_v8  ;;  %2871 = vmatprep.mubr.f32.mxu0 %v2592_v11  ;;  %vm2465_vm11 = vcmp.gt.f32.partialorder %v2355_v8, 0.0 }
 0x3c9   : > { %v2530_v15 = vmul.f32 0.2, %v2357_v9  ;;  %v2360_v16 = vpop.f32.mrb[106].mxu1  ;;  %2872 = vmatmul.mubr.f32.gmra.mrb[166].mxu0 %v2591_v14  ;;  %vm2466_vm10 = vcmp.gt.f32.partialorder %v2357_v9, 0.0 }
 0x3ca   : > { %v2361_v17 = vadd.f32 %v2360_v16, %v5346_v10  ;;  %v2362_v18 = vpop.f32.mrb[107].mxu1  ;;  %v2593_v25 = vsel %vm2465_vm11, %v2355_v8, %v2529_v12 }
 0x3cb   : > { %v2363_v20 = vadd.f32 %v2362_v18, %v5349_v13  ;;  %v2594_v21 = vsel %vm2466_vm10, %v2357_v9, %v2530_v15 }
 0x3cc   : > { %v2531_v23 = vmul.f32 0.2, %v2361_v17  ;;  %2877 = vmatprep.mubr.f32.mxu0 %v2594_v21  ;;  %vm2467_vm13 = vcmp.gt.f32.partialorder %v2361_v17, 0.0 }
 0x3cd   : > { %v2532_v27 = vmul.f32 0.2, %v2363_v20  ;;  %v2366_v28 = vpop.f32.mrb[108].mxu1  ;;  %2878 = vmatmul.mubr.f32.gmra.mrb[168].mxu0 %v2593_v25  ;;  %vm2468_vm12 = vcmp.gt.f32.partialorder %v2363_v20, 0.0 }
 0x3ce   : > { %v2367_v29 = vadd.f32 %v2366_v28, %v5346_v10  ;;  %v2368_v31 = vpop.f32.mrb[109].mxu1  ;;  %v2595_v39 = vsel %vm2467_vm13, %v2361_v17, %v2531_v23 }
 0x3cf   : > { %v2369_v35 = vadd.f32 %v2368_v31, %v5349_v13  ;;  %v2596_v36 = vsel %vm2468_vm12, %v2363_v20, %v2532_v27 }
 0x3d0   : > { %v2533_v38 = vmul.f32 0.2, %v2367_v29  ;;  %2883 = vmatprep.mubr.f32.mxu0 %v2596_v36  ;;  %vm2469_vm15 = vcmp.gt.f32.partialorder %v2367_v29, 0.0 }
 0x3d1   : > { %v2534_v40 = vmul.f32 0.2, %v2369_v35  ;;  %v2372_v41 = vpop.f32.mrb[110].mxu1  ;;  %2884 = vmatmul.mubr.f32.gmra.mrb[170].mxu0 %v2595_v39  ;;  %vm2470_vm14 = vcmp.gt.f32.partialorder %v2369_v35, 0.0 }
 0x3d2   : > { %v2373_v42 = vadd.f32 %v2372_v41, %v5346_v10  ;;  %v2374_v43 = vpop.f32.mrb[111].mxu1  ;;  %v2597_v50 = vsel %vm2469_vm15, %v2367_v29, %v2533_v38 }
 0x3d3   : > { %v2375_v46 = vadd.f32 %v2374_v43, %v5349_v13  ;;  %v2598_v47 = vsel %vm2470_vm14, %v2369_v35, %v2534_v40 }
 0x3d4   : > { %v2535_v49 = vmul.f32 0.2, %v2373_v42  ;;  %2889 = vmatprep.mubr.f32.mxu0 %v2598_v47  ;;  %vm2471_vm1 = vcmp.gt.f32.partialorder %v2373_v42, 0.0 }
 0x3d5   : > { %v2536_v51 = vmul.f32 0.2, %v2375_v46  ;;  %v2378_v52 = vpop.f32.mrb[112].mxu1  ;;  %2890 = vmatmul.mubr.f32.gmra.mrb[172].mxu0 %v2597_v50  ;;  %vm2472_vm0 = vcmp.gt.f32.partialorder %v2375_v46, 0.0 }
 0x3d6   : > { %v2379_v53 = vadd.f32 %v2378_v52, %v5346_v10  ;;  %v2380_v54 = vpop.f32.mrb[113].mxu1  ;;  %v2599_v55 = vsel %vm2471_vm1, %v2373_v42, %v2535_v49 }
 0x3d7   : > { %v2381_v56 = vadd.f32 %v2380_v54, %v5349_v13  ;;  %v2600_v19 = vsel %vm2472_vm0, %v2375_v46, %v2536_v51 }
 0x3d8   : > { %v2537_v22 = vmul.f32 0.2, %v2379_v53  ;;  %2895 = vmatprep.mubr.f32.mxu0 %v2600_v19  ;;  %vm2473_vm3 = vcmp.gt.f32.partialorder %v2379_v53, 0.0 }
 0x3d9   : > { %v2538_v57 = vmul.f32 0.2, %v2381_v56  ;;  %v2384_v58 = vpop.f32.mrb[114].mxu1  ;;  %2896 = vmatmul.mubr.f32.gmra.mrb[174].mxu0 %v2599_v55  ;;  %vm2474_vm2 = vcmp.gt.f32.partialorder %v2381_v56, 0.0 }
 0x3da   : > { %v2385_v59 = vadd.f32 %v2384_v58, %v5346_v10  ;;  %v2386_v60 = vpop.f32.mrb[115].mxu1  ;;  %v2601_v30 = vsel %vm2473_vm3, %v2379_v53, %v2537_v22 }
 0x3db   : > { %v2387_v61 = vadd.f32 %v2386_v60, %v5349_v13  ;;  %v2602_v62 = vsel %vm2474_vm2, %v2381_v56, %v2538_v57  ;;  %v4116_v57 = vld [vmem:[%s4266_s30 + $0x10] sm:$0xff] }
 0x3dc   : > { %v2539_v63 = vmul.f32 0.2, %v2385_v59  ;;  %2901 = vmatprep.mubr.f32.mxu0 %v2602_v62  ;;  %vm2475_vm5 = vcmp.gt.f32.partialorder %v2385_v59, 0.0  ;;  %v3408_v58 = vsub.f32 1.0, %v4116_v57  ;;  %v4137_v57 = vld [vmem:[%s4266_s30 + $0xb8] sm:$0xff] }
 0x3dd   : > { %v2540_v33 = vmul.f32 0.2, %v2387_v61  ;;  %v2390_v0 = vpop.f32.mrb[116].mxu1  ;;  %2902 = vmatmul.mubr.f32.gmra.mrb[176].mxu0 %v2601_v30  ;;  %vm2476_vm4 = vcmp.gt.f32.partialorder %v2387_v61, 0.0 }
 0x3de   : > { %v2391_v1 = vadd.f32 %v2390_v0, %v5346_v10  ;;  %v2392_v3 = vpop.f32.mrb[117].mxu1  ;;  %v2603_v7 = vsel %vm2475_vm5, %v2385_v59, %v2539_v63  ;;  %v4117_v59 = vld [vmem:[%s4266_s30 + $0x8] sm:$0xff] }
 0x3df   : > { %v2393_v4 = vadd.f32 %v2392_v3, %v5349_v13  ;;  %v2604_v5 = vsel %vm2476_vm4, %v2387_v61, %v2540_v33  ;;  %v3407_v60 = vsub.f32 1.0, %v4117_v59  ;;  %v4118_v61 = vld [vmem:[%s4266_s30 + $0x18] sm:$0xff]  ;;  %v4119_v63 = vld [vmem:[%s4266_s30 + $0x28] sm:$0xff]  ;;  %v4120_v33 = vld [vmem:[%s4266_s30 + $0x20] sm:$0xff] }
 0x3e0   : > { %v2541_v6 = vmul.f32 0.2, %v2391_v1  ;;  %2907 = vmatprep.mubr.f32.mxu0 %v2604_v5  ;;  %vm2477_vm7 = vcmp.gt.f32.partialorder %v2391_v1, 0.0  ;;  %v3409_v62 = vsub.f32 1.0, %v4118_v61  ;;  %v3411_v30 = vsub.f32 1.0, %v4119_v63  ;;  %v4138_v59 = vld [vmem:[%s4266_s30 + $0xb0] sm:$0xff] }
 0x3e1   : > { %v2542_v8 = vmul.f32 0.2, %v2393_v4  ;;  %v2396_v2 = vpop.f32.mrb[118].mxu1  ;;  %2908 = vmatmul.mubr.f32.gmra.mrb[178].mxu0 %v2603_v7  ;;  %vm2478_vm6 = vcmp.gt.f32.partialorder %v2393_v4, 0.0  ;;  %v3410_v0 = vsub.f32 1.0, %v4120_v33 }
 0x3e2   : > { %v2397_v9 = vadd.f32 %v2396_v2, %v5346_v10  ;;  %v2398_v11 = vpop.f32.mrb[119].mxu1  ;;  %v2605_v16 = vsel %vm2477_vm7, %v2391_v1, %v2541_v6  ;;  %v4121_v1 = vld [vmem:[%s4266_s30 + $0x38] sm:$0xff]  ;;  %v4123_v6 = vld [vmem:[%s4266_s30 + $0x48] sm:$0xff] }
 0x3e3   : > { %v2399_v12 = vadd.f32 %v2398_v11, %v5349_v13  ;;  %v2606_v14 = vsel %vm2478_vm6, %v2393_v4, %v2542_v8  ;;  %v3413_v3 = vsub.f32 1.0, %v4121_v1  ;;  %v4122_v4 = vld [vmem:[%s4266_s30 + $0x30] sm:$0xff]  ;;  %v3415_v7 = vsub.f32 1.0, %v4123_v6  ;;  %v4124_v8 = vld [vmem:[%s4266_s30 + $0x40] sm:$0xff] }
 0x3e4   : > { %v2543_v15 = vmul.f32 0.2, %v2397_v9  ;;  %2913 = vmatprep.mubr.f32.mxu0 %v2606_v14  ;;  %vm2479_vm9 = vcmp.gt.f32.partialorder %v2397_v9, 0.0  ;;  %v3412_v5 = vsub.f32 1.0, %v4122_v4  ;;  %v3414_v2 = vsub.f32 1.0, %v4124_v8  ;;  %v4139_v4 = vld [vmem:[%s4266_s30 + $0xc8] sm:$0xff] }
 0x3e5   : > { %v2544_v17 = vmul.f32 0.2, %v2399_v12  ;;  %v2402_v18 = vpop.f32.mrb[120].mxu1  ;;  %2914 = vmatmul.mubr.f32.gmra.mrb[180].mxu0 %v2605_v16  ;;  %vm2480_vm8 = vcmp.gt.f32.partialorder %v2399_v12, 0.0  ;;  %v4140_v6 = vld [vmem:[%s4266_s30 + $0xc0] sm:$0xff] }
 0x3e6   : > { %v2403_v20 = vadd.f32 %v2402_v18, %v5346_v10  ;;  %v2404_v21 = vpop.f32.mrb[121].mxu1  ;;  %v2607_v28 = vsel %vm2479_vm9, %v2397_v9, %v2543_v15  ;;  %v4125_v9 = vld [vmem:[%s4266_s30 + $0x58] sm:$0xff]  ;;  %v4127_v15 = vld [vmem:[%s4266_s30 + $0x68] sm:$0xff] }
 0x3e7   : > { %v2405_v23 = vadd.f32 %v2404_v21, %v5349_v13  ;;  %v2608_v25 = vsel %vm2480_vm8, %v2399_v12, %v2544_v17  ;;  %v3417_v11 = vsub.f32 1.0, %v4125_v9  ;;  %v4126_v12 = vld [vmem:[%s4266_s30 + $0x50] sm:$0xff]  ;;  %v3419_v16 = vsub.f32 1.0, %v4127_v15  ;;  %v4128_v17 = vld [vmem:[%s4266_s30 + $0x60] sm:$0xff]  ;;  %v4129_v21 = vld [vmem:[%s4266_s30 + $0x78] sm:$0xff] }
 0x3e8   : > { %v2545_v27 = vmul.f32 0.2, %v2403_v20  ;;  %2919 = vmatprep.mubr.f32.mxu0 %v2608_v25  ;;  %vm2481_vm11 = vcmp.gt.f32.partialorder %v2403_v20, 0.0  ;;  %v3416_v14 = vsub.f32 1.0, %v4126_v12  ;;  %v3418_v18 = vsub.f32 1.0, %v4128_v17  ;;  %v4130_v25 = vld [vmem:[%s4266_s30 + $0x70] sm:$0xff] }
 0x3e9   : > { %v2546_v29 = vmul.f32 0.2, %v2405_v23  ;;  %v2408_v31 = vpop.f32.mrb[122].mxu1  ;;  %2920 = vmatmul.mubr.f32.gmra.mrb[182].mxu0 %v2607_v28  ;;  %vm2482_vm10 = vcmp.gt.f32.partialorder %v2405_v23, 0.0  ;;  %v4141_v17 = vld [vmem:[%s4266_s30 + $0xd8] sm:$0xff] }
 0x3ea   : > { %v2409_v32 = vadd.f32 %v2408_v31, %v5346_v10  ;;  %v2410_v34 = vpop.f32.mrb[123].mxu1  ;;  %v2609_v38 = vsel %vm2481_vm11, %v2403_v20, %v2545_v27  ;;  %v2681_v20 = vld [vmem:[%s5771_s10] sm:$0x3]  ;;  %v3420_v27 = vsub.f32 1.0, %v4130_v25 }
 0x3eb   : > { %v2411_v35 = vadd.f32 %v2410_v34, %v5349_v13  ;;  %v2610_v36 = vsel %vm2482_vm10, %v2405_v23, %v2546_v29  ;;  %v3421_v23 = vsub.f32 1.0, %v4129_v21  ;;  %v5564_v28 = vrot.slane %v2681_v20, %v4573_v24 }
 0x3ec   : > { %v2547_v37 = vmul.f32 0.2, %v2409_v32  ;;  %2925 = vmatprep.mubr.f32.mxu0 %v2610_v36  ;;  %vm2483_vm13 = vcmp.gt.f32.partialorder %v2409_v32, 0.0  ;;  %v5567_v29 = vrot.slane %v2681_v20, %v4578_v26  ;;  %v4142_v20 = vld [vmem:[%s4266_s30 + $0xd0] sm:$0xff] }
 0x3ed   : > { %v2548_v39 = vmul.f32 0.2, %v2411_v35  ;;  %v2414_v40 = vpop.f32.mrb[124].mxu1  ;;  %2926 = vmatmul.mubr.f32.gmra.mrb[184].mxu0 %v2609_v38  ;;  %vm2484_vm12 = vcmp.gt.f32.partialorder %v2411_v35, 0.0  ;;  %v3432_v21 = vsub.f32 1.0, %v4142_v20 }
 0x3ee   : > { %v2415_v41 = vadd.f32 %v2414_v40, %v5346_v10  ;;  %v2416_v42 = vpop.f32.mrb[125].mxu1  ;;  %v2611_v46 = vsel %vm2483_vm13, %v2409_v32, %v2547_v37  ;;  %v4131_v32 = vld [vmem:[%s4266_s30 + $0x88] sm:$0xff] }
 0x3ef   : > { %v2417_v43 = vadd.f32 %v2416_v42, %v5349_v13  ;;  %v2612_v44 = vsel %vm2484_vm12, %v2411_v35, %v2548_v39  ;;  %v3423_v34 = vsub.f32 1.0, %v4131_v32  ;;  %v4132_v35 = vld [vmem:[%s4266_s30 + $0x80] sm:$0xff] }
 0x3f0   : > { %v2549_v45 = vmul.f32 0.2, %v2415_v41  ;;  %2931 = vmatprep.mubr.f32.mxu0 %v2612_v44  ;;  %vm2485_vm15 = vcmp.gt.f32.partialorder %v2415_v41, 0.0  ;;  %v3422_v36 = vsub.f32 1.0, %v4132_v35 }
 0x3f1   : > { %v2550_v47 = vmul.f32 0.2, %v2417_v43  ;;  %v2420_v48 = vpop.f32.mrb[126].mxu1  ;;  %2932 = vmatmul.mubr.f32.gmra.mrb[186].mxu0 %v2611_v46  ;;  %vm2486_vm14 = vcmp.gt.f32.partialorder %v2417_v43, 0.0 }
 0x3f2   : > { %v2421_v49 = vadd.f32 %v2420_v48, %v5346_v10  ;;  %v2422_v50 = vpop.f32.mrb[127].mxu1  ;;  %v2613_v54 = vsel %vm2485_vm15, %v2415_v41, %v2549_v45  ;;  %v4115_v10 = vld [vmem:[%s4266_s30] sm:$0xff]  ;;  %v4133_v41 = vld [vmem:[%s4266_s30 + $0x98] sm:$0xff] }
 0x3f3   : > { %v2423_v51 = vadd.f32 %v2422_v50, %v5349_v13  ;;  %v2614_v52 = vsel %vm2486_vm14, %v2417_v43, %v2550_v47  ;;  %v3406_v55 = vsub.f32 1.0, %v4115_v10  ;;  %v4157_v13 = vmov 3   ;;  %v4134_v43 = vld [vmem:[%s4266_s30 + $0x90] sm:$0xff] }
 0x3f4   : > { %v2551_v53 = vmul.f32 0.2, %v2421_v49  ;;  %2937 = vmatprep.mubr.f32.mxu0 %v2614_v52  ;;  %vm2487_vm1 = vcmp.gt.f32.partialorder %v2421_v49, 0.0  ;;  %4112 = vset.pattern.permute.xlu0 %v4157_v13  ;;  %v3425_v42 = vsub.f32 1.0, %v4133_v41  ;;  %v3424_v44 = vsub.f32 1.0, %v4134_v43 }
 0x3f5   : > { %v2552_v56 = vmul.f32 0.2, %v2423_v51  ;;  %2938 = vmatmul.mubr.f32.gmra.mrb[188].mxu0 %v2613_v54  ;;  %vm2488_vm0 = vcmp.gt.f32.partialorder %v2423_v51, 0.0  ;;  %4113 = vset.pattern.permute.xlu1 %v4157_v13 }
 0x3f6   : > { %v2615_v22 = vsel %vm2487_vm1, %v2421_v49, %v2551_v53  ;;  %3440 = vperm.xlu0 %4112, %v3406_v55   ;;  %3450 = vperm.xlu1 %4113, %v3408_v58   ;;  %v4135_v49 = vld [vmem:[%s4266_s30 + $0xa8] sm:$0xff]  ;;  %v3429_v58 = vsub.f32 1.0, %v4137_v57 }
 0x3f7   : > { %v2616_v19 = vsel %vm2488_vm0, %v2423_v51, %v2552_v56  ;;  %v3427_v50 = vsub.f32 1.0, %v4135_v49  ;;  %v4136_v51 = vld [vmem:[%s4266_s30 + $0xa0] sm:$0xff]  ;;  %v4146_v49 = vld [vmem:[%s4266_s30 + $0xf0] sm:$0xff] }
 0x3f8   : > { %2943 = vmatprep.mubr.f32.mxu0 %v2616_v19  ;;  %v3426_v52 = vsub.f32 1.0, %v4136_v51 }
 0x3f9   : > { %2944 = vmatmul.mubr.f32.gmra.mrb[190].mxu0 %v2615_v22 }
 0x3fa   : > { %3445 = vperm.xlu0 %4112, %v3407_v60   ;;  %3455 = vperm.xlu1 %4113, %v3409_v62   ;;  %v3428_v60 = vsub.f32 1.0, %v4138_v59 }
 0x3fe   : > { %3465 = vperm.xlu1 %4113, %v3411_v30   ;;  %3460 = vperm.xlu0 %4112, %v3410_v0  }
 0x402   : > { %3475 = vperm.xlu1 %4113, %v3413_v3   ;;  %3470 = vperm.xlu0 %4112, %v3412_v5   ;;  %v3431_v5 = vsub.f32 1.0, %v4139_v4 }
 0x406   : > { %3485 = vperm.xlu1 %4113, %v3415_v7   ;;  %3480 = vperm.xlu0 %4112, %v3414_v2   ;;  %v3430_v7 = vsub.f32 1.0, %v4140_v6 }
 0x40a   : > { %3495 = vperm.xlu1 %4113, %v3417_v11   ;;  %3490 = vperm.xlu0 %4112, %v3416_v14  }
 0x40e   : > { %3505 = vperm.xlu1 %4113, %v3419_v16   ;;  %3500 = vperm.xlu0 %4112, %v3418_v18   ;;  %v3433_v18 = vsub.f32 1.0, %v4141_v17 }
 0x412   : > { %3515 = vperm.xlu1 %4113, %v3421_v23   ;;  %3510 = vperm.xlu0 %4112, %v3420_v27  }
 0x416   : > { %3525 = vperm.xlu1 %4113, %v3423_v34   ;;  %3520 = vperm.xlu0 %4112, %v3422_v36  }
 0x41a   : > { %3535 = vperm.xlu1 %4113, %v3425_v42   ;;  %3530 = vperm.xlu0 %4112, %v3424_v44  }
 0x41e   : > { %3545 = vperm.xlu1 %4113, %v3427_v50   ;;  %3540 = vperm.xlu0 %4112, %v3426_v52   ;;  %v3436_v50 = vsub.f32 1.0, %v4146_v49 }
 0x422   : > { %3555 = vperm.xlu1 %4113, %v3429_v58   ;;  %3550 = vperm.xlu0 %4112, %v3428_v60  }
 0x426   : > { %3565 = vperm.xlu1 %4113, %v3431_v5   ;;  %3560 = vperm.xlu0 %4112, %v3430_v7  }
 0x42a   : > { %3575 = vperm.xlu1 %4113, %v3433_v18   ;;  %3570 = vperm.xlu0 %4112, %v3432_v21  }
 0x450   : > { %v2759_v31 = vpop.f32.mrb[128].mxu0 }
 0x451   : > { %v2760_v37 = vadd.f32 %v2759_v31, %v5564_v28  ;;  %v2761_v38 = vpop.f32.mrb[129].mxu0 }
 0x452   : > { %v2762_v39 = vadd.f32 %v2761_v38, %v5567_v29 }
 0x453   : > { %vm2950_vm2 = vcmp.gt.f32.partialorder %v2760_v37, 0.0  ;;  %v3014_v24 = vmul.f32 0.2, %v2760_v37 }
 0x454   : > { %v3015_v26 = vmul.f32 0.2, %v2762_v39  ;;  %v2765_v40 = vpop.f32.mrb[130].mxu0  ;;  %vm2951_vm3 = vcmp.gt.f32.partialorder %v2762_v39, 0.0 }
 0x455   : > { %v2766_v45 = vadd.f32 %v2765_v40, %v5564_v28  ;;  %v2767_v46 = vpop.f32.mrb[131].mxu0  ;;  %v3078_v53 = vsel %vm2950_vm2, %v2760_v37, %v3014_v24  ;;  %v4143_v37 = vld [vmem:[%s4266_s30 + $0xe8] sm:$0xff] }
 0x456   : > { %v2768_v47 = vadd.f32 %v2767_v46, %v5567_v29  ;;  %v3079_v48 = vsel %vm2951_vm3, %v2762_v39, %v3015_v26  ;;  %v3435_v38 = vsub.f32 1.0, %v4143_v37  ;;  %v4144_v39 = vld [vmem:[%s4266_s30 + $0xe0] sm:$0xff] }
 0x457   : > { %v3016_v54 = vmul.f32 0.2, %v2766_v45  ;;  %3245 = vmatprep.mubr.f32.mxu0 %v3079_v48  ;;  %vm2952_vm5 = vcmp.gt.f32.partialorder %v2766_v45, 0.0  ;;  %v3434_v24 = vsub.f32 1.0, %v4144_v39 }
 0x458   : > { %v3017_v56 = vmul.f32 0.2, %v2768_v47  ;;  %v2771_v19 = vpop.f32.mrb[132].mxu0  ;;  %3246 = vmatmul.mubr.f32.vlgmr.msra.gmra.mrb[192].mxu0 %v3078_v53  ;;  %vm2953_vm4 = vcmp.gt.f32.partialorder %v2768_v47, 0.0  ;;  %3585 = vperm.xlu1 %4113, %v3435_v38  }
 0x459   : > { %v2772_v22 = vadd.f32 %v2771_v19, %v5564_v28  ;;  %v2773_v10 = vpop.f32.mrb[133].mxu0  ;;  %v3080_v62 = vsel %vm2952_vm5, %v2766_v45, %v3016_v54  ;;  %3580 = vperm.xlu0 %4112, %v3434_v24  }
 0x45a   : > { %v2774_v55 = vadd.f32 %v2773_v10, %v5567_v29  ;;  %v3081_v13 = vsel %vm2953_vm4, %v2768_v47, %v3017_v56  ;;  %v4145_v47 = vld [vmem:[%s4266_s30 + $0xf8] sm:$0xff] }
 0x45b   : > { %v3018_v61 = vmul.f32 0.2, %v2772_v22  ;;  %3250 = vmatprep.mubr.f32.mxu0 %v3081_v13  ;;  %vm2954_vm7 = vcmp.gt.f32.partialorder %v2772_v22, 0.0  ;;  %v3437_v48 = vsub.f32 1.0, %v4145_v47 }
 0x45c   : > { %v3019_v63 = vmul.f32 0.2, %v2774_v55  ;;  %v2777_v30 = vpop.f32.mrb[134].mxu0  ;;  %3251 = vmatmul.mubr.f32.gmra.mrb[194].mxu0 %v3080_v62  ;;  %vm2955_vm6 = vcmp.gt.f32.partialorder %v2774_v55, 0.0 }
 0x45d   : > { %v2778_v33 = vadd.f32 %v2777_v30, %v5564_v28  ;;  %v2779_v0 = vpop.f32.mrb[135].mxu0  ;;  %v3082_v2 = vsel %vm2954_vm7, %v2772_v22, %v3018_v61  ;;  %3595 = vperm.xlu1 %4113, %v3437_v48   ;;  %3590 = vperm.xlu0 %4112, %v3436_v50  }
 0x45e   : > { %v2780_v1 = vadd.f32 %v2779_v0, %v5567_v29  ;;  %v3083_v3 = vsel %vm2955_vm6, %v2774_v55, %v3019_v63 }
 0x45f   : > { %v3020_v8 = vmul.f32 0.2, %v2778_v33  ;;  %3255 = vmatprep.mubr.f32.mxu0 %v3083_v3  ;;  %vm2956_vm9 = vcmp.gt.f32.partialorder %v2778_v33, 0.0 }
 0x460   : > { %v3021_v9 = vmul.f32 0.2, %v2780_v1  ;;  %v2783_v11 = vpop.f32.mrb[136].mxu0  ;;  %3256 = vmatmul.mubr.f32.gmra.mrb[196].mxu0 %v3082_v2  ;;  %vm2957_vm8 = vcmp.gt.f32.partialorder %v2780_v1, 0.0 }
 0x461   : > { %v2784_v12 = vadd.f32 %v2783_v11, %v5564_v28  ;;  %v2785_v14 = vpop.f32.mrb[137].mxu0  ;;  %v3084_v25 = vsel %vm2956_vm9, %v2778_v33, %v3020_v8 }
 0x462   : > { %v2786_v15 = vadd.f32 %v2785_v14, %v5567_v29  ;;  %v3085_v16 = vsel %vm2957_vm8, %v2780_v1, %v3021_v9 }
 0x463   : > { %v3022_v23 = vmul.f32 0.2, %v2784_v12  ;;  %3260 = vmatprep.mubr.f32.mxu0 %v3085_v16  ;;  %vm2958_vm11 = vcmp.gt.f32.partialorder %v2784_v12, 0.0 }
 0x464   : > { %v3023_v27 = vmul.f32 0.2, %v2786_v15  ;;  %v2789_v31 = vpop.f32.mrb[138].mxu0  ;;  %3261 = vmatmul.mubr.f32.gmra.mrb[198].mxu0 %v3084_v25  ;;  %vm2959_vm10 = vcmp.gt.f32.partialorder %v2786_v15, 0.0 }
 0x465   : > { %v2790_v32 = vadd.f32 %v2789_v31, %v5564_v28  ;;  %v2791_v34 = vpop.f32.mrb[139].mxu0  ;;  %v3086_v40 = vsel %vm2958_vm11, %v2784_v12, %v3022_v23 }
 0x466   : > { %v2792_v35 = vadd.f32 %v2791_v34, %v5567_v29  ;;  %v3087_v36 = vsel %vm2959_vm10, %v2786_v15, %v3023_v27 }
 0x467   : > { %v3024_v26 = vmul.f32 0.2, %v2790_v32  ;;  %3265 = vmatprep.mubr.f32.mxu0 %v3087_v36  ;;  %vm2960_vm13 = vcmp.gt.f32.partialorder %v2790_v32, 0.0 }
 0x468   : > { %v3025_v41 = vmul.f32 0.2, %v2792_v35  ;;  %v2795_v42 = vpop.f32.mrb[140].mxu0  ;;  %3266 = vmatmul.mubr.f32.gmra.mrb[200].mxu0 %v3086_v40  ;;  %vm2961_vm12 = vcmp.gt.f32.partialorder %v2792_v35, 0.0 }
 0x469   : > { %v2796_v43 = vadd.f32 %v2795_v42, %v5564_v28  ;;  %v2797_v44 = vpop.f32.mrb[141].mxu0  ;;  %v3088_v52 = vsel %vm2960_vm13, %v2790_v32, %v3024_v26 }
 0x46a   : > { %v2798_v45 = vadd.f32 %v2797_v44, %v5567_v29  ;;  %v3089_v46 = vsel %vm2961_vm12, %v2792_v35, %v3025_v41 }
 0x46b   : > { %v3026_v51 = vmul.f32 0.2, %v2796_v43  ;;  %3270 = vmatprep.mubr.f32.mxu0 %v3089_v46  ;;  %vm2962_vm15 = vcmp.gt.f32.partialorder %v2796_v43, 0.0 }
 0x46c   : > { %v3027_v53 = vmul.f32 0.2, %v2798_v45  ;;  %v2801_v54 = vpop.f32.mrb[142].mxu0  ;;  %3271 = vmatmul.mubr.f32.gmra.mrb[202].mxu0 %v3088_v52  ;;  %vm2963_vm14 = vcmp.gt.f32.partialorder %v2798_v45, 0.0 }
 0x46d   : > { %v2802_v56 = vadd.f32 %v2801_v54, %v5564_v28  ;;  %v2803_v19 = vpop.f32.mrb[143].mxu0  ;;  %v3090_v13 = vsel %vm2962_vm15, %v2796_v43, %v3026_v51 }
 0x46e   : > { %v2804_v22 = vadd.f32 %v2803_v19, %v5567_v29  ;;  %v3091_v10 = vsel %vm2963_vm14, %v2798_v45, %v3027_v53 }
 0x46f   : > { %v3028_v55 = vmul.f32 0.2, %v2802_v56  ;;  %3275 = vmatprep.mubr.f32.mxu0 %v3091_v10  ;;  %vm2964_vm0 = vcmp.gt.f32.partialorder %v2802_v56, 0.0 }
 0x470   : > { %v3029_v57 = vmul.f32 0.2, %v2804_v22  ;;  %v2807_v58 = vpop.f32.mrb[144].mxu0  ;;  %3276 = vmatmul.mubr.f32.gmra.mrb[204].mxu0 %v3090_v13  ;;  %vm2965_vm1 = vcmp.gt.f32.partialorder %v2804_v22, 0.0 }
 0x471   : > { %v2808_v59 = vadd.f32 %v2807_v58, %v5564_v28  ;;  %v2809_v60 = vpop.f32.mrb[145].mxu0  ;;  %v3092_v63 = vsel %vm2964_vm0, %v2802_v56, %v3028_v55 }
 0x472   : > { %v2810_v61 = vadd.f32 %v2809_v60, %v5567_v29  ;;  %v3093_v62 = vsel %vm2965_vm1, %v2804_v22, %v3029_v57 }
 0x473   : > { %v3030_v30 = vmul.f32 0.2, %v2808_v59  ;;  %3280 = vmatprep.mubr.f32.mxu1 %v3093_v62  ;;  %vm2966_vm3 = vcmp.gt.f32.partialorder %v2808_v59, 0.0 }
 0x474   : > { %v3031_v33 = vmul.f32 0.2, %v2810_v61  ;;  %v2813_v0 = vpop.f32.mrb[146].mxu0  ;;  %3281 = vmatmul.mubr.f32.vlgmr.msra.gmra.mrb[128].mxu1 %v3092_v63  ;;  %vm2967_vm2 = vcmp.gt.f32.partialorder %v2810_v61, 0.0 }
 0x475   : > { %v2814_v1 = vadd.f32 %v2813_v0, %v5564_v28  ;;  %v2815_v3 = vpop.f32.mrb[147].mxu0  ;;  %v3094_v7 = vsel %vm2966_vm3, %v2808_v59, %v3030_v30 }
 0x476   : > { %v2816_v4 = vadd.f32 %v2815_v3, %v5567_v29  ;;  %v3095_v5 = vsel %vm2967_vm2, %v2810_v61, %v3031_v33 }
 0x477   : > { %v3032_v6 = vmul.f32 0.2, %v2814_v1  ;;  %3285 = vmatprep.mubr.f32.mxu1 %v3095_v5  ;;  %vm2968_vm5 = vcmp.gt.f32.partialorder %v2814_v1, 0.0 }
 0x478   : > { %v3033_v8 = vmul.f32 0.2, %v2816_v4  ;;  %v2819_v2 = vpop.f32.mrb[148].mxu0  ;;  %3286 = vmatmul.mubr.f32.gmra.mrb[130].mxu1 %v3094_v7  ;;  %vm2969_vm4 = vcmp.gt.f32.partialorder %v2816_v4, 0.0 }
 0x479   : > { %v2820_v9 = vadd.f32 %v2819_v2, %v5564_v28  ;;  %v2821_v11 = vpop.f32.mrb[149].mxu0  ;;  %v3096_v16 = vsel %vm2968_vm5, %v2814_v1, %v3032_v6 }
 0x47a   : > { %v2822_v12 = vadd.f32 %v2821_v11, %v5567_v29  ;;  %v3097_v14 = vsel %vm2969_vm4, %v2816_v4, %v3033_v8 }
 0x47b   : > { %v3034_v15 = vmul.f32 0.2, %v2820_v9  ;;  %3290 = vmatprep.mubr.f32.mxu1 %v3097_v14  ;;  %vm2970_vm7 = vcmp.gt.f32.partialorder %v2820_v9, 0.0 }
 0x47c   : > { %v3035_v17 = vmul.f32 0.2, %v2822_v12  ;;  %v2825_v18 = vpop.f32.mrb[150].mxu0  ;;  %3291 = vmatmul.mubr.f32.gmra.mrb[132].mxu1 %v3096_v16  ;;  %vm2971_vm6 = vcmp.gt.f32.partialorder %v2822_v12, 0.0 }
 0x47d   : > { %v2826_v20 = vadd.f32 %v2825_v18, %v5564_v28  ;;  %v2827_v21 = vpop.f32.mrb[151].mxu0  ;;  %v3098_v31 = vsel %vm2970_vm7, %v2820_v9, %v3034_v15 }
 0x47e   : > { %v2828_v23 = vadd.f32 %v2827_v21, %v5567_v29  ;;  %v3099_v25 = vsel %vm2971_vm6, %v2822_v12, %v3035_v17 }
 0x47f   : > { %v3036_v27 = vmul.f32 0.2, %v2826_v20  ;;  %3295 = vmatprep.mubr.f32.mxu1 %v3099_v25  ;;  %vm2972_vm9 = vcmp.gt.f32.partialorder %v2826_v20, 0.0 }
 0x480   : > { %v3037_v32 = vmul.f32 0.2, %v2828_v23  ;;  %v2831_v34 = vpop.f32.mrb[152].mxu0  ;;  %3296 = vmatmul.mubr.f32.gmra.mrb[134].mxu1 %v3098_v31  ;;  %vm2973_vm8 = vcmp.gt.f32.partialorder %v2828_v23, 0.0 }
 0x481   : > { %v2832_v35 = vadd.f32 %v2831_v34, %v5564_v28  ;;  %v2833_v36 = vpop.f32.mrb[153].mxu0  ;;  %v3100_v24 = vsel %vm2972_vm9, %v2826_v20, %v3036_v27 }
 0x482   : > { %v2834_v37 = vadd.f32 %v2833_v36, %v5567_v29  ;;  %v3101_v38 = vsel %vm2973_vm8, %v2828_v23, %v3037_v32 }
 0x483   : > { %v3038_v39 = vmul.f32 0.2, %v2832_v35  ;;  %3300 = vmatprep.mubr.f32.mxu1 %v3101_v38  ;;  %vm2974_vm11 = vcmp.gt.f32.partialorder %v2832_v35, 0.0 }
 0x484   : > { %v3039_v26 = vmul.f32 0.2, %v2834_v37  ;;  %v2837_v40 = vpop.f32.mrb[154].mxu0  ;;  %3301 = vmatmul.mubr.f32.gmra.mrb[136].mxu1 %v3100_v24  ;;  %vm2975_vm10 = vcmp.gt.f32.partialorder %v2834_v37, 0.0 }
 0x485   : > { %v2838_v41 = vadd.f32 %v2837_v40, %v5564_v28  ;;  %v2839_v42 = vpop.f32.mrb[155].mxu0  ;;  %v3102_v46 = vsel %vm2974_vm11, %v2832_v35, %v3038_v39 }
 0x486   : > { %v2840_v43 = vadd.f32 %v2839_v42, %v5567_v29  ;;  %v3103_v44 = vsel %vm2975_vm10, %v2834_v37, %v3039_v26 }
 0x487   : > { %v3040_v45 = vmul.f32 0.2, %v2838_v41  ;;  %3305 = vmatprep.mubr.f32.mxu1 %v3103_v44  ;;  %vm2976_vm13 = vcmp.gt.f32.partialorder %v2838_v41, 0.0 }
 0x488   : > { %v3041_v47 = vmul.f32 0.2, %v2840_v43  ;;  %v2843_v48 = vpop.f32.mrb[156].mxu0  ;;  %3306 = vmatmul.mubr.f32.gmra.mrb[138].mxu1 %v3102_v46  ;;  %vm2977_vm12 = vcmp.gt.f32.partialorder %v2840_v43, 0.0 }
 0x489   : > { %v2844_v49 = vadd.f32 %v2843_v48, %v5564_v28  ;;  %v2845_v50 = vpop.f32.mrb[157].mxu0  ;;  %v3104_v54 = vsel %vm2976_vm13, %v2838_v41, %v3040_v45 }
 0x48a   : > { %v2846_v51 = vadd.f32 %v2845_v50, %v5567_v29  ;;  %v3105_v52 = vsel %vm2977_vm12, %v2840_v43, %v3041_v47 }
 0x48b   : > { %v3042_v53 = vmul.f32 0.2, %v2844_v49  ;;  %3310 = vmatprep.mubr.f32.mxu1 %v3105_v52  ;;  %vm2978_vm15 = vcmp.gt.f32.partialorder %v2844_v49, 0.0 }
 0x48c   : > { %v3043_v56 = vmul.f32 0.2, %v2846_v51  ;;  %v2849_v19 = vpop.f32.mrb[158].mxu0  ;;  %3311 = vmatmul.mubr.f32.gmra.mrb[140].mxu1 %v3104_v54  ;;  %vm2979_vm14 = vcmp.gt.f32.partialorder %v2846_v51, 0.0 }
 0x48d   : > { %v2850_v22 = vadd.f32 %v2849_v19, %v5564_v28  ;;  %v2851_v10 = vpop.f32.mrb[159].mxu0  ;;  %v3106_v58 = vsel %vm2978_vm15, %v2844_v49, %v3042_v53 }
 0x48e   : > { %v2852_v55 = vadd.f32 %v2851_v10, %v5567_v29  ;;  %v3107_v13 = vsel %vm2979_vm14, %v2846_v51, %v3043_v56 }
 0x48f   : > { %v3044_v57 = vmul.f32 0.2, %v2850_v22  ;;  %3315 = vmatprep.mubr.f32.mxu1 %v3107_v13  ;;  %vm2980_vm1 = vcmp.gt.f32.partialorder %v2850_v22, 0.0 }
 0x490   : > { %v3045_v59 = vmul.f32 0.2, %v2852_v55  ;;  %v2855_v60 = vpop.f32.mrb[160].mxu0  ;;  %3316 = vmatmul.mubr.f32.gmra.mrb[142].mxu1 %v3106_v58  ;;  %vm2981_vm0 = vcmp.gt.f32.partialorder %v2852_v55, 0.0 }
 0x491   : > { %v2856_v61 = vadd.f32 %v2855_v60, %v5564_v28  ;;  %v2857_v62 = vpop.f32.mrb[161].mxu0  ;;  %v3108_v0 = vsel %vm2980_vm1, %v2850_v22, %v3044_v57 }
 0x492   : > { %v2858_v63 = vadd.f32 %v2857_v62, %v5567_v29  ;;  %v3109_v30 = vsel %vm2981_vm0, %v2852_v55, %v3045_v59 }
 0x493   : > { %v3046_v33 = vmul.f32 0.2, %v2856_v61  ;;  %3320 = vmatprep.mubr.f32.mxu1 %v3109_v30  ;;  %vm2982_vm3 = vcmp.gt.f32.partialorder %v2856_v61, 0.0 }
 0x494   : > { %v3047_v1 = vmul.f32 0.2, %v2858_v63  ;;  %v2861_v3 = vpop.f32.mrb[162].mxu0  ;;  %3321 = vmatmul.mubr.f32.gmra.mrb[144].mxu1 %v3108_v0  ;;  %vm2983_vm2 = vcmp.gt.f32.partialorder %v2858_v63, 0.0 }
 0x495   : > { %v2862_v4 = vadd.f32 %v2861_v3, %v5564_v28  ;;  %v2863_v5 = vpop.f32.mrb[163].mxu0  ;;  %v3110_v2 = vsel %vm2982_vm3, %v2856_v61, %v3046_v33 }
 0x496   : > { %v2864_v6 = vadd.f32 %v2863_v5, %v5567_v29  ;;  %v3111_v7 = vsel %vm2983_vm2, %v2858_v63, %v3047_v1 }
 0x497   : > { %v3048_v8 = vmul.f32 0.2, %v2862_v4  ;;  %3325 = vmatprep.mubr.f32.mxu1 %v3111_v7  ;;  %vm2984_vm5 = vcmp.gt.f32.partialorder %v2862_v4, 0.0 }
 0x498   : > { %v3049_v9 = vmul.f32 0.2, %v2864_v6  ;;  %v2867_v11 = vpop.f32.mrb[164].mxu0  ;;  %3326 = vmatmul.mubr.f32.gmra.mrb[146].mxu1 %v3110_v2  ;;  %vm2985_vm4 = vcmp.gt.f32.partialorder %v2864_v6, 0.0 }
 0x499   : > { %v2868_v12 = vadd.f32 %v2867_v11, %v5564_v28  ;;  %v2869_v14 = vpop.f32.mrb[165].mxu0  ;;  %v3112_v18 = vsel %vm2984_vm5, %v2862_v4, %v3048_v8 }
 0x49a   : > { %v2870_v15 = vadd.f32 %v2869_v14, %v5567_v29  ;;  %v3113_v16 = vsel %vm2985_vm4, %v2864_v6, %v3049_v9 }
 0x49b   : > { %v3050_v17 = vmul.f32 0.2, %v2868_v12  ;;  %3330 = vmatprep.mubr.f32.mxu1 %v3113_v16  ;;  %vm2986_vm7 = vcmp.gt.f32.partialorder %v2868_v12, 0.0 }
 0x49c   : > { %v3051_v20 = vmul.f32 0.2, %v2870_v15  ;;  %v2873_v21 = vpop.f32.mrb[166].mxu0  ;;  %3331 = vmatmul.mubr.f32.gmra.mrb[148].mxu1 %v3112_v18  ;;  %vm2987_vm6 = vcmp.gt.f32.partialorder %v2870_v15, 0.0 }
 0x49d   : > { %v2874_v23 = vadd.f32 %v2873_v21, %v5564_v28  ;;  %v2875_v25 = vpop.f32.mrb[167].mxu0  ;;  %v3114_v34 = vsel %vm2986_vm7, %v2868_v12, %v3050_v17 }
 0x49e   : > { %v2876_v27 = vadd.f32 %v2875_v25, %v5567_v29  ;;  %v3115_v31 = vsel %vm2987_vm6, %v2870_v15, %v3051_v20 }
 0x49f   : > { %v3052_v32 = vmul.f32 0.2, %v2874_v23  ;;  %3335 = vmatprep.mubr.f32.mxu1 %v3115_v31  ;;  %vm2988_vm9 = vcmp.gt.f32.partialorder %v2874_v23, 0.0 }
 0x4a0   : > { %v3053_v35 = vmul.f32 0.2, %v2876_v27  ;;  %v2879_v36 = vpop.f32.mrb[168].mxu0  ;;  %3336 = vmatmul.mubr.f32.gmra.mrb[150].mxu1 %v3114_v34  ;;  %vm2989_vm8 = vcmp.gt.f32.partialorder %v2876_v27, 0.0 }
 0x4a1   : > { %v2880_v37 = vadd.f32 %v2879_v36, %v5564_v28  ;;  %v2881_v38 = vpop.f32.mrb[169].mxu0  ;;  %v3116_v40 = vsel %vm2988_vm9, %v2874_v23, %v3052_v32 }
 0x4a2   : > { %v2882_v39 = vadd.f32 %v2881_v38, %v5567_v29  ;;  %v3117_v24 = vsel %vm2989_vm8, %v2876_v27, %v3053_v35 }
 0x4a3   : > { %v3054_v26 = vmul.f32 0.2, %v2880_v37  ;;  %3340 = vmatprep.mubr.f32.mxu1 %v3117_v24  ;;  %vm2990_vm11 = vcmp.gt.f32.partialorder %v2880_v37, 0.0 }
 0x4a4   : > { %v3055_v41 = vmul.f32 0.2, %v2882_v39  ;;  %v2885_v42 = vpop.f32.mrb[170].mxu0  ;;  %3341 = vmatmul.mubr.f32.gmra.mrb[152].mxu1 %v3116_v40  ;;  %vm2991_vm10 = vcmp.gt.f32.partialorder %v2882_v39, 0.0 }
 0x4a5   : > { %v2886_v43 = vadd.f32 %v2885_v42, %v5564_v28  ;;  %v2887_v44 = vpop.f32.mrb[171].mxu0  ;;  %v3118_v48 = vsel %vm2990_vm11, %v2880_v37, %v3054_v26 }
 0x4a6   : > { %v2888_v45 = vadd.f32 %v2887_v44, %v5567_v29  ;;  %v3119_v46 = vsel %vm2991_vm10, %v2882_v39, %v3055_v41 }
 0x4a7   : > { %v3056_v47 = vmul.f32 0.2, %v2886_v43  ;;  %3345 = vmatprep.mubr.f32.mxu1 %v3119_v46  ;;  %vm2992_vm13 = vcmp.gt.f32.partialorder %v2886_v43, 0.0 }
 0x4a8   : > { %v3057_v49 = vmul.f32 0.2, %v2888_v45  ;;  %v2891_v50 = vpop.f32.mrb[172].mxu0  ;;  %3346 = vmatmul.mubr.f32.gmra.mrb[154].mxu1 %v3118_v48  ;;  %vm2993_vm12 = vcmp.gt.f32.partialorder %v2888_v45, 0.0 }
 0x4a9   : > { %v2892_v51 = vadd.f32 %v2891_v50, %v5564_v28  ;;  %v2893_v52 = vpop.f32.mrb[173].mxu0  ;;  %v3120_v19 = vsel %vm2992_vm13, %v2886_v43, %v3056_v47 }
 0x4aa   : > { %v2894_v53 = vadd.f32 %v2893_v52, %v5567_v29  ;;  %v3121_v54 = vsel %vm2993_vm12, %v2888_v45, %v3057_v49 }
 0x4ab   : > { %v3058_v56 = vmul.f32 0.2, %v2892_v51  ;;  %3350 = vmatprep.mubr.f32.mxu1 %v3121_v54  ;;  %vm2994_vm15 = vcmp.gt.f32.partialorder %v2892_v51, 0.0 }
 0x4ac   : > { %v3059_v22 = vmul.f32 0.2, %v2894_v53  ;;  %v2897_v10 = vpop.f32.mrb[174].mxu0  ;;  %3351 = vmatmul.mubr.f32.gmra.mrb[156].mxu1 %v3120_v19  ;;  %vm2995_vm14 = vcmp.gt.f32.partialorder %v2894_v53, 0.0 }
 0x4ad   : > { %v2898_v55 = vadd.f32 %v2897_v10, %v5564_v28  ;;  %v2899_v13 = vpop.f32.mrb[175].mxu0  ;;  %v3122_v60 = vsel %vm2994_vm15, %v2892_v51, %v3058_v56 }
 0x4ae   : > { %v2900_v57 = vadd.f32 %v2899_v13, %v5567_v29  ;;  %v3123_v58 = vsel %vm2995_vm14, %v2894_v53, %v3059_v22 }
 0x4af   : > { %v3060_v59 = vmul.f32 0.2, %v2898_v55  ;;  %3355 = vmatprep.mubr.f32.mxu1 %v3123_v58  ;;  %vm2996_vm1 = vcmp.gt.f32.partialorder %v2898_v55, 0.0 }
 0x4b0   : > { %v3061_v61 = vmul.f32 0.2, %v2900_v57  ;;  %v2903_v62 = vpop.f32.mrb[176].mxu0  ;;  %3356 = vmatmul.mubr.f32.gmra.mrb[158].mxu1 %v3122_v60  ;;  %vm2997_vm0 = vcmp.gt.f32.partialorder %v2900_v57, 0.0 }
 0x4b1   : > { %v2904_v63 = vadd.f32 %v2903_v62, %v5564_v28  ;;  %v2905_v30 = vpop.f32.mrb[177].mxu0  ;;  %v3124_v3 = vsel %vm2996_vm1, %v2898_v55, %v3060_v59 }
 0x4b2   : > { %v2906_v33 = vadd.f32 %v2905_v30, %v5567_v29  ;;  %v3125_v0 = vsel %vm2997_vm0, %v2900_v57, %v3061_v61 }
 0x4b3   : > { %v3062_v1 = vmul.f32 0.2, %v2904_v63  ;;  %3360 = vmatprep.mubr.f32.mxu1 %v3125_v0  ;;  %vm2998_vm3 = vcmp.gt.f32.partialorder %v2904_v63, 0.0  ;;  %v3441_v0 = vpop.permute.xlu0 %3440 }
 0x4b4   : > { %v3063_v4 = vmul.f32 0.2, %v2906_v33  ;;  %v2909_v5 = vpop.f32.mrb[178].mxu0  ;;  %3361 = vmatmul.mubr.f32.gmra.mrb[160].mxu1 %v3124_v3  ;;  %vm2999_vm2 = vcmp.gt.f32.partialorder %v2906_v33, 0.0 }
 0x4b5   : > { %v2910_v6 = vadd.f32 %v2909_v5, %v5564_v28  ;;  %v2911_v7 = vpop.f32.mrb[179].mxu0  ;;  %v3126_v11 = vsel %vm2998_vm3, %v2904_v63, %v3062_v1 }
 0x4b6   : > { %v2912_v8 = vadd.f32 %v2911_v7, %v5567_v29  ;;  %v3127_v2 = vsel %vm2999_vm2, %v2906_v33, %v3063_v4  ;;  %vm3630_vm2 = vcmask 23552  }
 0x4b7   : > { %v3064_v9 = vmul.f32 0.2, %v2910_v6  ;;  %3365 = vmatprep.mubr.f32.mxu1 %v3127_v2  ;;  %vm3000_vm5 = vcmp.gt.f32.partialorder %v2910_v6, 0.0 }
 0x4b8   : > { %v3065_v12 = vmul.f32 0.2, %v2912_v8  ;;  %v2915_v14 = vpop.f32.mrb[180].mxu0  ;;  %3366 = vmatmul.mubr.f32.gmra.mrb[162].mxu1 %v3126_v11  ;;  %vm3001_vm4 = vcmp.gt.f32.partialorder %v2912_v8, 0.0 }
 0x4b9   : > { %v2916_v15 = vadd.f32 %v2915_v14, %v5564_v28  ;;  %v2917_v16 = vpop.f32.mrb[181].mxu0  ;;  %v3128_v21 = vsel %vm3000_vm5, %v2910_v6, %v3064_v9  ;;  %v3446_v6 = vpop.permute.xlu0 %3445 }
 0x4ba   : > { %v2918_v17 = vadd.f32 %v2917_v16, %v5567_v29  ;;  %v3129_v18 = vsel %vm3001_vm4, %v2912_v8, %v3065_v12  ;;  %v3451_v9 = vpop.permute.xlu1 %3450 }
 0x4bb   : > { %v3066_v20 = vmul.f32 0.2, %v2916_v15  ;;  %3370 = vmatprep.mubr.f32.mxu1 %v3129_v18  ;;  %vm3002_vm7 = vcmp.gt.f32.partialorder %v2916_v15, 0.0 }
 0x4bc   : > { %v3067_v23 = vmul.f32 0.2, %v2918_v17  ;;  %v2921_v25 = vpop.f32.mrb[182].mxu0  ;;  %3371 = vmatmul.mubr.f32.gmra.mrb[164].mxu1 %v3128_v21  ;;  %vm3003_vm6 = vcmp.gt.f32.partialorder %v2918_v17, 0.0 }
 0x4bd   : > { %v2922_v27 = vadd.f32 %v2921_v25, %v5564_v28  ;;  %v2923_v31 = vpop.f32.mrb[183].mxu0  ;;  %v3130_v36 = vsel %vm3002_vm7, %v2916_v15, %v3066_v20 }
 0x4be   : > { %v2924_v32 = vadd.f32 %v2923_v31, %v5567_v29  ;;  %v3131_v34 = vsel %vm3003_vm6, %v2918_v17, %v3067_v23  ;;  %v3456_v20 = vpop.permute.xlu1 %3455  ;;  %v3461_v31 = vpop.permute.xlu0 %3460 }
 0x4bf   : > { %v3068_v35 = vmul.f32 0.2, %v2922_v27  ;;  %3375 = vmatprep.mubr.f32.mxu1 %v3131_v34  ;;  %vm3004_vm9 = vcmp.gt.f32.partialorder %v2922_v27, 0.0 }
 0x4c0   : > { %v3069_v37 = vmul.f32 0.2, %v2924_v32  ;;  %v2927_v38 = vpop.f32.mrb[184].mxu0  ;;  %3376 = vmatmul.mubr.f32.gmra.mrb[166].mxu1 %v3130_v36  ;;  %vm3005_vm8 = vcmp.gt.f32.partialorder %v2924_v32, 0.0 }
 0x4c1   : > { %v2928_v39 = vadd.f32 %v2927_v38, %v5564_v28  ;;  %v2929_v24 = vpop.f32.mrb[185].mxu0  ;;  %v3132_v42 = vsel %vm3004_vm9, %v2922_v27, %v3068_v35 }
 0x4c2   : > { %v2930_v26 = vadd.f32 %v2929_v24, %v5567_v29  ;;  %v3133_v40 = vsel %vm3005_vm8, %v2924_v32, %v3069_v37  ;;  %v3466_v37 = vpop.permute.xlu1 %3465 }
 0x4c3   : > { %v3070_v41 = vmul.f32 0.2, %v2928_v39  ;;  %3380 = vmatprep.mubr.f32.mxu1 %v3133_v40  ;;  %vm3006_vm11 = vcmp.gt.f32.partialorder %v2928_v39, 0.0  ;;  %v3471_v40 = vpop.permute.xlu0 %3470 }
 0x4c4   : > { %v3071_v43 = vmul.f32 0.2, %v2930_v26  ;;  %v2933_v44 = vpop.f32.mrb[186].mxu0  ;;  %3381 = vmatmul.mubr.f32.gmra.mrb[168].mxu1 %v3132_v42  ;;  %vm3007_vm10 = vcmp.gt.f32.partialorder %v2930_v26, 0.0 }
 0x4c5   : > { %v2934_v45 = vadd.f32 %v2933_v44, %v5564_v28  ;;  %v2935_v46 = vpop.f32.mrb[187].mxu0  ;;  %v3134_v50 = vsel %vm3006_vm11, %v2928_v39, %v3070_v41 }
 0x4c6   : > { %v2936_v47 = vadd.f32 %v2935_v46, %v5567_v29  ;;  %v3135_v48 = vsel %vm3007_vm10, %v2930_v26, %v3071_v43 }
 0x4c7   : > { %v3072_v49 = vmul.f32 0.2, %v2934_v45  ;;  %3385 = vmatprep.mubr.f32.mxu1 %v3135_v48  ;;  %vm3008_vm13 = vcmp.gt.f32.partialorder %v2934_v45, 0.0 }
 0x4c8   : > { %v3073_v51 = vmul.f32 0.2, %v2936_v47  ;;  %v2939_v52 = vpop.f32.mrb[188].mxu0  ;;  %3386 = vmatmul.mubr.f32.gmra.mrb[170].mxu1 %v3134_v50  ;;  %vm3009_vm12 = vcmp.gt.f32.partialorder %v2936_v47, 0.0  ;;  %v3481_v50 = vpop.permute.xlu0 %3480 }
 0x4c9   : > { %v2940_v53 = vadd.f32 %v2939_v52, %v5564_v28  ;;  %v2941_v54 = vpop.f32.mrb[189].mxu0  ;;  %v3136_v10 = vsel %vm3008_vm13, %v2934_v45, %v3072_v49  ;;  %v3476_v45 = vpop.permute.xlu1 %3475 }
 0x4ca   : > { %v2942_v56 = vadd.f32 %v2941_v54, %v5567_v29  ;;  %v3137_v19 = vsel %vm3009_vm12, %v2936_v47, %v3073_v51 }
 0x4cb   : > { %v3074_v22 = vmul.f32 0.2, %v2940_v53  ;;  %3390 = vmatprep.mubr.f32.mxu1 %v3137_v19  ;;  %vm3010_vm15 = vcmp.gt.f32.partialorder %v2940_v53, 0.0 }
 0x4cc   : > { %v3075_v55 = vmul.f32 0.2, %v2942_v56  ;;  %v2945_v13 = vpop.f32.mrb[190].mxu0  ;;  %3391 = vmatmul.mubr.f32.gmra.mrb[172].mxu1 %v3136_v10  ;;  %vm3011_vm14 = vcmp.gt.f32.partialorder %v2942_v56, 0.0 }
 0x4cd   : > { %v2946_v57 = vadd.f32 %v2945_v13, %v5564_v28  ;;  %v2947_v58 = vpop.f32.mrb[191].mxu0  ;;  %v3138_v62 = vsel %vm3010_vm15, %v2940_v53, %v3074_v22  ;;  %v5653_v28 = vld [vmem:[%s5773_s12] ss:$0 sm:$0xff]  ;;  %v3491_v13 = vpop.permute.xlu0 %3490 }
 0x4ce   : > { %v2948_v59 = vadd.f32 %v2947_v58, %v5567_v29  ;;  %v3139_v60 = vsel %vm3011_vm14, %v2942_v56, %v3075_v55  ;;  %v3486_v56 = vpop.permute.xlu1 %3485 }
 0x4cf   : > { %v3076_v61 = vmul.f32 0.2, %v2946_v57  ;;  %3395 = vmatprep.mubr.f32.mxu1 %v3139_v60  ;;  %vm3012_vm1 = vcmp.gt.f32.partialorder %v2946_v57, 0.0 }
 0x4d0   : > { %v3077_v63 = vmul.f32 0.2, %v2948_v59  ;;  %3396 = vmatmul.mubr.f32.gmra.mrb[174].mxu1 %v3138_v62  ;;  %vm3013_vm0 = vcmp.gt.f32.partialorder %v2948_v59, 0.0 }
 0x4d1   : > { %v3140_v33 = vsel %vm3012_vm1, %v2946_v57, %v3076_v61 }
 0x4d2   : > { %v3141_v30 = vsel %vm3013_vm0, %v2948_v59, %v3077_v63  ;;  %v3496_v61 = vpop.permute.xlu1 %3495 }
 0x4d3   : > { %3400 = vmatprep.mubr.f32.mxu1 %v3141_v30 }
 0x4d4   : > { %3401 = vmatmul.mubr.f32.gmra.mrb[176].mxu1 %v3140_v33 }
 0x52b   : > { %v3247_v29 = vpop.f32.mrb[192].mxu0 }
 0x52c   : > { %v3248_v1 = vadd.f32 %v5653_v28, %v3247_v29  ;;  %v3249_v3 = vpop.f32.mrb[193].mxu0 }
 0x52e   : > { %v3598_v4 = vmul.f32 %v3441_v0, %v3248_v1  ;;  %v3501_v0 = vpop.permute.xlu0 %3500 }
 0x52f   : > { %v3252_v5 = vpop.f32.mrb[194].mxu0 }
 0x530   : > { %3631 = vst.msk [vmem:[%s5661_s20] sm:$0xff] %vm3630_vm2, %v3598_v4  ;;  %v3253_v7 = vadd.f32 %v5653_v28, %v3252_v5  ;;  %v3254_v8 = vpop.f32.mrb[195].mxu0  ;;  %v3506_v5 = vpop.permute.xlu1 %3505 }
 0x532   : > { %v3599_v2 = vmul.f32 %v3446_v6, %v3253_v7 }
 0x533   : > { %v3257_v11 = vpop.f32.mrb[196].mxu0 }
 0x534   : > { %3632 = vst.msk [vmem:[%s5661_s20 + $0x8] sm:$0xff] %vm3630_vm2, %v3599_v2  ;;  %v3258_v12 = vadd.f32 %v5653_v28, %v3257_v11  ;;  %v3259_v14 = vpop.f32.mrb[197].mxu0 }
 0x536   : > { %v3600_v15 = vmul.f32 %v3451_v9, %v3258_v12  ;;  %v3511_v9 = vpop.permute.xlu0 %3510 }
 0x537   : > { %v3262_v16 = vpop.f32.mrb[198].mxu0 }
 0x538   : > { %3633 = vst.msk [vmem:[%s5661_s20 + $0x10] sm:$0xff] %vm3630_vm2, %v3600_v15  ;;  %v3263_v17 = vadd.f32 %v5653_v28, %v3262_v16  ;;  %v3264_v18 = vpop.f32.mrb[199].mxu0  ;;  %v3516_v16 = vpop.permute.xlu1 %3515 }
 0x53a   : > { %v3601_v21 = vmul.f32 %v3456_v20, %v3263_v17 }
 0x53b   : > { %v3267_v23 = vpop.f32.mrb[200].mxu0 }
 0x53c   : > { %3634 = vst.msk [vmem:[%s5661_s20 + $0x18] sm:$0xff] %vm3630_vm2, %v3601_v21  ;;  %v3268_v25 = vadd.f32 %v5653_v28, %v3267_v23  ;;  %v3269_v27 = vpop.f32.mrb[201].mxu0  ;;  %v3521_v23 = vpop.permute.xlu0 %3520 }
 0x53e   : > { %v3602_v32 = vmul.f32 %v3461_v31, %v3268_v25 }
 0x53f   : > { %v3272_v34 = vpop.f32.mrb[202].mxu0 }
 0x540   : > { %3635 = vst.msk [vmem:[%s5661_s20 + $0x20] sm:$0xff] %vm3630_vm2, %v3602_v32  ;;  %v3273_v35 = vadd.f32 %v5653_v28, %v3272_v34  ;;  %v3274_v36 = vpop.f32.mrb[203].mxu0  ;;  %v3526_v34 = vpop.permute.xlu1 %3525 }
 0x542   : > { %v3603_v38 = vmul.f32 %v3466_v37, %v3273_v35 }
 0x543   : > { %v3277_v39 = vpop.f32.mrb[204].mxu0 }
 0x544   : > { %3636 = vst.msk [vmem:[%s5661_s20 + $0x28] sm:$0xff] %vm3630_vm2, %v3603_v38  ;;  %v3278_v24 = vadd.f32 %v5653_v28, %v3277_v39  ;;  %v3279_v26 = vpop.f32.mrb[205].mxu0  ;;  %v3531_v39 = vpop.permute.xlu0 %3530 }
 0x546   : > { %v3604_v41 = vmul.f32 %v3471_v40, %v3278_v24 }
 0x547   : > { %v3282_v42 = vpop.f32.mrb[128].mxu1 }
 0x548   : > { %3637 = vst.msk [vmem:[%s5661_s20 + $0x30] sm:$0xff] %vm3630_vm2, %v3604_v41  ;;  %v3283_v43 = vadd.f32 %v5653_v28, %v3282_v42  ;;  %v3284_v44 = vpop.f32.mrb[129].mxu1  ;;  %v3536_v42 = vpop.permute.xlu1 %3535 }
 0x54a   : > { %v3605_v46 = vmul.f32 %v3476_v45, %v3283_v43 }
 0x54b   : > { %v3287_v47 = vpop.f32.mrb[130].mxu1 }
 0x54c   : > { %3638 = vst.msk [vmem:[%s5661_s20 + $0x38] sm:$0xff] %vm3630_vm2, %v3605_v46  ;;  %v3288_v48 = vadd.f32 %v5653_v28, %v3287_v47  ;;  %v3289_v49 = vpop.f32.mrb[131].mxu1  ;;  %v3541_v47 = vpop.permute.xlu0 %3540 }
 0x54e   : > { %v3606_v51 = vmul.f32 %v3481_v50, %v3288_v48 }
 0x54f   : > { %v3292_v52 = vpop.f32.mrb[132].mxu1 }
 0x550   : > { %3639 = vst.msk [vmem:[%s5661_s20 + $0x40] sm:$0xff] %vm3630_vm2, %v3606_v51  ;;  %v3293_v53 = vadd.f32 %v5653_v28, %v3292_v52  ;;  %v3294_v54 = vpop.f32.mrb[133].mxu1  ;;  %v3546_v52 = vpop.permute.xlu1 %3545 }
 0x552   : > { %v3607_v19 = vmul.f32 %v3486_v56, %v3293_v53 }
 0x553   : > { %v3297_v22 = vpop.f32.mrb[134].mxu1 }
 0x554   : > { %3640 = vst.msk [vmem:[%s5661_s20 + $0x48] sm:$0xff] %vm3630_vm2, %v3607_v19  ;;  %v3298_v10 = vadd.f32 %v5653_v28, %v3297_v22  ;;  %v3299_v55 = vpop.f32.mrb[135].mxu1  ;;  %v3551_v22 = vpop.permute.xlu0 %3550 }
 0x556   : > { %v3608_v57 = vmul.f32 %v3491_v13, %v3298_v10 }
 0x557   : > { %v3302_v58 = vpop.f32.mrb[136].mxu1 }
 0x558   : > { %3641 = vst.msk [vmem:[%s5661_s20 + $0x50] sm:$0xff] %vm3630_vm2, %v3608_v57  ;;  %v3303_v59 = vadd.f32 %v5653_v28, %v3302_v58  ;;  %v3304_v60 = vpop.f32.mrb[137].mxu1  ;;  %v3556_v58 = vpop.permute.xlu1 %3555 }
 0x55a   : > { %v3609_v62 = vmul.f32 %v3496_v61, %v3303_v59 }
 0x55b   : > { %v3307_v63 = vpop.f32.mrb[138].mxu1 }
 0x55c   : > { %3642 = vst.msk [vmem:[%s5661_s20 + $0x58] sm:$0xff] %vm3630_vm2, %v3609_v62  ;;  %v3308_v30 = vadd.f32 %v5653_v28, %v3307_v63  ;;  %v3309_v33 = vpop.f32.mrb[139].mxu1  ;;  %v3561_v63 = vpop.permute.xlu0 %3560 }
 0x55e   : > { %v3610_v29 = vmul.f32 %v3501_v0, %v3308_v30 }
 0x55f   : > { %v3312_v1 = vpop.f32.mrb[140].mxu1 }
 0x560   : > { %3643 = vst.msk [vmem:[%s5661_s20 + $0x60] sm:$0xff] %vm3630_vm2, %v3610_v29  ;;  %v3313_v3 = vadd.f32 %v5653_v28, %v3312_v1  ;;  %v3314_v4 = vpop.f32.mrb[141].mxu1  ;;  %v3566_v1 = vpop.permute.xlu1 %3565 }
 0x562   : > { %v3611_v6 = vmul.f32 %v3506_v5, %v3313_v3 }
 0x563   : > { %v3317_v7 = vpop.f32.mrb[142].mxu1 }
 0x564   : > { %3644 = vst.msk [vmem:[%s5661_s20 + $0x68] sm:$0xff] %vm3630_vm2, %v3611_v6  ;;  %v3318_v8 = vadd.f32 %v5653_v28, %v3317_v7  ;;  %v3319_v2 = vpop.f32.mrb[143].mxu1  ;;  %v3571_v7 = vpop.permute.xlu0 %3570 }
 0x566   : > { %v3612_v11 = vmul.f32 %v3511_v9, %v3318_v8 }
 0x567   : > { %v3322_v12 = vpop.f32.mrb[144].mxu1 }
 0x568   : > { %3645 = vst.msk [vmem:[%s5661_s20 + $0x70] sm:$0xff] %vm3630_vm2, %v3612_v11  ;;  %v3323_v14 = vadd.f32 %v5653_v28, %v3322_v12  ;;  %v3324_v15 = vpop.f32.mrb[145].mxu1  ;;  %v3576_v12 = vpop.permute.xlu1 %3575 }
 0x56a   : > { %v3613_v17 = vmul.f32 %v3516_v16, %v3323_v14 }
 0x56b   : > { %v3327_v18 = vpop.f32.mrb[146].mxu1 }
 0x56c   : > { %3646 = vst.msk [vmem:[%s5661_s20 + $0x78] sm:$0xff] %vm3630_vm2, %v3613_v17  ;;  %v3328_v20 = vadd.f32 %v5653_v28, %v3327_v18  ;;  %v3329_v21 = vpop.f32.mrb[147].mxu1  ;;  %v3581_v18 = vpop.permute.xlu0 %3580 }
 0x56e   : > { %v3614_v25 = vmul.f32 %v3521_v23, %v3328_v20 }
 0x56f   : > { %v3332_v27 = vpop.f32.mrb[148].mxu1 }
 0x570   : > { %3647 = vst.msk [vmem:[%s5661_s20 + $0x80] sm:$0xff] %vm3630_vm2, %v3614_v25  ;;  %v3333_v31 = vadd.f32 %v5653_v28, %v3332_v27  ;;  %v3334_v32 = vpop.f32.mrb[149].mxu1  ;;  %v3586_v27 = vpop.permute.xlu1 %3585 }
 0x572   : > { %v3615_v35 = vmul.f32 %v3526_v34, %v3333_v31 }
 0x573   : > { %v3337_v36 = vpop.f32.mrb[150].mxu1 }
 0x574   : > { %3648 = vst.msk [vmem:[%s5661_s20 + $0x88] sm:$0xff] %vm3630_vm2, %v3615_v35  ;;  %v3338_v37 = vadd.f32 %v5653_v28, %v3337_v36  ;;  %v3339_v38 = vpop.f32.mrb[151].mxu1  ;;  %v3591_v36 = vpop.permute.xlu0 %3590 }
 0x576   : > { %v3616_v24 = vmul.f32 %v3531_v39, %v3338_v37 }
 0x577   : > { %v3342_v26 = vpop.f32.mrb[152].mxu1 }
 0x578   : > { %3649 = vst.msk [vmem:[%s5661_s20 + $0x90] sm:$0xff] %vm3630_vm2, %v3616_v24  ;;  %v3343_v40 = vadd.f32 %v5653_v28, %v3342_v26  ;;  %v3344_v41 = vpop.f32.mrb[153].mxu1  ;;  %v3596_v26 = vpop.permute.xlu1 %3595 }
 0x57a   : > { %v3617_v43 = vmul.f32 %v3536_v42, %v3343_v40 }
 0x57b   : > { %v3347_v44 = vpop.f32.mrb[154].mxu1 }
 0x57c   : > { %3650 = vst.msk [vmem:[%s5661_s20 + $0x98] sm:$0xff] %vm3630_vm2, %v3617_v43  ;;  %v3348_v45 = vadd.f32 %v5653_v28, %v3347_v44  ;;  %v3349_v46 = vpop.f32.mrb[155].mxu1 }
 0x57e   : > { %v3618_v48 = vmul.f32 %v3541_v47, %v3348_v45 }
 0x57f   : > { %v3352_v49 = vpop.f32.mrb[156].mxu1 }
 0x580   : > { %3651 = vst.msk [vmem:[%s5661_s20 + $0xa0] sm:$0xff] %vm3630_vm2, %v3618_v48  ;;  %v3353_v50 = vadd.f32 %v5653_v28, %v3352_v49  ;;  %v3354_v51 = vpop.f32.mrb[157].mxu1 }
 0x582   : > { %v3619_v53 = vmul.f32 %v3546_v52, %v3353_v50 }
 0x583   : > { %v3357_v54 = vpop.f32.mrb[158].mxu1 }
 0x584   : > { %3652 = vst.msk [vmem:[%s5661_s20 + $0xa8] sm:$0xff] %vm3630_vm2, %v3619_v53  ;;  %v3358_v56 = vadd.f32 %v5653_v28, %v3357_v54  ;;  %v3359_v19 = vpop.f32.mrb[159].mxu1 }
 0x586   : > { %v3620_v10 = vmul.f32 %v3551_v22, %v3358_v56 }
 0x587   : > { %v3362_v55 = vpop.f32.mrb[160].mxu1 }
 0x588   : > { %3653 = vst.msk [vmem:[%s5661_s20 + $0xb0] sm:$0xff] %vm3630_vm2, %v3620_v10  ;;  %v3363_v13 = vadd.f32 %v5653_v28, %v3362_v55  ;;  %v3364_v57 = vpop.f32.mrb[161].mxu1 }
 0x58a   : > { %v3621_v59 = vmul.f32 %v3556_v58, %v3363_v13 }
 0x58b   : > { %v3367_v60 = vpop.f32.mrb[162].mxu1 }
 0x58c   : > { %3654 = vst.msk [vmem:[%s5661_s20 + $0xb8] sm:$0xff] %vm3630_vm2, %v3621_v59  ;;  %v3368_v61 = vadd.f32 %v5653_v28, %v3367_v60  ;;  %v3369_v62 = vpop.f32.mrb[163].mxu1 }
 0x58e   : > { %v3622_v30 = vmul.f32 %v3561_v63, %v3368_v61 }
 0x58f   : > { %v3372_v33 = vpop.f32.mrb[164].mxu1 }
 0x590   : > { %3655 = vst.msk [vmem:[%s5661_s20 + $0xc0] sm:$0xff] %vm3630_vm2, %v3622_v30  ;;  %v3373_v0 = vadd.f32 %v5653_v28, %v3372_v33  ;;  %v3374_v29 = vpop.f32.mrb[165].mxu1 }
 0x592   : > { %v3623_v3 = vmul.f32 %v3566_v1, %v3373_v0 }
 0x593   : > { %v3377_v4 = vpop.f32.mrb[166].mxu1 }
 0x594   : > { %3656 = vst.msk [vmem:[%s5661_s20 + $0xc8] sm:$0xff] %vm3630_vm2, %v3623_v3  ;;  %v3378_v5 = vadd.f32 %v5653_v28, %v3377_v4  ;;  %v3379_v6 = vpop.f32.mrb[167].mxu1 }
 0x596   : > { %v3624_v8 = vmul.f32 %v3571_v7, %v3378_v5 }
 0x597   : > { %v3382_v2 = vpop.f32.mrb[168].mxu1 }
 0x598   : > { %3657 = vst.msk [vmem:[%s5661_s20 + $0xd0] sm:$0xff] %vm3630_vm2, %v3624_v8  ;;  %v3383_v9 = vadd.f32 %v5653_v28, %v3382_v2  ;;  %v3384_v11 = vpop.f32.mrb[169].mxu1 }
 0x59a   : > { %v3625_v14 = vmul.f32 %v3576_v12, %v3383_v9 }
 0x59b   : > { %v3387_v15 = vpop.f32.mrb[170].mxu1 }
 0x59c   : > { %3658 = vst.msk [vmem:[%s5661_s20 + $0xd8] sm:$0xff] %vm3630_vm2, %v3625_v14  ;;  %v3388_v16 = vadd.f32 %v5653_v28, %v3387_v15  ;;  %v3389_v17 = vpop.f32.mrb[171].mxu1 }
 0x59e   : > { %v3626_v20 = vmul.f32 %v3581_v18, %v3388_v16 }
 0x59f   : > { %v3392_v21 = vpop.f32.mrb[172].mxu1 }
 0x5a0   : > { %3659 = vst.msk [vmem:[%s5661_s20 + $0xe0] sm:$0xff] %vm3630_vm2, %v3626_v20  ;;  %v3393_v23 = vadd.f32 %v5653_v28, %v3392_v21  ;;  %v3394_v25 = vpop.f32.mrb[173].mxu1 }
 0x5a2   : > { %v3627_v31 = vmul.f32 %v3586_v27, %v3393_v23 }
 0x5a3   : > { %v3397_v32 = vpop.f32.mrb[174].mxu1 }
 0x5a4   : > { %3660 = vst.msk [vmem:[%s5661_s20 + $0xe8] sm:$0xff] %vm3630_vm2, %v3627_v31  ;;  %v3398_v34 = vadd.f32 %v5653_v28, %v3397_v32  ;;  %v3399_v35 = vpop.f32.mrb[175].mxu1 }
 0x5a6   : > { %v3628_v37 = vmul.f32 %v3591_v36, %v3398_v34 }
 0x5a7   : > { %v3402_v38 = vpop.f32.mrb[176].mxu1 }
 0x5a8   : > { %3661 = vst.msk [vmem:[%s5661_s20 + $0xf0] sm:$0xff] %vm3630_vm2, %v3628_v37  ;;  %v3403_v39 = vadd.f32 %v5653_v28, %v3402_v38  ;;  %v3404_v24 = vpop.f32.mrb[177].mxu1 }
 0x5aa   : > { %v3629_v40 = vmul.f32 %v3596_v26, %v3403_v39 }
 0x5ac   : > { %3662 = vst.msk [vmem:[%s5661_s20 + $0xf8] sm:$0xff] %vm3630_vm2, %v3629_v40 }
 0x5ad PF: > { %s23_s25 = sadd.s32 1, %s4153_s25  }
 0x5ae   : > { %p20_p4 = scmp.ge.s32.totalorder %s23_s25, 4  }
 0x5b0   :  { %22 = sbr.rel (!%p20_p4) target bundleno = 1 (0x1), region = 102 }

</bundles_post_ra>
